<compile_context>
chip_gen: v6e
topology: v6e:2x2x1
jax: 0.10.0
libtpu: 0.0.40
codegen_flags: <defaults>
</compile_context>

<pallas_src>
import functools

import jax
import jax.numpy as jnp
from jax.experimental import pallas as pl
from jax.experimental.pallas import tpu as pltpu


# -----------------------------------------------------------------------------
# Pallas kernel: full forward pass in one invocation.
# All weights arrive PRE-TRANSPOSED and gate-reordered to [i, f, o, g].
# -----------------------------------------------------------------------------
def tokenizer_kernel(
    x_ref,        # (T, D_in)
    wih0_ref,     # (D_in, 4H)   = W_ih_l0.T, gates [i,f,o,g]
    whh0_ref,     # (H, 4H)      = W_hh_l0.T, gates [i,f,o,g]
    b0_ref,       # (1, 4H)      = b_ih_l0 + b_hh_l0, gates [i,f,o,g]
    wih1_ref,     # (H, 4H)
    whh1_ref,     # (H, 4H)
    b1_ref,       # (1, 4H)
    wfc_ref,      # (H, O)       = W_fc.T
    bfc_ref,      # (1, O)
    out_ref,      # (T, O)       log-probabilities
):
    T = x_ref.shape[0]
    H = whh0_ref.shape[0]

    whh0 = whh0_ref[...]
    whh1 = whh1_ref[...]
    wih1 = wih1_ref[...]
    b1 = b1_ref[...]

    def lstm_step(pre_row, h_prev, c_prev, whh):
        # pre_row: (1, 4H) input projection (+ bias), gate order [i, f, o, g].
        gates = pre_row + jnp.dot(h_prev, whh, preferred_element_type=jnp.float32)
        sig = jax.nn.sigmoid(gates[:, : 3 * H])      # one EUP slab: [i, f, o]
        i_g = sig[:, 0 * H:1 * H]
        f_g = sig[:, 1 * H:2 * H]
        o_g = sig[:, 2 * H:3 * H]
        g_g = jnp.tanh(gates[:, 3 * H:4 * H])        # one EUP slab: [g]
        c_new = f_g * c_prev + i_g * g_g
        h_new = o_g * jnp.tanh(c_new)
        return h_new, c_new

    # Layer-0 input projection for all timesteps in a single MXU call.
    pre0 = (
        jnp.dot(x_ref[...], wih0_ref[...], preferred_element_type=jnp.float32)
        + b0_ref[...]
    )
    pre0_rows = jnp.split(pre0, T, axis=0)           # static 1-row slices

    zeros = jnp.zeros((1, H), jnp.float32)
    h0, c0 = zeros, zeros
    h1, c1 = zeros, zeros
    pre1 = None                                      # layer-1 projection of h0_{t-1}
    h1_rows = []

    # Fused, fully unrolled pipeline over time:
    #   iteration t: layer-1 step t-1 (consumes pre1 from iteration t-1),
    #                layer-0 step t   (produces h0_t and the next pre1).
    for t in range(T + 1):
        if t >= 1:
            h1, c1 = lstm_step(pre1, h1, c1, whh1)
            h1_rows.append(h1)
        if t < T:
            h0, c0 = lstm_step(pre0_rows[t], h0, c0, whh0)
            pre1 = (
                jnp.dot(h0, wih1, preferred_element_type=jnp.float32) + b1
            )

    # (T, H) layer-1 hidden states held in registers (one vreg at T=8, H=128).
    h2 = jnp.concatenate(h1_rows, axis=0)

    # ---- fc + LogSoftmax(dim=1) ----
    logits = (
        jnp.dot(h2, wfc_ref[...], preferred_element_type=jnp.float32)
        + bfc_ref[...]
    )
    m = jnp.max(logits, axis=1, keepdims=True)
    lse = m + jnp.log(jnp.sum(jnp.exp(logits - m), axis=1, keepdims=True))
    out_ref[...] = logits - lse


# -----------------------------------------------------------------------------
# Wrapper: parameter plumbing + pallas_call
# -----------------------------------------------------------------------------
def _reorder_gate_cols(w_t):
    """Permute the last axis from PyTorch gate order [i,f,g,o] to [i,f,o,g]."""
    i, f, g, o = jnp.split(w_t, 4, axis=-1)
    return jnp.concatenate([i, f, o, g], axis=-1)


@functools.partial(jax.jit, static_argnames=())
def custom_tokenizer_forward(x, params):
    """x: (T, input_size) float32. Returns (T, output_size) log-probs."""
    T, _ = x.shape
    O = params["w_fc"].shape[0]

    # Pre-transpose (PyTorch stores (4H, in) / (out, in)) and reorder gates so
    # every matmul is a plain row-major `x @ W` and the sigmoid slab is contiguous.
    wih0 = _reorder_gate_cols(params["w_ih_l0"].T)
    whh0 = _reorder_gate_cols(params["w_hh_l0"].T)
    b0 = _reorder_gate_cols((params["b_ih_l0"] + params["b_hh_l0"]).reshape(1, -1))
    wih1 = _reorder_gate_cols(params["w_ih_l1"].T)
    whh1 = _reorder_gate_cols(params["w_hh_l1"].T)
    b1 = _reorder_gate_cols((params["b_ih_l1"] + params["b_hh_l1"]).reshape(1, -1))
    wfc = params["w_fc"].T
    bfc = params["b_fc"].reshape(1, -1)

    vmem = pl.BlockSpec(memory_space=pltpu.MemorySpace.VMEM)
    return pl.pallas_call(
        tokenizer_kernel,
        out_shape=jax.ShapeDtypeStruct((T, O), jnp.float32),
        in_specs=[vmem] * 9,
        out_specs=vmem,
    )(x, wih0, whh0, b0, wih1, whh1, b1, wfc, bfc)


# -----------------------------------------------------------------------------
# Pure-JAX reference (mirrors torch.nn.LSTM / Linear / LogSoftmax semantics)
# -----------------------------------------------------------------------------
def _lstm_layer_ref(x, w_ih, w_hh, b_ih, b_hh):
    H = w_hh.shape[1]

    def step(carry, xt):
        h, c = carry
        g = xt @ w_ih.T + h @ w_hh.T + b_ih + b_hh
        i = jax.nn.sigmoid(g[0:H])
        f = jax.nn.sigmoid(g[H:2 * H])
        gg = jnp.tanh(g[2 * H:3 * H])
        o = jax.nn.sigmoid(g[3 * H:4 * H])
        c = f * c + i * gg
        h = o * jnp.tanh(c)
        return (h, c), h

    (_, _), hs = jax.lax.scan(step, (jnp.zeros(H), jnp.zeros(H)), x)
    return hs


def reference_forward(x, p):
    h1 = _lstm_layer_ref(x, p["w_ih_l0"], p["w_hh_l0"], p["b_ih_l0"], p["b_hh_l0"])
    h2 = _lstm_layer_ref(h1, p["w_ih_l1"], p["w_hh_l1"], p["b_ih_l1"], p["b_hh_l1"])
    logits = h2 @ p["w_fc"].T + p["b_fc"]
    return jax.nn.log_softmax(logits, axis=1)


# -----------------------------------------------------------------------------
# Main
# -----------------------------------------------------------------------------
if __name__ == "__main__":
    # Small, lane-friendly sizes consistent with CustomTokenizer(version=0).
    T = 8            # sequence length (N tokens)
    INPUT_SIZE = 128
    HIDDEN_SIZE = 128
    OUTPUT_SIZE = 256

    key = jax.random.PRNGKey(0)
    keys = jax.random.split(key, 12)

    def u(k, shape):
        return jax.random.uniform(k, shape, jnp.float32, -0.1, 0.1)

    params = {
        # LSTM layer 0
        "w_ih_l0": u(keys[0], (4 * HIDDEN_SIZE, INPUT_SIZE)),
        "w_hh_l0": u(keys[1], (4 * HIDDEN_SIZE, HIDDEN_SIZE)),
        "b_ih_l0": u(keys[2], (4 * HIDDEN_SIZE,)),
        "b_hh_l0": u(keys[3], (4 * HIDDEN_SIZE,)),
        # LSTM layer 1
        "w_ih_l1": u(keys[4], (4 * HIDDEN_SIZE, HIDDEN_SIZE)),
        "w_hh_l1": u(keys[5], (4 * HIDDEN_SIZE, HIDDEN_SIZE)),
        "b_ih_l1": u(keys[6], (4 * HIDDEN_SIZE,)),
        "b_hh_l1": u(keys[7], (4 * HIDDEN_SIZE,)),
        # fc
        "w_fc": u(keys[8], (OUTPUT_SIZE, HIDDEN_SIZE)),
        "b_fc": u(keys[9], (OUTPUT_SIZE,)),
    }

    x = jax.random.normal(keys[10], (T, INPUT_SIZE), jnp.float32)

    out = custom_tokenizer_forward(x, params)
    out = jax.block_until_ready(out)

    ref = reference_forward(x, params)
    assert out.shape == (T, OUTPUT_SIZE)
    assert jnp.allclose(out, ref, atol=1e-4, rtol=1e-4), "mismatch vs reference"

    print("KERNEL_OK")
</pallas_src>

<mosaic_0001>
module attributes {stable_mosaic.version = 11 : i64} {
  func.func @tokenizer_kernel(%arg0: memref<8x128xf32, #tpu.memory_space<vmem>>, %arg1: memref<128x512xf32, #tpu.memory_space<vmem>>, %arg2: memref<128x512xf32, #tpu.memory_space<vmem>>, %arg3: memref<1x512xf32, #tpu.memory_space<vmem>>, %arg4: memref<128x512xf32, #tpu.memory_space<vmem>>, %arg5: memref<128x512xf32, #tpu.memory_space<vmem>>, %arg6: memref<1x512xf32, #tpu.memory_space<vmem>>, %arg7: memref<128x256xf32, #tpu.memory_space<vmem>>, %arg8: memref<1x256xf32, #tpu.memory_space<vmem>>, %arg9: memref<8x256xf32, #tpu.memory_space<vmem>>) attributes {dimension_semantics = [], scalar_prefetch = 0 : i64, scratch_operands = 0 : i64, tpu.core_type = #tpu.core_type<tc>} {
    %c0 = arith.constant 0 : index
    %c0_0 = arith.constant 0 : index
    %0 = vector.load %arg2[%c0, %c0_0] : memref<128x512xf32, #tpu.memory_space<vmem>>, vector<128x512xf32>
    %c0_1 = arith.constant 0 : index
    %c0_2 = arith.constant 0 : index
    %1 = vector.load %arg5[%c0_1, %c0_2] : memref<128x512xf32, #tpu.memory_space<vmem>>, vector<128x512xf32>
    %c0_3 = arith.constant 0 : index
    %c0_4 = arith.constant 0 : index
    %2 = vector.load %arg4[%c0_3, %c0_4] : memref<128x512xf32, #tpu.memory_space<vmem>>, vector<128x512xf32>
    %c0_5 = arith.constant 0 : index
    %c0_6 = arith.constant 0 : index
    %3 = vector.load %arg6[%c0_5, %c0_6] : memref<1x512xf32, #tpu.memory_space<vmem>>, vector<1x512xf32>
    %c0_7 = arith.constant 0 : index
    %c0_8 = arith.constant 0 : index
    %4 = vector.load %arg0[%c0_7, %c0_8] : memref<8x128xf32, #tpu.memory_space<vmem>>, vector<8x128xf32>
    %c0_9 = arith.constant 0 : index
    %c0_10 = arith.constant 0 : index
    %5 = vector.load %arg1[%c0_9, %c0_10] : memref<128x512xf32, #tpu.memory_space<vmem>>, vector<128x512xf32>
    %cst = arith.constant dense<0.000000e+00> : vector<8x512xf32>
    %6 = tpu.matmul %4, %5, %cst {dimension_numbers = #tpu.dot_dimension_numbers<[1], [0], [0], [1], [0, 0, 1, 1], [], []>} : vector<8x128xf32>, vector<128x512xf32>, vector<8x512xf32> -> vector<8x512xf32>
    %c0_11 = arith.constant 0 : index
    %c0_12 = arith.constant 0 : index
    %7 = vector.load %arg3[%c0_11, %c0_12] : memref<1x512xf32, #tpu.memory_space<vmem>>, vector<1x512xf32>
    %8 = vector.broadcast %7 : vector<1x512xf32> to vector<8x512xf32>
    %9 = arith.addf %6, %8 : vector<8x512xf32>
    %10 = vector.extract_strided_slice %9 {offsets = [0, 0], sizes = [1, 512], strides = [1, 1]} : vector<8x512xf32> to vector<1x512xf32>
    %11 = vector.extract_strided_slice %9 {offsets = [1, 0], sizes = [1, 512], strides = [1, 1]} : vector<8x512xf32> to vector<1x512xf32>
    %12 = vector.extract_strided_slice %9 {offsets = [2, 0], sizes = [1, 512], strides = [1, 1]} : vector<8x512xf32> to vector<1x512xf32>
    %13 = vector.extract_strided_slice %9 {offsets = [3, 0], sizes = [1, 512], strides = [1, 1]} : vector<8x512xf32> to vector<1x512xf32>
    %14 = vector.extract_strided_slice %9 {offsets = [4, 0], sizes = [1, 512], strides = [1, 1]} : vector<8x512xf32> to vector<1x512xf32>
    %15 = vector.extract_strided_slice %9 {offsets = [5, 0], sizes = [1, 512], strides = [1, 1]} : vector<8x512xf32> to vector<1x512xf32>
    %16 = vector.extract_strided_slice %9 {offsets = [6, 0], sizes = [1, 512], strides = [1, 1]} : vector<8x512xf32> to vector<1x512xf32>
    %17 = vector.extract_strided_slice %9 {offsets = [7, 0], sizes = [1, 512], strides = [1, 1]} : vector<8x512xf32> to vector<1x512xf32>
    %cst_13 = arith.constant 0.000000e+00 : f32
    %18 = vector.broadcast %cst_13 : f32 to vector<1x128xf32>
    %cst_14 = arith.constant dense<0.000000e+00> : vector<1x512xf32>
    %19 = tpu.matmul %18, %0, %cst_14 {dimension_numbers = #tpu.dot_dimension_numbers<[1], [0], [0], [1], [0, 0, 1, 1], [], []>} : vector<1x128xf32>, vector<128x512xf32>, vector<1x512xf32> -> vector<1x512xf32>
    %20 = arith.addf %10, %19 : vector<1x512xf32>
    %21 = vector.extract_strided_slice %20 {offsets = [0, 0], sizes = [1, 384], strides = [1, 1]} : vector<1x512xf32> to vector<1x384xf32>
    %22 = arith.negf %21 : vector<1x384xf32>
    %23 = math.exp %22 : vector<1x384xf32>
    %cst_15 = arith.constant 1.000000e+00 : f32
    %24 = vector.broadcast %cst_15 : f32 to vector<1x384xf32>
    %25 = arith.addf %24, %23 : vector<1x384xf32>
    %26 = arith.divf %24, %25 : vector<1x384xf32>
    %27 = vector.extract_strided_slice %26 {offsets = [0, 0], sizes = [1, 128], strides = [1, 1]} : vector<1x384xf32> to vector<1x128xf32>
    %28 = vector.extract_strided_slice %26 {offsets = [0, 128], sizes = [1, 128], strides = [1, 1]} : vector<1x384xf32> to vector<1x128xf32>
    %29 = vector.extract_strided_slice %26 {offsets = [0, 256], sizes = [1, 128], strides = [1, 1]} : vector<1x384xf32> to vector<1x128xf32>
    %30 = vector.extract_strided_slice %20 {offsets = [0, 384], sizes = [1, 128], strides = [1, 1]} : vector<1x512xf32> to vector<1x128xf32>
    %31 = math.tanh %30 : vector<1x128xf32>
    %32 = arith.mulf %28, %18 : vector<1x128xf32>
    %33 = arith.mulf %27, %31 : vector<1x128xf32>
    %34 = arith.addf %32, %33 : vector<1x128xf32>
    %35 = math.tanh %34 : vector<1x128xf32>
    %36 = arith.mulf %29, %35 : vector<1x128xf32>
    %cst_16 = arith.constant dense<0.000000e+00> : vector<1x512xf32>
    %37 = tpu.matmul %36, %2, %cst_16 {dimension_numbers = #tpu.dot_dimension_numbers<[1], [0], [0], [1], [0, 0, 1, 1], [], []>} : vector<1x128xf32>, vector<128x512xf32>, vector<1x512xf32> -> vector<1x512xf32>
    %38 = arith.addf %37, %3 : vector<1x512xf32>
    %cst_17 = arith.constant dense<0.000000e+00> : vector<1x512xf32>
    %39 = tpu.matmul %18, %1, %cst_17 {dimension_numbers = #tpu.dot_dimension_numbers<[1], [0], [0], [1], [0, 0, 1, 1], [], []>} : vector<1x128xf32>, vector<128x512xf32>, vector<1x512xf32> -> vector<1x512xf32>
    %40 = arith.addf %38, %39 : vector<1x512xf32>
    %41 = vector.extract_strided_slice %40 {offsets = [0, 0], sizes = [1, 384], strides = [1, 1]} : vector<1x512xf32> to vector<1x384xf32>
    %42 = arith.negf %41 : vector<1x384xf32>
    %43 = math.exp %42 : vector<1x384xf32>
    %cst_18 = arith.constant 1.000000e+00 : f32
    %44 = vector.broadcast %cst_18 : f32 to vector<1x384xf32>
    %45 = arith.addf %44, %43 : vector<1x384xf32>
    %46 = arith.divf %44, %45 : vector<1x384xf32>
    %47 = vector.extract_strided_slice %46 {offsets = [0, 0], sizes = [1, 128], strides = [1, 1]} : vector<1x384xf32> to vector<1x128xf32>
    %48 = vector.extract_strided_slice %46 {offsets = [0, 128], sizes = [1, 128], strides = [1, 1]} : vector<1x384xf32> to vector<1x128xf32>
    %49 = vector.extract_strided_slice %46 {offsets = [0, 256], sizes = [1, 128], strides = [1, 1]} : vector<1x384xf32> to vector<1x128xf32>
    %50 = vector.extract_strided_slice %40 {offsets = [0, 384], sizes = [1, 128], strides = [1, 1]} : vector<1x512xf32> to vector<1x128xf32>
    %51 = math.tanh %50 : vector<1x128xf32>
    %52 = arith.mulf %48, %18 : vector<1x128xf32>
    %53 = arith.mulf %47, %51 : vector<1x128xf32>
    %54 = arith.addf %52, %53 : vector<1x128xf32>
    %55 = math.tanh %54 : vector<1x128xf32>
    %56 = arith.mulf %49, %55 : vector<1x128xf32>
    %cst_19 = arith.constant dense<0.000000e+00> : vector<1x512xf32>
    %57 = tpu.matmul %36, %0, %cst_19 {dimension_numbers = #tpu.dot_dimension_numbers<[1], [0], [0], [1], [0, 0, 1, 1], [], []>} : vector<1x128xf32>, vector<128x512xf32>, vector<1x512xf32> -> vector<1x512xf32>
    %58 = arith.addf %11, %57 : vector<1x512xf32>
    %59 = vector.extract_strided_slice %58 {offsets = [0, 0], sizes = [1, 384], strides = [1, 1]} : vector<1x512xf32> to vector<1x384xf32>
    %60 = arith.negf %59 : vector<1x384xf32>
    %61 = math.exp %60 : vector<1x384xf32>
    %cst_20 = arith.constant 1.000000e+00 : f32
    %62 = vector.broadcast %cst_20 : f32 to vector<1x384xf32>
    %63 = arith.addf %62, %61 : vector<1x384xf32>
    %64 = arith.divf %62, %63 : vector<1x384xf32>
    %65 = vector.extract_strided_slice %64 {offsets = [0, 0], sizes = [1, 128], strides = [1, 1]} : vector<1x384xf32> to vector<1x128xf32>
    %66 = vector.extract_strided_slice %64 {offsets = [0, 128], sizes = [1, 128], strides = [1, 1]} : vector<1x384xf32> to vector<1x128xf32>
    %67 = vector.extract_strided_slice %64 {offsets = [0, 256], sizes = [1, 128], strides = [1, 1]} : vector<1x384xf32> to vector<1x128xf32>
    %68 = vector.extract_strided_slice %58 {offsets = [0, 384], sizes = [1, 128], strides = [1, 1]} : vector<1x512xf32> to vector<1x128xf32>
    %69 = math.tanh %68 : vector<1x128xf32>
    %70 = arith.mulf %66, %34 : vector<1x128xf32>
    %71 = arith.mulf %65, %69 : vector<1x128xf32>
    %72 = arith.addf %70, %71 : vector<1x128xf32>
    %73 = math.tanh %72 : vector<1x128xf32>
    %74 = arith.mulf %67, %73 : vector<1x128xf32>
    %cst_21 = arith.constant dense<0.000000e+00> : vector<1x512xf32>
    %75 = tpu.matmul %74, %2, %cst_21 {dimension_numbers = #tpu.dot_dimension_numbers<[1], [0], [0], [1], [0, 0, 1, 1], [], []>} : vector<1x128xf32>, vector<128x512xf32>, vector<1x512xf32> -> vector<1x512xf32>
    %76 = arith.addf %75, %3 : vector<1x512xf32>
    %cst_22 = arith.constant dense<0.000000e+00> : vector<1x512xf32>
    %77 = tpu.matmul %56, %1, %cst_22 {dimension_numbers = #tpu.dot_dimension_numbers<[1], [0], [0], [1], [0, 0, 1, 1], [], []>} : vector<1x128xf32>, vector<128x512xf32>, vector<1x512xf32> -> vector<1x512xf32>
    %78 = arith.addf %76, %77 : vector<1x512xf32>
    %79 = vector.extract_strided_slice %78 {offsets = [0, 0], sizes = [1, 384], strides = [1, 1]} : vector<1x512xf32> to vector<1x384xf32>
    %80 = arith.negf %79 : vector<1x384xf32>
    %81 = math.exp %80 : vector<1x384xf32>
    %cst_23 = arith.constant 1.000000e+00 : f32
    %82 = vector.broadcast %cst_23 : f32 to vector<1x384xf32>
    %83 = arith.addf %82, %81 : vector<1x384xf32>
    %84 = arith.divf %82, %83 : vector<1x384xf32>
    %85 = vector.extract_strided_slice %84 {offsets = [0, 0], sizes = [1, 128], strides = [1, 1]} : vector<1x384xf32> to vector<1x128xf32>
    %86 = vector.extract_strided_slice %84 {offsets = [0, 128], sizes = [1, 128], strides = [1, 1]} : vector<1x384xf32> to vector<1x128xf32>
    %87 = vector.extract_strided_slice %84 {offsets = [0, 256], sizes = [1, 128], strides = [1, 1]} : vector<1x384xf32> to vector<1x128xf32>
    %88 = vector.extract_strided_slice %78 {offsets = [0, 384], sizes = [1, 128], strides = [1, 1]} : vector<1x512xf32> to vector<1x128xf32>
    %89 = math.tanh %88 : vector<1x128xf32>
    %90 = arith.mulf %86, %54 : vector<1x128xf32>
    %91 = arith.mulf %85, %89 : vector<1x128xf32>
    %92 = arith.addf %90, %91 : vector<1x128xf32>
    %93 = math.tanh %92 : vector<1x128xf32>
    %94 = arith.mulf %87, %93 : vector<1x128xf32>
    %cst_24 = arith.constant dense<0.000000e+00> : vector<1x512xf32>
    %95 = tpu.matmul %74, %0, %cst_24 {dimension_numbers = #tpu.dot_dimension_numbers<[1], [0], [0], [1], [0, 0, 1, 1], [], []>} : vector<1x128xf32>, vector<128x512xf32>, vector<1x512xf32> -> vector<1x512xf32>
    %96 = arith.addf %12, %95 : vector<1x512xf32>
    %97 = vector.extract_strided_slice %96 {offsets = [0, 0], sizes = [1, 384], strides = [1, 1]} : vector<1x512xf32> to vector<1x384xf32>
    %98 = arith.negf %97 : vector<1x384xf32>
    %99 = math.exp %98 : vector<1x384xf32>
    %cst_25 = arith.constant 1.000000e+00 : f32
    %100 = vector.broadcast %cst_25 : f32 to vector<1x384xf32>
    %101 = arith.addf %100, %99 : vector<1x384xf32>
    %102 = arith.divf %100, %101 : vector<1x384xf32>
    %103 = vector.extract_strided_slice %102 {offsets = [0, 0], sizes = [1, 128], strides = [1, 1]} : vector<1x384xf32> to vector<1x128xf32>
    %104 = vector.extract_strided_slice %102 {offsets = [0, 128], sizes = [1, 128], strides = [1, 1]} : vector<1x384xf32> to vector<1x128xf32>
    %105 = vector.extract_strided_slice %102 {offsets = [0, 256], sizes = [1, 128], strides = [1, 1]} : vector<1x384xf32> to vector<1x128xf32>
    %106 = vector.extract_strided_slice %96 {offsets = [0, 384], sizes = [1, 128], strides = [1, 1]} : vector<1x512xf32> to vector<1x128xf32>
    %107 = math.tanh %106 : vector<1x128xf32>
    %108 = arith.mulf %104, %72 : vector<1x128xf32>
    %109 = arith.mulf %103, %107 : vector<1x128xf32>
    %110 = arith.addf %108, %109 : vector<1x128xf32>
    %111 = math.tanh %110 : vector<1x128xf32>
    %112 = arith.mulf %105, %111 : vector<1x128xf32>
    %cst_26 = arith.constant dense<0.000000e+00> : vector<1x512xf32>
    %113 = tpu.matmul %112, %2, %cst_26 {dimension_numbers = #tpu.dot_dimension_numbers<[1], [0], [0], [1], [0, 0, 1, 1], [], []>} : vector<1x128xf32>, vector<128x512xf32>, vector<1x512xf32> -> vector<1x512xf32>
    %114 = arith.addf %113, %3 : vector<1x512xf32>
    %cst_27 = arith.constant dense<0.000000e+00> : vector<1x512xf32>
    %115 = tpu.matmul %94, %1, %cst_27 {dimension_numbers = #tpu.dot_dimension_numbers<[1], [0], [0], [1], [0, 0, 1, 1], [], []>} : vector<1x128xf32>, vector<128x512xf32>, vector<1x512xf32> -> vector<1x512xf32>
    %116 = arith.addf %114, %115 : vector<1x512xf32>
    %117 = vector.extract_strided_slice %116 {offsets = [0, 0], sizes = [1, 384], strides = [1, 1]} : vector<1x512xf32> to vector<1x384xf32>
    %118 = arith.negf %117 : vector<1x384xf32>
    %119 = math.exp %118 : vector<1x384xf32>
    %cst_28 = arith.constant 1.000000e+00 : f32
    %120 = vector.broadcast %cst_28 : f32 to vector<1x384xf32>
    %121 = arith.addf %120, %119 : vector<1x384xf32>
    %122 = arith.divf %120, %121 : vector<1x384xf32>
    %123 = vector.extract_strided_slice %122 {offsets = [0, 0], sizes = [1, 128], strides = [1, 1]} : vector<1x384xf32> to vector<1x128xf32>
    %124 = vector.extract_strided_slice %122 {offsets = [0, 128], sizes = [1, 128], strides = [1, 1]} : vector<1x384xf32> to vector<1x128xf32>
    %125 = vector.extract_strided_slice %122 {offsets = [0, 256], sizes = [1, 128], strides = [1, 1]} : vector<1x384xf32> to vector<1x128xf32>
    %126 = vector.extract_strided_slice %116 {offsets = [0, 384], sizes = [1, 128], strides = [1, 1]} : vector<1x512xf32> to vector<1x128xf32>
    %127 = math.tanh %126 : vector<1x128xf32>
    %128 = arith.mulf %124, %92 : vector<1x128xf32>
    %129 = arith.mulf %123, %127 : vector<1x128xf32>
    %130 = arith.addf %128, %129 : vector<1x128xf32>
    %131 = math.tanh %130 : vector<1x128xf32>
    %132 = arith.mulf %125, %131 : vector<1x128xf32>
    %cst_29 = arith.constant dense<0.000000e+00> : vector<1x512xf32>
    %133 = tpu.matmul %112, %0, %cst_29 {dimension_numbers = #tpu.dot_dimension_numbers<[1], [0], [0], [1], [0, 0, 1, 1], [], []>} : vector<1x128xf32>, vector<128x512xf32>, vector<1x512xf32> -> vector<1x512xf32>
    %134 = arith.addf %13, %133 : vector<1x512xf32>
    %135 = vector.extract_strided_slice %134 {offsets = [0, 0], sizes = [1, 384], strides = [1, 1]} : vector<1x512xf32> to vector<1x384xf32>
    %136 = arith.negf %135 : vector<1x384xf32>
    %137 = math.exp %136 : vector<1x384xf32>
    %cst_30 = arith.constant 1.000000e+00 : f32
    %138 = vector.broadcast %cst_30 : f32 to vector<1x384xf32>
    %139 = arith.addf %138, %137 : vector<1x384xf32>
    %140 = arith.divf %138, %139 : vector<1x384xf32>
    %141 = vector.extract_strided_slice %140 {offsets = [0, 0], sizes = [1, 128], strides = [1, 1]} : vector<1x384xf32> to vector<1x128xf32>
    %142 = vector.extract_strided_slice %140 {offsets = [0, 128], sizes = [1, 128], strides = [1, 1]} : vector<1x384xf32> to vector<1x128xf32>
    %143 = vector.extract_strided_slice %140 {offsets = [0, 256], sizes = [1, 128], strides = [1, 1]} : vector<1x384xf32> to vector<1x128xf32>
    %144 = vector.extract_strided_slice %134 {offsets = [0, 384], sizes = [1, 128], strides = [1, 1]} : vector<1x512xf32> to vector<1x128xf32>
    %145 = math.tanh %144 : vector<1x128xf32>
    %146 = arith.mulf %142, %110 : vector<1x128xf32>
    %147 = arith.mulf %141, %145 : vector<1x128xf32>
    %148 = arith.addf %146, %147 : vector<1x128xf32>
    %149 = math.tanh %148 : vector<1x128xf32>
    %150 = arith.mulf %143, %149 : vector<1x128xf32>
    %cst_31 = arith.constant dense<0.000000e+00> : vector<1x512xf32>
    %151 = tpu.matmul %150, %2, %cst_31 {dimension_numbers = #tpu.dot_dimension_numbers<[1], [0], [0], [1], [0, 0, 1, 1], [], []>} : vector<1x128xf32>, vector<128x512xf32>, vector<1x512xf32> -> vector<1x512xf32>
    %152 = arith.addf %151, %3 : vector<1x512xf32>
    %cst_32 = arith.constant dense<0.000000e+00> : vector<1x512xf32>
    %153 = tpu.matmul %132, %1, %cst_32 {dimension_numbers = #tpu.dot_dimension_numbers<[1], [0], [0], [1], [0, 0, 1, 1], [], []>} : vector<1x128xf32>, vector<128x512xf32>, vector<1x512xf32> -> vector<1x512xf32>
    %154 = arith.addf %152, %153 : vector<1x512xf32>
    %155 = vector.extract_strided_slice %154 {offsets = [0, 0], sizes = [1, 384], strides = [1, 1]} : vector<1x512xf32> to vector<1x384xf32>
    %156 = arith.negf %155 : vector<1x384xf32>
    %157 = math.exp %156 : vector<1x384xf32>
    %cst_33 = arith.constant 1.000000e+00 : f32
    %158 = vector.broadcast %cst_33 : f32 to vector<1x384xf32>
    %159 = arith.addf %158, %157 : vector<1x384xf32>
    %160 = arith.divf %158, %159 : vector<1x384xf32>
    %161 = vector.extract_strided_slice %160 {offsets = [0, 0], sizes = [1, 128], strides = [1, 1]} : vector<1x384xf32> to vector<1x128xf32>
    %162 = vector.extract_strided_slice %160 {offsets = [0, 128], sizes = [1, 128], strides = [1, 1]} : vector<1x384xf32> to vector<1x128xf32>
    %163 = vector.extract_strided_slice %160 {offsets = [0, 256], sizes = [1, 128], strides = [1, 1]} : vector<1x384xf32> to vector<1x128xf32>
    %164 = vector.extract_strided_slice %154 {offsets = [0, 384], sizes = [1, 128], strides = [1, 1]} : vector<1x512xf32> to vector<1x128xf32>
    %165 = math.tanh %164 : vector<1x128xf32>
    %166 = arith.mulf %162, %130 : vector<1x128xf32>
    %167 = arith.mulf %161, %165 : vector<1x128xf32>
    %168 = arith.addf %166, %167 : vector<1x128xf32>
    %169 = math.tanh %168 : vector<1x128xf32>
    %170 = arith.mulf %163, %169 : vector<1x128xf32>
    %cst_34 = arith.constant dense<0.000000e+00> : vector<1x512xf32>
    %171 = tpu.matmul %150, %0, %cst_34 {dimension_numbers = #tpu.dot_dimension_numbers<[1], [0], [0], [1], [0, 0, 1, 1], [], []>} : vector<1x128xf32>, vector<128x512xf32>, vector<1x512xf32> -> vector<1x512xf32>
    %172 = arith.addf %14, %171 : vector<1x512xf32>
    %173 = vector.extract_strided_slice %172 {offsets = [0, 0], sizes = [1, 384], strides = [1, 1]} : vector<1x512xf32> to vector<1x384xf32>
    %174 = arith.negf %173 : vector<1x384xf32>
    %175 = math.exp %174 : vector<1x384xf32>
    %cst_35 = arith.constant 1.000000e+00 : f32
    %176 = vector.broadcast %cst_35 : f32 to vector<1x384xf32>
    %177 = arith.addf %176, %175 : vector<1x384xf32>
    %178 = arith.divf %176, %177 : vector<1x384xf32>
    %179 = vector.extract_strided_slice %178 {offsets = [0, 0], sizes = [1, 128], strides = [1, 1]} : vector<1x384xf32> to vector<1x128xf32>
    %180 = vector.extract_strided_slice %178 {offsets = [0, 128], sizes = [1, 128], strides = [1, 1]} : vector<1x384xf32> to vector<1x128xf32>
    %181 = vector.extract_strided_slice %178 {offsets = [0, 256], sizes = [1, 128], strides = [1, 1]} : vector<1x384xf32> to vector<1x128xf32>
    %182 = vector.extract_strided_slice %172 {offsets = [0, 384], sizes = [1, 128], strides = [1, 1]} : vector<1x512xf32> to vector<1x128xf32>
    %183 = math.tanh %182 : vector<1x128xf32>
    %184 = arith.mulf %180, %148 : vector<1x128xf32>
    %185 = arith.mulf %179, %183 : vector<1x128xf32>
    %186 = arith.addf %184, %185 : vector<1x128xf32>
    %187 = math.tanh %186 : vector<1x128xf32>
    %188 = arith.mulf %181, %187 : vector<1x128xf32>
    %cst_36 = arith.constant dense<0.000000e+00> : vector<1x512xf32>
    %189 = tpu.matmul %188, %2, %cst_36 {dimension_numbers = #tpu.dot_dimension_numbers<[1], [0], [0], [1], [0, 0, 1, 1], [], []>} : vector<1x128xf32>, vector<128x512xf32>, vector<1x512xf32> -> vector<1x512xf32>
    %190 = arith.addf %189, %3 : vector<1x512xf32>
    %cst_37 = arith.constant dense<0.000000e+00> : vector<1x512xf32>
    %191 = tpu.matmul %170, %1, %cst_37 {dimension_numbers = #tpu.dot_dimension_numbers<[1], [0], [0], [1], [0, 0, 1, 1], [], []>} : vector<1x128xf32>, vector<128x512xf32>, vector<1x512xf32> -> vector<1x512xf32>
    %192 = arith.addf %190, %191 : vector<1x512xf32>
    %193 = vector.extract_strided_slice %192 {offsets = [0, 0], sizes = [1, 384], strides = [1, 1]} : vector<1x512xf32> to vector<1x384xf32>
    %194 = arith.negf %193 : vector<1x384xf32>
    %195 = math.exp %194 : vector<1x384xf32>
    %cst_38 = arith.constant 1.000000e+00 : f32
    %196 = vector.broadcast %cst_38 : f32 to vector<1x384xf32>
    %197 = arith.addf %196, %195 : vector<1x384xf32>
    %198 = arith.divf %196, %197 : vector<1x384xf32>
    %199 = vector.extract_strided_slice %198 {offsets = [0, 0], sizes = [1, 128], strides = [1, 1]} : vector<1x384xf32> to vector<1x128xf32>
    %200 = vector.extract_strided_slice %198 {offsets = [0, 128], sizes = [1, 128], strides = [1, 1]} : vector<1x384xf32> to vector<1x128xf32>
    %201 = vector.extract_strided_slice %198 {offsets = [0, 256], sizes = [1, 128], strides = [1, 1]} : vector<1x384xf32> to vector<1x128xf32>
    %202 = vector.extract_strided_slice %192 {offsets = [0, 384], sizes = [1, 128], strides = [1, 1]} : vector<1x512xf32> to vector<1x128xf32>
    %203 = math.tanh %202 : vector<1x128xf32>
    %204 = arith.mulf %200, %168 : vector<1x128xf32>
    %205 = arith.mulf %199, %203 : vector<1x128xf32>
    %206 = arith.addf %204, %205 : vector<1x128xf32>
    %207 = math.tanh %206 : vector<1x128xf32>
    %208 = arith.mulf %201, %207 : vector<1x128xf32>
    %cst_39 = arith.constant dense<0.000000e+00> : vector<1x512xf32>
    %209 = tpu.matmul %188, %0, %cst_39 {dimension_numbers = #tpu.dot_dimension_numbers<[1], [0], [0], [1], [0, 0, 1, 1], [], []>} : vector<1x128xf32>, vector<128x512xf32>, vector<1x512xf32> -> vector<1x512xf32>
    %210 = arith.addf %15, %209 : vector<1x512xf32>
    %211 = vector.extract_strided_slice %210 {offsets = [0, 0], sizes = [1, 384], strides = [1, 1]} : vector<1x512xf32> to vector<1x384xf32>
    %212 = arith.negf %211 : vector<1x384xf32>
    %213 = math.exp %212 : vector<1x384xf32>
    %cst_40 = arith.constant 1.000000e+00 : f32
    %214 = vector.broadcast %cst_40 : f32 to vector<1x384xf32>
    %215 = arith.addf %214, %213 : vector<1x384xf32>
    %216 = arith.divf %214, %215 : vector<1x384xf32>
    %217 = vector.extract_strided_slice %216 {offsets = [0, 0], sizes = [1, 128], strides = [1, 1]} : vector<1x384xf32> to vector<1x128xf32>
    %218 = vector.extract_strided_slice %216 {offsets = [0, 128], sizes = [1, 128], strides = [1, 1]} : vector<1x384xf32> to vector<1x128xf32>
    %219 = vector.extract_strided_slice %216 {offsets = [0, 256], sizes = [1, 128], strides = [1, 1]} : vector<1x384xf32> to vector<1x128xf32>
    %220 = vector.extract_strided_slice %210 {offsets = [0, 384], sizes = [1, 128], strides = [1, 1]} : vector<1x512xf32> to vector<1x128xf32>
    %221 = math.tanh %220 : vector<1x128xf32>
    %222 = arith.mulf %218, %186 : vector<1x128xf32>
    %223 = arith.mulf %217, %221 : vector<1x128xf32>
    %224 = arith.addf %222, %223 : vector<1x128xf32>
    %225 = math.tanh %224 : vector<1x128xf32>
    %226 = arith.mulf %219, %225 : vector<1x128xf32>
    %cst_41 = arith.constant dense<0.000000e+00> : vector<1x512xf32>
    %227 = tpu.matmul %226, %2, %cst_41 {dimension_numbers = #tpu.dot_dimension_numbers<[1], [0], [0], [1], [0, 0, 1, 1], [], []>} : vector<1x128xf32>, vector<128x512xf32>, vector<1x512xf32> -> vector<1x512xf32>
    %228 = arith.addf %227, %3 : vector<1x512xf32>
    %cst_42 = arith.constant dense<0.000000e+00> : vector<1x512xf32>
    %229 = tpu.matmul %208, %1, %cst_42 {dimension_numbers = #tpu.dot_dimension_numbers<[1], [0], [0], [1], [0, 0, 1, 1], [], []>} : vector<1x128xf32>, vector<128x512xf32>, vector<1x512xf32> -> vector<1x512xf32>
    %230 = arith.addf %228, %229 : vector<1x512xf32>
    %231 = vector.extract_strided_slice %230 {offsets = [0, 0], sizes = [1, 384], strides = [1, 1]} : vector<1x512xf32> to vector<1x384xf32>
    %232 = arith.negf %231 : vector<1x384xf32>
    %233 = math.exp %232 : vector<1x384xf32>
    %cst_43 = arith.constant 1.000000e+00 : f32
    %234 = vector.broadcast %cst_43 : f32 to vector<1x384xf32>
    %235 = arith.addf %234, %233 : vector<1x384xf32>
    %236 = arith.divf %234, %235 : vector<1x384xf32>
    %237 = vector.extract_strided_slice %236 {offsets = [0, 0], sizes = [1, 128], strides = [1, 1]} : vector<1x384xf32> to vector<1x128xf32>
    %238 = vector.extract_strided_slice %236 {offsets = [0, 128], sizes = [1, 128], strides = [1, 1]} : vector<1x384xf32> to vector<1x128xf32>
    %239 = vector.extract_strided_slice %236 {offsets = [0, 256], sizes = [1, 128], strides = [1, 1]} : vector<1x384xf32> to vector<1x128xf32>
    %240 = vector.extract_strided_slice %230 {offsets = [0, 384], sizes = [1, 128], strides = [1, 1]} : vector<1x512xf32> to vector<1x128xf32>
    %241 = math.tanh %240 : vector<1x128xf32>
    %242 = arith.mulf %238, %206 : vector<1x128xf32>
    %243 = arith.mulf %237, %241 : vector<1x128xf32>
    %244 = arith.addf %242, %243 : vector<1x128xf32>
    %245 = math.tanh %244 : vector<1x128xf32>
    %246 = arith.mulf %239, %245 : vector<1x128xf32>
    %cst_44 = arith.constant dense<0.000000e+00> : vector<1x512xf32>
    %247 = tpu.matmul %226, %0, %cst_44 {dimension_numbers = #tpu.dot_dimension_numbers<[1], [0], [0], [1], [0, 0, 1, 1], [], []>} : vector<1x128xf32>, vector<128x512xf32>, vector<1x512xf32> -> vector<1x512xf32>
    %248 = arith.addf %16, %247 : vector<1x512xf32>
    %249 = vector.extract_strided_slice %248 {offsets = [0, 0], sizes = [1, 384], strides = [1, 1]} : vector<1x512xf32> to vector<1x384xf32>
    %250 = arith.negf %249 : vector<1x384xf32>
    %251 = math.exp %250 : vector<1x384xf32>
    %cst_45 = arith.constant 1.000000e+00 : f32
    %252 = vector.broadcast %cst_45 : f32 to vector<1x384xf32>
    %253 = arith.addf %252, %251 : vector<1x384xf32>
    %254 = arith.divf %252, %253 : vector<1x384xf32>
    %255 = vector.extract_strided_slice %254 {offsets = [0, 0], sizes = [1, 128], strides = [1, 1]} : vector<1x384xf32> to vector<1x128xf32>
    %256 = vector.extract_strided_slice %254 {offsets = [0, 128], sizes = [1, 128], strides = [1, 1]} : vector<1x384xf32> to vector<1x128xf32>
    %257 = vector.extract_strided_slice %254 {offsets = [0, 256], sizes = [1, 128], strides = [1, 1]} : vector<1x384xf32> to vector<1x128xf32>
    %258 = vector.extract_strided_slice %248 {offsets = [0, 384], sizes = [1, 128], strides = [1, 1]} : vector<1x512xf32> to vector<1x128xf32>
    %259 = math.tanh %258 : vector<1x128xf32>
    %260 = arith.mulf %256, %224 : vector<1x128xf32>
    %261 = arith.mulf %255, %259 : vector<1x128xf32>
    %262 = arith.addf %260, %261 : vector<1x128xf32>
    %263 = math.tanh %262 : vector<1x128xf32>
    %264 = arith.mulf %257, %263 : vector<1x128xf32>
    %cst_46 = arith.constant dense<0.000000e+00> : vector<1x512xf32>
    %265 = tpu.matmul %264, %2, %cst_46 {dimension_numbers = #tpu.dot_dimension_numbers<[1], [0], [0], [1], [0, 0, 1, 1], [], []>} : vector<1x128xf32>, vector<128x512xf32>, vector<1x512xf32> -> vector<1x512xf32>
    %266 = arith.addf %265, %3 : vector<1x512xf32>
    %cst_47 = arith.constant dense<0.000000e+00> : vector<1x512xf32>
    %267 = tpu.matmul %246, %1, %cst_47 {dimension_numbers = #tpu.dot_dimension_numbers<[1], [0], [0], [1], [0, 0, 1, 1], [], []>} : vector<1x128xf32>, vector<128x512xf32>, vector<1x512xf32> -> vector<1x512xf32>
    %268 = arith.addf %266, %267 : vector<1x512xf32>
    %269 = vector.extract_strided_slice %268 {offsets = [0, 0], sizes = [1, 384], strides = [1, 1]} : vector<1x512xf32> to vector<1x384xf32>
    %270 = arith.negf %269 : vector<1x384xf32>
    %271 = math.exp %270 : vector<1x384xf32>
    %cst_48 = arith.constant 1.000000e+00 : f32
    %272 = vector.broadcast %cst_48 : f32 to vector<1x384xf32>
    %273 = arith.addf %272, %271 : vector<1x384xf32>
    %274 = arith.divf %272, %273 : vector<1x384xf32>
    %275 = vector.extract_strided_slice %274 {offsets = [0, 0], sizes = [1, 128], strides = [1, 1]} : vector<1x384xf32> to vector<1x128xf32>
    %276 = vector.extract_strided_slice %274 {offsets = [0, 128], sizes = [1, 128], strides = [1, 1]} : vector<1x384xf32> to vector<1x128xf32>
    %277 = vector.extract_strided_slice %274 {offsets = [0, 256], sizes = [1, 128], strides = [1, 1]} : vector<1x384xf32> to vector<1x128xf32>
    %278 = vector.extract_strided_slice %268 {offsets = [0, 384], sizes = [1, 128], strides = [1, 1]} : vector<1x512xf32> to vector<1x128xf32>
    %279 = math.tanh %278 : vector<1x128xf32>
    %280 = arith.mulf %276, %244 : vector<1x128xf32>
    %281 = arith.mulf %275, %279 : vector<1x128xf32>
    %282 = arith.addf %280, %281 : vector<1x128xf32>
    %283 = math.tanh %282 : vector<1x128xf32>
    %284 = arith.mulf %277, %283 : vector<1x128xf32>
    %cst_49 = arith.constant dense<0.000000e+00> : vector<1x512xf32>
    %285 = tpu.matmul %264, %0, %cst_49 {dimension_numbers = #tpu.dot_dimension_numbers<[1], [0], [0], [1], [0, 0, 1, 1], [], []>} : vector<1x128xf32>, vector<128x512xf32>, vector<1x512xf32> -> vector<1x512xf32>
    %286 = arith.addf %17, %285 : vector<1x512xf32>
    %287 = vector.extract_strided_slice %286 {offsets = [0, 0], sizes = [1, 384], strides = [1, 1]} : vector<1x512xf32> to vector<1x384xf32>
    %288 = arith.negf %287 : vector<1x384xf32>
    %289 = math.exp %288 : vector<1x384xf32>
    %cst_50 = arith.constant 1.000000e+00 : f32
    %290 = vector.broadcast %cst_50 : f32 to vector<1x384xf32>
    %291 = arith.addf %290, %289 : vector<1x384xf32>
    %292 = arith.divf %290, %291 : vector<1x384xf32>
    %293 = vector.extract_strided_slice %292 {offsets = [0, 0], sizes = [1, 128], strides = [1, 1]} : vector<1x384xf32> to vector<1x128xf32>
    %294 = vector.extract_strided_slice %292 {offsets = [0, 128], sizes = [1, 128], strides = [1, 1]} : vector<1x384xf32> to vector<1x128xf32>
    %295 = vector.extract_strided_slice %292 {offsets = [0, 256], sizes = [1, 128], strides = [1, 1]} : vector<1x384xf32> to vector<1x128xf32>
    %296 = vector.extract_strided_slice %286 {offsets = [0, 384], sizes = [1, 128], strides = [1, 1]} : vector<1x512xf32> to vector<1x128xf32>
    %297 = math.tanh %296 : vector<1x128xf32>
    %298 = arith.mulf %294, %262 : vector<1x128xf32>
    %299 = arith.mulf %293, %297 : vector<1x128xf32>
    %300 = arith.addf %298, %299 : vector<1x128xf32>
    %301 = math.tanh %300 : vector<1x128xf32>
    %302 = arith.mulf %295, %301 : vector<1x128xf32>
    %cst_51 = arith.constant dense<0.000000e+00> : vector<1x512xf32>
    %303 = tpu.matmul %302, %2, %cst_51 {dimension_numbers = #tpu.dot_dimension_numbers<[1], [0], [0], [1], [0, 0, 1, 1], [], []>} : vector<1x128xf32>, vector<128x512xf32>, vector<1x512xf32> -> vector<1x512xf32>
    %304 = arith.addf %303, %3 : vector<1x512xf32>
    %cst_52 = arith.constant dense<0.000000e+00> : vector<1x512xf32>
    %305 = tpu.matmul %284, %1, %cst_52 {dimension_numbers = #tpu.dot_dimension_numbers<[1], [0], [0], [1], [0, 0, 1, 1], [], []>} : vector<1x128xf32>, vector<128x512xf32>, vector<1x512xf32> -> vector<1x512xf32>
    %306 = arith.addf %304, %305 : vector<1x512xf32>
    %307 = vector.extract_strided_slice %306 {offsets = [0, 0], sizes = [1, 384], strides = [1, 1]} : vector<1x512xf32> to vector<1x384xf32>
    %308 = arith.negf %307 : vector<1x384xf32>
    %309 = math.exp %308 : vector<1x384xf32>
    %cst_53 = arith.constant 1.000000e+00 : f32
    %310 = vector.broadcast %cst_53 : f32 to vector<1x384xf32>
    %311 = arith.addf %310, %309 : vector<1x384xf32>
    %312 = arith.divf %310, %311 : vector<1x384xf32>
    %313 = vector.extract_strided_slice %312 {offsets = [0, 0], sizes = [1, 128], strides = [1, 1]} : vector<1x384xf32> to vector<1x128xf32>
    %314 = vector.extract_strided_slice %312 {offsets = [0, 128], sizes = [1, 128], strides = [1, 1]} : vector<1x384xf32> to vector<1x128xf32>
    %315 = vector.extract_strided_slice %312 {offsets = [0, 256], sizes = [1, 128], strides = [1, 1]} : vector<1x384xf32> to vector<1x128xf32>
    %316 = vector.extract_strided_slice %306 {offsets = [0, 384], sizes = [1, 128], strides = [1, 1]} : vector<1x512xf32> to vector<1x128xf32>
    %317 = math.tanh %316 : vector<1x128xf32>
    %318 = arith.mulf %314, %282 : vector<1x128xf32>
    %319 = arith.mulf %313, %317 : vector<1x128xf32>
    %320 = arith.addf %318, %319 : vector<1x128xf32>
    %321 = math.tanh %320 : vector<1x128xf32>
    %322 = arith.mulf %315, %321 : vector<1x128xf32>
    %323 = tpu.concatenate %56, %94, %132, %170, %208, %246, %284, %322 in 0 : vector<1x128xf32>, vector<1x128xf32>, vector<1x128xf32>, vector<1x128xf32>, vector<1x128xf32>, vector<1x128xf32>, vector<1x128xf32>, vector<1x128xf32> -> vector<8x128xf32>
    %c0_54 = arith.constant 0 : index
    %c0_55 = arith.constant 0 : index
    %324 = vector.load %arg7[%c0_54, %c0_55] : memref<128x256xf32, #tpu.memory_space<vmem>>, vector<128x256xf32>
    %cst_56 = arith.constant dense<0.000000e+00> : vector<8x256xf32>
    %325 = tpu.matmul %323, %324, %cst_56 {dimension_numbers = #tpu.dot_dimension_numbers<[1], [0], [0], [1], [0, 0, 1, 1], [], []>} : vector<8x128xf32>, vector<128x256xf32>, vector<8x256xf32> -> vector<8x256xf32>
    %c0_57 = arith.constant 0 : index
    %c0_58 = arith.constant 0 : index
    %326 = vector.load %arg8[%c0_57, %c0_58] : memref<1x256xf32, #tpu.memory_space<vmem>>, vector<1x256xf32>
    %327 = vector.broadcast %326 : vector<1x256xf32> to vector<8x256xf32>
    %328 = arith.addf %325, %327 : vector<8x256xf32>
    %cst_59 = arith.constant dense<0xFF800000> : vector<8xf32>
    %329 = vector.multi_reduction <maximumf>, %328, %cst_59 [1] : vector<8x256xf32> to vector<8xf32>
    %330 = vector.shape_cast %329 : vector<8xf32> to vector<8x1xf32>
    %331 = vector.broadcast %330 : vector<8x1xf32> to vector<8x256xf32>
    %332 = arith.subf %328, %331 : vector<8x256xf32>
    %333 = math.exp %332 : vector<8x256xf32>
    %cst_60 = arith.constant dense<0.000000e+00> : vector<8xf32>
    %334 = vector.multi_reduction <add>, %333, %cst_60 [1] : vector<8x256xf32> to vector<8xf32>
    %335 = vector.shape_cast %334 : vector<8xf32> to vector<8x1xf32>
    %336 = math.log %335 : vector<8x1xf32>
    %337 = arith.addf %330, %336 : vector<8x1xf32>
    %338 = vector.broadcast %337 : vector<8x1xf32> to vector<8x256xf32>
    %339 = arith.subf %328, %338 : vector<8x256xf32>
    %c0_61 = arith.constant 0 : index
    %c0_62 = arith.constant 0 : index
    %340 = vector.load %arg9[%c0_61, %c0_62] : memref<8x256xf32, #tpu.memory_space<vmem>>, vector<8x256xf32>
    tpu.vector_store %arg9[%c0_61, %c0_62], %339 {strides = array<i32>} : memref<8x256xf32, #tpu.memory_space<vmem>>, vector<8x256xf32>,
    return
  }
}

</mosaic_0001>

<bundles_post_ra>
// kernel: custom_tokenizer_forward.1
= control target key start
LH: loop header
LB: loop body
LE: loop exit
PB: predicated region body
PF: predicated region fallthrough
CT: control target
= control target key end

     0   :  { %s11574_s0 = inlined_call_operand.vmem [shape: f32[8,128], index: 0, kind: input, shape index: {}]   ;;  %s11575_s1 = inlined_call_operand.vmem [shape: f32[128,512], index: 1, kind: input, shape index: {}]   ;;  %s11576_s2 = inlined_call_operand.vmem [shape: f32[128,512], index: 2, kind: input, shape index: {}]   ;;  %s11577_s3 = inlined_call_operand.vmem [shape: f32[1,512], index: 3, kind: input, shape index: {}]   ;;  %s11578_s4 = inlined_call_operand.vmem [shape: f32[128,512], index: 4, kind: input, shape index: {}]   ;;  %s11579_s5 = inlined_call_operand.vmem [shape: f32[128,512], index: 5, kind: input, shape index: {}]   ;;  %s11580_s6 = inlined_call_operand.vmem [shape: f32[1,512], index: 6, kind: input, shape index: {}]   ;;  %s11581_s7 = inlined_call_operand.vmem [shape: f32[128,256], index: 7, kind: input, shape index: {}]   ;;  %s11582_s8 = inlined_call_operand.vmem [shape: f32[1,256], index: 8, kind: input, shape index: {}]   ;;  %s11583_s9 = inlined_call_operand.hbm [shape: f32[8,256], index: 9, kind: output, shape index: {}]  }
   0x1   :  { %v288_v0 = vld [vmem:[%s11575_s1 + $0x1e8] sm:$0xff]  ;;  %v290_v1 = vld [vmem:[%s11575_s1 + $0x1f8] sm:$0xff]  ;;  %v287_v2 = vld [vmem:[%s11575_s1 + $0x1e0] sm:$0xff] }
   0x2   :  { %313 = vmatprep.subr.mxu0 %v288_v0  ;;  %384 = vmatprep.subr.mxu1 %v290_v1  ;;  %v289_v3 = vld [vmem:[%s11575_s1 + $0x1f0] sm:$0xff]  ;;  %v284_v4 = vld [vmem:[%s11575_s1 + $0x1c8] sm:$0xff]  ;;  %v286_v5 = vld [vmem:[%s11575_s1 + $0x1d8] sm:$0xff] }
   0x3   :  { %314 = vmatpush1.msra.mxu0 %v287_v2  ;;  %385 = vmatpush1.msra.mxu1 %v289_v3  ;;  %v283_v6 = vld [vmem:[%s11575_s1 + $0x1c0] sm:$0xff]  ;;  %v285_v7 = vld [vmem:[%s11575_s1 + $0x1d0] sm:$0xff]  ;;  %v280_v8 = vld [vmem:[%s11575_s1 + $0x1a8] sm:$0xff]  ;;  %v11584_v2 = vmov 0.0  }
   0x4   :  { %315 = vmatprep.subr.mxu0 %v284_v4  ;;  %386 = vmatprep.subr.mxu1 %v286_v5  ;;  %v282_v9 = vld [vmem:[%s11575_s1 + $0x1b8] sm:$0xff]  ;;  %v279_v10 = vld [vmem:[%s11575_s1 + $0x1a0] sm:$0xff]  ;;  %v281_v11 = vld [vmem:[%s11575_s1 + $0x1b0] sm:$0xff] }
   0x5   :  { %316 = vmatpush1.msra.mxu0 %v283_v6  ;;  %387 = vmatpush1.msra.mxu1 %v285_v7  ;;  %v276_v12 = vld [vmem:[%s11575_s1 + $0x188] sm:$0xff]  ;;  %v278_v13 = vld [vmem:[%s11575_s1 + $0x198] sm:$0xff]  ;;  %v275_v14 = vld [vmem:[%s11575_s1 + $0x180] sm:$0xff] }
   0x6   :  { %317 = vmatprep.subr.mxu0 %v280_v8  ;;  %388 = vmatprep.subr.mxu1 %v282_v9  ;;  %v277_v15 = vld [vmem:[%s11575_s1 + $0x190] sm:$0xff]  ;;  %v272_v16 = vld [vmem:[%s11575_s1 + $0x168] sm:$0xff]  ;;  %v274_v17 = vld [vmem:[%s11575_s1 + $0x178] sm:$0xff] }
   0x7   :  { %318 = vmatpush1.msra.mxu0 %v279_v10  ;;  %389 = vmatpush1.msra.mxu1 %v281_v11  ;;  %v271_v18 = vld [vmem:[%s11575_s1 + $0x160] sm:$0xff]  ;;  %v273_v19 = vld [vmem:[%s11575_s1 + $0x170] sm:$0xff]  ;;  %v268_v20 = vld [vmem:[%s11575_s1 + $0x148] sm:$0xff] }
   0x8   :  { %319 = vmatprep.subr.mxu0 %v276_v12  ;;  %390 = vmatprep.subr.mxu1 %v278_v13  ;;  %v270_v21 = vld [vmem:[%s11575_s1 + $0x158] sm:$0xff]  ;;  %v267_v22 = vld [vmem:[%s11575_s1 + $0x140] sm:$0xff]  ;;  %v269_v23 = vld [vmem:[%s11575_s1 + $0x150] sm:$0xff] }
   0x9   :  { %320 = vmatpush1.msra.mxu0 %v275_v14  ;;  %391 = vmatpush1.msra.mxu1 %v277_v15  ;;  %v264_v24 = vld [vmem:[%s11575_s1 + $0x128] sm:$0xff]  ;;  %v266_v25 = vld [vmem:[%s11575_s1 + $0x138] sm:$0xff]  ;;  %v263_v26 = vld [vmem:[%s11575_s1 + $0x120] sm:$0xff] }
   0xa   :  { %321 = vmatprep.subr.mxu0 %v272_v16  ;;  %392 = vmatprep.subr.mxu1 %v274_v17  ;;  %v265_v27 = vld [vmem:[%s11575_s1 + $0x130] sm:$0xff]  ;;  %v260_v28 = vld [vmem:[%s11575_s1 + $0x108] sm:$0xff]  ;;  %v262_v29 = vld [vmem:[%s11575_s1 + $0x118] sm:$0xff] }
   0xb   :  { %322 = vmatpush1.msra.mxu0 %v271_v18  ;;  %393 = vmatpush1.msra.mxu1 %v273_v19  ;;  %v259_v30 = vld [vmem:[%s11575_s1 + $0x100] sm:$0xff]  ;;  %v261_v31 = vld [vmem:[%s11575_s1 + $0x110] sm:$0xff]  ;;  %v256_v32 = vld [vmem:[%s11575_s1 + $0xe8] sm:$0xff] }
   0xc   :  { %323 = vmatprep.subr.mxu0 %v268_v20  ;;  %394 = vmatprep.subr.mxu1 %v270_v21  ;;  %v258_v33 = vld [vmem:[%s11575_s1 + $0xf8] sm:$0xff]  ;;  %v255_v34 = vld [vmem:[%s11575_s1 + $0xe0] sm:$0xff]  ;;  %v257_v35 = vld [vmem:[%s11575_s1 + $0xf0] sm:$0xff] }
   0xd   :  { %324 = vmatpush1.msra.mxu0 %v267_v22  ;;  %395 = vmatpush1.msra.mxu1 %v269_v23  ;;  %v252_v36 = vld [vmem:[%s11575_s1 + $0xc8] sm:$0xff]  ;;  %v254_v37 = vld [vmem:[%s11575_s1 + $0xd8] sm:$0xff]  ;;  %v251_v38 = vld [vmem:[%s11575_s1 + $0xc0] sm:$0xff] }
   0xe   :  { %325 = vmatprep.subr.mxu0 %v264_v24  ;;  %396 = vmatprep.subr.mxu1 %v266_v25  ;;  %v253_v39 = vld [vmem:[%s11575_s1 + $0xd0] sm:$0xff]  ;;  %v248_v40 = vld [vmem:[%s11575_s1 + $0xa8] sm:$0xff]  ;;  %v250_v41 = vld [vmem:[%s11575_s1 + $0xb8] sm:$0xff] }
   0xf   :  { %326 = vmatpush1.msra.mxu0 %v263_v26  ;;  %397 = vmatpush1.msra.mxu1 %v265_v27  ;;  %v247_v42 = vld [vmem:[%s11575_s1 + $0xa0] sm:$0xff]  ;;  %v249_v43 = vld [vmem:[%s11575_s1 + $0xb0] sm:$0xff]  ;;  %v244_v44 = vld [vmem:[%s11575_s1 + $0x88] sm:$0xff] }
  0x10   :  { %327 = vmatprep.subr.mxu0 %v260_v28  ;;  %398 = vmatprep.subr.mxu1 %v262_v29  ;;  %v246_v45 = vld [vmem:[%s11575_s1 + $0x98] sm:$0xff]  ;;  %v243_v46 = vld [vmem:[%s11575_s1 + $0x80] sm:$0xff]  ;;  %v245_v47 = vld [vmem:[%s11575_s1 + $0x90] sm:$0xff] }
  0x11   :  { %328 = vmatpush1.msra.mxu0 %v259_v30  ;;  %399 = vmatpush1.msra.mxu1 %v261_v31  ;;  %v240_v48 = vld [vmem:[%s11575_s1 + $0x68] sm:$0xff]  ;;  %v242_v49 = vld [vmem:[%s11575_s1 + $0x78] sm:$0xff]  ;;  %v239_v50 = vld [vmem:[%s11575_s1 + $0x60] sm:$0xff] }
  0x12   :  { %329 = vmatprep.subr.mxu0 %v256_v32  ;;  %400 = vmatprep.subr.mxu1 %v258_v33  ;;  %v241_v51 = vld [vmem:[%s11575_s1 + $0x70] sm:$0xff]  ;;  %v236_v52 = vld [vmem:[%s11575_s1 + $0x48] sm:$0xff]  ;;  %v238_v53 = vld [vmem:[%s11575_s1 + $0x58] sm:$0xff] }
  0x13   :  { %330 = vmatpush1.msra.mxu0 %v255_v34  ;;  %401 = vmatpush1.msra.mxu1 %v257_v35  ;;  %v235_v54 = vld [vmem:[%s11575_s1 + $0x40] sm:$0xff]  ;;  %v237_v55 = vld [vmem:[%s11575_s1 + $0x50] sm:$0xff]  ;;  %v232_v56 = vld [vmem:[%s11575_s1 + $0x28] sm:$0xff] }
  0x14   :  { %331 = vmatprep.subr.mxu0 %v252_v36  ;;  %402 = vmatprep.subr.mxu1 %v254_v37  ;;  %v234_v57 = vld [vmem:[%s11575_s1 + $0x38] sm:$0xff]  ;;  %v231_v58 = vld [vmem:[%s11575_s1 + $0x20] sm:$0xff]  ;;  %v233_v59 = vld [vmem:[%s11575_s1 + $0x30] sm:$0xff] }
  0x15   :  { %332 = vmatpush1.msra.mxu0 %v251_v38  ;;  %403 = vmatpush1.msra.mxu1 %v253_v39  ;;  %v228_v60 = vld [vmem:[%s11575_s1 + $0x8] sm:$0xff]  ;;  %v230_v61 = vld [vmem:[%s11575_s1 + $0x18] sm:$0xff]  ;;  %v227_v62 = vld [vmem:[%s11575_s1] sm:$0xff] }
  0x16   :  { %333 = vmatprep.subr.mxu0 %v248_v40  ;;  %404 = vmatprep.subr.mxu1 %v250_v41  ;;  %v229_v63 = vld [vmem:[%s11575_s1 + $0x10] sm:$0xff]  ;;  %v226_v0 = vld [vmem:[%s11574_s0] sm:$0xff]  ;;  %v5801_v1 = vld [vmem:[%s11576_s2 + $0x1e8] sm:$0xff] }
  0x17   :  { %334 = vmatpush1.msra.mxu0 %v247_v42  ;;  %405 = vmatpush1.msra.mxu1 %v249_v43  ;;  %v5807_v3 = vld [vmem:[%s11576_s2 + $0x1f8] sm:$0xff]  ;;  %v5812_v4 = vld [vmem:[%s11576_s2 + $0x1e0] sm:$0xff]  ;;  %v5817_v5 = vld [vmem:[%s11576_s2 + $0x1f0] sm:$0xff] }
  0x18   :  { %335 = vmatprep.subr.mxu0 %v244_v44  ;;  %406 = vmatprep.subr.mxu1 %v246_v45  ;;  %v5824_v6 = vld [vmem:[%s11576_s2 + $0x1c8] sm:$0xff]  ;;  %v5829_v7 = vld [vmem:[%s11576_s2 + $0x1d8] sm:$0xff]  ;;  %v5835_v8 = vld [vmem:[%s11576_s2 + $0x1c0] sm:$0xff] }
  0x19   :  { %336 = vmatpush1.msra.mxu0 %v243_v46  ;;  %407 = vmatpush1.msra.mxu1 %v245_v47  ;;  %v5840_v9 = vld [vmem:[%s11576_s2 + $0x1d0] sm:$0xff]  ;;  %v5847_v10 = vld [vmem:[%s11576_s2 + $0x1a8] sm:$0xff]  ;;  %v5852_v11 = vld [vmem:[%s11576_s2 + $0x1b8] sm:$0xff] }
  0x1a   :  { %337 = vmatprep.subr.mxu0 %v240_v48  ;;  %408 = vmatprep.subr.mxu1 %v242_v49  ;;  %v5859_v12 = vld [vmem:[%s11576_s2 + $0x1a0] sm:$0xff]  ;;  %v5864_v13 = vld [vmem:[%s11576_s2 + $0x1b0] sm:$0xff]  ;;  %v5871_v14 = vld [vmem:[%s11576_s2 + $0x188] sm:$0xff] }
  0x1b   :  { %338 = vmatpush1.msra.mxu0 %v239_v50  ;;  %409 = vmatpush1.msra.mxu1 %v241_v51  ;;  %v5876_v15 = vld [vmem:[%s11576_s2 + $0x198] sm:$0xff]  ;;  %v5883_v16 = vld [vmem:[%s11576_s2 + $0x180] sm:$0xff]  ;;  %v5888_v17 = vld [vmem:[%s11576_s2 + $0x190] sm:$0xff] }
  0x1c   :  { %339 = vmatprep.subr.mxu0 %v236_v52  ;;  %410 = vmatprep.subr.mxu1 %v238_v53  ;;  %v5895_v18 = vld [vmem:[%s11576_s2 + $0x168] sm:$0xff]  ;;  %v5900_v19 = vld [vmem:[%s11576_s2 + $0x178] sm:$0xff]  ;;  %v5907_v20 = vld [vmem:[%s11576_s2 + $0x160] sm:$0xff] }
  0x1d   :  { %340 = vmatpush1.msra.mxu0 %v235_v54  ;;  %411 = vmatpush1.msra.mxu1 %v237_v55  ;;  %v5912_v21 = vld [vmem:[%s11576_s2 + $0x170] sm:$0xff]  ;;  %v5919_v22 = vld [vmem:[%s11576_s2 + $0x148] sm:$0xff]  ;;  %v5924_v23 = vld [vmem:[%s11576_s2 + $0x158] sm:$0xff] }
  0x1e   :  { %341 = vmatprep.subr.mxu0 %v232_v56  ;;  %412 = vmatprep.subr.mxu1 %v234_v57  ;;  %v5931_v24 = vld [vmem:[%s11576_s2 + $0x140] sm:$0xff]  ;;  %v5936_v25 = vld [vmem:[%s11576_s2 + $0x150] sm:$0xff] }
  0x1f   :  { %342 = vmatpush1.msra.mxu0 %v231_v58  ;;  %413 = vmatpush1.msra.mxu1 %v233_v59 }
  0x20   :  { %343 = vmatprep.subr.mxu0 %v228_v60  ;;  %414 = vmatprep.subr.mxu1 %v230_v61 }
  0x21   :  { %344 = vmatpush1.msra.mxu0 %v227_v62  ;;  %377 = vmatprep.mubr.f32.mxu0 %v11584_v2 }
  0x22   :  { %415 = vmatpush1.msra.mxu1 %v229_v63  ;;  %378 = vmatmul.mubr.f32.vlgmr.msra.gmra.mxu0 %v226_v0 }
  0x23   :  { %448 = vmatprep.mubr.f32.mxu1 %v11584_v2  ;;  %455 = vmatprep.subr.mxu0 %v5801_v1 }
  0x24   :  { %526 = vmatprep.subr.mxu1 %v5807_v3  ;;  %449 = vmatmul.mubr.f32.vlgmr.msra.gmra.mxu1 %v226_v0 }
  0x25   :  { %456 = vmatpush1.msra.mxu0 %v5812_v4  ;;  %527 = vmatpush1.msra.mxu1 %v5817_v5 }
  0x26   :  { %457 = vmatprep.subr.mxu0 %v5824_v6  ;;  %528 = vmatprep.subr.mxu1 %v5829_v7 }
  0x27   :  { %458 = vmatpush1.msra.mxu0 %v5835_v8  ;;  %529 = vmatpush1.msra.mxu1 %v5840_v9 }
  0x28   :  { %459 = vmatprep.subr.mxu0 %v5847_v10  ;;  %530 = vmatprep.subr.mxu1 %v5852_v11 }
  0x29   :  { %460 = vmatpush1.msra.mxu0 %v5859_v12  ;;  %531 = vmatpush1.msra.mxu1 %v5864_v13 }
  0x2a   :  { %461 = vmatprep.subr.mxu0 %v5871_v14  ;;  %532 = vmatprep.subr.mxu1 %v5876_v15 }
  0x2b   :  { %462 = vmatpush1.msra.mxu0 %v5883_v16  ;;  %533 = vmatpush1.msra.mxu1 %v5888_v17 }
  0x2c   :  { %463 = vmatprep.subr.mxu0 %v5895_v18  ;;  %534 = vmatprep.subr.mxu1 %v5900_v19 }
  0x2d   :  { %14 = vsyncpa [#allocation3], 0  ;;  %464 = vmatpush1.msra.mxu0 %v5907_v20  ;;  %535 = vmatpush1.msra.mxu1 %v5912_v21  ;;  %v5943_v26 = vld [vmem:[%s11576_s2 + $0x128] sm:$0xff]  ;;  %v5948_v27 = vld [vmem:[%s11576_s2 + $0x138] sm:$0xff]  ;;  %vm4479_vm0 = vcmask 1040384   ;;  %vm4481_vm1 = vcmask 1041408  }
  0x2e   :  { %465 = vmatprep.subr.mxu0 %v5919_v22  ;;  %536 = vmatprep.subr.mxu1 %v5924_v23  ;;  %v5955_v28 = vld [vmem:[%s11576_s2 + $0x120] sm:$0xff]  ;;  %v5960_v29 = vld [vmem:[%s11576_s2 + $0x130] sm:$0xff]  ;;  %v5967_v30 = vld [vmem:[%s11576_s2 + $0x108] sm:$0xff]  ;;  %vm4483_vm2 = vcmask 1042432   ;;  %vm4485_vm3 = vcmask 1043456   ;;  %vm4487_vm4 = vcmask 1044480  }
  0x2f   :  { %466 = vmatpush1.msra.mxu0 %v5931_v24  ;;  %537 = vmatpush1.msra.mxu1 %v5936_v25  ;;  %v5972_v31 = vld [vmem:[%s11576_s2 + $0x118] sm:$0xff]  ;;  %v5979_v32 = vld [vmem:[%s11576_s2 + $0x100] sm:$0xff]  ;;  %v5984_v33 = vld [vmem:[%s11576_s2 + $0x110] sm:$0xff]  ;;  %vm4489_vm5 = vcmask 1045504   ;;  %vm4491_vm6 = vcmask 1046528  }
  0x30   :  { %467 = vmatprep.subr.mxu0 %v5943_v26  ;;  %538 = vmatprep.subr.mxu1 %v5948_v27  ;;  %v5991_v34 = vld [vmem:[%s11576_s2 + $0xe8] sm:$0xff]  ;;  %v5996_v35 = vld [vmem:[%s11576_s2 + $0xf8] sm:$0xff]  ;;  %v6003_v36 = vld [vmem:[%s11576_s2 + $0xe0] sm:$0xff] }
  0x31   :  { %468 = vmatpush1.msra.mxu0 %v5955_v28  ;;  %539 = vmatpush1.msra.mxu1 %v5960_v29  ;;  %v6008_v37 = vld [vmem:[%s11576_s2 + $0xf0] sm:$0xff]  ;;  %v6015_v38 = vld [vmem:[%s11576_s2 + $0xc8] sm:$0xff]  ;;  %v6020_v39 = vld [vmem:[%s11576_s2 + $0xd8] sm:$0xff] }
  0x32   :  { %469 = vmatprep.subr.mxu0 %v5967_v30  ;;  %540 = vmatprep.subr.mxu1 %v5972_v31  ;;  %v6027_v40 = vld [vmem:[%s11576_s2 + $0xc0] sm:$0xff]  ;;  %v6032_v41 = vld [vmem:[%s11576_s2 + $0xd0] sm:$0xff]  ;;  %v6039_v42 = vld [vmem:[%s11576_s2 + $0xa8] sm:$0xff] }
  0x33   :  { %470 = vmatpush1.msra.mxu0 %v5979_v32  ;;  %541 = vmatpush1.msra.mxu1 %v5984_v33  ;;  %v6044_v43 = vld [vmem:[%s11576_s2 + $0xb8] sm:$0xff]  ;;  %v6051_v44 = vld [vmem:[%s11576_s2 + $0xa0] sm:$0xff]  ;;  %v6056_v45 = vld [vmem:[%s11576_s2 + $0xb0] sm:$0xff] }
  0x34   :  { %471 = vmatprep.subr.mxu0 %v5991_v34  ;;  %542 = vmatprep.subr.mxu1 %v5996_v35  ;;  %v6063_v46 = vld [vmem:[%s11576_s2 + $0x88] sm:$0xff]  ;;  %v6068_v47 = vld [vmem:[%s11576_s2 + $0x98] sm:$0xff]  ;;  %v6075_v48 = vld [vmem:[%s11576_s2 + $0x80] sm:$0xff] }
  0x35   :  { %472 = vmatpush1.msra.mxu0 %v6003_v36  ;;  %543 = vmatpush1.msra.mxu1 %v6008_v37  ;;  %12166 = vst [vmem:[#allocation5_spill] sm:$0xff] %v6068_v47  ;;  %12167 = vst [vmem:[#allocation6_spill] sm:$0xff] %v6075_v48  ;;  %v6080_v49 = vld [vmem:[%s11576_s2 + $0x90] sm:$0xff]  ;;  %v6087_v50 = vld [vmem:[%s11576_s2 + $0x68] sm:$0xff] }
  0x36   :  { %473 = vmatprep.subr.mxu0 %v6015_v38  ;;  %544 = vmatprep.subr.mxu1 %v6020_v39  ;;  %12168 = vst [vmem:[#allocation7_spill] sm:$0xff] %v6080_v49  ;;  %12169 = vst [vmem:[#allocation8_spill] sm:$0xff] %v6087_v50  ;;  %v6092_v51 = vld [vmem:[%s11576_s2 + $0x78] sm:$0xff]  ;;  %v6099_v52 = vld [vmem:[%s11576_s2 + $0x60] sm:$0xff] }
  0x37   :  { %474 = vmatpush1.msra.mxu0 %v6027_v40  ;;  %545 = vmatpush1.msra.mxu1 %v6032_v41  ;;  %12170 = vst [vmem:[#allocation9_spill] sm:$0xff] %v6092_v51  ;;  %12171 = vst [vmem:[#allocation10_spill] sm:$0xff] %v6099_v52  ;;  %v6104_v53 = vld [vmem:[%s11576_s2 + $0x70] sm:$0xff]  ;;  %v6111_v54 = vld [vmem:[%s11576_s2 + $0x48] sm:$0xff] }
  0x38   :  { %475 = vmatprep.subr.mxu0 %v6039_v42  ;;  %546 = vmatprep.subr.mxu1 %v6044_v43  ;;  %12172 = vst [vmem:[#allocation11_spill] sm:$0xff] %v6104_v53  ;;  %12173 = vst [vmem:[#allocation12_spill] sm:$0xff] %v6111_v54  ;;  %v6116_v55 = vld [vmem:[%s11576_s2 + $0x58] sm:$0xff]  ;;  %v6123_v56 = vld [vmem:[%s11576_s2 + $0x40] sm:$0xff] }
  0x39   :  { %476 = vmatpush1.msra.mxu0 %v6051_v44  ;;  %547 = vmatpush1.msra.mxu1 %v6056_v45  ;;  %12174 = vst [vmem:[#allocation13_spill] sm:$0xff] %v6116_v55  ;;  %12175 = vst [vmem:[#allocation14_spill] sm:$0xff] %v6123_v56  ;;  %v6128_v57 = vld [vmem:[%s11576_s2 + $0x50] sm:$0xff]  ;;  %v6135_v58 = vld [vmem:[%s11576_s2 + $0x28] sm:$0xff] }
  0x3a   :  { %477 = vmatprep.subr.mxu0 %v6063_v46  ;;  %548 = vmatprep.subr.mxu1 %v6068_v47  ;;  %12176 = vst [vmem:[#allocation15_spill] sm:$0xff] %v6128_v57  ;;  %12177 = vst [vmem:[#allocation16_spill] sm:$0xff] %v6135_v58  ;;  %v6140_v59 = vld [vmem:[%s11576_s2 + $0x38] sm:$0xff]  ;;  %v6147_v60 = vld [vmem:[%s11576_s2 + $0x20] sm:$0xff] }
  0x3b   :  { %478 = vmatpush1.msra.mxu0 %v6075_v48  ;;  %549 = vmatpush1.msra.mxu1 %v6080_v49  ;;  %12178 = vst [vmem:[#allocation17_spill] sm:$0xff] %v6140_v59  ;;  %12179 = vst [vmem:[#allocation18_spill] sm:$0xff] %v6147_v60  ;;  %v6152_v61 = vld [vmem:[%s11576_s2 + $0x30] sm:$0xff]  ;;  %v6159_v62 = vld [vmem:[%s11576_s2 + $0x8] sm:$0xff] }
  0x3c   :  { %479 = vmatprep.subr.mxu0 %v6087_v50  ;;  %550 = vmatprep.subr.mxu1 %v6092_v51  ;;  %12180 = vst [vmem:[#allocation19_spill] sm:$0xff] %v6152_v61  ;;  %12181 = vst [vmem:[#allocation20_spill] sm:$0xff] %v6159_v62  ;;  %v6164_v63 = vld [vmem:[%s11576_s2 + $0x18] sm:$0xff]  ;;  %v6171_v0 = vld [vmem:[%s11576_s2] sm:$0xff] }
  0x3d   :  { %480 = vmatpush1.msra.mxu0 %v6099_v52  ;;  %551 = vmatpush1.msra.mxu1 %v6104_v53  ;;  %12182 = vst [vmem:[#allocation21_spill] sm:$0xff] %v6164_v63  ;;  %12183 = vst [vmem:[#allocation22_spill] sm:$0xff] %v6171_v0  ;;  %v6178_v2 = vld [vmem:[%s11576_s2 + $0x10] sm:$0xff] }
  0x3e   :  { %481 = vmatprep.subr.mxu0 %v6111_v54  ;;  %552 = vmatprep.subr.mxu1 %v6116_v55  ;;  %12184 = vst [vmem:[#allocation23_spill] sm:$0xff] %v6178_v2 }
  0x3f   :  { %482 = vmatpush1.msra.mxu0 %v6123_v56  ;;  %553 = vmatpush1.msra.mxu1 %v6128_v57  ;;  %v6434_v57 = vld [vmem:[%s11578_s4 + $0xb8] sm:$0xff] }
  0x40   :  { %483 = vmatprep.subr.mxu0 %v6135_v58  ;;  %554 = vmatprep.subr.mxu1 %v6140_v59  ;;  %v12185_v59 = vmov 0.0   ;;  %v6417_v58 = vld [vmem:[%s11578_s4 + $0xc0] sm:$0xff]  ;;  %12227 = vst [vmem:[#allocation65_spill] sm:$0xff] %v6434_v57 }
  0x41   :  { %484 = vmatpush1.msra.mxu0 %v6147_v60  ;;  %555 = vmatpush1.msra.mxu1 %v6152_v61  ;;  %v6383_v61 = vld [vmem:[%s11578_s4 + $0xe8] sm:$0xff]  ;;  %v6400_v60 = vld [vmem:[%s11578_s4 + $0xf0] sm:$0xff]  ;;  %12224 = vst [vmem:[#allocation62_spill] sm:$0xff] %v6417_v58 }
  0x42   :  { %485 = vmatprep.subr.mxu0 %v6159_v62  ;;  %556 = vmatprep.subr.mxu1 %v6164_v63  ;;  %v6193_v63 = vld [vmem:[%s11578_s4 + $0x1e8] sm:$0xff]  ;;  %v6210_v62 = vld [vmem:[%s11578_s4 + $0x1f0] sm:$0xff]  ;;  %12218 = vst [vmem:[#allocation56_spill] sm:$0xff] %v6383_v61  ;;  %12221 = vst [vmem:[#allocation59_spill] sm:$0xff] %v6400_v60 }
  0x43   :  { %486 = vmatpush1.msra.mxu0 %v6171_v0  ;;  %519 = vmatprep.mubr.f32.mxu0 %v12185_v59  ;;  %12186 = vst [vmem:[#allocation24_spill] sm:$0xff] %v6193_v63  ;;  %v6198_v0 = vld [vmem:[%s11578_s4 + $0x1f8] sm:$0xff]  ;;  %12189 = vst [vmem:[#allocation27_spill] sm:$0xff] %v6210_v62 }
  0x44   :  { %557 = vmatpush1.msra.mxu1 %v6178_v2  ;;  %590 = vmatprep.mubr.f32.mxu1 %v12185_v59  ;;  %12187 = vst [vmem:[#allocation25_spill] sm:$0xff] %v6198_v0  ;;  %v6205_v2 = vld [vmem:[%s11578_s4 + $0x1e0] sm:$0xff] }
  0x45   :  { %520 = vmatmul.mubr.f32.vlgmr.msra.gmra.mxu0 %v12185_v59  ;;  %591 = vmatmul.mubr.f32.vlgmr.msra.gmra.mxu1 %v12185_v59  ;;  %12188 = vst [vmem:[#allocation26_spill] sm:$0xff] %v6205_v2 }
  0x46   :  { %710 = vmatprep.mubr.f32.mxu0 %v12185_v59  ;;  %781 = vmatprep.mubr.f32.mxu1 %v12185_v59 }
  0x47   :  { %646 = vmatprep.subr.mxu0 %v6193_v63  ;;  %717 = vmatprep.subr.mxu1 %v6198_v0  ;;  %v6217_v63 = vld [vmem:[%s11578_s4 + $0x1c8] sm:$0xff]  ;;  %v6222_v0 = vld [vmem:[%s11578_s4 + $0x1d8] sm:$0xff] }
  0x48   :  { %647 = vmatpush1.msra.mxu0 %v6205_v2  ;;  %718 = vmatpush1.msra.mxu1 %v6210_v62  ;;  %12190 = vst [vmem:[#allocation28_spill] sm:$0xff] %v6217_v63  ;;  %12191 = vst [vmem:[#allocation29_spill] sm:$0xff] %v6222_v0  ;;  %v6229_v2 = vld [vmem:[%s11578_s4 + $0x1c0] sm:$0xff]  ;;  %v6234_v62 = vld [vmem:[%s11578_s4 + $0x1d0] sm:$0xff] }
  0x49   :  { %648 = vmatprep.subr.mxu0 %v6217_v63  ;;  %719 = vmatprep.subr.mxu1 %v6222_v0  ;;  %12192 = vst [vmem:[#allocation30_spill] sm:$0xff] %v6229_v2  ;;  %12193 = vst [vmem:[#allocation31_spill] sm:$0xff] %v6234_v62  ;;  %v6241_v63 = vld [vmem:[%s11578_s4 + $0x1a8] sm:$0xff]  ;;  %v6246_v0 = vld [vmem:[%s11578_s4 + $0x1b8] sm:$0xff] }
  0x4a   :  { %649 = vmatpush1.msra.mxu0 %v6229_v2  ;;  %720 = vmatpush1.msra.mxu1 %v6234_v62  ;;  %12194 = vst [vmem:[#allocation32_spill] sm:$0xff] %v6241_v63  ;;  %12195 = vst [vmem:[#allocation33_spill] sm:$0xff] %v6246_v0  ;;  %v6253_v2 = vld [vmem:[%s11578_s4 + $0x1a0] sm:$0xff]  ;;  %v6258_v62 = vld [vmem:[%s11578_s4 + $0x1b0] sm:$0xff] }
  0x4b   :  { %650 = vmatprep.subr.mxu0 %v6241_v63  ;;  %721 = vmatprep.subr.mxu1 %v6246_v0  ;;  %12196 = vst [vmem:[#allocation34_spill] sm:$0xff] %v6253_v2  ;;  %12197 = vst [vmem:[#allocation35_spill] sm:$0xff] %v6258_v62  ;;  %v6265_v63 = vld [vmem:[%s11578_s4 + $0x188] sm:$0xff]  ;;  %v6270_v0 = vld [vmem:[%s11578_s4 + $0x198] sm:$0xff] }
  0x4c   :  { %651 = vmatpush1.msra.mxu0 %v6253_v2  ;;  %722 = vmatpush1.msra.mxu1 %v6258_v62  ;;  %12198 = vst [vmem:[#allocation36_spill] sm:$0xff] %v6265_v63  ;;  %12199 = vst [vmem:[#allocation37_spill] sm:$0xff] %v6270_v0  ;;  %v6277_v2 = vld [vmem:[%s11578_s4 + $0x180] sm:$0xff]  ;;  %v6282_v62 = vld [vmem:[%s11578_s4 + $0x190] sm:$0xff] }
  0x4d   :  { %652 = vmatprep.subr.mxu0 %v6265_v63  ;;  %723 = vmatprep.subr.mxu1 %v6270_v0  ;;  %12200 = vst [vmem:[#allocation38_spill] sm:$0xff] %v6277_v2  ;;  %12201 = vst [vmem:[#allocation39_spill] sm:$0xff] %v6282_v62  ;;  %v6289_v63 = vld [vmem:[%s11578_s4 + $0x168] sm:$0xff]  ;;  %v6294_v0 = vld [vmem:[%s11578_s4 + $0x178] sm:$0xff] }
  0x4e   :  { %653 = vmatpush1.msra.mxu0 %v6277_v2  ;;  %724 = vmatpush1.msra.mxu1 %v6282_v62  ;;  %12202 = vst [vmem:[#allocation40_spill] sm:$0xff] %v6289_v63  ;;  %12203 = vst [vmem:[#allocation41_spill] sm:$0xff] %v6294_v0  ;;  %v6301_v2 = vld [vmem:[%s11578_s4 + $0x160] sm:$0xff]  ;;  %v6306_v62 = vld [vmem:[%s11578_s4 + $0x170] sm:$0xff] }
  0x4f   :  { %654 = vmatprep.subr.mxu0 %v6289_v63  ;;  %725 = vmatprep.subr.mxu1 %v6294_v0  ;;  %12204 = vst [vmem:[#allocation42_spill] sm:$0xff] %v6301_v2  ;;  %12205 = vst [vmem:[#allocation43_spill] sm:$0xff] %v6306_v62  ;;  %v6313_v63 = vld [vmem:[%s11578_s4 + $0x148] sm:$0xff]  ;;  %v6318_v0 = vld [vmem:[%s11578_s4 + $0x158] sm:$0xff] }
  0x50   :  { %655 = vmatpush1.msra.mxu0 %v6301_v2  ;;  %726 = vmatpush1.msra.mxu1 %v6306_v62  ;;  %12206 = vst [vmem:[#allocation44_spill] sm:$0xff] %v6313_v63  ;;  %12207 = vst [vmem:[#allocation45_spill] sm:$0xff] %v6318_v0  ;;  %v6325_v2 = vld [vmem:[%s11578_s4 + $0x140] sm:$0xff]  ;;  %v6330_v62 = vld [vmem:[%s11578_s4 + $0x150] sm:$0xff] }
  0x51   :  { %656 = vmatprep.subr.mxu0 %v6313_v63  ;;  %727 = vmatprep.subr.mxu1 %v6318_v0  ;;  %12208 = vst [vmem:[#allocation46_spill] sm:$0xff] %v6325_v2  ;;  %12209 = vst [vmem:[#allocation47_spill] sm:$0xff] %v6330_v62  ;;  %v6337_v63 = vld [vmem:[%s11578_s4 + $0x128] sm:$0xff]  ;;  %v6342_v0 = vld [vmem:[%s11578_s4 + $0x138] sm:$0xff] }
  0x52   :  { %657 = vmatpush1.msra.mxu0 %v6325_v2  ;;  %728 = vmatpush1.msra.mxu1 %v6330_v62  ;;  %12210 = vst [vmem:[#allocation48_spill] sm:$0xff] %v6337_v63  ;;  %12211 = vst [vmem:[#allocation49_spill] sm:$0xff] %v6342_v0  ;;  %v6349_v2 = vld [vmem:[%s11578_s4 + $0x120] sm:$0xff]  ;;  %v6354_v62 = vld [vmem:[%s11578_s4 + $0x130] sm:$0xff] }
  0x53   :  { %658 = vmatprep.subr.mxu0 %v6337_v63  ;;  %729 = vmatprep.subr.mxu1 %v6342_v0  ;;  %12212 = vst [vmem:[#allocation50_spill] sm:$0xff] %v6349_v2  ;;  %12213 = vst [vmem:[#allocation51_spill] sm:$0xff] %v6354_v62  ;;  %v6361_v63 = vld [vmem:[%s11578_s4 + $0x108] sm:$0xff]  ;;  %v6366_v0 = vld [vmem:[%s11578_s4 + $0x118] sm:$0xff] }
  0x54   :  { %659 = vmatpush1.msra.mxu0 %v6349_v2  ;;  %730 = vmatpush1.msra.mxu1 %v6354_v62  ;;  %12214 = vst [vmem:[#allocation52_spill] sm:$0xff] %v6361_v63  ;;  %12215 = vst [vmem:[#allocation53_spill] sm:$0xff] %v6366_v0  ;;  %v6373_v2 = vld [vmem:[%s11578_s4 + $0x100] sm:$0xff]  ;;  %v6378_v62 = vld [vmem:[%s11578_s4 + $0x110] sm:$0xff] }
  0x55   :  { %660 = vmatprep.subr.mxu0 %v6361_v63  ;;  %731 = vmatprep.subr.mxu1 %v6366_v0  ;;  %12216 = vst [vmem:[#allocation54_spill] sm:$0xff] %v6373_v2  ;;  %12217 = vst [vmem:[#allocation55_spill] sm:$0xff] %v6378_v62  ;;  %v6390_v0 = vld [vmem:[%s11578_s4 + $0xf8] sm:$0xff]  ;;  %v6395_v63 = vld [vmem:[%s11578_s4 + $0xe0] sm:$0xff] }
  0x56   :  { %661 = vmatpush1.msra.mxu0 %v6373_v2  ;;  %732 = vmatpush1.msra.mxu1 %v6378_v62  ;;  %12219 = vst [vmem:[#allocation57_spill] sm:$0xff] %v6390_v0  ;;  %12220 = vst [vmem:[#allocation58_spill] sm:$0xff] %v6395_v63  ;;  %v6407_v62 = vld [vmem:[%s11578_s4 + $0xc8] sm:$0xff]  ;;  %v6412_v2 = vld [vmem:[%s11578_s4 + $0xd8] sm:$0xff] }
  0x57   :  { %662 = vmatprep.subr.mxu0 %v6383_v61  ;;  %733 = vmatprep.subr.mxu1 %v6390_v0  ;;  %12222 = vst [vmem:[#allocation60_spill] sm:$0xff] %v6407_v62  ;;  %12223 = vst [vmem:[#allocation61_spill] sm:$0xff] %v6412_v2  ;;  %v6424_v0 = vld [vmem:[%s11578_s4 + $0xd0] sm:$0xff]  ;;  %v6429_v61 = vld [vmem:[%s11578_s4 + $0xa8] sm:$0xff] }
  0x58   :  { %663 = vmatpush1.msra.mxu0 %v6395_v63  ;;  %734 = vmatpush1.msra.mxu1 %v6400_v60  ;;  %12225 = vst [vmem:[#allocation63_spill] sm:$0xff] %v6424_v0  ;;  %12226 = vst [vmem:[#allocation64_spill] sm:$0xff] %v6429_v61  ;;  %v6441_v60 = vld [vmem:[%s11578_s4 + $0xa0] sm:$0xff]  ;;  %v6446_v63 = vld [vmem:[%s11578_s4 + $0xb0] sm:$0xff] }
  0x59   :  { %664 = vmatprep.subr.mxu0 %v6407_v62  ;;  %735 = vmatprep.subr.mxu1 %v6412_v2  ;;  %12228 = vst [vmem:[#allocation66_spill] sm:$0xff] %v6441_v60  ;;  %12229 = vst [vmem:[#allocation67_spill] sm:$0xff] %v6446_v63  ;;  %v6453_v62 = vld [vmem:[%s11578_s4 + $0x88] sm:$0xff]  ;;  %v6458_v2 = vld [vmem:[%s11578_s4 + $0x98] sm:$0xff] }
  0x5a   :  { %665 = vmatpush1.msra.mxu0 %v6417_v58  ;;  %736 = vmatpush1.msra.mxu1 %v6424_v0  ;;  %12230 = vst [vmem:[#allocation68_spill] sm:$0xff] %v6453_v62  ;;  %12231 = vst [vmem:[#allocation69_spill] sm:$0xff] %v6458_v2  ;;  %v6465_v58 = vld [vmem:[%s11578_s4 + $0x80] sm:$0xff]  ;;  %v6470_v0 = vld [vmem:[%s11578_s4 + $0x90] sm:$0xff] }
  0x5b   :  { %666 = vmatprep.subr.mxu0 %v6429_v61  ;;  %737 = vmatprep.subr.mxu1 %v6434_v57  ;;  %12232 = vst [vmem:[#allocation70_spill] sm:$0xff] %v6465_v58  ;;  %12233 = vst [vmem:[#allocation71_spill] sm:$0xff] %v6470_v0  ;;  %v6477_v61 = vld [vmem:[%s11578_s4 + $0x68] sm:$0xff]  ;;  %v6482_v57 = vld [vmem:[%s11578_s4 + $0x78] sm:$0xff] }
  0x5c   :  { %667 = vmatpush1.msra.mxu0 %v6441_v60  ;;  %738 = vmatpush1.msra.mxu1 %v6446_v63  ;;  %12234 = vst [vmem:[#allocation72_spill] sm:$0xff] %v6477_v61  ;;  %12235 = vst [vmem:[#allocation73_spill] sm:$0xff] %v6482_v57  ;;  %v6489_v60 = vld [vmem:[%s11578_s4 + $0x60] sm:$0xff]  ;;  %v6494_v63 = vld [vmem:[%s11578_s4 + $0x70] sm:$0xff] }
  0x5d   :  { %668 = vmatprep.subr.mxu0 %v6453_v62  ;;  %739 = vmatprep.subr.mxu1 %v6458_v2  ;;  %12236 = vst [vmem:[#allocation74_spill] sm:$0xff] %v6489_v60  ;;  %12237 = vst [vmem:[#allocation75_spill] sm:$0xff] %v6494_v63  ;;  %v6501_v62 = vld [vmem:[%s11578_s4 + $0x48] sm:$0xff]  ;;  %v6506_v2 = vld [vmem:[%s11578_s4 + $0x58] sm:$0xff] }
  0x5e   :  { %669 = vmatpush1.msra.mxu0 %v6465_v58  ;;  %740 = vmatpush1.msra.mxu1 %v6470_v0  ;;  %12238 = vst [vmem:[#allocation76_spill] sm:$0xff] %v6501_v62  ;;  %12239 = vst [vmem:[#allocation77_spill] sm:$0xff] %v6506_v2  ;;  %v6513_v58 = vld [vmem:[%s11578_s4 + $0x40] sm:$0xff]  ;;  %v6518_v0 = vld [vmem:[%s11578_s4 + $0x50] sm:$0xff] }
  0x5f   :  { %670 = vmatprep.subr.mxu0 %v6477_v61  ;;  %741 = vmatprep.subr.mxu1 %v6482_v57  ;;  %12240 = vst [vmem:[#allocation78_spill] sm:$0xff] %v6513_v58  ;;  %12241 = vst [vmem:[#allocation79_spill] sm:$0xff] %v6518_v0  ;;  %v6525_v61 = vld [vmem:[%s11578_s4 + $0x28] sm:$0xff]  ;;  %v6530_v57 = vld [vmem:[%s11578_s4 + $0x38] sm:$0xff] }
  0x60   :  { %671 = vmatpush1.msra.mxu0 %v6489_v60  ;;  %742 = vmatpush1.msra.mxu1 %v6494_v63  ;;  %12242 = vst [vmem:[#allocation80_spill] sm:$0xff] %v6525_v61  ;;  %12243 = vst [vmem:[#allocation81_spill] sm:$0xff] %v6530_v57  ;;  %v6537_v60 = vld [vmem:[%s11578_s4 + $0x20] sm:$0xff]  ;;  %v6542_v63 = vld [vmem:[%s11578_s4 + $0x30] sm:$0xff] }
  0x61   :  { %672 = vmatprep.subr.mxu0 %v6501_v62  ;;  %743 = vmatprep.subr.mxu1 %v6506_v2  ;;  %12244 = vst [vmem:[#allocation82_spill] sm:$0xff] %v6537_v60  ;;  %12245 = vst [vmem:[#allocation83_spill] sm:$0xff] %v6542_v63  ;;  %v6549_v62 = vld [vmem:[%s11578_s4 + $0x8] sm:$0xff]  ;;  %v6554_v2 = vld [vmem:[%s11578_s4 + $0x18] sm:$0xff] }
  0x62   :  { %673 = vmatpush1.msra.mxu0 %v6513_v58  ;;  %744 = vmatpush1.msra.mxu1 %v6518_v0  ;;  %12246 = vst [vmem:[#allocation84_spill] sm:$0xff] %v6549_v62  ;;  %12247 = vst [vmem:[#allocation85_spill] sm:$0xff] %v6554_v2  ;;  %v6561_v58 = vld [vmem:[%s11578_s4] sm:$0xff]  ;;  %v6566_v0 = vld [vmem:[%s11578_s4 + $0x10] sm:$0xff] }
  0x63   :  { %674 = vmatprep.subr.mxu0 %v6525_v61  ;;  %745 = vmatprep.subr.mxu1 %v6530_v57  ;;  %12248 = vst [vmem:[#allocation86_spill] sm:$0xff] %v6561_v58  ;;  %12249 = vst [vmem:[#allocation87_spill] sm:$0xff] %v6566_v0  ;;  %v6573_v61 = vld [vmem:[%s11579_s5 + $0x1e8] sm:$0xff]  ;;  %v6578_v57 = vld [vmem:[%s11579_s5 + $0x1f8] sm:$0xff] }
  0x64   :  { %675 = vmatpush1.msra.mxu0 %v6537_v60  ;;  %746 = vmatpush1.msra.mxu1 %v6542_v63  ;;  %12250 = vst [vmem:[#allocation88_spill] sm:$0xff] %v6573_v61  ;;  %12251 = vst [vmem:[#allocation89_spill] sm:$0xff] %v6578_v57  ;;  %v293_v63 = vlaneseq }
  0x65   :  { %676 = vmatprep.subr.mxu0 %v6549_v62  ;;  %747 = vmatprep.subr.mxu1 %v6554_v2  ;;  %v291_v62 = vld [vmem:[%s11577_s3] sm:$0xf] }
  0x66   :  { %677 = vmatpush1.msra.mxu0 %v6561_v58  ;;  %748 = vmatpush1.msra.mxu1 %v6566_v0  ;;  %v6586_v60 = vshrl.u32 %v293_v63, 7 }
  0x67   :  { %788 = vmatprep.subr.mxu0 %v6573_v61  ;;  %859 = vmatprep.subr.mxu1 %v6578_v57 }
  0x68   :  { %12252 = vst [vmem:[#allocation90_spill] sm:$0xff] %v6586_v60  ;;  %v6589_v56 = vsub.s32 0, %v6586_v60  ;;  %v6595_v2 = vsub.s32 1, %v6586_v60  ;;  %v11677_v52 = vsub.s32 2, %v6586_v60 }
  0x6a   :  { %12253 = vst [vmem:[#allocation91_spill] sm:$0xff] %v6589_v56  ;;  %12254 = vst [vmem:[#allocation92_spill] sm:$0xff] %v6595_v2  ;;  %v296_v0 = vrot.slane %v291_v62, %v6589_v56  ;;  %v300_v61 = vrot.slane %v291_v62, %v6595_v2  ;;  %v304_v56 = vrot.slane %v291_v62, %v11677_v52 }
  0xe2   :  { %v379_v58 = vpop.f32.mrf.mxu0 }
  0xe3   :  { %v6599_v57 = vadd.f32 %v379_v58, %v296_v0  ;;  %v11682_v58 = vsub.s32 3, %v6586_v60 }
  0xe4   :  { %v381_v55 = vpop.f32.mrf.mxu0  ;;  %v450_v50 = vpop.f32.mrf.mxu1 }
  0xe5   :  { %12255 = vst [vmem:[#allocation93_spill] sm:$0xff] %v6599_v57  ;;  %v6601_v54 = vadd.f32 %v381_v55, %v300_v61  ;;  %v6609_v61 = vadd.f32 %v450_v50, %v304_v56  ;;  %v308_v0 = vrot.slane %v291_v62, %v11682_v58 }
  0xe6   :  { %v452_v2 = vpop.f32.mrf.mxu1 }
  0xe7   :  { %12256 = vst [vmem:[#allocation94_spill] sm:$0xff] %v6601_v54  ;;  %12257 = vst [vmem:[#allocation95_spill] sm:$0xff] %v6609_v61 }
 0x105   :  { %v521_v63 = vpop.f32.mrf.mxu0  ;;  %v592_v55 = vpop.f32.mrf.mxu1 }
 0x106   :  { %v597_v53 = vadd.f32 %v521_v63, %v6599_v57  ;;  %v599_v63 = vadd.f32 %v592_v55, %v6609_v61  ;;  %v6614_v57 = vadd.f32 %v452_v2, %v308_v0 }
 0x107   :  { %v523_v51 = vpop.f32.mrf.mxu0 }
 0x108   :  { %v4641_v49 = vmul.f32 -1.442695, %v597_v53  ;;  %v598_v48 = vadd.f32 %v523_v51, %v6601_v54  ;;  %v594_v53 = vpop.f32.mrf.mxu1 }
 0x109   :  { %v600_v51 = vadd.f32 %v594_v53, %v6614_v57 }
 0x10a   :  { %4691 = vpow2.f32 %v4641_v49  ;;  %v4642_v47 = vmul.f32 -1.442695, %v598_v48  ;;  %v4643_v49 = vmul.f32 -1.442695, %v599_v63 }
 0x10c   :  { %4693 = vpow2.f32 %v4642_v47 }
 0x10d   :  { %4695 = vpow2.f32 %v4643_v49  ;;  %v6652_v49 = vld [vmem:[%s11579_s5 + $0x1d0] sm:$0xff] }
 0x117   :  { %v4692_v48 = vpop.eup %4691 }
 0x118   :  { %v610_v52 = vadd.f32 1.0, %v4692_v48  ;;  %v6659_v48 = vld [vmem:[%s11579_s5 + $0x1a8] sm:$0xff] }
 0x119   :  { %v4694_v54 = vpop.eup %4693 }
 0x11a   :  { %4697 = vrcp.f32 %v610_v52  ;;  %v611_v47 = vadd.f32 1.0, %v4694_v54  ;;  %v4696_v50 = vpop.eup %4695  ;;  %v6625_v52 = vld [vmem:[%s11579_s5 + $0x1e0] sm:$0xff]  ;;  %v6630_v54 = vld [vmem:[%s11579_s5 + $0x1f0] sm:$0xff] }
 0x11b   :  { %4699 = vtanh.f32 %v600_v51  ;;  %v612_v58 = vadd.f32 1.0, %v4696_v50  ;;  %v6664_v51 = vld [vmem:[%s11579_s5 + $0x1b8] sm:$0xff]  ;;  %v6676_v50 = vld [vmem:[%s11579_s5 + $0x1b0] sm:$0xff] }
 0x11c   :  { %4701 = vrcp.f32 %v611_v47  ;;  %12258 = vst [vmem:[#allocation96_spill] sm:$0xff] %v6664_v51  ;;  %v6671_v47 = vld [vmem:[%s11579_s5 + $0x1a0] sm:$0xff]  ;;  %12260 = vst [vmem:[#allocation98_spill] sm:$0xff] %v6676_v50 }
 0x11d   :  { %4703 = vrcp.f32 %v612_v58  ;;  %v6640_v58 = vld [vmem:[%s11579_s5 + $0x1d8] sm:$0xff]  ;;  %12259 = vst [vmem:[#allocation97_spill] sm:$0xff] %v6671_v47 }
 0x127   :  { %v4698_v56 = vpop.eup %4697 }
 0x128   :  { %v4700_v60 = vpop.eup %4699 }
 0x129   :  { %v4702_v62 = vpop.eup %4701  ;;  %v621_v61 = vmul.f32 %v4700_v60, %v4698_v56  ;;  %v6635_v60 = vld [vmem:[%s11579_s5 + $0x1c8] sm:$0xff] }
 0x12a   :  { %v620_v55 = vmul.f32 0.0, %v4702_v62  ;;  %v4704_v0 = vpop.eup %4703  ;;  %v6683_v56 = vld [vmem:[%s11579_s5 + $0x188] sm:$0xff]  ;;  %v6688_v62 = vld [vmem:[%s11579_s5 + $0x198] sm:$0xff] }
 0x12b   :  { %12261 = vst [vmem:[#allocation99_spill] sm:$0xff] %v6683_v56  ;;  %12262 = vst [vmem:[#allocation100_spill] sm:$0xff] %v6688_v62 }
 0x12c   :  { %v6617_v2 = vadd.f32 %v621_v61, %v620_v55  ;;  %v6647_v61 = vld [vmem:[%s11579_s5 + $0x1c0] sm:$0xff] }
 0x12d   :  { %v6695_v55 = vld [vmem:[%s11579_s5 + $0x180] sm:$0xff] }
 0x12e   :  { %4705 = vtanh.f32 %v6617_v2  ;;  %12263 = vst [vmem:[#allocation101_spill] sm:$0xff] %v6695_v55 }
 0x13b   :  { %v4706_v63 = vpop.eup %4705 }
 0x13c   :  { %v6620_v53 = vmul.f32 %v4706_v63, %v4704_v0  ;;  %v6700_v0 = vld [vmem:[%s11579_s5 + $0x190] sm:$0xff]  ;;  %v6707_v63 = vld [vmem:[%s11579_s5 + $0x168] sm:$0xff] }
 0x13d   :  { %12264 = vst [vmem:[#allocation102_spill] sm:$0xff] %v6700_v0  ;;  %12265 = vst [vmem:[#allocation103_spill] sm:$0xff] %v6707_v63 }
 0x13e   :  { %711 = vmatmul.mubr.f32.vlgmr.msra.gmra.mxu0 %v6620_v53  ;;  %782 = vmatmul.mubr.f32.vlgmr.msra.gmra.mxu1 %v6620_v53 }
 0x13f   :  { %789 = vmatpush1.msra.mxu0 %v6625_v52  ;;  %860 = vmatpush1.msra.mxu1 %v6630_v54 }
 0x140   :  { %790 = vmatprep.subr.mxu0 %v6635_v60  ;;  %861 = vmatprep.subr.mxu1 %v6640_v58 }
 0x141   :  { %791 = vmatpush1.msra.mxu0 %v6647_v61  ;;  %862 = vmatpush1.msra.mxu1 %v6652_v49 }
 0x142   :  { %792 = vmatprep.subr.mxu0 %v6659_v48  ;;  %863 = vmatprep.subr.mxu1 %v6664_v51  ;;  %v6712_v51 = vld [vmem:[%s11579_s5 + $0x178] sm:$0xff] }
 0x143   :  { %793 = vmatpush1.msra.mxu0 %v6671_v47  ;;  %864 = vmatpush1.msra.mxu1 %v6676_v50  ;;  %12266 = vst [vmem:[#allocation104_spill] sm:$0xff] %v6712_v51  ;;  %v6719_v47 = vld [vmem:[%s11579_s5 + $0x160] sm:$0xff]  ;;  %v6724_v50 = vld [vmem:[%s11579_s5 + $0x170] sm:$0xff] }
 0x144   :  { %794 = vmatprep.subr.mxu0 %v6683_v56  ;;  %865 = vmatprep.subr.mxu1 %v6688_v62  ;;  %12267 = vst [vmem:[#allocation105_spill] sm:$0xff] %v6719_v47  ;;  %12268 = vst [vmem:[#allocation106_spill] sm:$0xff] %v6724_v50  ;;  %v6731_v56 = vld [vmem:[%s11579_s5 + $0x148] sm:$0xff]  ;;  %v6736_v62 = vld [vmem:[%s11579_s5 + $0x158] sm:$0xff] }
 0x145   :  { %795 = vmatpush1.msra.mxu0 %v6695_v55  ;;  %866 = vmatpush1.msra.mxu1 %v6700_v0  ;;  %12269 = vst [vmem:[#allocation107_spill] sm:$0xff] %v6731_v56  ;;  %12270 = vst [vmem:[#allocation108_spill] sm:$0xff] %v6736_v62  ;;  %v6743_v55 = vld [vmem:[%s11579_s5 + $0x140] sm:$0xff]  ;;  %v6748_v0 = vld [vmem:[%s11579_s5 + $0x150] sm:$0xff] }
 0x146   :  { %796 = vmatprep.subr.mxu0 %v6707_v63  ;;  %867 = vmatprep.subr.mxu1 %v6712_v51  ;;  %12271 = vst [vmem:[#allocation109_spill] sm:$0xff] %v6743_v55  ;;  %12272 = vst [vmem:[#allocation110_spill] sm:$0xff] %v6748_v0  ;;  %v6755_v63 = vld [vmem:[%s11579_s5 + $0x128] sm:$0xff]  ;;  %v6760_v51 = vld [vmem:[%s11579_s5 + $0x138] sm:$0xff] }
 0x147   :  { %797 = vmatpush1.msra.mxu0 %v6719_v47  ;;  %868 = vmatpush1.msra.mxu1 %v6724_v50  ;;  %12273 = vst [vmem:[#allocation111_spill] sm:$0xff] %v6755_v63  ;;  %12274 = vst [vmem:[#allocation112_spill] sm:$0xff] %v6760_v51  ;;  %v6767_v47 = vld [vmem:[%s11579_s5 + $0x120] sm:$0xff]  ;;  %v6772_v50 = vld [vmem:[%s11579_s5 + $0x130] sm:$0xff] }
 0x148   :  { %798 = vmatprep.subr.mxu0 %v6731_v56  ;;  %869 = vmatprep.subr.mxu1 %v6736_v62  ;;  %12275 = vst [vmem:[#allocation113_spill] sm:$0xff] %v6767_v47  ;;  %12276 = vst [vmem:[#allocation114_spill] sm:$0xff] %v6772_v50  ;;  %v6779_v56 = vld [vmem:[%s11579_s5 + $0x108] sm:$0xff]  ;;  %v6784_v62 = vld [vmem:[%s11579_s5 + $0x118] sm:$0xff] }
 0x149   :  { %799 = vmatpush1.msra.mxu0 %v6743_v55  ;;  %870 = vmatpush1.msra.mxu1 %v6748_v0  ;;  %12277 = vst [vmem:[#allocation115_spill] sm:$0xff] %v6779_v56  ;;  %12278 = vst [vmem:[#allocation116_spill] sm:$0xff] %v6784_v62  ;;  %v6791_v55 = vld [vmem:[%s11579_s5 + $0x100] sm:$0xff]  ;;  %v6796_v0 = vld [vmem:[%s11579_s5 + $0x110] sm:$0xff] }
 0x14a   :  { %800 = vmatprep.subr.mxu0 %v6755_v63  ;;  %871 = vmatprep.subr.mxu1 %v6760_v51  ;;  %12279 = vst [vmem:[#allocation117_spill] sm:$0xff] %v6791_v55  ;;  %12280 = vst [vmem:[#allocation118_spill] sm:$0xff] %v6796_v0  ;;  %v6803_v63 = vld [vmem:[%s11579_s5 + $0xe8] sm:$0xff]  ;;  %v6808_v51 = vld [vmem:[%s11579_s5 + $0xf8] sm:$0xff] }
 0x14b   :  { %801 = vmatpush1.msra.mxu0 %v6767_v47  ;;  %872 = vmatpush1.msra.mxu1 %v6772_v50  ;;  %12281 = vst [vmem:[#allocation119_spill] sm:$0xff] %v6803_v63  ;;  %12282 = vst [vmem:[#allocation120_spill] sm:$0xff] %v6808_v51  ;;  %v6815_v47 = vld [vmem:[%s11579_s5 + $0xe0] sm:$0xff]  ;;  %v6820_v50 = vld [vmem:[%s11579_s5 + $0xf0] sm:$0xff] }
 0x14c   :  { %802 = vmatprep.subr.mxu0 %v6779_v56  ;;  %873 = vmatprep.subr.mxu1 %v6784_v62  ;;  %12283 = vst [vmem:[#allocation121_spill] sm:$0xff] %v6815_v47  ;;  %12284 = vst [vmem:[#allocation122_spill] sm:$0xff] %v6820_v50  ;;  %v6827_v56 = vld [vmem:[%s11579_s5 + $0xc8] sm:$0xff]  ;;  %v6832_v62 = vld [vmem:[%s11579_s5 + $0xd8] sm:$0xff] }
 0x14d   :  { %803 = vmatpush1.msra.mxu0 %v6791_v55  ;;  %874 = vmatpush1.msra.mxu1 %v6796_v0  ;;  %12285 = vst [vmem:[#allocation123_spill] sm:$0xff] %v6827_v56  ;;  %12286 = vst [vmem:[#allocation124_spill] sm:$0xff] %v6832_v62  ;;  %v6839_v55 = vld [vmem:[%s11579_s5 + $0xc0] sm:$0xff]  ;;  %v6844_v0 = vld [vmem:[%s11579_s5 + $0xd0] sm:$0xff] }
 0x14e   :  { %804 = vmatprep.subr.mxu0 %v6803_v63  ;;  %875 = vmatprep.subr.mxu1 %v6808_v51  ;;  %12287 = vst [vmem:[#allocation125_spill] sm:$0xff] %v6839_v55  ;;  %12288 = vst [vmem:[#allocation126_spill] sm:$0xff] %v6844_v0  ;;  %v6851_v63 = vld [vmem:[%s11579_s5 + $0xa8] sm:$0xff]  ;;  %v6856_v51 = vld [vmem:[%s11579_s5 + $0xb8] sm:$0xff] }
 0x14f   :  { %805 = vmatpush1.msra.mxu0 %v6815_v47  ;;  %876 = vmatpush1.msra.mxu1 %v6820_v50  ;;  %12289 = vst [vmem:[#allocation127_spill] sm:$0xff] %v6851_v63  ;;  %12290 = vst [vmem:[#allocation128_spill] sm:$0xff] %v6856_v51  ;;  %v6863_v47 = vld [vmem:[%s11579_s5 + $0xa0] sm:$0xff]  ;;  %v6868_v50 = vld [vmem:[%s11579_s5 + $0xb0] sm:$0xff] }
 0x150   :  { %806 = vmatprep.subr.mxu0 %v6827_v56  ;;  %877 = vmatprep.subr.mxu1 %v6832_v62  ;;  %12291 = vst [vmem:[#allocation129_spill] sm:$0xff] %v6863_v47  ;;  %12292 = vst [vmem:[#allocation130_spill] sm:$0xff] %v6868_v50  ;;  %v6875_v56 = vld [vmem:[%s11579_s5 + $0x88] sm:$0xff]  ;;  %v6880_v62 = vld [vmem:[%s11579_s5 + $0x98] sm:$0xff] }
 0x151   :  { %807 = vmatpush1.msra.mxu0 %v6839_v55  ;;  %878 = vmatpush1.msra.mxu1 %v6844_v0  ;;  %12293 = vst [vmem:[#allocation131_spill] sm:$0xff] %v6875_v56  ;;  %12294 = vst [vmem:[#allocation132_spill] sm:$0xff] %v6880_v62  ;;  %v6887_v55 = vld [vmem:[%s11579_s5 + $0x80] sm:$0xff]  ;;  %v6892_v0 = vld [vmem:[%s11579_s5 + $0x90] sm:$0xff] }
 0x152   :  { %808 = vmatprep.subr.mxu0 %v6851_v63  ;;  %879 = vmatprep.subr.mxu1 %v6856_v51  ;;  %12295 = vst [vmem:[#allocation133_spill] sm:$0xff] %v6887_v55  ;;  %12296 = vst [vmem:[#allocation134_spill] sm:$0xff] %v6892_v0  ;;  %v6899_v63 = vld [vmem:[%s11579_s5 + $0x68] sm:$0xff]  ;;  %v6904_v51 = vld [vmem:[%s11579_s5 + $0x78] sm:$0xff] }
 0x153   :  { %809 = vmatpush1.msra.mxu0 %v6863_v47  ;;  %880 = vmatpush1.msra.mxu1 %v6868_v50  ;;  %12297 = vst [vmem:[#allocation135_spill] sm:$0xff] %v6899_v63  ;;  %12298 = vst [vmem:[#allocation136_spill] sm:$0xff] %v6904_v51  ;;  %v6911_v47 = vld [vmem:[%s11579_s5 + $0x60] sm:$0xff]  ;;  %v6916_v50 = vld [vmem:[%s11579_s5 + $0x70] sm:$0xff] }
 0x154   :  { %810 = vmatprep.subr.mxu0 %v6875_v56  ;;  %881 = vmatprep.subr.mxu1 %v6880_v62  ;;  %12299 = vst [vmem:[#allocation137_spill] sm:$0xff] %v6911_v47  ;;  %12300 = vst [vmem:[#allocation138_spill] sm:$0xff] %v6916_v50  ;;  %v6923_v56 = vld [vmem:[%s11579_s5 + $0x48] sm:$0xff]  ;;  %v6928_v62 = vld [vmem:[%s11579_s5 + $0x58] sm:$0xff] }
 0x155   :  { %811 = vmatpush1.msra.mxu0 %v6887_v55  ;;  %882 = vmatpush1.msra.mxu1 %v6892_v0  ;;  %12301 = vst [vmem:[#allocation139_spill] sm:$0xff] %v6923_v56  ;;  %12302 = vst [vmem:[#allocation140_spill] sm:$0xff] %v6928_v62  ;;  %v6935_v55 = vld [vmem:[%s11579_s5 + $0x40] sm:$0xff]  ;;  %v6940_v0 = vld [vmem:[%s11579_s5 + $0x50] sm:$0xff] }
 0x156   :  { %812 = vmatprep.subr.mxu0 %v6899_v63  ;;  %883 = vmatprep.subr.mxu1 %v6904_v51  ;;  %12303 = vst [vmem:[#allocation141_spill] sm:$0xff] %v6935_v55  ;;  %12304 = vst [vmem:[#allocation142_spill] sm:$0xff] %v6940_v0  ;;  %v6947_v63 = vld [vmem:[%s11579_s5 + $0x28] sm:$0xff]  ;;  %v6952_v51 = vld [vmem:[%s11579_s5 + $0x38] sm:$0xff] }
 0x157   :  { %813 = vmatpush1.msra.mxu0 %v6911_v47  ;;  %884 = vmatpush1.msra.mxu1 %v6916_v50  ;;  %v6959_v47 = vld [vmem:[%s11579_s5 + $0x20] sm:$0xff]  ;;  %v6964_v50 = vld [vmem:[%s11579_s5 + $0x30] sm:$0xff] }
 0x158   :  { %814 = vmatprep.subr.mxu0 %v6923_v56  ;;  %885 = vmatprep.subr.mxu1 %v6928_v62  ;;  %v6971_v56 = vld [vmem:[%s11579_s5 + $0x8] sm:$0xff]  ;;  %v6976_v62 = vld [vmem:[%s11579_s5 + $0x18] sm:$0xff] }
 0x159   :  { %815 = vmatpush1.msra.mxu0 %v6935_v55  ;;  %886 = vmatpush1.msra.mxu1 %v6940_v0  ;;  %v6983_v55 = vld [vmem:[%s11579_s5] sm:$0xff]  ;;  %v6990_v0 = vld [vmem:[%s11579_s5 + $0x10] sm:$0xff] }
 0x15a   :  { %816 = vmatprep.subr.mxu0 %v6947_v63  ;;  %887 = vmatprep.subr.mxu1 %v6952_v51 }
 0x15b   :  { %817 = vmatpush1.msra.mxu0 %v6959_v47  ;;  %888 = vmatpush1.msra.mxu1 %v6964_v50 }
 0x15c   :  { %818 = vmatprep.subr.mxu0 %v6971_v56  ;;  %889 = vmatprep.subr.mxu1 %v6976_v62 }
 0x15d   :  { %819 = vmatpush1.msra.mxu0 %v6983_v55  ;;  %852 = vmatprep.mubr.f32.mxu0 %v12185_v59 }
 0x15e   :  { %890 = vmatpush1.msra.mxu1 %v6990_v0  ;;  %923 = vmatprep.mubr.f32.mxu1 %v12185_v59 }
 0x15f   :  { %853 = vmatmul.mubr.f32.vlgmr.msra.gmra.mxu0 %v12185_v59  ;;  %924 = vmatmul.mubr.f32.vlgmr.msra.gmra.mxu1 %v12185_v59 }
 0x160   :  { %958 = vmatprep.subr.mxu0 %v5801_v1  ;;  %1029 = vmatprep.subr.mxu1 %v5807_v3  ;;  %v12305_v1 = vld [vmem:[#allocation5_spill] sm:$0xff]  ;;  %v12306_v3 = vld [vmem:[#allocation6_spill] sm:$0xff] }
 0x161   :  { %959 = vmatpush1.msra.mxu0 %v5812_v4  ;;  %1030 = vmatpush1.msra.mxu1 %v5817_v5  ;;  %v12307_v4 = vld [vmem:[#allocation7_spill] sm:$0xff]  ;;  %v12308_v5 = vld [vmem:[#allocation8_spill] sm:$0xff] }
 0x162   :  { %960 = vmatprep.subr.mxu0 %v5824_v6  ;;  %1031 = vmatprep.subr.mxu1 %v5829_v7  ;;  %v12309_v6 = vld [vmem:[#allocation9_spill] sm:$0xff]  ;;  %v12310_v7 = vld [vmem:[#allocation10_spill] sm:$0xff] }
 0x163   :  { %961 = vmatpush1.msra.mxu0 %v5835_v8  ;;  %1032 = vmatpush1.msra.mxu1 %v5840_v9  ;;  %v12311_v8 = vld [vmem:[#allocation11_spill] sm:$0xff]  ;;  %v12312_v9 = vld [vmem:[#allocation12_spill] sm:$0xff] }
 0x164   :  { %962 = vmatprep.subr.mxu0 %v5847_v10  ;;  %1033 = vmatprep.subr.mxu1 %v5852_v11  ;;  %v12313_v10 = vld [vmem:[#allocation13_spill] sm:$0xff]  ;;  %v12314_v11 = vld [vmem:[#allocation14_spill] sm:$0xff] }
 0x165   :  { %963 = vmatpush1.msra.mxu0 %v5859_v12  ;;  %1034 = vmatpush1.msra.mxu1 %v5864_v13  ;;  %v12315_v12 = vld [vmem:[#allocation15_spill] sm:$0xff]  ;;  %v12316_v13 = vld [vmem:[#allocation16_spill] sm:$0xff] }
 0x166   :  { %964 = vmatprep.subr.mxu0 %v5871_v14  ;;  %1035 = vmatprep.subr.mxu1 %v5876_v15  ;;  %v12317_v14 = vld [vmem:[#allocation17_spill] sm:$0xff]  ;;  %v12318_v15 = vld [vmem:[#allocation18_spill] sm:$0xff] }
 0x167   :  { %965 = vmatpush1.msra.mxu0 %v5883_v16  ;;  %1036 = vmatpush1.msra.mxu1 %v5888_v17  ;;  %v12319_v16 = vld [vmem:[#allocation19_spill] sm:$0xff]  ;;  %v12320_v17 = vld [vmem:[#allocation20_spill] sm:$0xff] }
 0x168   :  { %966 = vmatprep.subr.mxu0 %v5895_v18  ;;  %1037 = vmatprep.subr.mxu1 %v5900_v19  ;;  %v12321_v18 = vld [vmem:[#allocation21_spill] sm:$0xff]  ;;  %v12322_v19 = vld [vmem:[#allocation22_spill] sm:$0xff] }
 0x169   :  { %967 = vmatpush1.msra.mxu0 %v5907_v20  ;;  %1038 = vmatpush1.msra.mxu1 %v5912_v21  ;;  %v12323_v20 = vld [vmem:[#allocation23_spill] sm:$0xff]  ;;  %v12324_v21 = vld [vmem:[#allocation24_spill] sm:$0xff] }
 0x16a   :  { %968 = vmatprep.subr.mxu0 %v5919_v22  ;;  %1039 = vmatprep.subr.mxu1 %v5924_v23  ;;  %v12325_v22 = vld [vmem:[#allocation25_spill] sm:$0xff]  ;;  %v12326_v23 = vld [vmem:[#allocation26_spill] sm:$0xff] }
 0x16b   :  { %969 = vmatpush1.msra.mxu0 %v5931_v24  ;;  %1040 = vmatpush1.msra.mxu1 %v5936_v25  ;;  %v12327_v24 = vld [vmem:[#allocation27_spill] sm:$0xff]  ;;  %v12328_v25 = vld [vmem:[#allocation28_spill] sm:$0xff] }
 0x16c   :  { %970 = vmatprep.subr.mxu0 %v5943_v26  ;;  %1041 = vmatprep.subr.mxu1 %v5948_v27  ;;  %v12329_v26 = vld [vmem:[#allocation29_spill] sm:$0xff]  ;;  %v12330_v27 = vld [vmem:[#allocation30_spill] sm:$0xff] }
 0x16d   :  { %971 = vmatpush1.msra.mxu0 %v5955_v28  ;;  %1042 = vmatpush1.msra.mxu1 %v5960_v29  ;;  %v12331_v28 = vld [vmem:[#allocation31_spill] sm:$0xff]  ;;  %v12332_v29 = vld [vmem:[#allocation32_spill] sm:$0xff] }
 0x16e   :  { %972 = vmatprep.subr.mxu0 %v5967_v30  ;;  %1043 = vmatprep.subr.mxu1 %v5972_v31  ;;  %v12333_v30 = vld [vmem:[#allocation33_spill] sm:$0xff]  ;;  %v12334_v31 = vld [vmem:[#allocation34_spill] sm:$0xff] }
 0x16f   :  { %973 = vmatpush1.msra.mxu0 %v5979_v32  ;;  %1044 = vmatpush1.msra.mxu1 %v5984_v33  ;;  %v12335_v32 = vld [vmem:[#allocation35_spill] sm:$0xff]  ;;  %v12336_v33 = vld [vmem:[#allocation36_spill] sm:$0xff] }
 0x170   :  { %974 = vmatprep.subr.mxu0 %v5991_v34  ;;  %1045 = vmatprep.subr.mxu1 %v5996_v35  ;;  %v12337_v34 = vld [vmem:[#allocation37_spill] sm:$0xff]  ;;  %v12338_v35 = vld [vmem:[#allocation38_spill] sm:$0xff] }
 0x171   :  { %975 = vmatpush1.msra.mxu0 %v6003_v36  ;;  %1046 = vmatpush1.msra.mxu1 %v6008_v37  ;;  %v12339_v36 = vld [vmem:[#allocation39_spill] sm:$0xff]  ;;  %v12340_v37 = vld [vmem:[#allocation40_spill] sm:$0xff] }
 0x172   :  { %976 = vmatprep.subr.mxu0 %v6015_v38  ;;  %1047 = vmatprep.subr.mxu1 %v6020_v39  ;;  %v12341_v38 = vld [vmem:[#allocation41_spill] sm:$0xff]  ;;  %v12342_v39 = vld [vmem:[#allocation42_spill] sm:$0xff] }
 0x173   :  { %977 = vmatpush1.msra.mxu0 %v6027_v40  ;;  %1048 = vmatpush1.msra.mxu1 %v6032_v41  ;;  %v12343_v40 = vld [vmem:[#allocation43_spill] sm:$0xff]  ;;  %v12344_v41 = vld [vmem:[#allocation44_spill] sm:$0xff] }
 0x174   :  { %978 = vmatprep.subr.mxu0 %v6039_v42  ;;  %1049 = vmatprep.subr.mxu1 %v6044_v43  ;;  %v12345_v42 = vld [vmem:[#allocation45_spill] sm:$0xff]  ;;  %v12346_v43 = vld [vmem:[#allocation46_spill] sm:$0xff] }
 0x175   :  { %979 = vmatpush1.msra.mxu0 %v6051_v44  ;;  %1050 = vmatpush1.msra.mxu1 %v6056_v45  ;;  %v12347_v44 = vld [vmem:[#allocation47_spill] sm:$0xff]  ;;  %v12348_v45 = vld [vmem:[#allocation48_spill] sm:$0xff] }
 0x176   :  { %980 = vmatprep.subr.mxu0 %v6063_v46  ;;  %1051 = vmatprep.subr.mxu1 %v12305_v1  ;;  %v12349_v46 = vld [vmem:[#allocation49_spill] sm:$0xff]  ;;  %v12351_v1 = vld [vmem:[#allocation51_spill] sm:$0xff] }
 0x177   :  { %981 = vmatpush1.msra.mxu0 %v12306_v3  ;;  %1052 = vmatpush1.msra.mxu1 %v12307_v4  ;;  %v12352_v3 = vld [vmem:[#allocation52_spill] sm:$0xff]  ;;  %v12353_v4 = vld [vmem:[#allocation53_spill] sm:$0xff] }
 0x178   :  { %982 = vmatprep.subr.mxu0 %v12308_v5  ;;  %1053 = vmatprep.subr.mxu1 %v12309_v6  ;;  %v12354_v5 = vld [vmem:[#allocation54_spill] sm:$0xff]  ;;  %v12355_v6 = vld [vmem:[#allocation55_spill] sm:$0xff] }
 0x179   :  { %983 = vmatpush1.msra.mxu0 %v12310_v7  ;;  %1054 = vmatpush1.msra.mxu1 %v12311_v8  ;;  %v12356_v7 = vld [vmem:[#allocation56_spill] sm:$0xff]  ;;  %v12357_v8 = vld [vmem:[#allocation57_spill] sm:$0xff] }
 0x17a   :  { %984 = vmatprep.subr.mxu0 %v12312_v9  ;;  %1055 = vmatprep.subr.mxu1 %v12313_v10  ;;  %v12358_v9 = vld [vmem:[#allocation58_spill] sm:$0xff]  ;;  %v12359_v10 = vld [vmem:[#allocation59_spill] sm:$0xff] }
 0x17b   :  { %985 = vmatpush1.msra.mxu0 %v12314_v11  ;;  %1056 = vmatpush1.msra.mxu1 %v12315_v12  ;;  %v12360_v11 = vld [vmem:[#allocation60_spill] sm:$0xff]  ;;  %v12361_v12 = vld [vmem:[#allocation61_spill] sm:$0xff] }
 0x17c   :  { %986 = vmatprep.subr.mxu0 %v12316_v13  ;;  %1057 = vmatprep.subr.mxu1 %v12317_v14  ;;  %v12362_v13 = vld [vmem:[#allocation62_spill] sm:$0xff]  ;;  %v12363_v14 = vld [vmem:[#allocation63_spill] sm:$0xff] }
 0x17d   :  { %987 = vmatpush1.msra.mxu0 %v12318_v15  ;;  %1058 = vmatpush1.msra.mxu1 %v12319_v16  ;;  %v12364_v15 = vld [vmem:[#allocation64_spill] sm:$0xff]  ;;  %v12365_v16 = vld [vmem:[#allocation65_spill] sm:$0xff] }
 0x17e   :  { %988 = vmatprep.subr.mxu0 %v12320_v17  ;;  %1059 = vmatprep.subr.mxu1 %v12321_v18  ;;  %v12366_v17 = vld [vmem:[#allocation66_spill] sm:$0xff]  ;;  %v12367_v18 = vld [vmem:[#allocation67_spill] sm:$0xff] }
 0x17f   :  { %989 = vmatpush1.msra.mxu0 %v12322_v19  ;;  %1022 = vmatprep.mubr.f32.mxu0 %v12185_v59  ;;  %v12368_v19 = vld [vmem:[#allocation68_spill] sm:$0xff] }
 0x180   :  { %1060 = vmatpush1.msra.mxu1 %v12323_v20  ;;  %1093 = vmatprep.mubr.f32.mxu1 %v12185_v59  ;;  %v12369_v20 = vld [vmem:[#allocation69_spill] sm:$0xff] }
 0x181   :  { %1023 = vmatmul.mubr.f32.vlgmr.msra.gmra.mxu0 %v6620_v53  ;;  %1094 = vmatmul.mubr.f32.vlgmr.msra.gmra.mxu1 %v6620_v53  ;;  %v12350_v53 = vld [vmem:[#allocation50_spill] sm:$0xff] }
 0x182   :  { %1146 = vmatprep.subr.mxu0 %v12324_v21  ;;  %1217 = vmatprep.subr.mxu1 %v12325_v22  ;;  %v12370_v21 = vld [vmem:[#allocation70_spill] sm:$0xff]  ;;  %v12371_v22 = vld [vmem:[#allocation71_spill] sm:$0xff] }
 0x183   :  { %1147 = vmatpush1.msra.mxu0 %v12326_v23  ;;  %1218 = vmatpush1.msra.mxu1 %v12327_v24  ;;  %v12372_v23 = vld [vmem:[#allocation72_spill] sm:$0xff]  ;;  %v12373_v24 = vld [vmem:[#allocation73_spill] sm:$0xff] }
 0x184   :  { %1148 = vmatprep.subr.mxu0 %v12328_v25  ;;  %1219 = vmatprep.subr.mxu1 %v12329_v26  ;;  %v12374_v25 = vld [vmem:[#allocation74_spill] sm:$0xff]  ;;  %v12375_v26 = vld [vmem:[#allocation75_spill] sm:$0xff] }
 0x185   :  { %1149 = vmatpush1.msra.mxu0 %v12330_v27  ;;  %1220 = vmatpush1.msra.mxu1 %v12331_v28  ;;  %v12376_v27 = vld [vmem:[#allocation76_spill] sm:$0xff]  ;;  %v12377_v28 = vld [vmem:[#allocation77_spill] sm:$0xff] }
 0x186   :  { %1150 = vmatprep.subr.mxu0 %v12332_v29  ;;  %1221 = vmatprep.subr.mxu1 %v12333_v30  ;;  %v12378_v29 = vld [vmem:[#allocation78_spill] sm:$0xff]  ;;  %v12379_v30 = vld [vmem:[#allocation79_spill] sm:$0xff] }
 0x187   :  { %1151 = vmatpush1.msra.mxu0 %v12334_v31  ;;  %1222 = vmatpush1.msra.mxu1 %v12335_v32  ;;  %v12380_v31 = vld [vmem:[#allocation80_spill] sm:$0xff]  ;;  %v12381_v32 = vld [vmem:[#allocation81_spill] sm:$0xff] }
 0x188   :  { %1152 = vmatprep.subr.mxu0 %v12336_v33  ;;  %1223 = vmatprep.subr.mxu1 %v12337_v34  ;;  %v12382_v33 = vld [vmem:[#allocation82_spill] sm:$0xff]  ;;  %v12383_v34 = vld [vmem:[#allocation83_spill] sm:$0xff] }
 0x189   :  { %1153 = vmatpush1.msra.mxu0 %v12338_v35  ;;  %1224 = vmatpush1.msra.mxu1 %v12339_v36  ;;  %v12384_v35 = vld [vmem:[#allocation84_spill] sm:$0xff]  ;;  %v12385_v36 = vld [vmem:[#allocation85_spill] sm:$0xff] }
 0x18a   :  { %1154 = vmatprep.subr.mxu0 %v12340_v37  ;;  %1225 = vmatprep.subr.mxu1 %v12341_v38  ;;  %v12386_v37 = vld [vmem:[#allocation86_spill] sm:$0xff]  ;;  %v12387_v38 = vld [vmem:[#allocation87_spill] sm:$0xff] }
 0x18b   :  { %1155 = vmatpush1.msra.mxu0 %v12342_v39  ;;  %1226 = vmatpush1.msra.mxu1 %v12343_v40  ;;  %v12388_v39 = vld [vmem:[#allocation88_spill] sm:$0xff]  ;;  %v12389_v40 = vld [vmem:[#allocation89_spill] sm:$0xff] }
 0x18c   :  { %1156 = vmatprep.subr.mxu0 %v12344_v41  ;;  %1227 = vmatprep.subr.mxu1 %v12345_v42 }
 0x18d   :  { %1157 = vmatpush1.msra.mxu0 %v12346_v43  ;;  %1228 = vmatpush1.msra.mxu1 %v12347_v44 }
 0x18e   :  { %1158 = vmatprep.subr.mxu0 %v12348_v45  ;;  %1229 = vmatprep.subr.mxu1 %v12349_v46 }
 0x18f   :  { %1159 = vmatpush1.msra.mxu0 %v12350_v53  ;;  %1230 = vmatpush1.msra.mxu1 %v12351_v1 }
 0x190   :  { %1160 = vmatprep.subr.mxu0 %v12352_v3  ;;  %1231 = vmatprep.subr.mxu1 %v12353_v4 }
 0x191   :  { %1161 = vmatpush1.msra.mxu0 %v12354_v5  ;;  %1232 = vmatpush1.msra.mxu1 %v12355_v6  ;;  %v12390_v5 = vld [vmem:[#allocation93_spill] sm:$0xff] }
 0x192   :  { %1162 = vmatprep.subr.mxu0 %v12356_v7  ;;  %1233 = vmatprep.subr.mxu1 %v12357_v8 }
 0x193   :  { %1163 = vmatpush1.msra.mxu0 %v12358_v9  ;;  %1234 = vmatpush1.msra.mxu1 %v12359_v10  ;;  %v12391_v9 = vld [vmem:[#allocation94_spill] sm:$0xff] }
 0x194   :  { %1164 = vmatprep.subr.mxu0 %v12360_v11  ;;  %1235 = vmatprep.subr.mxu1 %v12361_v12 }
 0x195   :  { %1165 = vmatpush1.msra.mxu0 %v12362_v13  ;;  %1236 = vmatpush1.msra.mxu1 %v12363_v14 }
 0x196   :  { %1166 = vmatprep.subr.mxu0 %v12364_v15  ;;  %1237 = vmatprep.subr.mxu1 %v12365_v16  ;;  %v12392_v16 = vld [vmem:[#allocation95_spill] sm:$0xff] }
 0x197   :  { %1167 = vmatpush1.msra.mxu0 %v12366_v17  ;;  %1238 = vmatpush1.msra.mxu1 %v12367_v18 }
 0x198   :  { %1168 = vmatprep.subr.mxu0 %v12368_v19  ;;  %1239 = vmatprep.subr.mxu1 %v12369_v20  ;;  %v225_v19 = vld [vmem:[%s11580_s6] sm:$0xf]  ;;  %v12393_v20 = vld [vmem:[#allocation92_spill] sm:$0xff] }
 0x199   :  { %1169 = vmatpush1.msra.mxu0 %v12370_v21  ;;  %1240 = vmatpush1.msra.mxu1 %v12371_v22  ;;  %v7143_v21 = vrot.slane %v225_v19, %v12393_v20  ;;  %v7537_v20 = vld [vmem:[%s11576_s2 + $0x78] sm:$0xff] }
 0x19a   :  { %1170 = vmatprep.subr.mxu0 %v12372_v23  ;;  %1241 = vmatprep.subr.mxu1 %v12373_v24  ;;  %v12394_v24 = vld [vmem:[#allocation91_spill] sm:$0xff]  ;;  %12466 = vst [vmem:[#allocation26_spill] sm:$0xff] %v7537_v20 }
 0x19b   :  { %1171 = vmatpush1.msra.mxu0 %v12374_v25  ;;  %1242 = vmatpush1.msra.mxu1 %v12375_v26  ;;  %v7146_v25 = vrot.slane %v225_v19, %v12394_v24  ;;  %v7543_v24 = vld [vmem:[%s11576_s2 + $0x60] sm:$0xff] }
 0x19c   :  { %1172 = vmatprep.subr.mxu0 %v12376_v27  ;;  %1243 = vmatprep.subr.mxu1 %v12377_v28  ;;  %12467 = vst [vmem:[#allocation27_spill] sm:$0xff] %v7543_v24 }
 0x19d   :  { %1173 = vmatpush1.msra.mxu0 %v12378_v29  ;;  %1244 = vmatpush1.msra.mxu1 %v12379_v30 }
 0x19e   :  { %1174 = vmatprep.subr.mxu0 %v12380_v31  ;;  %1245 = vmatprep.subr.mxu1 %v12381_v32 }
 0x19f   :  { %1175 = vmatpush1.msra.mxu0 %v12382_v33  ;;  %1246 = vmatpush1.msra.mxu1 %v12383_v34 }
 0x1a0   :  { %1176 = vmatprep.subr.mxu0 %v12384_v35  ;;  %1247 = vmatprep.subr.mxu1 %v12385_v36 }
 0x1a1   :  { %1177 = vmatpush1.msra.mxu0 %v12386_v37  ;;  %1248 = vmatpush1.msra.mxu1 %v12387_v38 }
 0x1a2   :  { %1210 = vmatprep.mubr.f32.mxu0 %v12185_v59  ;;  %1281 = vmatprep.mubr.f32.mxu1 %v12185_v59 }
 0x1a3   :  { %1288 = vmatprep.subr.mxu0 %v12388_v39  ;;  %1359 = vmatprep.subr.mxu1 %v12389_v40  ;;  %v1136_v39 = vrot.slane %v6617_v2, 7 }
 0x1fe   :  { %v712_v41 = vpop.f32.mrf.mxu0  ;;  %v783_v44 = vpop.f32.mrf.mxu1 }
 0x1ff   :  { %v713_v31 = vadd.f32 %v712_v41, %v7146_v25  ;;  %v12395_v41 = vld [vmem:[#allocation90_spill] sm:$0xff] }
 0x200   :  { %v714_v42 = vpop.f32.mrf.mxu0  ;;  %v785_v46 = vpop.f32.mrf.mxu1 }
 0x201   :  { %v715_v29 = vadd.f32 %v714_v42, %v7143_v21 }
 0x21f   :  { %v854_v43 = vpop.f32.mrf.mxu0  ;;  %v925_v3 = vpop.f32.mrf.mxu1 }
 0x220   :  { %v930_v33 = vadd.f32 %v854_v43, %v713_v31  ;;  %v12396_v43 = vsub.s32 2, %v12395_v41  ;;  %v12408_v31 = vld [vmem:[#allocation106_spill] sm:$0xff] }
 0x221   :  { %v856_v45 = vpop.f32.mrf.mxu0  ;;  %v927_v11 = vpop.f32.mrf.mxu1 }
 0x222   :  { %v931_v32 = vadd.f32 %v856_v45, %v715_v29  ;;  %v4644_v35 = vmul.f32 -1.442695, %v930_v33  ;;  %v7157_v45 = vrot.slane %v225_v19, %v12396_v43  ;;  %v12409_v33 = vld [vmem:[#allocation107_spill] sm:$0xff]  ;;  %v12419_v43 = vld [vmem:[#allocation117_spill] sm:$0xff] }
 0x224   :  { %v4645_v34 = vmul.f32 -1.442695, %v931_v32  ;;  %v784_v2 = vadd.f32 %v783_v44, %v7157_v45 }
 0x241   :  { %v1024_v53 = vpop.f32.mrf.mxu0  ;;  %v1095_v13 = vpop.f32.mrf.mxu1 }
 0x242   :  { %v1104_v1 = vrot.slane %v1024_v53, 7  ;;  %v1106_v14 = vrot.slane %v1095_v13, 7 }
 0x243   :  { %v1026_v4 = vpop.f32.mrf.mxu0  ;;  %v1097_v15 = vpop.f32.mrf.mxu1 }
 0x244   :  { %v1112_v6 = vadd.f32 %v1104_v1, %v12390_v5  ;;  %v1105_v7 = vrot.slane %v1026_v4, 7  ;;  %v1114_v17 = vadd.f32 %v1106_v14, %v12392_v16  ;;  %v1107_v18 = vrot.slane %v1097_v15, 7 }
 0x245   :  { %v932_v15 = vadd.f32 %v925_v3, %v784_v2  ;;  %v12399_v3 = vld [vmem:[#allocation97_spill] sm:$0xff] }
 0x246   :  { %v4647_v8 = vmul.f32 -1.442695, %v1112_v6  ;;  %v1113_v10 = vadd.f32 %v1105_v7, %v12391_v9  ;;  %v4649_v22 = vmul.f32 -1.442695, %v1114_v17  ;;  %v1115_v26 = vadd.f32 %v1107_v18, %v6614_v57  ;;  %v12423_v2 = vld [vmem:[#allocation121_spill] sm:$0xff] }
 0x247   :  { %v12397_v7 = vsub.s32 3, %v12395_v41  ;;  %v4646_v18 = vmul.f32 -1.442695, %v932_v15  ;;  %v12418_v41 = vld [vmem:[#allocation116_spill] sm:$0xff]  ;;  %v12427_v15 = vld [vmem:[#allocation125_spill] sm:$0xff] }
 0x248   :  { %v4648_v12 = vmul.f32 -1.442695, %v1113_v10  ;;  %4707 = vpow2.f32 %v4647_v8 }
 0x249   :  { %v7161_v8 = vrot.slane %v225_v19, %v12397_v7  ;;  %v12401_v19 = vld [vmem:[#allocation99_spill] sm:$0xff] }
 0x24a   :  { %4709 = vpow2.f32 %v4648_v12  ;;  %v12421_v7 = vld [vmem:[#allocation119_spill] sm:$0xff] }
 0x24b   :  { %4711 = vpow2.f32 %v4649_v22  ;;  %v786_v13 = vadd.f32 %v785_v46, %v7161_v8  ;;  %v12398_v46 = vld [vmem:[#allocation96_spill] sm:$0xff] }
 0x24d   :  { %v933_v17 = vadd.f32 %v927_v11, %v786_v13  ;;  %v12400_v11 = vld [vmem:[#allocation98_spill] sm:$0xff]  ;;  %v12425_v13 = vld [vmem:[#allocation123_spill] sm:$0xff] }
 0x255   :  { %v4708_v23 = vpop.eup %4707 }
 0x256   :  { %v1125_v27 = vadd.f32 1.0, %v4708_v23 }
 0x257   :  { %v4710_v28 = vpop.eup %4709 }
 0x258   :  { %4713 = vrcp.f32 %v1125_v27  ;;  %v1126_v30 = vadd.f32 1.0, %v4710_v28  ;;  %v4712_v36 = vpop.eup %4711  ;;  %v12405_v28 = vld [vmem:[#allocation103_spill] sm:$0xff] }
 0x259   :  { %4715 = vtanh.f32 %v1115_v26  ;;  %v1127_v42 = vadd.f32 1.0, %v4712_v36  ;;  %v12411_v36 = vld [vmem:[#allocation109_spill] sm:$0xff] }
 0x25a   :  { %4717 = vrcp.f32 %v1126_v30  ;;  %v12407_v30 = vld [vmem:[#allocation105_spill] sm:$0xff] }
 0x25b   :  { %4719 = vpow2.f32 %v4645_v34  ;;  %v12410_v34 = vld [vmem:[#allocation108_spill] sm:$0xff] }
 0x25c   :  { %4721 = vpow2.f32 %v4644_v35 }
 0x25d   :  { %4723 = vrcp.f32 %v1127_v42  ;;  %v12415_v42 = vld [vmem:[#allocation113_spill] sm:$0xff] }
 0x265   :  { %v4714_v37 = vpop.eup %4713 }
 0x266   :  { %v4716_v38 = vpop.eup %4715 }
 0x267   :  { %v4718_v40 = vpop.eup %4717  ;;  %v1139_v1 = vmul.f32 %v4716_v38, %v4714_v37  ;;  %v12412_v37 = vld [vmem:[#allocation110_spill] sm:$0xff]  ;;  %v12413_v38 = vld [vmem:[#allocation111_spill] sm:$0xff] }
 0x268   :  { %v1138_v53 = vmul.f32 %v4718_v40, %v1136_v39  ;;  %v4720_v6 = vpop.eup %4719  ;;  %v12414_v39 = vld [vmem:[#allocation112_spill] sm:$0xff] }
 0x269   :  { %v4722_v10 = vpop.eup %4721  ;;  %v944_v12 = vadd.f32 1.0, %v4720_v6  ;;  %v12420_v6 = vld [vmem:[#allocation118_spill] sm:$0xff] }
 0x26a   :  { %v7152_v4 = vadd.f32 %v1139_v1, %v1138_v53  ;;  %v943_v14 = vadd.f32 1.0, %v4722_v10  ;;  %v4724_v22 = vpop.eup %4723  ;;  %v12416_v53 = vld [vmem:[#allocation114_spill] sm:$0xff]  ;;  %v12417_v1 = vld [vmem:[#allocation115_spill] sm:$0xff]  ;;  %v12422_v10 = vld [vmem:[#allocation120_spill] sm:$0xff] }
 0x26c   :  { %4725 = vtanh.f32 %v7152_v4 }
 0x26d   :  { %4727 = vrcp.f32 %v944_v12  ;;  %v12424_v12 = vld [vmem:[#allocation122_spill] sm:$0xff] }
 0x26e   :  { %4729 = vrcp.f32 %v943_v14  ;;  %v12426_v14 = vld [vmem:[#allocation124_spill] sm:$0xff] }
 0x26f   :  { %4731 = vtanh.f32 %v933_v17  ;;  %v12428_v17 = vld [vmem:[#allocation126_spill] sm:$0xff] }
 0x270   :  { %4733 = vpow2.f32 %v4646_v18  ;;  %v12429_v18 = vld [vmem:[#allocation127_spill] sm:$0xff] }
 0x279   :  { %v4726_v23 = vpop.eup %4725 }
 0x27a   :  { %v1142_v26 = vmul.f32 %v4726_v23, %v4724_v22  ;;  %v4728_v44 = vpop.eup %4727  ;;  %v12430_v22 = vld [vmem:[#allocation128_spill] sm:$0xff]  ;;  %v12431_v23 = vld [vmem:[#allocation129_spill] sm:$0xff] }
 0x27c   :  { %v7165_v27 = vrot.slane %v1142_v26, 1  ;;  %v12432_v26 = vld [vmem:[#allocation130_spill] sm:$0xff] }
 0x27e   :  { %1211 = vmatmul.mubr.f32.vlgmr.msra.gmra.mxu0 %v7165_v27  ;;  %1282 = vmatmul.mubr.f32.vlgmr.msra.gmra.mxu1 %v7165_v27 }
 0x27f   :  { %1289 = vmatpush1.msra.mxu0 %v6625_v52  ;;  %1360 = vmatpush1.msra.mxu1 %v6630_v54  ;;  %v4730_v52 = vpop.eup %4729  ;;  %v12402_v54 = vld [vmem:[#allocation100_spill] sm:$0xff] }
 0x280   :  { %1290 = vmatprep.subr.mxu0 %v6635_v60  ;;  %1361 = vmatprep.subr.mxu1 %v6640_v58  ;;  %v953_v60 = vmul.f32 0.0, %v4728_v44  ;;  %v12403_v58 = vld [vmem:[#allocation101_spill] sm:$0xff]  ;;  %v12433_v44 = vld [vmem:[#allocation131_spill] sm:$0xff] }
 0x281   :  { %1291 = vmatpush1.msra.mxu0 %v6647_v61  ;;  %1362 = vmatpush1.msra.mxu1 %v6652_v49  ;;  %v12404_v61 = vld [vmem:[#allocation102_spill] sm:$0xff]  ;;  %v4732_v49 = vpop.eup %4731 }
 0x282   :  { %1292 = vmatprep.subr.mxu0 %v6659_v48  ;;  %1363 = vmatprep.subr.mxu1 %v12398_v46  ;;  %v12406_v48 = vld [vmem:[#allocation104_spill] sm:$0xff]  ;;  %v954_v29 = vmul.f32 %v4732_v49, %v4730_v52  ;;  %v4734_v32 = vpop.eup %4733  ;;  %v12437_v52 = vld [vmem:[#allocation135_spill] sm:$0xff]  ;;  %v12443_v49 = vld [vmem:[#allocation141_spill] sm:$0xff] }
 0x283   :  { %1293 = vmatpush1.msra.mxu0 %v12399_v3  ;;  %1364 = vmatpush1.msra.mxu1 %v12400_v11  ;;  %v945_v40 = vadd.f32 1.0, %v4734_v32  ;;  %v12434_v46 = vld [vmem:[#allocation132_spill] sm:$0xff]  ;;  %v12435_v3 = vld [vmem:[#allocation133_spill] sm:$0xff]  ;;  %v12436_v11 = vld [vmem:[#allocation134_spill] sm:$0xff] }
 0x284   :  { %1294 = vmatprep.subr.mxu0 %v12401_v19  ;;  %1365 = vmatprep.subr.mxu1 %v12402_v54  ;;  %v7189_v35 = vadd.f32 %v954_v29, %v953_v60  ;;  %v12438_v19 = vld [vmem:[#allocation136_spill] sm:$0xff]  ;;  %v12439_v54 = vld [vmem:[#allocation137_spill] sm:$0xff]  ;;  %v12440_v60 = vld [vmem:[#allocation138_spill] sm:$0xff] }
 0x285   :  { %1295 = vmatpush1.msra.mxu0 %v12403_v58  ;;  %1366 = vmatpush1.msra.mxu1 %v12404_v61  ;;  %v12441_v58 = vld [vmem:[#allocation139_spill] sm:$0xff]  ;;  %v12442_v61 = vld [vmem:[#allocation140_spill] sm:$0xff]  ;;  %v7297_v32 = vld [vmem:[%s11576_s2 + $0x1b8] sm:$0xff] }
 0x286   :  { %1296 = vmatprep.subr.mxu0 %v12405_v28  ;;  %1367 = vmatprep.subr.mxu1 %v12406_v48  ;;  %4735 = vtanh.f32 %v7189_v35  ;;  %v12444_v28 = vld [vmem:[#allocation142_spill] sm:$0xff] }
 0x287   :  { %1297 = vmatpush1.msra.mxu0 %v12407_v30  ;;  %1368 = vmatpush1.msra.mxu1 %v12408_v31  ;;  %4737 = vrcp.f32 %v945_v40  ;;  %v7291_v31 = vld [vmem:[%s11576_s2 + $0x1a8] sm:$0xff] }
 0x288   :  { %1298 = vmatprep.subr.mxu0 %v12409_v33  ;;  %1369 = vmatprep.subr.mxu1 %v12410_v34  ;;  %v7303_v33 = vld [vmem:[%s11576_s2 + $0x1a0] sm:$0xff]  ;;  %v7309_v34 = vld [vmem:[%s11576_s2 + $0x1b0] sm:$0xff]  ;;  %v7339_v40 = vld [vmem:[%s11576_s2 + $0x168] sm:$0xff] }
 0x289   :  { %1299 = vmatpush1.msra.mxu0 %v12411_v36  ;;  %1370 = vmatpush1.msra.mxu1 %v12412_v37  ;;  %v7315_v36 = vld [vmem:[%s11576_s2 + $0x188] sm:$0xff]  ;;  %v7321_v37 = vld [vmem:[%s11576_s2 + $0x198] sm:$0xff] }
 0x28a   :  { %1300 = vmatprep.subr.mxu0 %v12413_v38  ;;  %1371 = vmatprep.subr.mxu1 %v12414_v39  ;;  %v7327_v38 = vld [vmem:[%s11576_s2 + $0x180] sm:$0xff]  ;;  %v7333_v39 = vld [vmem:[%s11576_s2 + $0x190] sm:$0xff] }
 0x28b   :  { %1301 = vmatpush1.msra.mxu0 %v12415_v42  ;;  %1372 = vmatpush1.msra.mxu1 %v12416_v53  ;;  %v7345_v42 = vld [vmem:[%s11576_s2 + $0x178] sm:$0xff]  ;;  %v7351_v53 = vld [vmem:[%s11576_s2 + $0x160] sm:$0xff] }
 0x28c   :  { %1302 = vmatprep.subr.mxu0 %v12417_v1  ;;  %1373 = vmatprep.subr.mxu1 %v12418_v41  ;;  %v7357_v1 = vld [vmem:[%s11576_s2 + $0x170] sm:$0xff]  ;;  %v7363_v41 = vld [vmem:[%s11576_s2 + $0x148] sm:$0xff] }
 0x28d   :  { %1303 = vmatpush1.msra.mxu0 %v12419_v43  ;;  %1374 = vmatpush1.msra.mxu1 %v12420_v6  ;;  %v7369_v43 = vld [vmem:[%s11576_s2 + $0x158] sm:$0xff]  ;;  %v7375_v6 = vld [vmem:[%s11576_s2 + $0x140] sm:$0xff] }
 0x28e   :  { %1304 = vmatprep.subr.mxu0 %v12421_v7  ;;  %1375 = vmatprep.subr.mxu1 %v12422_v10  ;;  %v7381_v7 = vld [vmem:[%s11576_s2 + $0x150] sm:$0xff]  ;;  %v7387_v10 = vld [vmem:[%s11576_s2 + $0x128] sm:$0xff] }
 0x28f   :  { %1305 = vmatpush1.msra.mxu0 %v12423_v2  ;;  %1376 = vmatpush1.msra.mxu1 %v12424_v12  ;;  %v7393_v2 = vld [vmem:[%s11576_s2 + $0x138] sm:$0xff]  ;;  %v7399_v12 = vld [vmem:[%s11576_s2 + $0x120] sm:$0xff] }
 0x290   :  { %1306 = vmatprep.subr.mxu0 %v12425_v13  ;;  %1377 = vmatprep.subr.mxu1 %v12426_v14  ;;  %v7405_v13 = vld [vmem:[%s11576_s2 + $0x130] sm:$0xff]  ;;  %v7411_v14 = vld [vmem:[%s11576_s2 + $0x108] sm:$0xff] }
 0x291   :  { %1307 = vmatpush1.msra.mxu0 %v12427_v15  ;;  %1378 = vmatpush1.msra.mxu1 %v12428_v17  ;;  %v7417_v15 = vld [vmem:[%s11576_s2 + $0x118] sm:$0xff]  ;;  %v7423_v17 = vld [vmem:[%s11576_s2 + $0x100] sm:$0xff] }
 0x292   :  { %1308 = vmatprep.subr.mxu0 %v12429_v18  ;;  %1379 = vmatprep.subr.mxu1 %v12430_v22  ;;  %12446 = vst [vmem:[#allocation6_spill] sm:$0xff] %v7417_v15  ;;  %12447 = vst [vmem:[#allocation7_spill] sm:$0xff] %v7423_v17  ;;  %v7429_v18 = vld [vmem:[%s11576_s2 + $0x110] sm:$0xff]  ;;  %v7435_v22 = vld [vmem:[%s11576_s2 + $0xe8] sm:$0xff] }
 0x293   :  { %1309 = vmatpush1.msra.mxu0 %v12431_v23  ;;  %1380 = vmatpush1.msra.mxu1 %v12432_v26  ;;  %v4736_v48 = vpop.eup %4735  ;;  %12448 = vst [vmem:[#allocation8_spill] sm:$0xff] %v7429_v18  ;;  %12449 = vst [vmem:[#allocation9_spill] sm:$0xff] %v7435_v22  ;;  %v7441_v23 = vld [vmem:[%s11576_s2 + $0xf8] sm:$0xff]  ;;  %v7447_v26 = vld [vmem:[%s11576_s2 + $0xe0] sm:$0xff] }
 0x294   :  { %1310 = vmatprep.subr.mxu0 %v12433_v44  ;;  %1381 = vmatprep.subr.mxu1 %v12434_v46  ;;  %v4738_v29 = vpop.eup %4737  ;;  %12450 = vst [vmem:[#allocation10_spill] sm:$0xff] %v7441_v23  ;;  %12451 = vst [vmem:[#allocation11_spill] sm:$0xff] %v7447_v26  ;;  %v7453_v44 = vld [vmem:[%s11576_s2 + $0xf0] sm:$0xff]  ;;  %v7459_v46 = vld [vmem:[%s11576_s2 + $0xc8] sm:$0xff] }
 0x295   :  { %1311 = vmatpush1.msra.mxu0 %v12435_v3  ;;  %1382 = vmatpush1.msra.mxu1 %v12436_v11  ;;  %v7234_v30 = vmul.f32 %v4738_v29, %v4736_v48  ;;  %12452 = vst [vmem:[#allocation12_spill] sm:$0xff] %v7453_v44  ;;  %12453 = vst [vmem:[#allocation13_spill] sm:$0xff] %v7459_v46  ;;  %v7465_v3 = vld [vmem:[%s11576_s2 + $0xd8] sm:$0xff]  ;;  %v7471_v11 = vld [vmem:[%s11576_s2 + $0xc0] sm:$0xff] }
 0x296   :  { %1312 = vmatprep.subr.mxu0 %v12437_v52  ;;  %1383 = vmatprep.subr.mxu1 %v12438_v19  ;;  %12454 = vst [vmem:[#allocation14_spill] sm:$0xff] %v7465_v3  ;;  %12455 = vst [vmem:[#allocation15_spill] sm:$0xff] %v7471_v11  ;;  %v7477_v52 = vld [vmem:[%s11576_s2 + $0xd0] sm:$0xff]  ;;  %v7483_v19 = vld [vmem:[%s11576_s2 + $0xa8] sm:$0xff] }
 0x297   :  { %1313 = vmatpush1.msra.mxu0 %v12439_v54  ;;  %1384 = vmatpush1.msra.mxu1 %v12440_v60  ;;  %12445 = vst [vmem:[#allocation5_spill] sm:$0xff] %v7234_v30  ;;  %12456 = vst [vmem:[#allocation16_spill] sm:$0xff] %v7477_v52  ;;  %v7489_v54 = vld [vmem:[%s11576_s2 + $0xb8] sm:$0xff]  ;;  %v7495_v60 = vld [vmem:[%s11576_s2 + $0xa0] sm:$0xff] }
 0x298   :  { %1314 = vmatprep.subr.mxu0 %v12441_v58  ;;  %1385 = vmatprep.subr.mxu1 %v12442_v61  ;;  %12457 = vst [vmem:[#allocation17_spill] sm:$0xff] %v7483_v19  ;;  %12458 = vst [vmem:[#allocation18_spill] sm:$0xff] %v7489_v54  ;;  %v7501_v58 = vld [vmem:[%s11576_s2 + $0xb0] sm:$0xff]  ;;  %v7507_v61 = vld [vmem:[%s11576_s2 + $0x88] sm:$0xff] }
 0x299   :  { %1315 = vmatpush1.msra.mxu0 %v12443_v49  ;;  %1386 = vmatpush1.msra.mxu1 %v12444_v28  ;;  %12459 = vst [vmem:[#allocation19_spill] sm:$0xff] %v7495_v60  ;;  %12460 = vst [vmem:[#allocation20_spill] sm:$0xff] %v7501_v58  ;;  %v7513_v49 = vld [vmem:[%s11576_s2 + $0x98] sm:$0xff]  ;;  %v7519_v28 = vld [vmem:[%s11576_s2 + $0x80] sm:$0xff] }
 0x29a   :  { %1316 = vmatprep.subr.mxu0 %v6947_v63  ;;  %1387 = vmatprep.subr.mxu1 %v6952_v51  ;;  %v7243_v51 = vld [vmem:[%s11576_s2 + $0x1e8] sm:$0xff]  ;;  %v7285_v63 = vld [vmem:[%s11576_s2 + $0x1d0] sm:$0xff]  ;;  %12461 = vst [vmem:[#allocation21_spill] sm:$0xff] %v7507_v61  ;;  %12462 = vst [vmem:[#allocation22_spill] sm:$0xff] %v7513_v49 }
 0x29b   :  { %1317 = vmatpush1.msra.mxu0 %v6959_v47  ;;  %1388 = vmatpush1.msra.mxu1 %v6964_v50  ;;  %v7249_v47 = vld [vmem:[%s11576_s2 + $0x1f8] sm:$0xff]  ;;  %v7255_v50 = vld [vmem:[%s11576_s2 + $0x1e0] sm:$0xff]  ;;  %12463 = vst [vmem:[#allocation23_spill] sm:$0xff] %v7519_v28  ;;  %v7525_v48 = vld [vmem:[%s11576_s2 + $0x90] sm:$0xff] }
 0x29c   :  { %1318 = vmatprep.subr.mxu0 %v6971_v56  ;;  %1389 = vmatprep.subr.mxu1 %v6976_v62  ;;  %v7261_v56 = vld [vmem:[%s11576_s2 + $0x1f0] sm:$0xff]  ;;  %v7267_v62 = vld [vmem:[%s11576_s2 + $0x1c8] sm:$0xff]  ;;  %12464 = vst [vmem:[#allocation24_spill] sm:$0xff] %v7525_v48 }
 0x29d   :  { %1319 = vmatpush1.msra.mxu0 %v6983_v55  ;;  %1352 = vmatprep.mubr.f32.mxu0 %v12185_v59  ;;  %v7273_v55 = vld [vmem:[%s11576_s2 + $0x1d8] sm:$0xff]  ;;  %v7531_v29 = vld [vmem:[%s11576_s2 + $0x68] sm:$0xff] }
 0x29e   :  { %1390 = vmatpush1.msra.mxu1 %v6990_v0  ;;  %1423 = vmatprep.mubr.f32.mxu1 %v12185_v59  ;;  %v7279_v0 = vld [vmem:[%s11576_s2 + $0x1c0] sm:$0xff]  ;;  %12465 = vst [vmem:[#allocation25_spill] sm:$0xff] %v7531_v29 }
 0x29f   :  { %1353 = vmatmul.mubr.f32.vlgmr.msra.gmra.mxu0 %v7234_v30  ;;  %1424 = vmatmul.mubr.f32.vlgmr.msra.gmra.mxu1 %v7234_v30  ;;  %v7549_v30 = vld [vmem:[%s11576_s2 + $0x70] sm:$0xff] }
 0x2a0   :  { %1458 = vmatprep.subr.mxu0 %v7243_v51  ;;  %1529 = vmatprep.subr.mxu1 %v7249_v47  ;;  %12468 = vst [vmem:[#allocation28_spill] sm:$0xff] %v7549_v30 }
 0x2a1   :  { %1459 = vmatpush1.msra.mxu0 %v7255_v50  ;;  %1530 = vmatpush1.msra.mxu1 %v7261_v56 }
 0x2a2   :  { %1460 = vmatprep.subr.mxu0 %v7267_v62  ;;  %1531 = vmatprep.subr.mxu1 %v7273_v55 }
 0x2a3   :  { %1461 = vmatpush1.msra.mxu0 %v7279_v0  ;;  %1532 = vmatpush1.msra.mxu1 %v7285_v63 }
 0x2a4   :  { %1462 = vmatprep.subr.mxu0 %v7291_v31  ;;  %1533 = vmatprep.subr.mxu1 %v7297_v32 }
 0x2a5   :  { %1463 = vmatpush1.msra.mxu0 %v7303_v33  ;;  %1534 = vmatpush1.msra.mxu1 %v7309_v34 }
 0x2a6   :  { %1464 = vmatprep.subr.mxu0 %v7315_v36  ;;  %1535 = vmatprep.subr.mxu1 %v7321_v37 }
 0x2a7   :  { %1465 = vmatpush1.msra.mxu0 %v7327_v38  ;;  %1536 = vmatpush1.msra.mxu1 %v7333_v39 }
 0x2a8   :  { %1466 = vmatprep.subr.mxu0 %v7339_v40  ;;  %1537 = vmatprep.subr.mxu1 %v7345_v42 }
 0x2a9   :  { %1467 = vmatpush1.msra.mxu0 %v7351_v53  ;;  %1538 = vmatpush1.msra.mxu1 %v7357_v1 }
 0x2aa   :  { %1468 = vmatprep.subr.mxu0 %v7363_v41  ;;  %1539 = vmatprep.subr.mxu1 %v7369_v43 }
 0x2ab   :  { %1469 = vmatpush1.msra.mxu0 %v7375_v6  ;;  %1540 = vmatpush1.msra.mxu1 %v7381_v7 }
 0x2ac   :  { %1470 = vmatprep.subr.mxu0 %v7387_v10  ;;  %1541 = vmatprep.subr.mxu1 %v7393_v2 }
 0x2ad   :  { %1471 = vmatpush1.msra.mxu0 %v7399_v12  ;;  %1542 = vmatpush1.msra.mxu1 %v7405_v13 }
 0x2ae   :  { %1472 = vmatprep.subr.mxu0 %v7411_v14  ;;  %1543 = vmatprep.subr.mxu1 %v7417_v15 }
 0x2af   :  { %1473 = vmatpush1.msra.mxu0 %v7423_v17  ;;  %1544 = vmatpush1.msra.mxu1 %v7429_v18 }
 0x2b0   :  { %1474 = vmatprep.subr.mxu0 %v7435_v22  ;;  %1545 = vmatprep.subr.mxu1 %v7441_v23 }
 0x2b1   :  { %1475 = vmatpush1.msra.mxu0 %v7447_v26  ;;  %1546 = vmatpush1.msra.mxu1 %v7453_v44 }
 0x2b2   :  { %1476 = vmatprep.subr.mxu0 %v7459_v46  ;;  %1547 = vmatprep.subr.mxu1 %v7465_v3 }
 0x2b3   :  { %1477 = vmatpush1.msra.mxu0 %v7471_v11  ;;  %1548 = vmatpush1.msra.mxu1 %v7477_v52 }
 0x2b4   :  { %1478 = vmatprep.subr.mxu0 %v7483_v19  ;;  %1549 = vmatprep.subr.mxu1 %v7489_v54 }
 0x2b5   :  { %1479 = vmatpush1.msra.mxu0 %v7495_v60  ;;  %1550 = vmatpush1.msra.mxu1 %v7501_v58 }
 0x2b6   :  { %1480 = vmatprep.subr.mxu0 %v7507_v61  ;;  %1551 = vmatprep.subr.mxu1 %v7513_v49 }
 0x2b7   :  { %1481 = vmatpush1.msra.mxu0 %v7519_v28  ;;  %1552 = vmatpush1.msra.mxu1 %v7525_v48 }
 0x2b8   :  { %1482 = vmatprep.subr.mxu0 %v7531_v29  ;;  %1553 = vmatprep.subr.mxu1 %v7537_v20  ;;  %v7555_v29 = vld [vmem:[%s11576_s2 + $0x48] sm:$0xff]  ;;  %v7561_v20 = vld [vmem:[%s11576_s2 + $0x58] sm:$0xff] }
 0x2b9   :  { %1483 = vmatpush1.msra.mxu0 %v7543_v24  ;;  %1554 = vmatpush1.msra.mxu1 %v7549_v30  ;;  %12469 = vst [vmem:[#allocation29_spill] sm:$0xff] %v7555_v29  ;;  %12470 = vst [vmem:[#allocation30_spill] sm:$0xff] %v7561_v20  ;;  %v7567_v24 = vld [vmem:[%s11576_s2 + $0x40] sm:$0xff]  ;;  %v7573_v30 = vld [vmem:[%s11576_s2 + $0x50] sm:$0xff] }
 0x2ba   :  { %1484 = vmatprep.subr.mxu0 %v7555_v29  ;;  %1555 = vmatprep.subr.mxu1 %v7561_v20  ;;  %12471 = vst [vmem:[#allocation31_spill] sm:$0xff] %v7567_v24  ;;  %12472 = vst [vmem:[#allocation32_spill] sm:$0xff] %v7573_v30  ;;  %v7579_v29 = vld [vmem:[%s11576_s2 + $0x28] sm:$0xff]  ;;  %v7585_v20 = vld [vmem:[%s11576_s2 + $0x38] sm:$0xff] }
 0x2bb   :  { %1485 = vmatpush1.msra.mxu0 %v7567_v24  ;;  %1556 = vmatpush1.msra.mxu1 %v7573_v30  ;;  %12473 = vst [vmem:[#allocation33_spill] sm:$0xff] %v7579_v29  ;;  %12474 = vst [vmem:[#allocation34_spill] sm:$0xff] %v7585_v20  ;;  %v7591_v24 = vld [vmem:[%s11576_s2 + $0x20] sm:$0xff]  ;;  %v7597_v30 = vld [vmem:[%s11576_s2 + $0x30] sm:$0xff] }
 0x2bc   :  { %1486 = vmatprep.subr.mxu0 %v7579_v29  ;;  %1557 = vmatprep.subr.mxu1 %v7585_v20  ;;  %12475 = vst [vmem:[#allocation35_spill] sm:$0xff] %v7591_v24  ;;  %12476 = vst [vmem:[#allocation36_spill] sm:$0xff] %v7597_v30  ;;  %v7603_v29 = vld [vmem:[%s11576_s2 + $0x8] sm:$0xff]  ;;  %v7609_v20 = vld [vmem:[%s11576_s2 + $0x18] sm:$0xff] }
 0x2bd   :  { %1487 = vmatpush1.msra.mxu0 %v7591_v24  ;;  %1558 = vmatpush1.msra.mxu1 %v7597_v30  ;;  %12477 = vst [vmem:[#allocation37_spill] sm:$0xff] %v7603_v29  ;;  %12478 = vst [vmem:[#allocation38_spill] sm:$0xff] %v7609_v20  ;;  %v7615_v24 = vld [vmem:[%s11576_s2] sm:$0xff] }
 0x2be   :  { %1488 = vmatprep.subr.mxu0 %v7603_v29  ;;  %1559 = vmatprep.subr.mxu1 %v7609_v20  ;;  %12479 = vst [vmem:[#allocation39_spill] sm:$0xff] %v7615_v24  ;;  %v7622_v29 = vld [vmem:[%s11576_s2 + $0x10] sm:$0xff]  ;;  %v7631_v20 = vld [vmem:[%s11578_s4 + $0x1e8] sm:$0xff] }
 0x2bf   :  { %1489 = vmatpush1.msra.mxu0 %v7615_v24  ;;  %1522 = vmatprep.mubr.f32.mxu0 %v12185_v59  ;;  %12480 = vst [vmem:[#allocation40_spill] sm:$0xff] %v7622_v29  ;;  %12481 = vst [vmem:[#allocation41_spill] sm:$0xff] %v7631_v20  ;;  %v7637_v24 = vld [vmem:[%s11578_s4 + $0x1f8] sm:$0xff] }
 0x2c0   :  { %1560 = vmatpush1.msra.mxu1 %v7622_v29  ;;  %1593 = vmatprep.mubr.f32.mxu1 %v12185_v59  ;;  %12482 = vst [vmem:[#allocation42_spill] sm:$0xff] %v7637_v24  ;;  %v7643_v29 = vld [vmem:[%s11578_s4 + $0x1e0] sm:$0xff] }
 0x2c1   :  { %1523 = vmatmul.mubr.f32.vlgmr.msra.gmra.mxu0 %v7165_v27  ;;  %1594 = vmatmul.mubr.f32.vlgmr.msra.gmra.mxu1 %v7165_v27  ;;  %12483 = vst [vmem:[#allocation43_spill] sm:$0xff] %v7643_v29  ;;  %v7649_v27 = vld [vmem:[%s11578_s4 + $0x1f0] sm:$0xff] }
 0x2c2   :  { %1646 = vmatprep.subr.mxu0 %v7631_v20  ;;  %1717 = vmatprep.subr.mxu1 %v7637_v24  ;;  %12484 = vst [vmem:[#allocation44_spill] sm:$0xff] %v7649_v27  ;;  %v7655_v20 = vld [vmem:[%s11578_s4 + $0x1c8] sm:$0xff]  ;;  %v7661_v24 = vld [vmem:[%s11578_s4 + $0x1d8] sm:$0xff] }
 0x2c3   :  { %1647 = vmatpush1.msra.mxu0 %v7643_v29  ;;  %1718 = vmatpush1.msra.mxu1 %v7649_v27  ;;  %12485 = vst [vmem:[#allocation45_spill] sm:$0xff] %v7655_v20  ;;  %12486 = vst [vmem:[#allocation46_spill] sm:$0xff] %v7661_v24  ;;  %v7667_v29 = vld [vmem:[%s11578_s4 + $0x1c0] sm:$0xff]  ;;  %v7673_v27 = vld [vmem:[%s11578_s4 + $0x1d0] sm:$0xff] }
 0x2c4   :  { %1648 = vmatprep.subr.mxu0 %v7655_v20  ;;  %1719 = vmatprep.subr.mxu1 %v7661_v24  ;;  %12487 = vst [vmem:[#allocation47_spill] sm:$0xff] %v7667_v29  ;;  %12488 = vst [vmem:[#allocation48_spill] sm:$0xff] %v7673_v27  ;;  %v7679_v20 = vld [vmem:[%s11578_s4 + $0x1a8] sm:$0xff]  ;;  %v7685_v24 = vld [vmem:[%s11578_s4 + $0x1b8] sm:$0xff] }
 0x2c5   :  { %1649 = vmatpush1.msra.mxu0 %v7667_v29  ;;  %1720 = vmatpush1.msra.mxu1 %v7673_v27  ;;  %12489 = vst [vmem:[#allocation49_spill] sm:$0xff] %v7679_v20  ;;  %12490 = vst [vmem:[#allocation50_spill] sm:$0xff] %v7685_v24  ;;  %v7691_v29 = vld [vmem:[%s11578_s4 + $0x1a0] sm:$0xff]  ;;  %v7697_v27 = vld [vmem:[%s11578_s4 + $0x1b0] sm:$0xff] }
 0x2c6   :  { %1650 = vmatprep.subr.mxu0 %v7679_v20  ;;  %1721 = vmatprep.subr.mxu1 %v7685_v24  ;;  %12491 = vst [vmem:[#allocation51_spill] sm:$0xff] %v7691_v29  ;;  %12492 = vst [vmem:[#allocation52_spill] sm:$0xff] %v7697_v27  ;;  %v7703_v20 = vld [vmem:[%s11578_s4 + $0x188] sm:$0xff]  ;;  %v7709_v24 = vld [vmem:[%s11578_s4 + $0x198] sm:$0xff] }
 0x2c7   :  { %1651 = vmatpush1.msra.mxu0 %v7691_v29  ;;  %1722 = vmatpush1.msra.mxu1 %v7697_v27  ;;  %12493 = vst [vmem:[#allocation53_spill] sm:$0xff] %v7703_v20  ;;  %12494 = vst [vmem:[#allocation54_spill] sm:$0xff] %v7709_v24  ;;  %v7715_v29 = vld [vmem:[%s11578_s4 + $0x180] sm:$0xff]  ;;  %v7721_v27 = vld [vmem:[%s11578_s4 + $0x190] sm:$0xff] }
 0x2c8   :  { %1652 = vmatprep.subr.mxu0 %v7703_v20  ;;  %1723 = vmatprep.subr.mxu1 %v7709_v24  ;;  %12495 = vst [vmem:[#allocation55_spill] sm:$0xff] %v7715_v29  ;;  %12496 = vst [vmem:[#allocation56_spill] sm:$0xff] %v7721_v27  ;;  %v7727_v20 = vld [vmem:[%s11578_s4 + $0x168] sm:$0xff]  ;;  %v7733_v24 = vld [vmem:[%s11578_s4 + $0x178] sm:$0xff] }
 0x2c9   :  { %1653 = vmatpush1.msra.mxu0 %v7715_v29  ;;  %1724 = vmatpush1.msra.mxu1 %v7721_v27  ;;  %12497 = vst [vmem:[#allocation57_spill] sm:$0xff] %v7727_v20  ;;  %12498 = vst [vmem:[#allocation58_spill] sm:$0xff] %v7733_v24  ;;  %v7739_v29 = vld [vmem:[%s11578_s4 + $0x160] sm:$0xff]  ;;  %v7745_v27 = vld [vmem:[%s11578_s4 + $0x170] sm:$0xff] }
 0x2ca   :  { %1654 = vmatprep.subr.mxu0 %v7727_v20  ;;  %1725 = vmatprep.subr.mxu1 %v7733_v24  ;;  %12499 = vst [vmem:[#allocation59_spill] sm:$0xff] %v7739_v29  ;;  %12500 = vst [vmem:[#allocation60_spill] sm:$0xff] %v7745_v27  ;;  %v7751_v20 = vld [vmem:[%s11578_s4 + $0x148] sm:$0xff]  ;;  %v7757_v24 = vld [vmem:[%s11578_s4 + $0x158] sm:$0xff] }
 0x2cb   :  { %1655 = vmatpush1.msra.mxu0 %v7739_v29  ;;  %1726 = vmatpush1.msra.mxu1 %v7745_v27  ;;  %12501 = vst [vmem:[#allocation61_spill] sm:$0xff] %v7751_v20  ;;  %12502 = vst [vmem:[#allocation62_spill] sm:$0xff] %v7757_v24  ;;  %v7763_v29 = vld [vmem:[%s11578_s4 + $0x140] sm:$0xff]  ;;  %v7769_v27 = vld [vmem:[%s11578_s4 + $0x150] sm:$0xff] }
 0x2cc   :  { %1656 = vmatprep.subr.mxu0 %v7751_v20  ;;  %1727 = vmatprep.subr.mxu1 %v7757_v24  ;;  %12503 = vst [vmem:[#allocation63_spill] sm:$0xff] %v7763_v29  ;;  %12504 = vst [vmem:[#allocation64_spill] sm:$0xff] %v7769_v27  ;;  %v7775_v20 = vld [vmem:[%s11578_s4 + $0x128] sm:$0xff]  ;;  %v7781_v24 = vld [vmem:[%s11578_s4 + $0x138] sm:$0xff] }
 0x2cd   :  { %1657 = vmatpush1.msra.mxu0 %v7763_v29  ;;  %1728 = vmatpush1.msra.mxu1 %v7769_v27  ;;  %12505 = vst [vmem:[#allocation65_spill] sm:$0xff] %v7775_v20  ;;  %12506 = vst [vmem:[#allocation66_spill] sm:$0xff] %v7781_v24  ;;  %v7787_v29 = vld [vmem:[%s11578_s4 + $0x120] sm:$0xff]  ;;  %v7793_v27 = vld [vmem:[%s11578_s4 + $0x130] sm:$0xff] }
 0x2ce   :  { %1658 = vmatprep.subr.mxu0 %v7775_v20  ;;  %1729 = vmatprep.subr.mxu1 %v7781_v24  ;;  %12507 = vst [vmem:[#allocation67_spill] sm:$0xff] %v7787_v29  ;;  %12508 = vst [vmem:[#allocation68_spill] sm:$0xff] %v7793_v27  ;;  %v7799_v20 = vld [vmem:[%s11578_s4 + $0x108] sm:$0xff]  ;;  %v7805_v24 = vld [vmem:[%s11578_s4 + $0x118] sm:$0xff] }
 0x2cf   :  { %1659 = vmatpush1.msra.mxu0 %v7787_v29  ;;  %1730 = vmatpush1.msra.mxu1 %v7793_v27  ;;  %12509 = vst [vmem:[#allocation69_spill] sm:$0xff] %v7799_v20  ;;  %12510 = vst [vmem:[#allocation70_spill] sm:$0xff] %v7805_v24  ;;  %v7811_v29 = vld [vmem:[%s11578_s4 + $0x100] sm:$0xff]  ;;  %v7817_v27 = vld [vmem:[%s11578_s4 + $0x110] sm:$0xff] }
 0x2d0   :  { %1660 = vmatprep.subr.mxu0 %v7799_v20  ;;  %1731 = vmatprep.subr.mxu1 %v7805_v24  ;;  %12511 = vst [vmem:[#allocation71_spill] sm:$0xff] %v7811_v29  ;;  %12512 = vst [vmem:[#allocation72_spill] sm:$0xff] %v7817_v27  ;;  %v7823_v20 = vld [vmem:[%s11578_s4 + $0xe8] sm:$0xff]  ;;  %v7829_v24 = vld [vmem:[%s11578_s4 + $0xf8] sm:$0xff] }
 0x2d1   :  { %1661 = vmatpush1.msra.mxu0 %v7811_v29  ;;  %1732 = vmatpush1.msra.mxu1 %v7817_v27  ;;  %12513 = vst [vmem:[#allocation73_spill] sm:$0xff] %v7823_v20  ;;  %12514 = vst [vmem:[#allocation74_spill] sm:$0xff] %v7829_v24  ;;  %v7835_v29 = vld [vmem:[%s11578_s4 + $0xe0] sm:$0xff]  ;;  %v7841_v27 = vld [vmem:[%s11578_s4 + $0xf0] sm:$0xff] }
 0x2d2   :  { %1662 = vmatprep.subr.mxu0 %v7823_v20  ;;  %1733 = vmatprep.subr.mxu1 %v7829_v24  ;;  %12515 = vst [vmem:[#allocation75_spill] sm:$0xff] %v7835_v29  ;;  %12516 = vst [vmem:[#allocation76_spill] sm:$0xff] %v7841_v27  ;;  %v7847_v20 = vld [vmem:[%s11578_s4 + $0xc8] sm:$0xff]  ;;  %v7853_v24 = vld [vmem:[%s11578_s4 + $0xd8] sm:$0xff] }
 0x2d3   :  { %1663 = vmatpush1.msra.mxu0 %v7835_v29  ;;  %1734 = vmatpush1.msra.mxu1 %v7841_v27  ;;  %12517 = vst [vmem:[#allocation77_spill] sm:$0xff] %v7847_v20  ;;  %12518 = vst [vmem:[#allocation78_spill] sm:$0xff] %v7853_v24  ;;  %v7859_v29 = vld [vmem:[%s11578_s4 + $0xc0] sm:$0xff]  ;;  %v7865_v27 = vld [vmem:[%s11578_s4 + $0xd0] sm:$0xff] }
 0x2d4   :  { %1664 = vmatprep.subr.mxu0 %v7847_v20  ;;  %1735 = vmatprep.subr.mxu1 %v7853_v24  ;;  %12519 = vst [vmem:[#allocation79_spill] sm:$0xff] %v7859_v29  ;;  %12520 = vst [vmem:[#allocation80_spill] sm:$0xff] %v7865_v27  ;;  %v7871_v20 = vld [vmem:[%s11578_s4 + $0xa8] sm:$0xff]  ;;  %v7877_v24 = vld [vmem:[%s11578_s4 + $0xb8] sm:$0xff] }
 0x2d5   :  { %1665 = vmatpush1.msra.mxu0 %v7859_v29  ;;  %1736 = vmatpush1.msra.mxu1 %v7865_v27  ;;  %12521 = vst [vmem:[#allocation81_spill] sm:$0xff] %v7871_v20  ;;  %12522 = vst [vmem:[#allocation82_spill] sm:$0xff] %v7877_v24  ;;  %v7883_v29 = vld [vmem:[%s11578_s4 + $0xa0] sm:$0xff]  ;;  %v7889_v27 = vld [vmem:[%s11578_s4 + $0xb0] sm:$0xff] }
 0x2d6   :  { %1666 = vmatprep.subr.mxu0 %v7871_v20  ;;  %1737 = vmatprep.subr.mxu1 %v7877_v24  ;;  %12523 = vst [vmem:[#allocation83_spill] sm:$0xff] %v7883_v29  ;;  %12524 = vst [vmem:[#allocation84_spill] sm:$0xff] %v7889_v27  ;;  %v7895_v20 = vld [vmem:[%s11578_s4 + $0x88] sm:$0xff]  ;;  %v7901_v24 = vld [vmem:[%s11578_s4 + $0x98] sm:$0xff] }
 0x2d7   :  { %1667 = vmatpush1.msra.mxu0 %v7883_v29  ;;  %1738 = vmatpush1.msra.mxu1 %v7889_v27  ;;  %12525 = vst [vmem:[#allocation85_spill] sm:$0xff] %v7895_v20  ;;  %12526 = vst [vmem:[#allocation86_spill] sm:$0xff] %v7901_v24  ;;  %v7907_v29 = vld [vmem:[%s11578_s4 + $0x80] sm:$0xff]  ;;  %v7913_v27 = vld [vmem:[%s11578_s4 + $0x90] sm:$0xff] }
 0x2d8   :  { %1668 = vmatprep.subr.mxu0 %v7895_v20  ;;  %1739 = vmatprep.subr.mxu1 %v7901_v24  ;;  %12527 = vst [vmem:[#allocation87_spill] sm:$0xff] %v7907_v29  ;;  %12528 = vst [vmem:[#allocation88_spill] sm:$0xff] %v7913_v27  ;;  %v7919_v20 = vld [vmem:[%s11578_s4 + $0x68] sm:$0xff]  ;;  %v7925_v24 = vld [vmem:[%s11578_s4 + $0x78] sm:$0xff] }
 0x2d9   :  { %1669 = vmatpush1.msra.mxu0 %v7907_v29  ;;  %1740 = vmatpush1.msra.mxu1 %v7913_v27  ;;  %12529 = vst [vmem:[#allocation89_spill] sm:$0xff] %v7919_v20  ;;  %12530 = vst [vmem:[#allocation93_spill] sm:$0xff] %v7925_v24  ;;  %v7931_v29 = vld [vmem:[%s11578_s4 + $0x60] sm:$0xff]  ;;  %v7937_v27 = vld [vmem:[%s11578_s4 + $0x70] sm:$0xff] }
 0x2da   :  { %1670 = vmatprep.subr.mxu0 %v7919_v20  ;;  %1741 = vmatprep.subr.mxu1 %v7925_v24  ;;  %12531 = vst [vmem:[#allocation94_spill] sm:$0xff] %v7931_v29  ;;  %12532 = vst [vmem:[#allocation95_spill] sm:$0xff] %v7937_v27  ;;  %v7943_v20 = vld [vmem:[%s11578_s4 + $0x48] sm:$0xff]  ;;  %v7949_v24 = vld [vmem:[%s11578_s4 + $0x58] sm:$0xff] }
 0x2db   :  { %1671 = vmatpush1.msra.mxu0 %v7931_v29  ;;  %1742 = vmatpush1.msra.mxu1 %v7937_v27  ;;  %12533 = vst [vmem:[#allocation90_spill] sm:$0xff] %v7943_v20  ;;  %12534 = vst [vmem:[#allocation96_spill] sm:$0xff] %v7949_v24  ;;  %v7955_v29 = vld [vmem:[%s11578_s4 + $0x40] sm:$0xff]  ;;  %v7961_v27 = vld [vmem:[%s11578_s4 + $0x50] sm:$0xff] }
 0x2dc   :  { %1672 = vmatprep.subr.mxu0 %v7943_v20  ;;  %1743 = vmatprep.subr.mxu1 %v7949_v24  ;;  %12535 = vst [vmem:[#allocation97_spill] sm:$0xff] %v7955_v29  ;;  %12536 = vst [vmem:[#allocation98_spill] sm:$0xff] %v7961_v27  ;;  %v7967_v20 = vld [vmem:[%s11578_s4 + $0x28] sm:$0xff]  ;;  %v7973_v24 = vld [vmem:[%s11578_s4 + $0x38] sm:$0xff] }
 0x2dd   :  { %1673 = vmatpush1.msra.mxu0 %v7955_v29  ;;  %1744 = vmatpush1.msra.mxu1 %v7961_v27  ;;  %12537 = vst [vmem:[#allocation99_spill] sm:$0xff] %v7967_v20  ;;  %12538 = vst [vmem:[#allocation100_spill] sm:$0xff] %v7973_v24  ;;  %v7979_v29 = vld [vmem:[%s11578_s4 + $0x20] sm:$0xff]  ;;  %v7985_v27 = vld [vmem:[%s11578_s4 + $0x30] sm:$0xff] }
 0x2de   :  { %1674 = vmatprep.subr.mxu0 %v7967_v20  ;;  %1745 = vmatprep.subr.mxu1 %v7973_v24  ;;  %12539 = vst [vmem:[#allocation101_spill] sm:$0xff] %v7979_v29  ;;  %12540 = vst [vmem:[#allocation102_spill] sm:$0xff] %v7985_v27  ;;  %v7991_v20 = vld [vmem:[%s11578_s4 + $0x8] sm:$0xff]  ;;  %v7997_v24 = vld [vmem:[%s11578_s4 + $0x18] sm:$0xff] }
 0x2df   :  { %1675 = vmatpush1.msra.mxu0 %v7979_v29  ;;  %1746 = vmatpush1.msra.mxu1 %v7985_v27  ;;  %12541 = vst [vmem:[#allocation103_spill] sm:$0xff] %v7991_v20  ;;  %12542 = vst [vmem:[#allocation104_spill] sm:$0xff] %v7997_v24  ;;  %v8003_v29 = vld [vmem:[%s11578_s4] sm:$0xff]  ;;  %v8009_v27 = vld [vmem:[%s11578_s4 + $0x10] sm:$0xff] }
 0x2e0   :  { %1676 = vmatprep.subr.mxu0 %v7991_v20  ;;  %1747 = vmatprep.subr.mxu1 %v7997_v24  ;;  %12543 = vst [vmem:[#allocation105_spill] sm:$0xff] %v8003_v29  ;;  %12544 = vst [vmem:[#allocation106_spill] sm:$0xff] %v8009_v27  ;;  %v8017_v24 = vld [vmem:[%s11579_s5 + $0x1e8] sm:$0xff] }
 0x2e1   :  { %1677 = vmatpush1.msra.mxu0 %v8003_v29  ;;  %1748 = vmatpush1.msra.mxu1 %v8009_v27  ;;  %12545 = vst [vmem:[#allocation107_spill] sm:$0xff] %v8017_v24  ;;  %v8023_v29 = vld [vmem:[%s11579_s5 + $0x1f8] sm:$0xff] }
 0x2e2   :  { %1710 = vmatprep.mubr.f32.mxu0 %v12185_v59  ;;  %1781 = vmatprep.mubr.f32.mxu1 %v12185_v59  ;;  %12546 = vst [vmem:[#allocation108_spill] sm:$0xff] %v8023_v29 }
 0x2e3   :  { %1788 = vmatprep.subr.mxu0 %v8017_v24  ;;  %1859 = vmatprep.subr.mxu1 %v8023_v29 }
 0x33e   :  { %v1212_v20 = vpop.f32.mrf.mxu0  ;;  %v1283_v48 = vpop.f32.mrf.mxu1 }
 0x340   :  { %v1214_v27 = vpop.f32.mrf.mxu0  ;;  %v1285_v49 = vpop.f32.mrf.mxu1 }
 0x35f   :  { %v1354_v30 = vpop.f32.mrf.mxu0  ;;  %v1425_v60 = vpop.f32.mrf.mxu1 }
 0x361   :  { %v1356_v28 = vpop.f32.mrf.mxu0  ;;  %v1427_v3 = vpop.f32.mrf.mxu1 }
 0x381   :  { %v1524_v61 = vpop.f32.mrf.mxu0  ;;  %v1595_v29 = vpop.f32.mrf.mxu1 }
 0x382   :  { %v1604_v58 = vrot.slane %v1524_v61, 6  ;;  %v1606_v44 = vrot.slane %v1595_v29, 6  ;;  %v1636_v29 = vrot.slane %v7152_v4, 7 }
 0x383   :  { %v1526_v54 = vpop.f32.mrf.mxu0  ;;  %v1597_v26 = vpop.f32.mrf.mxu1 }
 0x384   :  { %v1612_v19 = vadd.f32 %v1604_v58, %v12390_v5  ;;  %v1605_v24 = vrot.slane %v1526_v54, 6  ;;  %v1614_v23 = vadd.f32 %v1606_v44, %v12392_v16  ;;  %v1607_v22 = vrot.slane %v1597_v26, 6 }
 0x386   :  { %v4653_v52 = vmul.f32 -1.442695, %v1612_v19  ;;  %v1613_v11 = vadd.f32 %v1605_v24, %v12391_v9  ;;  %v4655_v18 = vmul.f32 -1.442695, %v1614_v23  ;;  %v1615_v17 = vadd.f32 %v1607_v22, %v6614_v57 }
 0x387   :  { %v1215_v19 = vadd.f32 %v1214_v27, %v7143_v21 }
 0x388   :  { %v4654_v46 = vmul.f32 -1.442695, %v1613_v11  ;;  %4739 = vpow2.f32 %v4653_v52  ;;  %v1213_v11 = vadd.f32 %v1212_v20, %v7146_v25 }
 0x389   :  { %v1431_v52 = vadd.f32 %v1356_v28, %v1215_v19  ;;  %v1286_v19 = vadd.f32 %v1285_v49, %v7161_v8  ;;  %v8045_v49 = vld [vmem:[%s11579_s5 + $0x1e0] sm:$0xff] }
 0x38a   :  { %4741 = vpow2.f32 %v4654_v46  ;;  %v1430_v46 = vadd.f32 %v1354_v30, %v1213_v11 }
 0x38b   :  { %4743 = vpow2.f32 %v4655_v18  ;;  %v4651_v54 = vmul.f32 -1.442695, %v1431_v52  ;;  %v1433_v4 = vadd.f32 %v1427_v3, %v1286_v19  ;;  %v8051_v3 = vld [vmem:[%s11579_s5 + $0x1f0] sm:$0xff]  ;;  %v8118_v19 = vld [vmem:[%s11579_s5 + $0x180] sm:$0xff] }
 0x38c   :  { %v4650_v44 = vmul.f32 -1.442695, %v1430_v46 }
 0x395   :  { %v4740_v61 = vpop.eup %4739 }
 0x396   :  { %v1625_v15 = vadd.f32 1.0, %v4740_v61 }
 0x397   :  { %v4742_v58 = vpop.eup %4741 }
 0x398   :  { %4745 = vrcp.f32 %v1625_v15  ;;  %v1626_v24 = vadd.f32 1.0, %v4742_v58  ;;  %v4744_v23 = vpop.eup %4743 }
 0x399   :  { %4747 = vtanh.f32 %v1615_v17  ;;  %v1627_v27 = vadd.f32 1.0, %v4744_v23  ;;  %v1284_v17 = vadd.f32 %v1283_v48, %v7157_v45  ;;  %v8063_v48 = vld [vmem:[%s11579_s5 + $0x1d8] sm:$0xff] }
 0x39a   :  { %4749 = vrcp.f32 %v1626_v24 }
 0x39b   :  { %4751 = vpow2.f32 %v4651_v54  ;;  %v1432_v11 = vadd.f32 %v1425_v60, %v1284_v17  ;;  %v8057_v60 = vld [vmem:[%s11579_s5 + $0x1c8] sm:$0xff]  ;;  %v8111_v17 = vld [vmem:[%s11579_s5 + $0x198] sm:$0xff] }
 0x39c   :  { %4753 = vpow2.f32 %v4650_v44 }
 0x39d   :  { %4755 = vrcp.f32 %v1627_v27  ;;  %v4652_v52 = vmul.f32 -1.442695, %v1432_v11  ;;  %v8087_v27 = vld [vmem:[%s11579_s5 + $0x1b8] sm:$0xff] }
 0x3a5   :  { %v4746_v26 = vpop.eup %4745 }
 0x3a6   :  { %v4748_v22 = vpop.eup %4747 }
 0x3a7   :  { %v4750_v61 = vpop.eup %4749  ;;  %v1639_v15 = vmul.f32 %v4748_v22, %v4746_v26  ;;  %v8069_v26 = vld [vmem:[%s11579_s5 + $0x1c0] sm:$0xff]  ;;  %v8075_v22 = vld [vmem:[%s11579_s5 + $0x1d0] sm:$0xff] }
 0x3a8   :  { %v1638_v18 = vmul.f32 %v4750_v61, %v1636_v29  ;;  %v4752_v20 = vpop.eup %4751  ;;  %v8081_v61 = vld [vmem:[%s11579_s5 + $0x1a8] sm:$0xff] }
 0x3a9   :  { %v4754_v30 = vpop.eup %4753  ;;  %v1444_v28 = vadd.f32 1.0, %v4752_v20 }
 0x3aa   :  { %v8033_v58 = vadd.f32 %v1639_v15, %v1638_v18  ;;  %v1443_v24 = vadd.f32 1.0, %v4754_v30  ;;  %v4756_v46 = vpop.eup %4755  ;;  %v8093_v18 = vld [vmem:[%s11579_s5 + $0x1a0] sm:$0xff]  ;;  %v8099_v15 = vld [vmem:[%s11579_s5 + $0x1b0] sm:$0xff]  ;;  %v8105_v30 = vld [vmem:[%s11579_s5 + $0x188] sm:$0xff] }
 0x3ac   :  { %4757 = vtanh.f32 %v8033_v58 }
 0x3ad   :  { %4759 = vrcp.f32 %v1444_v28 }
 0x3ae   :  { %4761 = vrcp.f32 %v1443_v24  ;;  %v8124_v24 = vld [vmem:[%s11579_s5 + $0x190] sm:$0xff] }
 0x3af   :  { %4763 = vtanh.f32 %v1433_v4  ;;  %v8130_v4 = vld [vmem:[%s11579_s5 + $0x168] sm:$0xff] }
 0x3b0   :  { %4765 = vpow2.f32 %v4652_v52 }
 0x3b9   :  { %v4758_v54 = vpop.eup %4757 }
 0x3ba   :  { %v1642_v44 = vmul.f32 %v4758_v54, %v4756_v46  ;;  %v4760_v29 = vpop.eup %4759  ;;  %v8142_v46 = vld [vmem:[%s11579_s5 + $0x160] sm:$0xff]  ;;  %v8148_v54 = vld [vmem:[%s11579_s5 + $0x170] sm:$0xff] }
 0x3bb   :  { %v4762_v20 = vpop.eup %4761  ;;  %v1453_v28 = vmul.f32 %v4760_v29, %v7189_v35  ;;  %v8136_v35 = vld [vmem:[%s11579_s5 + $0x178] sm:$0xff]  ;;  %12547 = vst [vmem:[#allocation109_spill] sm:$0xff] %v8148_v54  ;;  %v8154_v29 = vld [vmem:[%s11579_s5 + $0x148] sm:$0xff] }
 0x3bc   :  { %v8038_v23 = vrot.slane %v1642_v44, 2  ;;  %v4764_v11 = vpop.eup %4763  ;;  %12548 = vst [vmem:[#allocation110_spill] sm:$0xff] %v8154_v29 }
 0x3bd   :  { %v1454_v52 = vmul.f32 %v4764_v11, %v4762_v20  ;;  %v4766_v44 = vpop.eup %4765  ;;  %v8160_v20 = vld [vmem:[%s11579_s5 + $0x158] sm:$0xff] }
 0x3be   :  { %1711 = vmatmul.mubr.f32.vlgmr.msra.gmra.mxu0 %v8038_v23  ;;  %1782 = vmatmul.mubr.f32.vlgmr.msra.gmra.mxu1 %v8038_v23  ;;  %12549 = vst [vmem:[#allocation111_spill] sm:$0xff] %v8160_v20 }
 0x3bf   :  { %1789 = vmatpush1.msra.mxu0 %v8045_v49  ;;  %1860 = vmatpush1.msra.mxu1 %v8051_v3  ;;  %v8163_v11 = vadd.f32 %v1454_v52, %v1453_v28  ;;  %v8186_v28 = vld [vmem:[%s11579_s5 + $0x138] sm:$0xff]  ;;  %v1445_v52 = vadd.f32 1.0, %v4766_v44 }
 0x3c0   :  { %1790 = vmatprep.subr.mxu0 %v8057_v60  ;;  %1861 = vmatprep.subr.mxu1 %v8063_v48  ;;  %12553 = vst [vmem:[#allocation115_spill] sm:$0xff] %v8186_v28  ;;  %v8210_v44 = vld [vmem:[%s11579_s5 + $0x118] sm:$0xff] }
 0x3c1   :  { %1791 = vmatpush1.msra.mxu0 %v8069_v26  ;;  %1862 = vmatpush1.msra.mxu1 %v8075_v22  ;;  %12557 = vst [vmem:[#allocation119_spill] sm:$0xff] %v8210_v44  ;;  %4767 = vtanh.f32 %v8163_v11 }
 0x3c2   :  { %1792 = vmatprep.subr.mxu0 %v8081_v61  ;;  %1863 = vmatprep.subr.mxu1 %v8087_v27  ;;  %4769 = vrcp.f32 %v1445_v52  ;;  %v8259_v52 = vld [vmem:[%s11579_s5 + $0xd8] sm:$0xff] }
 0x3c3   :  { %1793 = vmatpush1.msra.mxu0 %v8093_v18  ;;  %1864 = vmatpush1.msra.mxu1 %v8099_v15  ;;  %12565 = vst [vmem:[#allocation127_spill] sm:$0xff] %v8259_v52 }
 0x3c4   :  { %1794 = vmatprep.subr.mxu0 %v8105_v30  ;;  %1865 = vmatprep.subr.mxu1 %v8111_v17 }
 0x3c5   :  { %1795 = vmatpush1.msra.mxu0 %v8118_v19  ;;  %1866 = vmatpush1.msra.mxu1 %v8124_v24 }
 0x3c6   :  { %1796 = vmatprep.subr.mxu0 %v8130_v4  ;;  %1867 = vmatprep.subr.mxu1 %v8136_v35 }
 0x3c7   :  { %1797 = vmatpush1.msra.mxu0 %v8142_v46  ;;  %1868 = vmatpush1.msra.mxu1 %v8148_v54  ;;  %v8168_v54 = vld [vmem:[%s11579_s5 + $0x140] sm:$0xff] }
 0x3c8   :  { %1798 = vmatprep.subr.mxu0 %v8154_v29  ;;  %1869 = vmatprep.subr.mxu1 %v8160_v20  ;;  %12550 = vst [vmem:[#allocation112_spill] sm:$0xff] %v8168_v54  ;;  %v8174_v29 = vld [vmem:[%s11579_s5 + $0x150] sm:$0xff]  ;;  %v8180_v20 = vld [vmem:[%s11579_s5 + $0x128] sm:$0xff] }
 0x3c9   :  { %1799 = vmatpush1.msra.mxu0 %v8168_v54  ;;  %12551 = vst [vmem:[#allocation113_spill] sm:$0xff] %v8174_v29  ;;  %1870 = vmatpush1.msra.mxu1 %v8174_v29  ;;  %12552 = vst [vmem:[#allocation114_spill] sm:$0xff] %v8180_v20  ;;  %v8192_v54 = vld [vmem:[%s11579_s5 + $0x120] sm:$0xff]  ;;  %v8198_v29 = vld [vmem:[%s11579_s5 + $0x130] sm:$0xff] }
 0x3ca   :  { %1800 = vmatprep.subr.mxu0 %v8180_v20  ;;  %1871 = vmatprep.subr.mxu1 %v8186_v28  ;;  %12554 = vst [vmem:[#allocation116_spill] sm:$0xff] %v8192_v54  ;;  %12555 = vst [vmem:[#allocation117_spill] sm:$0xff] %v8198_v29  ;;  %v8204_v20 = vld [vmem:[%s11579_s5 + $0x108] sm:$0xff] }
 0x3cb   :  { %1801 = vmatpush1.msra.mxu0 %v8192_v54  ;;  %1872 = vmatpush1.msra.mxu1 %v8198_v29  ;;  %12556 = vst [vmem:[#allocation118_spill] sm:$0xff] %v8204_v20  ;;  %v8217_v29 = vld [vmem:[%s11579_s5 + $0x100] sm:$0xff]  ;;  %v8235_v54 = vld [vmem:[%s11579_s5 + $0xf8] sm:$0xff]  ;;  %v8397_v28 = vld [vmem:[%s11579_s5 + $0x8] sm:$0xff] }
 0x3cc   :  { %1802 = vmatprep.subr.mxu0 %v8204_v20  ;;  %1873 = vmatprep.subr.mxu1 %v8210_v44  ;;  %12558 = vst [vmem:[#allocation120_spill] sm:$0xff] %v8217_v29  ;;  %v8223_v20 = vld [vmem:[%s11579_s5 + $0x110] sm:$0xff]  ;;  %v8229_v44 = vld [vmem:[%s11579_s5 + $0xe8] sm:$0xff]  ;;  %12561 = vst [vmem:[#allocation123_spill] sm:$0xff] %v8235_v54 }
 0x3cd   :  { %1803 = vmatpush1.msra.mxu0 %v8217_v29  ;;  %12559 = vst [vmem:[#allocation121_spill] sm:$0xff] %v8223_v20  ;;  %1874 = vmatpush1.msra.mxu1 %v8223_v20  ;;  %12560 = vst [vmem:[#allocation122_spill] sm:$0xff] %v8229_v44  ;;  %v8241_v29 = vld [vmem:[%s11579_s5 + $0xe0] sm:$0xff]  ;;  %v8247_v20 = vld [vmem:[%s11579_s5 + $0xf0] sm:$0xff] }
 0x3ce   :  { %1804 = vmatprep.subr.mxu0 %v8229_v44  ;;  %1875 = vmatprep.subr.mxu1 %v8235_v54  ;;  %12562 = vst [vmem:[#allocation124_spill] sm:$0xff] %v8241_v29  ;;  %12563 = vst [vmem:[#allocation125_spill] sm:$0xff] %v8247_v20  ;;  %v8253_v44 = vld [vmem:[%s11579_s5 + $0xc8] sm:$0xff] }
 0x3cf   :  { %1805 = vmatpush1.msra.mxu0 %v8241_v29  ;;  %1876 = vmatpush1.msra.mxu1 %v8247_v20  ;;  %12564 = vst [vmem:[#allocation126_spill] sm:$0xff] %v8253_v44  ;;  %v8265_v29 = vld [vmem:[%s11579_s5 + $0xc0] sm:$0xff]  ;;  %v8271_v20 = vld [vmem:[%s11579_s5 + $0xd0] sm:$0xff]  ;;  %v8373_v54 = vld [vmem:[%s11579_s5 + $0x28] sm:$0xff] }
 0x3d0   :  { %1806 = vmatprep.subr.mxu0 %v8253_v44  ;;  %1877 = vmatprep.subr.mxu1 %v8259_v52  ;;  %12566 = vst [vmem:[#allocation128_spill] sm:$0xff] %v8265_v29  ;;  %12567 = vst [vmem:[#allocation129_spill] sm:$0xff] %v8271_v20  ;;  %v8277_v44 = vld [vmem:[%s11579_s5 + $0xa8] sm:$0xff]  ;;  %v8283_v52 = vld [vmem:[%s11579_s5 + $0xb8] sm:$0xff] }
 0x3d1   :  { %1807 = vmatpush1.msra.mxu0 %v8265_v29  ;;  %1878 = vmatpush1.msra.mxu1 %v8271_v20  ;;  %12568 = vst [vmem:[#allocation130_spill] sm:$0xff] %v8277_v44  ;;  %12569 = vst [vmem:[#allocation131_spill] sm:$0xff] %v8283_v52  ;;  %v8289_v29 = vld [vmem:[%s11579_s5 + $0xa0] sm:$0xff]  ;;  %v8295_v20 = vld [vmem:[%s11579_s5 + $0xb0] sm:$0xff] }
 0x3d2   :  { %1808 = vmatprep.subr.mxu0 %v8277_v44  ;;  %1879 = vmatprep.subr.mxu1 %v8283_v52  ;;  %12570 = vst [vmem:[#allocation132_spill] sm:$0xff] %v8289_v29  ;;  %12571 = vst [vmem:[#allocation133_spill] sm:$0xff] %v8295_v20  ;;  %v8301_v44 = vld [vmem:[%s11579_s5 + $0x88] sm:$0xff]  ;;  %v8307_v52 = vld [vmem:[%s11579_s5 + $0x98] sm:$0xff] }
 0x3d3   :  { %1809 = vmatpush1.msra.mxu0 %v8289_v29  ;;  %1880 = vmatpush1.msra.mxu1 %v8295_v20  ;;  %12572 = vst [vmem:[#allocation134_spill] sm:$0xff] %v8301_v44  ;;  %12573 = vst [vmem:[#allocation135_spill] sm:$0xff] %v8307_v52  ;;  %v8313_v29 = vld [vmem:[%s11579_s5 + $0x80] sm:$0xff]  ;;  %v8319_v20 = vld [vmem:[%s11579_s5 + $0x90] sm:$0xff] }
 0x3d4   :  { %1810 = vmatprep.subr.mxu0 %v8301_v44  ;;  %1881 = vmatprep.subr.mxu1 %v8307_v52  ;;  %12574 = vst [vmem:[#allocation136_spill] sm:$0xff] %v8313_v29  ;;  %12575 = vst [vmem:[#allocation137_spill] sm:$0xff] %v8319_v20  ;;  %v8325_v44 = vld [vmem:[%s11579_s5 + $0x68] sm:$0xff]  ;;  %v8331_v52 = vld [vmem:[%s11579_s5 + $0x78] sm:$0xff] }
 0x3d5   :  { %1811 = vmatpush1.msra.mxu0 %v8313_v29  ;;  %1882 = vmatpush1.msra.mxu1 %v8319_v20  ;;  %12576 = vst [vmem:[#allocation138_spill] sm:$0xff] %v8325_v44  ;;  %12577 = vst [vmem:[#allocation139_spill] sm:$0xff] %v8331_v52  ;;  %v8337_v29 = vld [vmem:[%s11579_s5 + $0x60] sm:$0xff]  ;;  %v8343_v20 = vld [vmem:[%s11579_s5 + $0x70] sm:$0xff] }
 0x3d6   :  { %1812 = vmatprep.subr.mxu0 %v8325_v44  ;;  %1883 = vmatprep.subr.mxu1 %v8331_v52  ;;  %12578 = vst [vmem:[#allocation140_spill] sm:$0xff] %v8337_v29  ;;  %12579 = vst [vmem:[#allocation141_spill] sm:$0xff] %v8343_v20  ;;  %v8349_v44 = vld [vmem:[%s11579_s5 + $0x48] sm:$0xff]  ;;  %v8355_v52 = vld [vmem:[%s11579_s5 + $0x58] sm:$0xff] }
 0x3d7   :  { %1813 = vmatpush1.msra.mxu0 %v8337_v29  ;;  %1884 = vmatpush1.msra.mxu1 %v8343_v20  ;;  %12580 = vst [vmem:[#allocation142_spill] sm:$0xff] %v8349_v44  ;;  %12581 = vst [vmem:[#allocation143_spill] sm:$0xff] %v8355_v52  ;;  %v8361_v29 = vld [vmem:[%s11579_s5 + $0x40] sm:$0xff]  ;;  %v8367_v20 = vld [vmem:[%s11579_s5 + $0x50] sm:$0xff] }
 0x3d8   :  { %1814 = vmatprep.subr.mxu0 %v8349_v44  ;;  %1885 = vmatprep.subr.mxu1 %v8355_v52  ;;  %12582 = vst [vmem:[#allocation144_spill] sm:$0xff] %v8361_v29  ;;  %12583 = vst [vmem:[#allocation145_spill] sm:$0xff] %v8367_v20  ;;  %v4768_v44 = vpop.eup %4767  ;;  %v8379_v52 = vld [vmem:[%s11579_s5 + $0x38] sm:$0xff] }
 0x3d9   :  { %1815 = vmatpush1.msra.mxu0 %v8361_v29  ;;  %1886 = vmatpush1.msra.mxu1 %v8367_v20  ;;  %12584 = vst [vmem:[#allocation146_spill] sm:$0xff] %v8373_v54  ;;  %12585 = vst [vmem:[#allocation147_spill] sm:$0xff] %v8379_v52  ;;  %v8385_v29 = vld [vmem:[%s11579_s5 + $0x20] sm:$0xff]  ;;  %v8391_v20 = vld [vmem:[%s11579_s5 + $0x30] sm:$0xff] }
 0x3da   :  { %1816 = vmatprep.subr.mxu0 %v8373_v54  ;;  %1887 = vmatprep.subr.mxu1 %v8379_v52  ;;  %12586 = vst [vmem:[#allocation148_spill] sm:$0xff] %v8385_v29  ;;  %12587 = vst [vmem:[#allocation149_spill] sm:$0xff] %v8391_v20  ;;  %v4770_v54 = vpop.eup %4769  ;;  %v8403_v52 = vld [vmem:[%s11579_s5 + $0x18] sm:$0xff] }
 0x3db   :  { %1817 = vmatpush1.msra.mxu0 %v8385_v29  ;;  %1888 = vmatpush1.msra.mxu1 %v8391_v20  ;;  %12588 = vst [vmem:[#allocation150_spill] sm:$0xff] %v8397_v28  ;;  %v8409_v29 = vld [vmem:[%s11579_s5] sm:$0xff]  ;;  %v8413_v20 = vmul.f32 %v4770_v54, %v4768_v44  ;;  %v12620_v44 = vld [vmem:[#allocation36_spill] sm:$0xff] }
 0x3dc   :  { %1818 = vmatprep.subr.mxu0 %v8397_v28  ;;  %1889 = vmatprep.subr.mxu1 %v8403_v52  ;;  %v8418_v28 = vld [vmem:[%s11579_s5 + $0x10] sm:$0xff]  ;;  %v12619_v54 = vld [vmem:[#allocation35_spill] sm:$0xff] }
 0x3dd   :  { %1819 = vmatpush1.msra.mxu0 %v8409_v29  ;;  %1852 = vmatprep.mubr.f32.mxu0 %v12185_v59  ;;  %12589 = vst [vmem:[#allocation151_spill] sm:$0xff] %v8413_v20 }
 0x3de   :  { %1890 = vmatpush1.msra.mxu1 %v8418_v28  ;;  %1923 = vmatprep.mubr.f32.mxu1 %v12185_v59 }
 0x3df   :  { %1853 = vmatmul.mubr.f32.vlgmr.msra.gmra.mxu0 %v8413_v20  ;;  %1924 = vmatmul.mubr.f32.vlgmr.msra.gmra.mxu1 %v8413_v20  ;;  %v8957_v20 = vld [vmem:[%s11576_s2 + $0x70] sm:$0xff] }
 0x3e0   :  { %1958 = vmatprep.subr.mxu0 %v7243_v51  ;;  %2029 = vmatprep.subr.mxu1 %v7249_v47  ;;  %v12590_v51 = vld [vmem:[#allocation6_spill] sm:$0xff]  ;;  %v12591_v47 = vld [vmem:[#allocation7_spill] sm:$0xff] }
 0x3e1   :  { %1959 = vmatpush1.msra.mxu0 %v7255_v50  ;;  %2030 = vmatpush1.msra.mxu1 %v7261_v56  ;;  %v12592_v50 = vld [vmem:[#allocation8_spill] sm:$0xff]  ;;  %v12593_v56 = vld [vmem:[#allocation9_spill] sm:$0xff] }
 0x3e2   :  { %1960 = vmatprep.subr.mxu0 %v7267_v62  ;;  %2031 = vmatprep.subr.mxu1 %v7273_v55  ;;  %v12594_v62 = vld [vmem:[#allocation10_spill] sm:$0xff]  ;;  %v12595_v55 = vld [vmem:[#allocation11_spill] sm:$0xff] }
 0x3e3   :  { %1961 = vmatpush1.msra.mxu0 %v7279_v0  ;;  %2032 = vmatpush1.msra.mxu1 %v7285_v63  ;;  %v12596_v0 = vld [vmem:[#allocation12_spill] sm:$0xff]  ;;  %v12597_v63 = vld [vmem:[#allocation13_spill] sm:$0xff] }
 0x3e4   :  { %1962 = vmatprep.subr.mxu0 %v7291_v31  ;;  %2033 = vmatprep.subr.mxu1 %v7297_v32  ;;  %v12598_v31 = vld [vmem:[#allocation14_spill] sm:$0xff]  ;;  %v12599_v32 = vld [vmem:[#allocation15_spill] sm:$0xff] }
 0x3e5   :  { %1963 = vmatpush1.msra.mxu0 %v7303_v33  ;;  %2034 = vmatpush1.msra.mxu1 %v7309_v34  ;;  %v12600_v33 = vld [vmem:[#allocation16_spill] sm:$0xff]  ;;  %v12601_v34 = vld [vmem:[#allocation17_spill] sm:$0xff] }
 0x3e6   :  { %1964 = vmatprep.subr.mxu0 %v7315_v36  ;;  %2035 = vmatprep.subr.mxu1 %v7321_v37  ;;  %v12602_v36 = vld [vmem:[#allocation18_spill] sm:$0xff]  ;;  %v12603_v37 = vld [vmem:[#allocation19_spill] sm:$0xff] }
 0x3e7   :  { %1965 = vmatpush1.msra.mxu0 %v7327_v38  ;;  %2036 = vmatpush1.msra.mxu1 %v7333_v39  ;;  %v12604_v38 = vld [vmem:[#allocation20_spill] sm:$0xff]  ;;  %v12605_v39 = vld [vmem:[#allocation21_spill] sm:$0xff] }
 0x3e8   :  { %1966 = vmatprep.subr.mxu0 %v7339_v40  ;;  %2037 = vmatprep.subr.mxu1 %v7345_v42  ;;  %v12606_v40 = vld [vmem:[#allocation22_spill] sm:$0xff]  ;;  %v12607_v42 = vld [vmem:[#allocation23_spill] sm:$0xff] }
 0x3e9   :  { %1967 = vmatpush1.msra.mxu0 %v7351_v53  ;;  %2038 = vmatpush1.msra.mxu1 %v7357_v1  ;;  %v12608_v53 = vld [vmem:[#allocation24_spill] sm:$0xff]  ;;  %v12609_v1 = vld [vmem:[#allocation25_spill] sm:$0xff] }
 0x3ea   :  { %1968 = vmatprep.subr.mxu0 %v7363_v41  ;;  %2039 = vmatprep.subr.mxu1 %v7369_v43  ;;  %v12610_v41 = vld [vmem:[#allocation26_spill] sm:$0xff]  ;;  %v12611_v43 = vld [vmem:[#allocation27_spill] sm:$0xff] }
 0x3eb   :  { %1969 = vmatpush1.msra.mxu0 %v7375_v6  ;;  %2040 = vmatpush1.msra.mxu1 %v7381_v7  ;;  %v12612_v6 = vld [vmem:[#allocation28_spill] sm:$0xff]  ;;  %v12613_v7 = vld [vmem:[#allocation29_spill] sm:$0xff] }
 0x3ec   :  { %1970 = vmatprep.subr.mxu0 %v7387_v10  ;;  %2041 = vmatprep.subr.mxu1 %v7393_v2  ;;  %v12614_v10 = vld [vmem:[#allocation30_spill] sm:$0xff]  ;;  %v12615_v2 = vld [vmem:[#allocation31_spill] sm:$0xff]  ;;  %12756 = vst [vmem:[#allocation29_spill] sm:$0xff] %v8957_v20 }
 0x3ed   :  { %1971 = vmatpush1.msra.mxu0 %v7399_v12  ;;  %2042 = vmatpush1.msra.mxu1 %v7405_v13  ;;  %v12616_v12 = vld [vmem:[#allocation32_spill] sm:$0xff]  ;;  %v12617_v13 = vld [vmem:[#allocation33_spill] sm:$0xff] }
 0x3ee   :  { %1972 = vmatprep.subr.mxu0 %v7411_v14  ;;  %2043 = vmatprep.subr.mxu1 %v12590_v51  ;;  %v12618_v14 = vld [vmem:[#allocation34_spill] sm:$0xff]  ;;  %v12621_v51 = vld [vmem:[#allocation37_spill] sm:$0xff] }
 0x3ef   :  { %1973 = vmatpush1.msra.mxu0 %v12591_v47  ;;  %2044 = vmatpush1.msra.mxu1 %v12592_v50  ;;  %v12622_v47 = vld [vmem:[#allocation38_spill] sm:$0xff]  ;;  %v12623_v50 = vld [vmem:[#allocation39_spill] sm:$0xff] }
 0x3f0   :  { %1974 = vmatprep.subr.mxu0 %v12593_v56  ;;  %2045 = vmatprep.subr.mxu1 %v12594_v62  ;;  %v12624_v56 = vld [vmem:[#allocation40_spill] sm:$0xff]  ;;  %v12625_v62 = vld [vmem:[#allocation41_spill] sm:$0xff] }
 0x3f1   :  { %1975 = vmatpush1.msra.mxu0 %v12595_v55  ;;  %2046 = vmatpush1.msra.mxu1 %v12596_v0  ;;  %v12626_v55 = vld [vmem:[#allocation42_spill] sm:$0xff]  ;;  %v12627_v0 = vld [vmem:[#allocation43_spill] sm:$0xff] }
 0x3f2   :  { %1976 = vmatprep.subr.mxu0 %v12597_v63  ;;  %2047 = vmatprep.subr.mxu1 %v12598_v31  ;;  %v12628_v63 = vld [vmem:[#allocation44_spill] sm:$0xff]  ;;  %v12629_v31 = vld [vmem:[#allocation45_spill] sm:$0xff] }
 0x3f3   :  { %1977 = vmatpush1.msra.mxu0 %v12599_v32  ;;  %2048 = vmatpush1.msra.mxu1 %v12600_v33  ;;  %v12630_v32 = vld [vmem:[#allocation46_spill] sm:$0xff]  ;;  %v12631_v33 = vld [vmem:[#allocation47_spill] sm:$0xff] }
 0x3f4   :  { %1978 = vmatprep.subr.mxu0 %v12601_v34  ;;  %2049 = vmatprep.subr.mxu1 %v12602_v36  ;;  %v12632_v34 = vld [vmem:[#allocation48_spill] sm:$0xff]  ;;  %v12633_v36 = vld [vmem:[#allocation49_spill] sm:$0xff] }
 0x3f5   :  { %1979 = vmatpush1.msra.mxu0 %v12603_v37  ;;  %2050 = vmatpush1.msra.mxu1 %v12604_v38  ;;  %v12634_v37 = vld [vmem:[#allocation50_spill] sm:$0xff]  ;;  %v12636_v38 = vld [vmem:[#allocation52_spill] sm:$0xff] }
 0x3f6   :  { %1980 = vmatprep.subr.mxu0 %v12605_v39  ;;  %2051 = vmatprep.subr.mxu1 %v12606_v40  ;;  %v12637_v39 = vld [vmem:[#allocation53_spill] sm:$0xff]  ;;  %v12638_v40 = vld [vmem:[#allocation54_spill] sm:$0xff] }
 0x3f7   :  { %1981 = vmatpush1.msra.mxu0 %v12607_v42  ;;  %2052 = vmatpush1.msra.mxu1 %v12608_v53  ;;  %v12639_v42 = vld [vmem:[#allocation55_spill] sm:$0xff]  ;;  %v12640_v53 = vld [vmem:[#allocation56_spill] sm:$0xff] }
 0x3f8   :  { %1982 = vmatprep.subr.mxu0 %v12609_v1  ;;  %2053 = vmatprep.subr.mxu1 %v12610_v41  ;;  %v12641_v1 = vld [vmem:[#allocation57_spill] sm:$0xff]  ;;  %v12642_v41 = vld [vmem:[#allocation58_spill] sm:$0xff] }
 0x3f9   :  { %1983 = vmatpush1.msra.mxu0 %v12611_v43  ;;  %2054 = vmatpush1.msra.mxu1 %v12612_v6  ;;  %v12643_v43 = vld [vmem:[#allocation59_spill] sm:$0xff]  ;;  %v12644_v6 = vld [vmem:[#allocation60_spill] sm:$0xff] }
 0x3fa   :  { %1984 = vmatprep.subr.mxu0 %v12613_v7  ;;  %2055 = vmatprep.subr.mxu1 %v12614_v10  ;;  %v12645_v7 = vld [vmem:[#allocation61_spill] sm:$0xff]  ;;  %v12646_v10 = vld [vmem:[#allocation62_spill] sm:$0xff] }
 0x3fb   :  { %1985 = vmatpush1.msra.mxu0 %v12615_v2  ;;  %2056 = vmatpush1.msra.mxu1 %v12616_v12  ;;  %v12647_v2 = vld [vmem:[#allocation63_spill] sm:$0xff]  ;;  %v12648_v12 = vld [vmem:[#allocation64_spill] sm:$0xff] }
 0x3fc   :  { %1986 = vmatprep.subr.mxu0 %v12617_v13  ;;  %2057 = vmatprep.subr.mxu1 %v12618_v14  ;;  %v12649_v13 = vld [vmem:[#allocation65_spill] sm:$0xff]  ;;  %v12650_v14 = vld [vmem:[#allocation66_spill] sm:$0xff] }
 0x3fd   :  { %1987 = vmatpush1.msra.mxu0 %v12619_v54  ;;  %2058 = vmatpush1.msra.mxu1 %v12620_v44  ;;  %v12651_v54 = vld [vmem:[#allocation67_spill] sm:$0xff]  ;;  %v12652_v44 = vld [vmem:[#allocation68_spill] sm:$0xff] }
 0x3fe   :  { %1988 = vmatprep.subr.mxu0 %v12621_v51  ;;  %2059 = vmatprep.subr.mxu1 %v12622_v47  ;;  %v12653_v51 = vld [vmem:[#allocation69_spill] sm:$0xff]  ;;  %v12654_v47 = vld [vmem:[#allocation70_spill] sm:$0xff] }
 0x3ff   :  { %1989 = vmatpush1.msra.mxu0 %v12623_v50  ;;  %2022 = vmatprep.mubr.f32.mxu0 %v12185_v59  ;;  %v12655_v50 = vld [vmem:[#allocation71_spill] sm:$0xff] }
 0x400   :  { %2060 = vmatpush1.msra.mxu1 %v12624_v56  ;;  %2093 = vmatprep.mubr.f32.mxu1 %v12185_v59  ;;  %v12656_v56 = vld [vmem:[#allocation72_spill] sm:$0xff] }
 0x401   :  { %2023 = vmatmul.mubr.f32.vlgmr.msra.gmra.mxu0 %v8038_v23  ;;  %2094 = vmatmul.mubr.f32.vlgmr.msra.gmra.mxu1 %v8038_v23  ;;  %v12635_v23 = vld [vmem:[#allocation51_spill] sm:$0xff] }
 0x402   :  { %2146 = vmatprep.subr.mxu0 %v12625_v62  ;;  %2217 = vmatprep.subr.mxu1 %v12626_v55  ;;  %v12657_v62 = vld [vmem:[#allocation73_spill] sm:$0xff]  ;;  %v12658_v55 = vld [vmem:[#allocation74_spill] sm:$0xff] }
 0x403   :  { %2147 = vmatpush1.msra.mxu0 %v12627_v0  ;;  %2218 = vmatpush1.msra.mxu1 %v12628_v63  ;;  %v12659_v0 = vld [vmem:[#allocation75_spill] sm:$0xff]  ;;  %v12660_v63 = vld [vmem:[#allocation76_spill] sm:$0xff] }
 0x404   :  { %2148 = vmatprep.subr.mxu0 %v12629_v31  ;;  %2219 = vmatprep.subr.mxu1 %v12630_v32  ;;  %v12661_v31 = vld [vmem:[#allocation77_spill] sm:$0xff]  ;;  %v12662_v32 = vld [vmem:[#allocation78_spill] sm:$0xff] }
 0x405   :  { %2149 = vmatpush1.msra.mxu0 %v12631_v33  ;;  %2220 = vmatpush1.msra.mxu1 %v12632_v34  ;;  %v12663_v33 = vld [vmem:[#allocation79_spill] sm:$0xff]  ;;  %v12664_v34 = vld [vmem:[#allocation80_spill] sm:$0xff] }
 0x406   :  { %2150 = vmatprep.subr.mxu0 %v12633_v36  ;;  %2221 = vmatprep.subr.mxu1 %v12634_v37  ;;  %v12665_v36 = vld [vmem:[#allocation81_spill] sm:$0xff]  ;;  %v12666_v37 = vld [vmem:[#allocation82_spill] sm:$0xff] }
 0x407   :  { %2151 = vmatpush1.msra.mxu0 %v12635_v23  ;;  %2222 = vmatpush1.msra.mxu1 %v12636_v38  ;;  %v12667_v23 = vld [vmem:[#allocation83_spill] sm:$0xff]  ;;  %v12668_v38 = vld [vmem:[#allocation84_spill] sm:$0xff] }
 0x408   :  { %2152 = vmatprep.subr.mxu0 %v12637_v39  ;;  %2223 = vmatprep.subr.mxu1 %v12638_v40  ;;  %v12669_v39 = vld [vmem:[#allocation85_spill] sm:$0xff]  ;;  %v12670_v40 = vld [vmem:[#allocation86_spill] sm:$0xff] }
 0x409   :  { %2153 = vmatpush1.msra.mxu0 %v12639_v42  ;;  %2224 = vmatpush1.msra.mxu1 %v12640_v53  ;;  %v12671_v42 = vld [vmem:[#allocation87_spill] sm:$0xff]  ;;  %v12672_v53 = vld [vmem:[#allocation88_spill] sm:$0xff] }
 0x40a   :  { %2154 = vmatprep.subr.mxu0 %v12641_v1  ;;  %2225 = vmatprep.subr.mxu1 %v12642_v41  ;;  %v12673_v1 = vld [vmem:[#allocation89_spill] sm:$0xff] }
 0x40b   :  { %2155 = vmatpush1.msra.mxu0 %v12643_v43  ;;  %2226 = vmatpush1.msra.mxu1 %v12644_v6  ;;  %v12674_v41 = vld [vmem:[#allocation93_spill] sm:$0xff]  ;;  %v12675_v43 = vld [vmem:[#allocation94_spill] sm:$0xff]  ;;  %v12676_v6 = vld [vmem:[#allocation95_spill] sm:$0xff] }
 0x40c   :  { %2156 = vmatprep.subr.mxu0 %v12645_v7  ;;  %2227 = vmatprep.subr.mxu1 %v12646_v10  ;;  %v12677_v7 = vld [vmem:[#allocation90_spill] sm:$0xff]  ;;  %v12678_v10 = vld [vmem:[#allocation96_spill] sm:$0xff] }
 0x40d   :  { %2157 = vmatpush1.msra.mxu0 %v12647_v2  ;;  %2228 = vmatpush1.msra.mxu1 %v12648_v12  ;;  %v12679_v2 = vld [vmem:[#allocation97_spill] sm:$0xff]  ;;  %v12680_v12 = vld [vmem:[#allocation98_spill] sm:$0xff] }
 0x40e   :  { %2158 = vmatprep.subr.mxu0 %v12649_v13  ;;  %2229 = vmatprep.subr.mxu1 %v12650_v14  ;;  %v12681_v13 = vld [vmem:[#allocation99_spill] sm:$0xff]  ;;  %v12682_v14 = vld [vmem:[#allocation100_spill] sm:$0xff] }
 0x40f   :  { %2159 = vmatpush1.msra.mxu0 %v12651_v54  ;;  %2230 = vmatpush1.msra.mxu1 %v12652_v44  ;;  %v12683_v54 = vld [vmem:[#allocation101_spill] sm:$0xff]  ;;  %v12684_v44 = vld [vmem:[#allocation102_spill] sm:$0xff] }
 0x410   :  { %2160 = vmatprep.subr.mxu0 %v12653_v51  ;;  %2231 = vmatprep.subr.mxu1 %v12654_v47  ;;  %v12685_v51 = vld [vmem:[#allocation103_spill] sm:$0xff]  ;;  %v12686_v47 = vld [vmem:[#allocation104_spill] sm:$0xff] }
 0x411   :  { %2161 = vmatpush1.msra.mxu0 %v12655_v50  ;;  %2232 = vmatpush1.msra.mxu1 %v12656_v56  ;;  %v12687_v50 = vld [vmem:[#allocation105_spill] sm:$0xff]  ;;  %v12688_v56 = vld [vmem:[#allocation106_spill] sm:$0xff] }
 0x412   :  { %2162 = vmatprep.subr.mxu0 %v12657_v62  ;;  %2233 = vmatprep.subr.mxu1 %v12658_v55  ;;  %v12689_v62 = vld [vmem:[#allocation107_spill] sm:$0xff]  ;;  %v12690_v55 = vld [vmem:[#allocation108_spill] sm:$0xff] }
 0x413   :  { %2163 = vmatpush1.msra.mxu0 %v12659_v0  ;;  %2234 = vmatpush1.msra.mxu1 %v12660_v63 }
 0x414   :  { %2164 = vmatprep.subr.mxu0 %v12661_v31  ;;  %2235 = vmatprep.subr.mxu1 %v12662_v32 }
 0x415   :  { %2165 = vmatpush1.msra.mxu0 %v12663_v33  ;;  %2236 = vmatpush1.msra.mxu1 %v12664_v34 }
 0x416   :  { %2166 = vmatprep.subr.mxu0 %v12665_v36  ;;  %2237 = vmatprep.subr.mxu1 %v12666_v37 }
 0x417   :  { %2167 = vmatpush1.msra.mxu0 %v12667_v23  ;;  %2238 = vmatpush1.msra.mxu1 %v12668_v38 }
 0x418   :  { %2168 = vmatprep.subr.mxu0 %v12669_v39  ;;  %2239 = vmatprep.subr.mxu1 %v12670_v40 }
 0x419   :  { %2169 = vmatpush1.msra.mxu0 %v12671_v42  ;;  %2240 = vmatpush1.msra.mxu1 %v12672_v53 }
 0x41a   :  { %2170 = vmatprep.subr.mxu0 %v12673_v1  ;;  %2241 = vmatprep.subr.mxu1 %v12674_v41 }
 0x41b   :  { %2171 = vmatpush1.msra.mxu0 %v12675_v43  ;;  %2242 = vmatpush1.msra.mxu1 %v12676_v6 }
 0x41c   :  { %2172 = vmatprep.subr.mxu0 %v12677_v7  ;;  %2243 = vmatprep.subr.mxu1 %v12678_v10 }
 0x41d   :  { %2173 = vmatpush1.msra.mxu0 %v12679_v2  ;;  %2244 = vmatpush1.msra.mxu1 %v12680_v12 }
 0x41e   :  { %2174 = vmatprep.subr.mxu0 %v12681_v13  ;;  %2245 = vmatprep.subr.mxu1 %v12682_v14 }
 0x41f   :  { %2175 = vmatpush1.msra.mxu0 %v12683_v54  ;;  %2246 = vmatpush1.msra.mxu1 %v12684_v44 }
 0x420   :  { %2176 = vmatprep.subr.mxu0 %v12685_v51  ;;  %2247 = vmatprep.subr.mxu1 %v12686_v47 }
 0x421   :  { %2177 = vmatpush1.msra.mxu0 %v12687_v50  ;;  %2248 = vmatpush1.msra.mxu1 %v12688_v56 }
 0x422   :  { %2210 = vmatprep.mubr.f32.mxu0 %v12185_v59  ;;  %2281 = vmatprep.mubr.f32.mxu1 %v12185_v59 }
 0x423   :  { %2288 = vmatprep.subr.mxu0 %v12689_v62  ;;  %2359 = vmatprep.subr.mxu1 %v12690_v55 }
 0x47e   :  { %v1712_v0 = vpop.f32.mrf.mxu0  ;;  %v1783_v32 = vpop.f32.mrf.mxu1 }
 0x47f   :  { %v1713_v50 = vadd.f32 %v1712_v0, %v7146_v25 }
 0x480   :  { %v1714_v63 = vpop.f32.mrf.mxu0  ;;  %v1785_v34 = vpop.f32.mrf.mxu1 }
 0x481   :  { %v1715_v51 = vadd.f32 %v1714_v63, %v7143_v21 }
 0x49f   :  { %v1854_v31 = vpop.f32.mrf.mxu0  ;;  %v1925_v23 = vpop.f32.mrf.mxu1 }
 0x4a0   :  { %v1930_v62 = vadd.f32 %v1854_v31, %v1713_v50  ;;  %v12707_v50 = vld [vmem:[#allocation125_spill] sm:$0xff] }
 0x4a1   :  { %v1856_v33 = vpop.f32.mrf.mxu0  ;;  %v1927_v1 = vpop.f32.mrf.mxu1 }
 0x4a2   :  { %v1931_v56 = vadd.f32 %v1856_v33, %v1715_v51  ;;  %v1784_v33 = vadd.f32 %v1783_v32, %v7157_v45  ;;  %v12705_v51 = vld [vmem:[#allocation123_spill] sm:$0xff] }
 0x4a4   :  { %v4657_v55 = vmul.f32 -1.442695, %v1931_v56  ;;  %v12708_v56 = vld [vmem:[#allocation126_spill] sm:$0xff] }
 0x4c1   :  { %v2024_v36 = vpop.f32.mrf.mxu0  ;;  %v2095_v43 = vpop.f32.mrf.mxu1 }
 0x4c2   :  { %v2104_v37 = vrot.slane %v2024_v36, 5  ;;  %v2106_v6 = vrot.slane %v2095_v43, 5  ;;  %v4656_v36 = vmul.f32 -1.442695, %v1930_v62  ;;  %v12709_v62 = vld [vmem:[#allocation127_spill] sm:$0xff] }
 0x4c3   :  { %v2026_v38 = vpop.f32.mrf.mxu0  ;;  %v2097_v7 = vpop.f32.mrf.mxu1 }
 0x4c4   :  { %v2112_v39 = vadd.f32 %v2104_v37, %v12390_v5  ;;  %v2105_v40 = vrot.slane %v2026_v38, 5  ;;  %v2114_v10 = vadd.f32 %v2106_v6, %v12392_v16  ;;  %v2107_v2 = vrot.slane %v2097_v7, 5 }
 0x4c5   :  { %v1786_v7 = vadd.f32 %v1785_v34, %v7161_v8  ;;  %v12702_v34 = vld [vmem:[#allocation120_spill] sm:$0xff] }
 0x4c6   :  { %v4659_v42 = vmul.f32 -1.442695, %v2112_v39  ;;  %v2113_v53 = vadd.f32 %v2105_v40, %v12391_v9  ;;  %v4661_v12 = vmul.f32 -1.442695, %v2114_v10  ;;  %v2115_v14 = vadd.f32 %v2107_v2, %v6614_v57 }
 0x4c7   :  { %v2136_v40 = vrot.slane %v8033_v58, 7  ;;  %v1932_v2 = vadd.f32 %v1925_v23, %v1784_v33  ;;  %v1933_v58 = vadd.f32 %v1927_v1, %v1786_v7  ;;  %v12703_v23 = vld [vmem:[#allocation121_spill] sm:$0xff]  ;;  %v12704_v1 = vld [vmem:[#allocation122_spill] sm:$0xff]  ;;  %v12722_v33 = vld [vmem:[#allocation140_spill] sm:$0xff] }
 0x4c8   :  { %v4660_v41 = vmul.f32 -1.442695, %v2113_v53  ;;  %4771 = vpow2.f32 %v4659_v42  ;;  %v12724_v7 = vld [vmem:[#allocation142_spill] sm:$0xff] }
 0x4ca   :  { %4773 = vpow2.f32 %v4660_v41 }
 0x4cb   :  { %4775 = vpow2.f32 %v4661_v12  ;;  %v4658_v12 = vmul.f32 -1.442695, %v1932_v2  ;;  %v12726_v2 = vld [vmem:[#allocation144_spill] sm:$0xff] }
 0x4d5   :  { %v4772_v13 = vpop.eup %4771 }
 0x4d6   :  { %v2125_v54 = vadd.f32 1.0, %v4772_v13 }
 0x4d7   :  { %v4774_v44 = vpop.eup %4773 }
 0x4d8   :  { %4777 = vrcp.f32 %v2125_v54  ;;  %v2126_v47 = vadd.f32 1.0, %v4774_v44  ;;  %v4776_v37 = vpop.eup %4775 }
 0x4d9   :  { %4779 = vtanh.f32 %v2115_v14  ;;  %v2127_v63 = vadd.f32 1.0, %v4776_v37  ;;  %v12712_v37 = vld [vmem:[#allocation130_spill] sm:$0xff] }
 0x4da   :  { %4781 = vrcp.f32 %v2126_v47  ;;  %v12706_v47 = vld [vmem:[#allocation124_spill] sm:$0xff] }
 0x4db   :  { %4783 = vpow2.f32 %v4657_v55  ;;  %v12710_v55 = vld [vmem:[#allocation128_spill] sm:$0xff] }
 0x4dc   :  { %4785 = vpow2.f32 %v4656_v36  ;;  %v12711_v36 = vld [vmem:[#allocation129_spill] sm:$0xff] }
 0x4dd   :  { %4787 = vrcp.f32 %v2127_v63  ;;  %v12717_v63 = vld [vmem:[#allocation135_spill] sm:$0xff] }
 0x4e5   :  { %v4778_v38 = vpop.eup %4777 }
 0x4e6   :  { %v4780_v39 = vpop.eup %4779 }
 0x4e7   :  { %v4782_v42 = vpop.eup %4781  ;;  %v2139_v41 = vmul.f32 %v4780_v39, %v4778_v38  ;;  %v12713_v38 = vld [vmem:[#allocation131_spill] sm:$0xff]  ;;  %v12714_v39 = vld [vmem:[#allocation132_spill] sm:$0xff] }
 0x4e8   :  { %v2138_v53 = vmul.f32 %v4782_v42, %v2136_v40  ;;  %v4784_v0 = vpop.eup %4783  ;;  %v12715_v40 = vld [vmem:[#allocation133_spill] sm:$0xff]  ;;  %v12716_v42 = vld [vmem:[#allocation134_spill] sm:$0xff] }
 0x4e9   :  { %v4786_v31 = vpop.eup %4785  ;;  %v1944_v6 = vadd.f32 1.0, %v4784_v0  ;;  %v12720_v0 = vld [vmem:[#allocation138_spill] sm:$0xff] }
 0x4ea   :  { %v8567_v43 = vadd.f32 %v2139_v41, %v2138_v53  ;;  %v1943_v10 = vadd.f32 1.0, %v4786_v31  ;;  %v4788_v13 = vpop.eup %4787  ;;  %v12718_v53 = vld [vmem:[#allocation136_spill] sm:$0xff]  ;;  %v12719_v41 = vld [vmem:[#allocation137_spill] sm:$0xff]  ;;  %v12721_v31 = vld [vmem:[#allocation139_spill] sm:$0xff] }
 0x4ec   :  { %4789 = vtanh.f32 %v8567_v43 }
 0x4ed   :  { %4791 = vrcp.f32 %v1944_v6  ;;  %v12723_v6 = vld [vmem:[#allocation141_spill] sm:$0xff] }
 0x4ee   :  { %4793 = vrcp.f32 %v1943_v10  ;;  %v12725_v10 = vld [vmem:[#allocation143_spill] sm:$0xff] }
 0x4ef   :  { %4795 = vtanh.f32 %v1933_v58  ;;  %v12727_v58 = vld [vmem:[#allocation145_spill] sm:$0xff] }
 0x4f0   :  { %4797 = vpow2.f32 %v4658_v12 }
 0x4f9   :  { %v4790_v14 = vpop.eup %4789 }
 0x4fa   :  { %v2142_v54 = vmul.f32 %v4790_v14, %v4788_v13  ;;  %v4792_v32 = vpop.eup %4791  ;;  %v12728_v13 = vld [vmem:[#allocation146_spill] sm:$0xff]  ;;  %v12729_v14 = vld [vmem:[#allocation147_spill] sm:$0xff] }
 0x4fc   :  { %v8572_v44 = vrot.slane %v2142_v54, 3  ;;  %v12730_v54 = vld [vmem:[#allocation148_spill] sm:$0xff] }
 0x4fe   :  { %2211 = vmatmul.mubr.f32.vlgmr.msra.gmra.mxu0 %v8572_v44  ;;  %2282 = vmatmul.mubr.f32.vlgmr.msra.gmra.mxu1 %v8572_v44 }
 0x4ff   :  { %2289 = vmatpush1.msra.mxu0 %v8045_v49  ;;  %2360 = vmatpush1.msra.mxu1 %v8051_v3  ;;  %v4794_v49 = vpop.eup %4793  ;;  %v1953_v3 = vmul.f32 %v4792_v32, %v8163_v11  ;;  %v12701_v11 = vld [vmem:[#allocation119_spill] sm:$0xff]  ;;  %v12731_v32 = vld [vmem:[#allocation149_spill] sm:$0xff] }
 0x500   :  { %2290 = vmatprep.subr.mxu0 %v8057_v60  ;;  %2361 = vmatprep.subr.mxu1 %v8063_v48  ;;  %v4796_v60 = vpop.eup %4795 }
 0x501   :  { %2291 = vmatpush1.msra.mxu0 %v8069_v26  ;;  %2362 = vmatpush1.msra.mxu1 %v8075_v22  ;;  %v1954_v48 = vmul.f32 %v4796_v60, %v4794_v49  ;;  %v12691_v26 = vld [vmem:[#allocation109_spill] sm:$0xff]  ;;  %v4798_v22 = vpop.eup %4797 }
 0x502   :  { %2292 = vmatprep.subr.mxu0 %v8081_v61  ;;  %2363 = vmatprep.subr.mxu1 %v8087_v27  ;;  %v12692_v61 = vld [vmem:[#allocation110_spill] sm:$0xff]  ;;  %v12693_v27 = vld [vmem:[#allocation111_spill] sm:$0xff] }
 0x503   :  { %2293 = vmatpush1.msra.mxu0 %v8093_v18  ;;  %2364 = vmatpush1.msra.mxu1 %v8099_v15  ;;  %v8597_v18 = vadd.f32 %v1954_v48, %v1953_v3  ;;  %v12694_v15 = vld [vmem:[#allocation112_spill] sm:$0xff]  ;;  %v12732_v3 = vld [vmem:[#allocation150_spill] sm:$0xff] }
 0x504   :  { %2294 = vmatprep.subr.mxu0 %v8105_v30  ;;  %2365 = vmatprep.subr.mxu1 %v8111_v17  ;;  %v12695_v30 = vld [vmem:[#allocation113_spill] sm:$0xff]  ;;  %v12696_v17 = vld [vmem:[#allocation114_spill] sm:$0xff]  ;;  %v8651_v48 = vld [vmem:[%s11576_s2 + $0x1e8] sm:$0xff] }
 0x505   :  { %2295 = vmatpush1.msra.mxu0 %v8118_v19  ;;  %2366 = vmatpush1.msra.mxu1 %v8124_v24  ;;  %v12697_v19 = vld [vmem:[#allocation115_spill] sm:$0xff]  ;;  %v1945_v24 = vadd.f32 1.0, %v4798_v22  ;;  %4799 = vtanh.f32 %v8597_v18  ;;  %v8681_v22 = vld [vmem:[%s11576_s2 + $0x1d8] sm:$0xff] }
 0x506   :  { %2296 = vmatprep.subr.mxu0 %v8130_v4  ;;  %2367 = vmatprep.subr.mxu1 %v8136_v35  ;;  %v12698_v4 = vld [vmem:[#allocation116_spill] sm:$0xff]  ;;  %v12699_v35 = vld [vmem:[#allocation117_spill] sm:$0xff] }
 0x507   :  { %2297 = vmatpush1.msra.mxu0 %v8142_v46  ;;  %2368 = vmatpush1.msra.mxu1 %v12691_v26  ;;  %v12700_v46 = vld [vmem:[#allocation118_spill] sm:$0xff]  ;;  %4801 = vrcp.f32 %v1945_v24  ;;  %v8675_v26 = vld [vmem:[%s11576_s2 + $0x1c8] sm:$0xff] }
 0x508   :  { %2298 = vmatprep.subr.mxu0 %v12692_v61  ;;  %2369 = vmatprep.subr.mxu1 %v12693_v27  ;;  %v8687_v61 = vld [vmem:[%s11576_s2 + $0x1c0] sm:$0xff]  ;;  %v8693_v27 = vld [vmem:[%s11576_s2 + $0x1d0] sm:$0xff]  ;;  %v8723_v24 = vld [vmem:[%s11576_s2 + $0x188] sm:$0xff] }
 0x509   :  { %2299 = vmatpush1.msra.mxu0 %v12694_v15  ;;  %2370 = vmatpush1.msra.mxu1 %v12695_v30  ;;  %v8699_v15 = vld [vmem:[%s11576_s2 + $0x1a8] sm:$0xff]  ;;  %v8705_v30 = vld [vmem:[%s11576_s2 + $0x1b8] sm:$0xff] }
 0x50a   :  { %2300 = vmatprep.subr.mxu0 %v12696_v17  ;;  %2371 = vmatprep.subr.mxu1 %v12697_v19  ;;  %v8711_v17 = vld [vmem:[%s11576_s2 + $0x1a0] sm:$0xff]  ;;  %v8717_v19 = vld [vmem:[%s11576_s2 + $0x1b0] sm:$0xff] }
 0x50b   :  { %2301 = vmatpush1.msra.mxu0 %v12698_v4  ;;  %2372 = vmatpush1.msra.mxu1 %v12699_v35  ;;  %v8729_v4 = vld [vmem:[%s11576_s2 + $0x198] sm:$0xff]  ;;  %v8735_v35 = vld [vmem:[%s11576_s2 + $0x180] sm:$0xff] }
 0x50c   :  { %2302 = vmatprep.subr.mxu0 %v12700_v46  ;;  %2373 = vmatprep.subr.mxu1 %v12701_v11  ;;  %v8741_v46 = vld [vmem:[%s11576_s2 + $0x190] sm:$0xff]  ;;  %v8747_v11 = vld [vmem:[%s11576_s2 + $0x168] sm:$0xff] }
 0x50d   :  { %2303 = vmatpush1.msra.mxu0 %v12702_v34  ;;  %2374 = vmatpush1.msra.mxu1 %v12703_v23  ;;  %v8753_v34 = vld [vmem:[%s11576_s2 + $0x178] sm:$0xff]  ;;  %v8759_v23 = vld [vmem:[%s11576_s2 + $0x160] sm:$0xff] }
 0x50e   :  { %2304 = vmatprep.subr.mxu0 %v12704_v1  ;;  %2375 = vmatprep.subr.mxu1 %v12705_v51  ;;  %v8765_v1 = vld [vmem:[%s11576_s2 + $0x170] sm:$0xff]  ;;  %v8771_v51 = vld [vmem:[%s11576_s2 + $0x148] sm:$0xff] }
 0x50f   :  { %2305 = vmatpush1.msra.mxu0 %v12706_v47  ;;  %2376 = vmatpush1.msra.mxu1 %v12707_v50  ;;  %v8777_v47 = vld [vmem:[%s11576_s2 + $0x158] sm:$0xff]  ;;  %v8783_v50 = vld [vmem:[%s11576_s2 + $0x140] sm:$0xff] }
 0x510   :  { %2306 = vmatprep.subr.mxu0 %v12708_v56  ;;  %2377 = vmatprep.subr.mxu1 %v12709_v62  ;;  %v8789_v56 = vld [vmem:[%s11576_s2 + $0x150] sm:$0xff]  ;;  %v8795_v62 = vld [vmem:[%s11576_s2 + $0x128] sm:$0xff] }
 0x511   :  { %2307 = vmatpush1.msra.mxu0 %v12710_v55  ;;  %2378 = vmatpush1.msra.mxu1 %v12711_v36  ;;  %v8801_v55 = vld [vmem:[%s11576_s2 + $0x138] sm:$0xff]  ;;  %v8807_v36 = vld [vmem:[%s11576_s2 + $0x120] sm:$0xff] }
 0x512   :  { %2308 = vmatprep.subr.mxu0 %v12712_v37  ;;  %2379 = vmatprep.subr.mxu1 %v12713_v38  ;;  %v4800_v12 = vpop.eup %4799  ;;  %v8813_v37 = vld [vmem:[%s11576_s2 + $0x130] sm:$0xff]  ;;  %v8819_v38 = vld [vmem:[%s11576_s2 + $0x108] sm:$0xff] }
 0x513   :  { %2309 = vmatpush1.msra.mxu0 %v12714_v39  ;;  %2380 = vmatpush1.msra.mxu1 %v12715_v40  ;;  %v8825_v39 = vld [vmem:[%s11576_s2 + $0x118] sm:$0xff]  ;;  %v8831_v40 = vld [vmem:[%s11576_s2 + $0x100] sm:$0xff] }
 0x514   :  { %2310 = vmatprep.subr.mxu0 %v12716_v42  ;;  %2381 = vmatprep.subr.mxu1 %v12717_v63  ;;  %v4802_v49 = vpop.eup %4801  ;;  %12734 = vst [vmem:[#allocation7_spill] sm:$0xff] %v8825_v39  ;;  %12735 = vst [vmem:[#allocation8_spill] sm:$0xff] %v8831_v40  ;;  %v8837_v42 = vld [vmem:[%s11576_s2 + $0x110] sm:$0xff]  ;;  %v8843_v63 = vld [vmem:[%s11576_s2 + $0xe8] sm:$0xff] }
 0x515   :  { %2311 = vmatpush1.msra.mxu0 %v12718_v53  ;;  %2382 = vmatpush1.msra.mxu1 %v12719_v41  ;;  %v8642_v60 = vmul.f32 %v4802_v49, %v4800_v12  ;;  %12736 = vst [vmem:[#allocation9_spill] sm:$0xff] %v8837_v42  ;;  %12737 = vst [vmem:[#allocation10_spill] sm:$0xff] %v8843_v63  ;;  %v8849_v53 = vld [vmem:[%s11576_s2 + $0xf8] sm:$0xff]  ;;  %v8855_v41 = vld [vmem:[%s11576_s2 + $0xe0] sm:$0xff] }
 0x516   :  { %2312 = vmatprep.subr.mxu0 %v12720_v0  ;;  %2383 = vmatprep.subr.mxu1 %v12721_v31  ;;  %12738 = vst [vmem:[#allocation11_spill] sm:$0xff] %v8849_v53  ;;  %12739 = vst [vmem:[#allocation12_spill] sm:$0xff] %v8855_v41  ;;  %v8861_v0 = vld [vmem:[%s11576_s2 + $0xf0] sm:$0xff]  ;;  %v8867_v31 = vld [vmem:[%s11576_s2 + $0xc8] sm:$0xff] }
 0x517   :  { %2313 = vmatpush1.msra.mxu0 %v12722_v33  ;;  %2384 = vmatpush1.msra.mxu1 %v12723_v6  ;;  %12733 = vst [vmem:[#allocation6_spill] sm:$0xff] %v8642_v60  ;;  %12740 = vst [vmem:[#allocation13_spill] sm:$0xff] %v8861_v0  ;;  %v8873_v33 = vld [vmem:[%s11576_s2 + $0xd8] sm:$0xff]  ;;  %v8879_v6 = vld [vmem:[%s11576_s2 + $0xc0] sm:$0xff] }
 0x518   :  { %2314 = vmatprep.subr.mxu0 %v12724_v7  ;;  %2385 = vmatprep.subr.mxu1 %v12725_v10  ;;  %12741 = vst [vmem:[#allocation14_spill] sm:$0xff] %v8867_v31  ;;  %12742 = vst [vmem:[#allocation15_spill] sm:$0xff] %v8873_v33  ;;  %v8885_v7 = vld [vmem:[%s11576_s2 + $0xd0] sm:$0xff]  ;;  %v8891_v10 = vld [vmem:[%s11576_s2 + $0xa8] sm:$0xff] }
 0x519   :  { %2315 = vmatpush1.msra.mxu0 %v12726_v2  ;;  %2386 = vmatpush1.msra.mxu1 %v12727_v58  ;;  %12743 = vst [vmem:[#allocation16_spill] sm:$0xff] %v8879_v6  ;;  %12744 = vst [vmem:[#allocation17_spill] sm:$0xff] %v8885_v7  ;;  %v8897_v2 = vld [vmem:[%s11576_s2 + $0xb8] sm:$0xff]  ;;  %v8903_v58 = vld [vmem:[%s11576_s2 + $0xa0] sm:$0xff] }
 0x51a   :  { %2316 = vmatprep.subr.mxu0 %v12728_v13  ;;  %2387 = vmatprep.subr.mxu1 %v12729_v14  ;;  %12745 = vst [vmem:[#allocation18_spill] sm:$0xff] %v8891_v10  ;;  %12746 = vst [vmem:[#allocation19_spill] sm:$0xff] %v8897_v2  ;;  %v8909_v12 = vld [vmem:[%s11576_s2 + $0xb0] sm:$0xff]  ;;  %v8915_v13 = vld [vmem:[%s11576_s2 + $0x88] sm:$0xff] }
 0x51b   :  { %2317 = vmatpush1.msra.mxu0 %v12730_v54  ;;  %2388 = vmatpush1.msra.mxu1 %v12731_v32  ;;  %12747 = vst [vmem:[#allocation20_spill] sm:$0xff] %v8903_v58  ;;  %12748 = vst [vmem:[#allocation21_spill] sm:$0xff] %v8909_v12  ;;  %v8921_v14 = vld [vmem:[%s11576_s2 + $0x98] sm:$0xff]  ;;  %v8927_v54 = vld [vmem:[%s11576_s2 + $0x80] sm:$0xff] }
 0x51c   :  { %2318 = vmatprep.subr.mxu0 %v12732_v3  ;;  %2389 = vmatprep.subr.mxu1 %v8403_v52  ;;  %v8669_v52 = vld [vmem:[%s11576_s2 + $0x1f0] sm:$0xff]  ;;  %12749 = vst [vmem:[#allocation22_spill] sm:$0xff] %v8915_v13  ;;  %12750 = vst [vmem:[#allocation23_spill] sm:$0xff] %v8921_v14  ;;  %v8939_v49 = vld [vmem:[%s11576_s2 + $0x68] sm:$0xff] }
 0x51d   :  { %2319 = vmatpush1.msra.mxu0 %v8409_v29  ;;  %2352 = vmatprep.mubr.f32.mxu0 %v12185_v59  ;;  %v8657_v29 = vld [vmem:[%s11576_s2 + $0x1f8] sm:$0xff]  ;;  %12751 = vst [vmem:[#allocation24_spill] sm:$0xff] %v8927_v54  ;;  %v8933_v32 = vld [vmem:[%s11576_s2 + $0x90] sm:$0xff]  ;;  %12753 = vst [vmem:[#allocation26_spill] sm:$0xff] %v8939_v49 }
 0x51e   :  { %2390 = vmatpush1.msra.mxu1 %v8418_v28  ;;  %2423 = vmatprep.mubr.f32.mxu1 %v12185_v59  ;;  %v8663_v28 = vld [vmem:[%s11576_s2 + $0x1e0] sm:$0xff]  ;;  %12752 = vst [vmem:[#allocation25_spill] sm:$0xff] %v8933_v32  ;;  %v8945_v3 = vld [vmem:[%s11576_s2 + $0x78] sm:$0xff] }
 0x51f   :  { %2353 = vmatmul.mubr.f32.vlgmr.msra.gmra.mxu0 %v8642_v60  ;;  %2424 = vmatmul.mubr.f32.vlgmr.msra.gmra.mxu1 %v8642_v60  ;;  %12754 = vst [vmem:[#allocation27_spill] sm:$0xff] %v8945_v3  ;;  %v8951_v60 = vld [vmem:[%s11576_s2 + $0x60] sm:$0xff] }
 0x520   :  { %2458 = vmatprep.subr.mxu0 %v8651_v48  ;;  %2529 = vmatprep.subr.mxu1 %v8657_v29  ;;  %12755 = vst [vmem:[#allocation28_spill] sm:$0xff] %v8951_v60 }
 0x521   :  { %2459 = vmatpush1.msra.mxu0 %v8663_v28  ;;  %2530 = vmatpush1.msra.mxu1 %v8669_v52 }
 0x522   :  { %2460 = vmatprep.subr.mxu0 %v8675_v26  ;;  %2531 = vmatprep.subr.mxu1 %v8681_v22 }
 0x523   :  { %2461 = vmatpush1.msra.mxu0 %v8687_v61  ;;  %2532 = vmatpush1.msra.mxu1 %v8693_v27 }
 0x524   :  { %2462 = vmatprep.subr.mxu0 %v8699_v15  ;;  %2533 = vmatprep.subr.mxu1 %v8705_v30 }
 0x525   :  { %2463 = vmatpush1.msra.mxu0 %v8711_v17  ;;  %2534 = vmatpush1.msra.mxu1 %v8717_v19 }
 0x526   :  { %2464 = vmatprep.subr.mxu0 %v8723_v24  ;;  %2535 = vmatprep.subr.mxu1 %v8729_v4 }
 0x527   :  { %2465 = vmatpush1.msra.mxu0 %v8735_v35  ;;  %2536 = vmatpush1.msra.mxu1 %v8741_v46 }
 0x528   :  { %2466 = vmatprep.subr.mxu0 %v8747_v11  ;;  %2537 = vmatprep.subr.mxu1 %v8753_v34 }
 0x529   :  { %2467 = vmatpush1.msra.mxu0 %v8759_v23  ;;  %2538 = vmatpush1.msra.mxu1 %v8765_v1 }
 0x52a   :  { %2468 = vmatprep.subr.mxu0 %v8771_v51  ;;  %2539 = vmatprep.subr.mxu1 %v8777_v47 }
 0x52b   :  { %2469 = vmatpush1.msra.mxu0 %v8783_v50  ;;  %2540 = vmatpush1.msra.mxu1 %v8789_v56 }
 0x52c   :  { %2470 = vmatprep.subr.mxu0 %v8795_v62  ;;  %2541 = vmatprep.subr.mxu1 %v8801_v55 }
 0x52d   :  { %2471 = vmatpush1.msra.mxu0 %v8807_v36  ;;  %2542 = vmatpush1.msra.mxu1 %v8813_v37 }
 0x52e   :  { %2472 = vmatprep.subr.mxu0 %v8819_v38  ;;  %2543 = vmatprep.subr.mxu1 %v8825_v39 }
 0x52f   :  { %2473 = vmatpush1.msra.mxu0 %v8831_v40  ;;  %2544 = vmatpush1.msra.mxu1 %v8837_v42 }
 0x530   :  { %2474 = vmatprep.subr.mxu0 %v8843_v63  ;;  %2545 = vmatprep.subr.mxu1 %v8849_v53 }
 0x531   :  { %2475 = vmatpush1.msra.mxu0 %v8855_v41  ;;  %2546 = vmatpush1.msra.mxu1 %v8861_v0 }
 0x532   :  { %2476 = vmatprep.subr.mxu0 %v8867_v31  ;;  %2547 = vmatprep.subr.mxu1 %v8873_v33 }
 0x533   :  { %2477 = vmatpush1.msra.mxu0 %v8879_v6  ;;  %2548 = vmatpush1.msra.mxu1 %v8885_v7 }
 0x534   :  { %2478 = vmatprep.subr.mxu0 %v8891_v10  ;;  %2549 = vmatprep.subr.mxu1 %v8897_v2 }
 0x535   :  { %2479 = vmatpush1.msra.mxu0 %v8903_v58  ;;  %2550 = vmatpush1.msra.mxu1 %v8909_v12 }
 0x536   :  { %2480 = vmatprep.subr.mxu0 %v8915_v13  ;;  %2551 = vmatprep.subr.mxu1 %v8921_v14 }
 0x537   :  { %2481 = vmatpush1.msra.mxu0 %v8927_v54  ;;  %2552 = vmatpush1.msra.mxu1 %v8933_v32 }
 0x538   :  { %2482 = vmatprep.subr.mxu0 %v8939_v49  ;;  %2553 = vmatprep.subr.mxu1 %v8945_v3  ;;  %v8963_v49 = vld [vmem:[%s11576_s2 + $0x48] sm:$0xff]  ;;  %v8969_v3 = vld [vmem:[%s11576_s2 + $0x58] sm:$0xff] }
 0x539   :  { %2483 = vmatpush1.msra.mxu0 %v8951_v60  ;;  %2554 = vmatpush1.msra.mxu1 %v8957_v20  ;;  %12757 = vst [vmem:[#allocation30_spill] sm:$0xff] %v8963_v49  ;;  %12758 = vst [vmem:[#allocation31_spill] sm:$0xff] %v8969_v3  ;;  %v8975_v60 = vld [vmem:[%s11576_s2 + $0x40] sm:$0xff]  ;;  %v8981_v20 = vld [vmem:[%s11576_s2 + $0x50] sm:$0xff] }
 0x53a   :  { %2484 = vmatprep.subr.mxu0 %v8963_v49  ;;  %2555 = vmatprep.subr.mxu1 %v8969_v3  ;;  %12759 = vst [vmem:[#allocation32_spill] sm:$0xff] %v8975_v60  ;;  %12760 = vst [vmem:[#allocation33_spill] sm:$0xff] %v8981_v20  ;;  %v8987_v49 = vld [vmem:[%s11576_s2 + $0x28] sm:$0xff]  ;;  %v8993_v3 = vld [vmem:[%s11576_s2 + $0x38] sm:$0xff] }
 0x53b   :  { %2485 = vmatpush1.msra.mxu0 %v8975_v60  ;;  %2556 = vmatpush1.msra.mxu1 %v8981_v20  ;;  %12761 = vst [vmem:[#allocation34_spill] sm:$0xff] %v8987_v49  ;;  %12762 = vst [vmem:[#allocation35_spill] sm:$0xff] %v8993_v3  ;;  %v8999_v60 = vld [vmem:[%s11576_s2 + $0x20] sm:$0xff]  ;;  %v9005_v20 = vld [vmem:[%s11576_s2 + $0x30] sm:$0xff] }
 0x53c   :  { %2486 = vmatprep.subr.mxu0 %v8987_v49  ;;  %2557 = vmatprep.subr.mxu1 %v8993_v3  ;;  %12763 = vst [vmem:[#allocation36_spill] sm:$0xff] %v8999_v60  ;;  %12764 = vst [vmem:[#allocation37_spill] sm:$0xff] %v9005_v20  ;;  %v9011_v49 = vld [vmem:[%s11576_s2 + $0x8] sm:$0xff]  ;;  %v9017_v3 = vld [vmem:[%s11576_s2 + $0x18] sm:$0xff] }
 0x53d   :  { %2487 = vmatpush1.msra.mxu0 %v8999_v60  ;;  %2558 = vmatpush1.msra.mxu1 %v9005_v20  ;;  %12765 = vst [vmem:[#allocation38_spill] sm:$0xff] %v9011_v49  ;;  %12766 = vst [vmem:[#allocation39_spill] sm:$0xff] %v9017_v3  ;;  %v9023_v60 = vld [vmem:[%s11576_s2] sm:$0xff] }
 0x53e   :  { %2488 = vmatprep.subr.mxu0 %v9011_v49  ;;  %2559 = vmatprep.subr.mxu1 %v9017_v3  ;;  %12767 = vst [vmem:[#allocation40_spill] sm:$0xff] %v9023_v60  ;;  %v9030_v49 = vld [vmem:[%s11576_s2 + $0x10] sm:$0xff]  ;;  %v9039_v3 = vld [vmem:[%s11578_s4 + $0x1e8] sm:$0xff] }
 0x53f   :  { %2489 = vmatpush1.msra.mxu0 %v9023_v60  ;;  %2522 = vmatprep.mubr.f32.mxu0 %v12185_v59  ;;  %12768 = vst [vmem:[#allocation41_spill] sm:$0xff] %v9030_v49  ;;  %12769 = vst [vmem:[#allocation42_spill] sm:$0xff] %v9039_v3  ;;  %v9045_v60 = vld [vmem:[%s11578_s4 + $0x1f8] sm:$0xff] }
 0x540   :  { %2560 = vmatpush1.msra.mxu1 %v9030_v49  ;;  %2593 = vmatprep.mubr.f32.mxu1 %v12185_v59  ;;  %12770 = vst [vmem:[#allocation43_spill] sm:$0xff] %v9045_v60  ;;  %v9051_v49 = vld [vmem:[%s11578_s4 + $0x1e0] sm:$0xff] }
 0x541   :  { %2523 = vmatmul.mubr.f32.vlgmr.msra.gmra.mxu0 %v8572_v44  ;;  %2594 = vmatmul.mubr.f32.vlgmr.msra.gmra.mxu1 %v8572_v44  ;;  %12771 = vst [vmem:[#allocation44_spill] sm:$0xff] %v9051_v49  ;;  %v9057_v44 = vld [vmem:[%s11578_s4 + $0x1f0] sm:$0xff] }
 0x542   :  { %2646 = vmatprep.subr.mxu0 %v9039_v3  ;;  %2717 = vmatprep.subr.mxu1 %v9045_v60  ;;  %12772 = vst [vmem:[#allocation45_spill] sm:$0xff] %v9057_v44  ;;  %v9063_v3 = vld [vmem:[%s11578_s4 + $0x1c8] sm:$0xff]  ;;  %v9069_v60 = vld [vmem:[%s11578_s4 + $0x1d8] sm:$0xff] }
 0x543   :  { %2647 = vmatpush1.msra.mxu0 %v9051_v49  ;;  %2718 = vmatpush1.msra.mxu1 %v9057_v44  ;;  %12773 = vst [vmem:[#allocation46_spill] sm:$0xff] %v9063_v3  ;;  %12774 = vst [vmem:[#allocation47_spill] sm:$0xff] %v9069_v60  ;;  %v9075_v49 = vld [vmem:[%s11578_s4 + $0x1c0] sm:$0xff]  ;;  %v9081_v44 = vld [vmem:[%s11578_s4 + $0x1d0] sm:$0xff] }
 0x544   :  { %2648 = vmatprep.subr.mxu0 %v9063_v3  ;;  %2719 = vmatprep.subr.mxu1 %v9069_v60  ;;  %12775 = vst [vmem:[#allocation48_spill] sm:$0xff] %v9075_v49  ;;  %12776 = vst [vmem:[#allocation49_spill] sm:$0xff] %v9081_v44  ;;  %v9087_v3 = vld [vmem:[%s11578_s4 + $0x1a8] sm:$0xff]  ;;  %v9093_v60 = vld [vmem:[%s11578_s4 + $0x1b8] sm:$0xff] }
 0x545   :  { %2649 = vmatpush1.msra.mxu0 %v9075_v49  ;;  %2720 = vmatpush1.msra.mxu1 %v9081_v44  ;;  %12777 = vst [vmem:[#allocation50_spill] sm:$0xff] %v9087_v3  ;;  %12778 = vst [vmem:[#allocation51_spill] sm:$0xff] %v9093_v60  ;;  %v9099_v49 = vld [vmem:[%s11578_s4 + $0x1a0] sm:$0xff]  ;;  %v9105_v44 = vld [vmem:[%s11578_s4 + $0x1b0] sm:$0xff] }
 0x546   :  { %2650 = vmatprep.subr.mxu0 %v9087_v3  ;;  %2721 = vmatprep.subr.mxu1 %v9093_v60  ;;  %12779 = vst [vmem:[#allocation52_spill] sm:$0xff] %v9099_v49  ;;  %12780 = vst [vmem:[#allocation53_spill] sm:$0xff] %v9105_v44  ;;  %v9111_v3 = vld [vmem:[%s11578_s4 + $0x188] sm:$0xff]  ;;  %v9117_v60 = vld [vmem:[%s11578_s4 + $0x198] sm:$0xff] }
 0x547   :  { %2651 = vmatpush1.msra.mxu0 %v9099_v49  ;;  %2722 = vmatpush1.msra.mxu1 %v9105_v44  ;;  %12781 = vst [vmem:[#allocation54_spill] sm:$0xff] %v9111_v3  ;;  %12782 = vst [vmem:[#allocation55_spill] sm:$0xff] %v9117_v60  ;;  %v9123_v49 = vld [vmem:[%s11578_s4 + $0x180] sm:$0xff]  ;;  %v9129_v44 = vld [vmem:[%s11578_s4 + $0x190] sm:$0xff] }
 0x548   :  { %2652 = vmatprep.subr.mxu0 %v9111_v3  ;;  %2723 = vmatprep.subr.mxu1 %v9117_v60  ;;  %12783 = vst [vmem:[#allocation56_spill] sm:$0xff] %v9123_v49  ;;  %12784 = vst [vmem:[#allocation57_spill] sm:$0xff] %v9129_v44  ;;  %v9135_v3 = vld [vmem:[%s11578_s4 + $0x168] sm:$0xff]  ;;  %v9141_v60 = vld [vmem:[%s11578_s4 + $0x178] sm:$0xff] }
 0x549   :  { %2653 = vmatpush1.msra.mxu0 %v9123_v49  ;;  %2724 = vmatpush1.msra.mxu1 %v9129_v44  ;;  %12785 = vst [vmem:[#allocation58_spill] sm:$0xff] %v9135_v3  ;;  %12786 = vst [vmem:[#allocation59_spill] sm:$0xff] %v9141_v60  ;;  %v9147_v49 = vld [vmem:[%s11578_s4 + $0x160] sm:$0xff]  ;;  %v9153_v44 = vld [vmem:[%s11578_s4 + $0x170] sm:$0xff] }
 0x54a   :  { %2654 = vmatprep.subr.mxu0 %v9135_v3  ;;  %2725 = vmatprep.subr.mxu1 %v9141_v60  ;;  %12787 = vst [vmem:[#allocation60_spill] sm:$0xff] %v9147_v49  ;;  %12788 = vst [vmem:[#allocation61_spill] sm:$0xff] %v9153_v44  ;;  %v9159_v3 = vld [vmem:[%s11578_s4 + $0x148] sm:$0xff]  ;;  %v9165_v60 = vld [vmem:[%s11578_s4 + $0x158] sm:$0xff] }
 0x54b   :  { %2655 = vmatpush1.msra.mxu0 %v9147_v49  ;;  %2726 = vmatpush1.msra.mxu1 %v9153_v44  ;;  %12789 = vst [vmem:[#allocation62_spill] sm:$0xff] %v9159_v3  ;;  %12790 = vst [vmem:[#allocation63_spill] sm:$0xff] %v9165_v60  ;;  %v9171_v49 = vld [vmem:[%s11578_s4 + $0x140] sm:$0xff]  ;;  %v9177_v44 = vld [vmem:[%s11578_s4 + $0x150] sm:$0xff] }
 0x54c   :  { %2656 = vmatprep.subr.mxu0 %v9159_v3  ;;  %2727 = vmatprep.subr.mxu1 %v9165_v60  ;;  %12791 = vst [vmem:[#allocation64_spill] sm:$0xff] %v9171_v49  ;;  %12792 = vst [vmem:[#allocation65_spill] sm:$0xff] %v9177_v44  ;;  %v9183_v3 = vld [vmem:[%s11578_s4 + $0x128] sm:$0xff]  ;;  %v9189_v60 = vld [vmem:[%s11578_s4 + $0x138] sm:$0xff] }
 0x54d   :  { %2657 = vmatpush1.msra.mxu0 %v9171_v49  ;;  %2728 = vmatpush1.msra.mxu1 %v9177_v44  ;;  %12793 = vst [vmem:[#allocation66_spill] sm:$0xff] %v9183_v3  ;;  %12794 = vst [vmem:[#allocation67_spill] sm:$0xff] %v9189_v60  ;;  %v9195_v49 = vld [vmem:[%s11578_s4 + $0x120] sm:$0xff]  ;;  %v9201_v44 = vld [vmem:[%s11578_s4 + $0x130] sm:$0xff] }
 0x54e   :  { %2658 = vmatprep.subr.mxu0 %v9183_v3  ;;  %2729 = vmatprep.subr.mxu1 %v9189_v60  ;;  %12795 = vst [vmem:[#allocation68_spill] sm:$0xff] %v9195_v49  ;;  %12796 = vst [vmem:[#allocation69_spill] sm:$0xff] %v9201_v44  ;;  %v9207_v3 = vld [vmem:[%s11578_s4 + $0x108] sm:$0xff]  ;;  %v9213_v60 = vld [vmem:[%s11578_s4 + $0x118] sm:$0xff] }
 0x54f   :  { %2659 = vmatpush1.msra.mxu0 %v9195_v49  ;;  %2730 = vmatpush1.msra.mxu1 %v9201_v44  ;;  %12797 = vst [vmem:[#allocation70_spill] sm:$0xff] %v9207_v3  ;;  %12798 = vst [vmem:[#allocation71_spill] sm:$0xff] %v9213_v60  ;;  %v9219_v49 = vld [vmem:[%s11578_s4 + $0x100] sm:$0xff]  ;;  %v9225_v44 = vld [vmem:[%s11578_s4 + $0x110] sm:$0xff] }
 0x550   :  { %2660 = vmatprep.subr.mxu0 %v9207_v3  ;;  %2731 = vmatprep.subr.mxu1 %v9213_v60  ;;  %12799 = vst [vmem:[#allocation72_spill] sm:$0xff] %v9219_v49  ;;  %12800 = vst [vmem:[#allocation73_spill] sm:$0xff] %v9225_v44  ;;  %v9231_v3 = vld [vmem:[%s11578_s4 + $0xe8] sm:$0xff]  ;;  %v9237_v60 = vld [vmem:[%s11578_s4 + $0xf8] sm:$0xff] }
 0x551   :  { %2661 = vmatpush1.msra.mxu0 %v9219_v49  ;;  %2732 = vmatpush1.msra.mxu1 %v9225_v44  ;;  %12801 = vst [vmem:[#allocation74_spill] sm:$0xff] %v9231_v3  ;;  %12802 = vst [vmem:[#allocation75_spill] sm:$0xff] %v9237_v60  ;;  %v9243_v49 = vld [vmem:[%s11578_s4 + $0xe0] sm:$0xff]  ;;  %v9249_v44 = vld [vmem:[%s11578_s4 + $0xf0] sm:$0xff] }
 0x552   :  { %2662 = vmatprep.subr.mxu0 %v9231_v3  ;;  %2733 = vmatprep.subr.mxu1 %v9237_v60  ;;  %12803 = vst [vmem:[#allocation76_spill] sm:$0xff] %v9243_v49  ;;  %12804 = vst [vmem:[#allocation77_spill] sm:$0xff] %v9249_v44  ;;  %v9255_v3 = vld [vmem:[%s11578_s4 + $0xc8] sm:$0xff]  ;;  %v9261_v60 = vld [vmem:[%s11578_s4 + $0xd8] sm:$0xff] }
 0x553   :  { %2663 = vmatpush1.msra.mxu0 %v9243_v49  ;;  %2734 = vmatpush1.msra.mxu1 %v9249_v44  ;;  %12805 = vst [vmem:[#allocation78_spill] sm:$0xff] %v9255_v3  ;;  %12806 = vst [vmem:[#allocation79_spill] sm:$0xff] %v9261_v60  ;;  %v9267_v49 = vld [vmem:[%s11578_s4 + $0xc0] sm:$0xff]  ;;  %v9273_v44 = vld [vmem:[%s11578_s4 + $0xd0] sm:$0xff] }
 0x554   :  { %2664 = vmatprep.subr.mxu0 %v9255_v3  ;;  %2735 = vmatprep.subr.mxu1 %v9261_v60  ;;  %12807 = vst [vmem:[#allocation80_spill] sm:$0xff] %v9267_v49  ;;  %12808 = vst [vmem:[#allocation81_spill] sm:$0xff] %v9273_v44  ;;  %v9279_v3 = vld [vmem:[%s11578_s4 + $0xa8] sm:$0xff]  ;;  %v9285_v60 = vld [vmem:[%s11578_s4 + $0xb8] sm:$0xff] }
 0x555   :  { %2665 = vmatpush1.msra.mxu0 %v9267_v49  ;;  %2736 = vmatpush1.msra.mxu1 %v9273_v44  ;;  %12809 = vst [vmem:[#allocation82_spill] sm:$0xff] %v9279_v3  ;;  %12810 = vst [vmem:[#allocation83_spill] sm:$0xff] %v9285_v60  ;;  %v9291_v49 = vld [vmem:[%s11578_s4 + $0xa0] sm:$0xff]  ;;  %v9297_v44 = vld [vmem:[%s11578_s4 + $0xb0] sm:$0xff] }
 0x556   :  { %2666 = vmatprep.subr.mxu0 %v9279_v3  ;;  %2737 = vmatprep.subr.mxu1 %v9285_v60  ;;  %12811 = vst [vmem:[#allocation84_spill] sm:$0xff] %v9291_v49  ;;  %12812 = vst [vmem:[#allocation85_spill] sm:$0xff] %v9297_v44  ;;  %v9303_v3 = vld [vmem:[%s11578_s4 + $0x88] sm:$0xff]  ;;  %v9309_v60 = vld [vmem:[%s11578_s4 + $0x98] sm:$0xff] }
 0x557   :  { %2667 = vmatpush1.msra.mxu0 %v9291_v49  ;;  %2738 = vmatpush1.msra.mxu1 %v9297_v44  ;;  %12813 = vst [vmem:[#allocation86_spill] sm:$0xff] %v9303_v3  ;;  %12814 = vst [vmem:[#allocation87_spill] sm:$0xff] %v9309_v60  ;;  %v9315_v49 = vld [vmem:[%s11578_s4 + $0x80] sm:$0xff]  ;;  %v9321_v44 = vld [vmem:[%s11578_s4 + $0x90] sm:$0xff] }
 0x558   :  { %2668 = vmatprep.subr.mxu0 %v9303_v3  ;;  %2739 = vmatprep.subr.mxu1 %v9309_v60  ;;  %12815 = vst [vmem:[#allocation88_spill] sm:$0xff] %v9315_v49  ;;  %12816 = vst [vmem:[#allocation89_spill] sm:$0xff] %v9321_v44  ;;  %v9327_v3 = vld [vmem:[%s11578_s4 + $0x68] sm:$0xff]  ;;  %v9333_v60 = vld [vmem:[%s11578_s4 + $0x78] sm:$0xff] }
 0x559   :  { %2669 = vmatpush1.msra.mxu0 %v9315_v49  ;;  %2740 = vmatpush1.msra.mxu1 %v9321_v44  ;;  %12817 = vst [vmem:[#allocation93_spill] sm:$0xff] %v9327_v3  ;;  %12818 = vst [vmem:[#allocation94_spill] sm:$0xff] %v9333_v60  ;;  %v9339_v49 = vld [vmem:[%s11578_s4 + $0x60] sm:$0xff]  ;;  %v9345_v44 = vld [vmem:[%s11578_s4 + $0x70] sm:$0xff] }
 0x55a   :  { %2670 = vmatprep.subr.mxu0 %v9327_v3  ;;  %2741 = vmatprep.subr.mxu1 %v9333_v60  ;;  %12819 = vst [vmem:[#allocation95_spill] sm:$0xff] %v9339_v49  ;;  %12820 = vst [vmem:[#allocation90_spill] sm:$0xff] %v9345_v44  ;;  %v9351_v3 = vld [vmem:[%s11578_s4 + $0x48] sm:$0xff]  ;;  %v9357_v60 = vld [vmem:[%s11578_s4 + $0x58] sm:$0xff] }
 0x55b   :  { %2671 = vmatpush1.msra.mxu0 %v9339_v49  ;;  %2742 = vmatpush1.msra.mxu1 %v9345_v44  ;;  %12821 = vst [vmem:[#allocation96_spill] sm:$0xff] %v9351_v3  ;;  %12822 = vst [vmem:[#allocation97_spill] sm:$0xff] %v9357_v60  ;;  %v9363_v49 = vld [vmem:[%s11578_s4 + $0x40] sm:$0xff]  ;;  %v9369_v44 = vld [vmem:[%s11578_s4 + $0x50] sm:$0xff] }
 0x55c   :  { %2672 = vmatprep.subr.mxu0 %v9351_v3  ;;  %2743 = vmatprep.subr.mxu1 %v9357_v60  ;;  %12823 = vst [vmem:[#allocation98_spill] sm:$0xff] %v9363_v49  ;;  %12824 = vst [vmem:[#allocation99_spill] sm:$0xff] %v9369_v44  ;;  %v9375_v3 = vld [vmem:[%s11578_s4 + $0x28] sm:$0xff]  ;;  %v9381_v60 = vld [vmem:[%s11578_s4 + $0x38] sm:$0xff] }
 0x55d   :  { %2673 = vmatpush1.msra.mxu0 %v9363_v49  ;;  %2744 = vmatpush1.msra.mxu1 %v9369_v44  ;;  %12825 = vst [vmem:[#allocation100_spill] sm:$0xff] %v9375_v3  ;;  %12826 = vst [vmem:[#allocation101_spill] sm:$0xff] %v9381_v60  ;;  %v9387_v49 = vld [vmem:[%s11578_s4 + $0x20] sm:$0xff]  ;;  %v9393_v44 = vld [vmem:[%s11578_s4 + $0x30] sm:$0xff] }
 0x55e   :  { %2674 = vmatprep.subr.mxu0 %v9375_v3  ;;  %2745 = vmatprep.subr.mxu1 %v9381_v60  ;;  %12827 = vst [vmem:[#allocation102_spill] sm:$0xff] %v9387_v49  ;;  %12828 = vst [vmem:[#allocation103_spill] sm:$0xff] %v9393_v44  ;;  %v9399_v3 = vld [vmem:[%s11578_s4 + $0x8] sm:$0xff]  ;;  %v9405_v60 = vld [vmem:[%s11578_s4 + $0x18] sm:$0xff] }
 0x55f   :  { %2675 = vmatpush1.msra.mxu0 %v9387_v49  ;;  %2746 = vmatpush1.msra.mxu1 %v9393_v44  ;;  %12829 = vst [vmem:[#allocation104_spill] sm:$0xff] %v9399_v3  ;;  %12830 = vst [vmem:[#allocation105_spill] sm:$0xff] %v9405_v60  ;;  %v9411_v49 = vld [vmem:[%s11578_s4] sm:$0xff]  ;;  %v9417_v44 = vld [vmem:[%s11578_s4 + $0x10] sm:$0xff] }
 0x560   :  { %2676 = vmatprep.subr.mxu0 %v9399_v3  ;;  %2747 = vmatprep.subr.mxu1 %v9405_v60  ;;  %12831 = vst [vmem:[#allocation106_spill] sm:$0xff] %v9411_v49  ;;  %12832 = vst [vmem:[#allocation107_spill] sm:$0xff] %v9417_v44  ;;  %v9425_v60 = vld [vmem:[%s11579_s5 + $0x1e8] sm:$0xff] }
 0x561   :  { %2677 = vmatpush1.msra.mxu0 %v9411_v49  ;;  %2748 = vmatpush1.msra.mxu1 %v9417_v44  ;;  %12833 = vst [vmem:[#allocation108_spill] sm:$0xff] %v9425_v60  ;;  %v9431_v49 = vld [vmem:[%s11579_s5 + $0x1f8] sm:$0xff] }
 0x562   :  { %2710 = vmatprep.mubr.f32.mxu0 %v12185_v59  ;;  %2781 = vmatprep.mubr.f32.mxu1 %v12185_v59  ;;  %12834 = vst [vmem:[#allocation109_spill] sm:$0xff] %v9431_v49 }
 0x563   :  { %2788 = vmatprep.subr.mxu0 %v9425_v60  ;;  %2859 = vmatprep.subr.mxu1 %v9431_v49 }
 0x5be   :  { %v2212_v3 = vpop.f32.mrf.mxu0  ;;  %v2283_v32 = vpop.f32.mrf.mxu1 }
 0x5c0   :  { %v2214_v44 = vpop.f32.mrf.mxu0  ;;  %v2285_v14 = vpop.f32.mrf.mxu1 }
 0x5df   :  { %v2354_v20 = vpop.f32.mrf.mxu0  ;;  %v2425_v58 = vpop.f32.mrf.mxu1 }
 0x5e1   :  { %v2356_v54 = vpop.f32.mrf.mxu0  ;;  %v2427_v33 = vpop.f32.mrf.mxu1 }
 0x601   :  { %v2524_v13 = vpop.f32.mrf.mxu0  ;;  %v2595_v49 = vpop.f32.mrf.mxu1 }
 0x602   :  { %v2604_v12 = vrot.slane %v2524_v13, 4  ;;  %v2606_v0 = vrot.slane %v2595_v49, 4  ;;  %v2636_v49 = vrot.slane %v8567_v43, 7 }
 0x603   :  { %v2526_v2 = vpop.f32.mrf.mxu0  ;;  %v2597_v41 = vpop.f32.mrf.mxu1 }
 0x604   :  { %v2612_v10 = vadd.f32 %v2604_v12, %v12390_v5  ;;  %v2605_v60 = vrot.slane %v2526_v2, 4  ;;  %v2614_v53 = vadd.f32 %v2606_v0, %v12392_v16  ;;  %v2607_v63 = vrot.slane %v2597_v41, 4 }
 0x606   :  { %v4665_v7 = vmul.f32 -1.442695, %v2612_v10  ;;  %v2613_v6 = vadd.f32 %v2605_v60, %v12391_v9  ;;  %v4667_v42 = vmul.f32 -1.442695, %v2614_v53  ;;  %v2615_v40 = vadd.f32 %v2607_v63, %v6614_v57 }
 0x607   :  { %v2215_v10 = vadd.f32 %v2214_v44, %v7143_v21 }
 0x608   :  { %v4666_v31 = vmul.f32 -1.442695, %v2613_v6  ;;  %4803 = vpow2.f32 %v4665_v7  ;;  %v2213_v6 = vadd.f32 %v2212_v3, %v7146_v25 }
 0x609   :  { %v2431_v7 = vadd.f32 %v2356_v54, %v2215_v10  ;;  %v2284_v54 = vadd.f32 %v2283_v32, %v7157_v45  ;;  %v2286_v10 = vadd.f32 %v2285_v14, %v7161_v8  ;;  %v9453_v14 = vld [vmem:[%s11579_s5 + $0x1e0] sm:$0xff]  ;;  %v9471_v32 = vld [vmem:[%s11579_s5 + $0x1d8] sm:$0xff] }
 0x60a   :  { %4805 = vpow2.f32 %v4666_v31  ;;  %v2430_v31 = vadd.f32 %v2354_v20, %v2213_v6 }
 0x60b   :  { %4807 = vpow2.f32 %v4667_v42  ;;  %v4663_v2 = vmul.f32 -1.442695, %v2431_v7  ;;  %v2432_v6 = vadd.f32 %v2425_v58, %v2284_v54  ;;  %v2433_v43 = vadd.f32 %v2427_v33, %v2286_v10  ;;  %v9459_v33 = vld [vmem:[%s11579_s5 + $0x1f0] sm:$0xff]  ;;  %v9465_v58 = vld [vmem:[%s11579_s5 + $0x1c8] sm:$0xff]  ;;  %v9519_v54 = vld [vmem:[%s11579_s5 + $0x198] sm:$0xff] }
 0x60c   :  { %v4662_v0 = vmul.f32 -1.442695, %v2430_v31  ;;  %v9526_v10 = vld [vmem:[%s11579_s5 + $0x180] sm:$0xff] }
 0x60d   :  { %v4664_v7 = vmul.f32 -1.442695, %v2432_v6 }
 0x615   :  { %v4804_v13 = vpop.eup %4803 }
 0x616   :  { %v2625_v39 = vadd.f32 1.0, %v4804_v13 }
 0x617   :  { %v4806_v12 = vpop.eup %4805 }
 0x618   :  { %4809 = vrcp.f32 %v2625_v39  ;;  %v2626_v60 = vadd.f32 1.0, %v4806_v12  ;;  %v4808_v53 = vpop.eup %4807 }
 0x619   :  { %4811 = vtanh.f32 %v2615_v40  ;;  %v2627_v44 = vadd.f32 1.0, %v4808_v53 }
 0x61a   :  { %4813 = vrcp.f32 %v2626_v60 }
 0x61b   :  { %4815 = vpow2.f32 %v4663_v2 }
 0x61c   :  { %4817 = vpow2.f32 %v4662_v0 }
 0x61d   :  { %4819 = vrcp.f32 %v2627_v44  ;;  %v9495_v44 = vld [vmem:[%s11579_s5 + $0x1b8] sm:$0xff] }
 0x625   :  { %v4810_v41 = vpop.eup %4809 }
 0x626   :  { %v4812_v63 = vpop.eup %4811 }
 0x627   :  { %v4814_v13 = vpop.eup %4813  ;;  %v2639_v39 = vmul.f32 %v4812_v63, %v4810_v41  ;;  %v9477_v41 = vld [vmem:[%s11579_s5 + $0x1c0] sm:$0xff]  ;;  %v9483_v63 = vld [vmem:[%s11579_s5 + $0x1d0] sm:$0xff] }
 0x628   :  { %v2638_v42 = vmul.f32 %v4814_v13, %v2636_v49  ;;  %v4816_v40 = vpop.eup %4815  ;;  %v9489_v13 = vld [vmem:[%s11579_s5 + $0x1a8] sm:$0xff] }
 0x629   :  { %v4818_v20 = vpop.eup %4817  ;;  %v2444_v3 = vadd.f32 1.0, %v4816_v40 }
 0x62a   :  { %v9441_v12 = vadd.f32 %v2639_v39, %v2638_v42  ;;  %v2443_v60 = vadd.f32 1.0, %v4818_v20  ;;  %v4820_v31 = vpop.eup %4819  ;;  %v9501_v42 = vld [vmem:[%s11579_s5 + $0x1a0] sm:$0xff]  ;;  %v9507_v39 = vld [vmem:[%s11579_s5 + $0x1b0] sm:$0xff]  ;;  %v9513_v20 = vld [vmem:[%s11579_s5 + $0x188] sm:$0xff] }
 0x62c   :  { %4821 = vtanh.f32 %v9441_v12 }
 0x62d   :  { %4823 = vrcp.f32 %v2444_v3 }
 0x62e   :  { %4825 = vrcp.f32 %v2443_v60  ;;  %v9532_v60 = vld [vmem:[%s11579_s5 + $0x190] sm:$0xff] }
 0x62f   :  { %4827 = vtanh.f32 %v2433_v43  ;;  %v9538_v43 = vld [vmem:[%s11579_s5 + $0x168] sm:$0xff] }
 0x630   :  { %4829 = vpow2.f32 %v4664_v7 }
 0x639   :  { %v4822_v2 = vpop.eup %4821 }
 0x63a   :  { %v2642_v0 = vmul.f32 %v4822_v2, %v4820_v31  ;;  %v4824_v49 = vpop.eup %4823  ;;  %v9550_v31 = vld [vmem:[%s11579_s5 + $0x160] sm:$0xff]  ;;  %v9556_v2 = vld [vmem:[%s11579_s5 + $0x170] sm:$0xff] }
 0x63b   :  { %v4826_v40 = vpop.eup %4825  ;;  %v2453_v3 = vmul.f32 %v4824_v49, %v8597_v18  ;;  %v9544_v18 = vld [vmem:[%s11579_s5 + $0x178] sm:$0xff]  ;;  %12835 = vst [vmem:[#allocation110_spill] sm:$0xff] %v9556_v2  ;;  %v9562_v49 = vld [vmem:[%s11579_s5 + $0x148] sm:$0xff] }
 0x63c   :  { %v9446_v53 = vrot.slane %v2642_v0, 4  ;;  %v4828_v6 = vpop.eup %4827  ;;  %12836 = vst [vmem:[#allocation111_spill] sm:$0xff] %v9562_v49 }
 0x63d   :  { %v2454_v7 = vmul.f32 %v4828_v6, %v4826_v40  ;;  %v4830_v0 = vpop.eup %4829  ;;  %v9568_v40 = vld [vmem:[%s11579_s5 + $0x158] sm:$0xff] }
 0x63e   :  { %2711 = vmatmul.mubr.f32.vlgmr.msra.gmra.mxu0 %v9446_v53  ;;  %2782 = vmatmul.mubr.f32.vlgmr.msra.gmra.mxu1 %v9446_v53  ;;  %12837 = vst [vmem:[#allocation112_spill] sm:$0xff] %v9568_v40 }
 0x63f   :  { %2789 = vmatpush1.msra.mxu0 %v9453_v14  ;;  %2860 = vmatpush1.msra.mxu1 %v9459_v33  ;;  %v9571_v6 = vadd.f32 %v2454_v7, %v2453_v3  ;;  %v9594_v3 = vld [vmem:[%s11579_s5 + $0x138] sm:$0xff]  ;;  %v2445_v7 = vadd.f32 1.0, %v4830_v0 }
 0x640   :  { %2790 = vmatprep.subr.mxu0 %v9465_v58  ;;  %2861 = vmatprep.subr.mxu1 %v9471_v32  ;;  %12841 = vst [vmem:[#allocation116_spill] sm:$0xff] %v9594_v3  ;;  %v9618_v0 = vld [vmem:[%s11579_s5 + $0x118] sm:$0xff] }
 0x641   :  { %2791 = vmatpush1.msra.mxu0 %v9477_v41  ;;  %2862 = vmatpush1.msra.mxu1 %v9483_v63  ;;  %12845 = vst [vmem:[#allocation120_spill] sm:$0xff] %v9618_v0  ;;  %4831 = vtanh.f32 %v9571_v6 }
 0x642   :  { %2792 = vmatprep.subr.mxu0 %v9489_v13  ;;  %2863 = vmatprep.subr.mxu1 %v9495_v44  ;;  %4833 = vrcp.f32 %v2445_v7  ;;  %v9667_v7 = vld [vmem:[%s11579_s5 + $0xd8] sm:$0xff] }
 0x643   :  { %2793 = vmatpush1.msra.mxu0 %v9501_v42  ;;  %2864 = vmatpush1.msra.mxu1 %v9507_v39  ;;  %12853 = vst [vmem:[#allocation128_spill] sm:$0xff] %v9667_v7 }
 0x644   :  { %2794 = vmatprep.subr.mxu0 %v9513_v20  ;;  %2865 = vmatprep.subr.mxu1 %v9519_v54 }
 0x645   :  { %2795 = vmatpush1.msra.mxu0 %v9526_v10  ;;  %2866 = vmatpush1.msra.mxu1 %v9532_v60 }
 0x646   :  { %2796 = vmatprep.subr.mxu0 %v9538_v43  ;;  %2867 = vmatprep.subr.mxu1 %v9544_v18 }
 0x647   :  { %2797 = vmatpush1.msra.mxu0 %v9550_v31  ;;  %2868 = vmatpush1.msra.mxu1 %v9556_v2  ;;  %v9576_v2 = vld [vmem:[%s11579_s5 + $0x140] sm:$0xff] }
 0x648   :  { %2798 = vmatprep.subr.mxu0 %v9562_v49  ;;  %2869 = vmatprep.subr.mxu1 %v9568_v40  ;;  %12838 = vst [vmem:[#allocation113_spill] sm:$0xff] %v9576_v2  ;;  %v9582_v49 = vld [vmem:[%s11579_s5 + $0x150] sm:$0xff]  ;;  %v9588_v40 = vld [vmem:[%s11579_s5 + $0x128] sm:$0xff] }
 0x649   :  { %2799 = vmatpush1.msra.mxu0 %v9576_v2  ;;  %12839 = vst [vmem:[#allocation114_spill] sm:$0xff] %v9582_v49  ;;  %2870 = vmatpush1.msra.mxu1 %v9582_v49  ;;  %12840 = vst [vmem:[#allocation115_spill] sm:$0xff] %v9588_v40  ;;  %v9600_v2 = vld [vmem:[%s11579_s5 + $0x120] sm:$0xff]  ;;  %v9606_v49 = vld [vmem:[%s11579_s5 + $0x130] sm:$0xff] }
 0x64a   :  { %2800 = vmatprep.subr.mxu0 %v9588_v40  ;;  %2871 = vmatprep.subr.mxu1 %v9594_v3  ;;  %12842 = vst [vmem:[#allocation117_spill] sm:$0xff] %v9600_v2  ;;  %12843 = vst [vmem:[#allocation118_spill] sm:$0xff] %v9606_v49  ;;  %v9612_v40 = vld [vmem:[%s11579_s5 + $0x108] sm:$0xff] }
 0x64b   :  { %2801 = vmatpush1.msra.mxu0 %v9600_v2  ;;  %2872 = vmatpush1.msra.mxu1 %v9606_v49  ;;  %12844 = vst [vmem:[#allocation119_spill] sm:$0xff] %v9612_v40  ;;  %v9625_v49 = vld [vmem:[%s11579_s5 + $0x100] sm:$0xff]  ;;  %v9643_v2 = vld [vmem:[%s11579_s5 + $0xf8] sm:$0xff]  ;;  %v9805_v3 = vld [vmem:[%s11579_s5 + $0x8] sm:$0xff] }
 0x64c   :  { %2802 = vmatprep.subr.mxu0 %v9612_v40  ;;  %2873 = vmatprep.subr.mxu1 %v9618_v0  ;;  %12846 = vst [vmem:[#allocation121_spill] sm:$0xff] %v9625_v49  ;;  %v9631_v40 = vld [vmem:[%s11579_s5 + $0x110] sm:$0xff]  ;;  %v9637_v0 = vld [vmem:[%s11579_s5 + $0xe8] sm:$0xff]  ;;  %12849 = vst [vmem:[#allocation124_spill] sm:$0xff] %v9643_v2 }
 0x64d   :  { %2803 = vmatpush1.msra.mxu0 %v9625_v49  ;;  %12847 = vst [vmem:[#allocation122_spill] sm:$0xff] %v9631_v40  ;;  %2874 = vmatpush1.msra.mxu1 %v9631_v40  ;;  %12848 = vst [vmem:[#allocation123_spill] sm:$0xff] %v9637_v0  ;;  %v9649_v49 = vld [vmem:[%s11579_s5 + $0xe0] sm:$0xff]  ;;  %v9655_v40 = vld [vmem:[%s11579_s5 + $0xf0] sm:$0xff] }
 0x64e   :  { %2804 = vmatprep.subr.mxu0 %v9637_v0  ;;  %2875 = vmatprep.subr.mxu1 %v9643_v2  ;;  %12850 = vst [vmem:[#allocation125_spill] sm:$0xff] %v9649_v49  ;;  %12851 = vst [vmem:[#allocation126_spill] sm:$0xff] %v9655_v40  ;;  %v9661_v0 = vld [vmem:[%s11579_s5 + $0xc8] sm:$0xff] }
 0x64f   :  { %2805 = vmatpush1.msra.mxu0 %v9649_v49  ;;  %2876 = vmatpush1.msra.mxu1 %v9655_v40  ;;  %12852 = vst [vmem:[#allocation127_spill] sm:$0xff] %v9661_v0  ;;  %v9673_v49 = vld [vmem:[%s11579_s5 + $0xc0] sm:$0xff]  ;;  %v9679_v40 = vld [vmem:[%s11579_s5 + $0xd0] sm:$0xff]  ;;  %v9781_v2 = vld [vmem:[%s11579_s5 + $0x28] sm:$0xff] }
 0x650   :  { %2806 = vmatprep.subr.mxu0 %v9661_v0  ;;  %2877 = vmatprep.subr.mxu1 %v9667_v7  ;;  %12854 = vst [vmem:[#allocation129_spill] sm:$0xff] %v9673_v49  ;;  %12855 = vst [vmem:[#allocation130_spill] sm:$0xff] %v9679_v40  ;;  %v9685_v0 = vld [vmem:[%s11579_s5 + $0xa8] sm:$0xff]  ;;  %v9691_v7 = vld [vmem:[%s11579_s5 + $0xb8] sm:$0xff] }
 0x651   :  { %2807 = vmatpush1.msra.mxu0 %v9673_v49  ;;  %2878 = vmatpush1.msra.mxu1 %v9679_v40  ;;  %12856 = vst [vmem:[#allocation131_spill] sm:$0xff] %v9685_v0  ;;  %12857 = vst [vmem:[#allocation132_spill] sm:$0xff] %v9691_v7  ;;  %v9697_v49 = vld [vmem:[%s11579_s5 + $0xa0] sm:$0xff]  ;;  %v9703_v40 = vld [vmem:[%s11579_s5 + $0xb0] sm:$0xff] }
 0x652   :  { %2808 = vmatprep.subr.mxu0 %v9685_v0  ;;  %2879 = vmatprep.subr.mxu1 %v9691_v7  ;;  %12858 = vst [vmem:[#allocation133_spill] sm:$0xff] %v9697_v49  ;;  %12859 = vst [vmem:[#allocation134_spill] sm:$0xff] %v9703_v40  ;;  %v9709_v0 = vld [vmem:[%s11579_s5 + $0x88] sm:$0xff]  ;;  %v9715_v7 = vld [vmem:[%s11579_s5 + $0x98] sm:$0xff] }
 0x653   :  { %2809 = vmatpush1.msra.mxu0 %v9697_v49  ;;  %2880 = vmatpush1.msra.mxu1 %v9703_v40  ;;  %12860 = vst [vmem:[#allocation135_spill] sm:$0xff] %v9709_v0  ;;  %12861 = vst [vmem:[#allocation136_spill] sm:$0xff] %v9715_v7  ;;  %v9721_v49 = vld [vmem:[%s11579_s5 + $0x80] sm:$0xff]  ;;  %v9727_v40 = vld [vmem:[%s11579_s5 + $0x90] sm:$0xff] }
 0x654   :  { %2810 = vmatprep.subr.mxu0 %v9709_v0  ;;  %2881 = vmatprep.subr.mxu1 %v9715_v7  ;;  %12862 = vst [vmem:[#allocation137_spill] sm:$0xff] %v9721_v49  ;;  %12863 = vst [vmem:[#allocation138_spill] sm:$0xff] %v9727_v40  ;;  %v9733_v0 = vld [vmem:[%s11579_s5 + $0x68] sm:$0xff]  ;;  %v9739_v7 = vld [vmem:[%s11579_s5 + $0x78] sm:$0xff] }
 0x655   :  { %2811 = vmatpush1.msra.mxu0 %v9721_v49  ;;  %2882 = vmatpush1.msra.mxu1 %v9727_v40  ;;  %12864 = vst [vmem:[#allocation139_spill] sm:$0xff] %v9733_v0  ;;  %12865 = vst [vmem:[#allocation140_spill] sm:$0xff] %v9739_v7  ;;  %v9745_v49 = vld [vmem:[%s11579_s5 + $0x60] sm:$0xff]  ;;  %v9751_v40 = vld [vmem:[%s11579_s5 + $0x70] sm:$0xff] }
 0x656   :  { %2812 = vmatprep.subr.mxu0 %v9733_v0  ;;  %2883 = vmatprep.subr.mxu1 %v9739_v7  ;;  %12866 = vst [vmem:[#allocation141_spill] sm:$0xff] %v9745_v49  ;;  %12867 = vst [vmem:[#allocation142_spill] sm:$0xff] %v9751_v40  ;;  %v9757_v0 = vld [vmem:[%s11579_s5 + $0x48] sm:$0xff]  ;;  %v9763_v7 = vld [vmem:[%s11579_s5 + $0x58] sm:$0xff] }
 0x657   :  { %2813 = vmatpush1.msra.mxu0 %v9745_v49  ;;  %2884 = vmatpush1.msra.mxu1 %v9751_v40  ;;  %12868 = vst [vmem:[#allocation143_spill] sm:$0xff] %v9757_v0  ;;  %12869 = vst [vmem:[#allocation144_spill] sm:$0xff] %v9763_v7  ;;  %v9769_v49 = vld [vmem:[%s11579_s5 + $0x40] sm:$0xff]  ;;  %v9775_v40 = vld [vmem:[%s11579_s5 + $0x50] sm:$0xff] }
 0x658   :  { %2814 = vmatprep.subr.mxu0 %v9757_v0  ;;  %2885 = vmatprep.subr.mxu1 %v9763_v7  ;;  %12870 = vst [vmem:[#allocation145_spill] sm:$0xff] %v9769_v49  ;;  %12871 = vst [vmem:[#allocation146_spill] sm:$0xff] %v9775_v40  ;;  %v4832_v0 = vpop.eup %4831  ;;  %v9787_v7 = vld [vmem:[%s11579_s5 + $0x38] sm:$0xff] }
 0x659   :  { %2815 = vmatpush1.msra.mxu0 %v9769_v49  ;;  %2886 = vmatpush1.msra.mxu1 %v9775_v40  ;;  %12872 = vst [vmem:[#allocation147_spill] sm:$0xff] %v9781_v2  ;;  %12873 = vst [vmem:[#allocation148_spill] sm:$0xff] %v9787_v7  ;;  %v9793_v49 = vld [vmem:[%s11579_s5 + $0x20] sm:$0xff]  ;;  %v9799_v40 = vld [vmem:[%s11579_s5 + $0x30] sm:$0xff] }
 0x65a   :  { %2816 = vmatprep.subr.mxu0 %v9781_v2  ;;  %2887 = vmatprep.subr.mxu1 %v9787_v7  ;;  %12874 = vst [vmem:[#allocation149_spill] sm:$0xff] %v9793_v49  ;;  %12875 = vst [vmem:[#allocation150_spill] sm:$0xff] %v9799_v40  ;;  %v4834_v2 = vpop.eup %4833  ;;  %v9811_v7 = vld [vmem:[%s11579_s5 + $0x18] sm:$0xff] }
 0x65b   :  { %2817 = vmatpush1.msra.mxu0 %v9793_v49  ;;  %2888 = vmatpush1.msra.mxu1 %v9799_v40  ;;  %12876 = vst [vmem:[#allocation152_spill] sm:$0xff] %v9805_v3  ;;  %v9817_v49 = vld [vmem:[%s11579_s5] sm:$0xff]  ;;  %v9821_v40 = vmul.f32 %v4834_v2, %v4832_v0  ;;  %v12907_v2 = vld [vmem:[#allocation36_spill] sm:$0xff]  ;;  %v12908_v0 = vld [vmem:[#allocation37_spill] sm:$0xff] }
 0x65c   :  { %2818 = vmatprep.subr.mxu0 %v9805_v3  ;;  %2889 = vmatprep.subr.mxu1 %v9811_v7  ;;  %v9826_v3 = vld [vmem:[%s11579_s5 + $0x10] sm:$0xff] }
 0x65d   :  { %2819 = vmatpush1.msra.mxu0 %v9817_v49  ;;  %2852 = vmatprep.mubr.f32.mxu0 %v12185_v59  ;;  %12877 = vst [vmem:[#allocation153_spill] sm:$0xff] %v9821_v40 }
 0x65e   :  { %2890 = vmatpush1.msra.mxu1 %v9826_v3  ;;  %2923 = vmatprep.mubr.f32.mxu1 %v12185_v59 }
 0x65f   :  { %2853 = vmatmul.mubr.f32.vlgmr.msra.gmra.mxu0 %v9821_v40  ;;  %2924 = vmatmul.mubr.f32.vlgmr.msra.gmra.mxu1 %v9821_v40  ;;  %v10365_v40 = vld [vmem:[%s11576_s2 + $0x70] sm:$0xff] }
 0x660   :  { %2958 = vmatprep.subr.mxu0 %v8651_v48  ;;  %3029 = vmatprep.subr.mxu1 %v8657_v29  ;;  %v12878_v48 = vld [vmem:[#allocation7_spill] sm:$0xff]  ;;  %v12879_v29 = vld [vmem:[#allocation8_spill] sm:$0xff] }
 0x661   :  { %2959 = vmatpush1.msra.mxu0 %v8663_v28  ;;  %3030 = vmatpush1.msra.mxu1 %v8669_v52  ;;  %v12880_v28 = vld [vmem:[#allocation9_spill] sm:$0xff]  ;;  %v12881_v52 = vld [vmem:[#allocation10_spill] sm:$0xff] }
 0x662   :  { %2960 = vmatprep.subr.mxu0 %v8675_v26  ;;  %3031 = vmatprep.subr.mxu1 %v8681_v22  ;;  %v12882_v26 = vld [vmem:[#allocation11_spill] sm:$0xff]  ;;  %v12883_v22 = vld [vmem:[#allocation12_spill] sm:$0xff] }
 0x663   :  { %2961 = vmatpush1.msra.mxu0 %v8687_v61  ;;  %3032 = vmatpush1.msra.mxu1 %v8693_v27  ;;  %v12884_v61 = vld [vmem:[#allocation13_spill] sm:$0xff]  ;;  %v12885_v27 = vld [vmem:[#allocation14_spill] sm:$0xff] }
 0x664   :  { %2962 = vmatprep.subr.mxu0 %v8699_v15  ;;  %3033 = vmatprep.subr.mxu1 %v8705_v30  ;;  %v12886_v15 = vld [vmem:[#allocation15_spill] sm:$0xff]  ;;  %v12887_v30 = vld [vmem:[#allocation16_spill] sm:$0xff] }
 0x665   :  { %2963 = vmatpush1.msra.mxu0 %v8711_v17  ;;  %3034 = vmatpush1.msra.mxu1 %v8717_v19  ;;  %v12888_v17 = vld [vmem:[#allocation17_spill] sm:$0xff]  ;;  %v12889_v19 = vld [vmem:[#allocation18_spill] sm:$0xff] }
 0x666   :  { %2964 = vmatprep.subr.mxu0 %v8723_v24  ;;  %3035 = vmatprep.subr.mxu1 %v8729_v4  ;;  %v12890_v24 = vld [vmem:[#allocation19_spill] sm:$0xff]  ;;  %v12891_v4 = vld [vmem:[#allocation20_spill] sm:$0xff] }
 0x667   :  { %2965 = vmatpush1.msra.mxu0 %v8735_v35  ;;  %3036 = vmatpush1.msra.mxu1 %v8741_v46  ;;  %v12892_v35 = vld [vmem:[#allocation21_spill] sm:$0xff]  ;;  %v12893_v46 = vld [vmem:[#allocation22_spill] sm:$0xff] }
 0x668   :  { %2966 = vmatprep.subr.mxu0 %v8747_v11  ;;  %3037 = vmatprep.subr.mxu1 %v8753_v34  ;;  %v12894_v11 = vld [vmem:[#allocation23_spill] sm:$0xff]  ;;  %v12895_v34 = vld [vmem:[#allocation24_spill] sm:$0xff] }
 0x669   :  { %2967 = vmatpush1.msra.mxu0 %v8759_v23  ;;  %3038 = vmatpush1.msra.mxu1 %v8765_v1  ;;  %v12896_v23 = vld [vmem:[#allocation25_spill] sm:$0xff]  ;;  %v12897_v1 = vld [vmem:[#allocation26_spill] sm:$0xff] }
 0x66a   :  { %2968 = vmatprep.subr.mxu0 %v8771_v51  ;;  %3039 = vmatprep.subr.mxu1 %v8777_v47  ;;  %v12898_v51 = vld [vmem:[#allocation27_spill] sm:$0xff]  ;;  %v12899_v47 = vld [vmem:[#allocation28_spill] sm:$0xff] }
 0x66b   :  { %2969 = vmatpush1.msra.mxu0 %v8783_v50  ;;  %3040 = vmatpush1.msra.mxu1 %v8789_v56  ;;  %v12900_v50 = vld [vmem:[#allocation29_spill] sm:$0xff]  ;;  %v12901_v56 = vld [vmem:[#allocation30_spill] sm:$0xff] }
 0x66c   :  { %2970 = vmatprep.subr.mxu0 %v8795_v62  ;;  %3041 = vmatprep.subr.mxu1 %v8801_v55  ;;  %v12902_v62 = vld [vmem:[#allocation31_spill] sm:$0xff]  ;;  %v12903_v55 = vld [vmem:[#allocation32_spill] sm:$0xff]  ;;  %13044 = vst [vmem:[#allocation30_spill] sm:$0xff] %v10365_v40 }
 0x66d   :  { %2971 = vmatpush1.msra.mxu0 %v8807_v36  ;;  %3042 = vmatpush1.msra.mxu1 %v8813_v37  ;;  %v12904_v36 = vld [vmem:[#allocation33_spill] sm:$0xff]  ;;  %v12905_v37 = vld [vmem:[#allocation34_spill] sm:$0xff] }
 0x66e   :  { %2972 = vmatprep.subr.mxu0 %v8819_v38  ;;  %3043 = vmatprep.subr.mxu1 %v12878_v48  ;;  %v12906_v38 = vld [vmem:[#allocation35_spill] sm:$0xff]  ;;  %v12909_v48 = vld [vmem:[#allocation38_spill] sm:$0xff] }
 0x66f   :  { %2973 = vmatpush1.msra.mxu0 %v12879_v29  ;;  %3044 = vmatpush1.msra.mxu1 %v12880_v28  ;;  %v12910_v29 = vld [vmem:[#allocation39_spill] sm:$0xff]  ;;  %v12911_v28 = vld [vmem:[#allocation40_spill] sm:$0xff] }
 0x670   :  { %2974 = vmatprep.subr.mxu0 %v12881_v52  ;;  %3045 = vmatprep.subr.mxu1 %v12882_v26  ;;  %v12912_v52 = vld [vmem:[#allocation41_spill] sm:$0xff]  ;;  %v12913_v26 = vld [vmem:[#allocation42_spill] sm:$0xff] }
 0x671   :  { %2975 = vmatpush1.msra.mxu0 %v12883_v22  ;;  %3046 = vmatpush1.msra.mxu1 %v12884_v61  ;;  %v12914_v22 = vld [vmem:[#allocation43_spill] sm:$0xff]  ;;  %v12915_v61 = vld [vmem:[#allocation44_spill] sm:$0xff] }
 0x672   :  { %2976 = vmatprep.subr.mxu0 %v12885_v27  ;;  %3047 = vmatprep.subr.mxu1 %v12886_v15  ;;  %v12916_v27 = vld [vmem:[#allocation45_spill] sm:$0xff]  ;;  %v12917_v15 = vld [vmem:[#allocation46_spill] sm:$0xff] }
 0x673   :  { %2977 = vmatpush1.msra.mxu0 %v12887_v30  ;;  %3048 = vmatpush1.msra.mxu1 %v12888_v17  ;;  %v12918_v30 = vld [vmem:[#allocation47_spill] sm:$0xff]  ;;  %v12919_v17 = vld [vmem:[#allocation48_spill] sm:$0xff] }
 0x674   :  { %2978 = vmatprep.subr.mxu0 %v12889_v19  ;;  %3049 = vmatprep.subr.mxu1 %v12890_v24  ;;  %v12920_v19 = vld [vmem:[#allocation49_spill] sm:$0xff]  ;;  %v12921_v24 = vld [vmem:[#allocation50_spill] sm:$0xff] }
 0x675   :  { %2979 = vmatpush1.msra.mxu0 %v12891_v4  ;;  %3050 = vmatpush1.msra.mxu1 %v12892_v35  ;;  %v12922_v4 = vld [vmem:[#allocation51_spill] sm:$0xff]  ;;  %v12924_v35 = vld [vmem:[#allocation53_spill] sm:$0xff] }
 0x676   :  { %2980 = vmatprep.subr.mxu0 %v12893_v46  ;;  %3051 = vmatprep.subr.mxu1 %v12894_v11  ;;  %v12925_v46 = vld [vmem:[#allocation54_spill] sm:$0xff]  ;;  %v12926_v11 = vld [vmem:[#allocation55_spill] sm:$0xff] }
 0x677   :  { %2981 = vmatpush1.msra.mxu0 %v12895_v34  ;;  %3052 = vmatpush1.msra.mxu1 %v12896_v23  ;;  %v12927_v34 = vld [vmem:[#allocation56_spill] sm:$0xff]  ;;  %v12928_v23 = vld [vmem:[#allocation57_spill] sm:$0xff] }
 0x678   :  { %2982 = vmatprep.subr.mxu0 %v12897_v1  ;;  %3053 = vmatprep.subr.mxu1 %v12898_v51  ;;  %v12929_v1 = vld [vmem:[#allocation58_spill] sm:$0xff]  ;;  %v12930_v51 = vld [vmem:[#allocation59_spill] sm:$0xff] }
 0x679   :  { %2983 = vmatpush1.msra.mxu0 %v12899_v47  ;;  %3054 = vmatpush1.msra.mxu1 %v12900_v50  ;;  %v12931_v47 = vld [vmem:[#allocation60_spill] sm:$0xff]  ;;  %v12932_v50 = vld [vmem:[#allocation61_spill] sm:$0xff] }
 0x67a   :  { %2984 = vmatprep.subr.mxu0 %v12901_v56  ;;  %3055 = vmatprep.subr.mxu1 %v12902_v62  ;;  %v12933_v56 = vld [vmem:[#allocation62_spill] sm:$0xff]  ;;  %v12934_v62 = vld [vmem:[#allocation63_spill] sm:$0xff] }
 0x67b   :  { %2985 = vmatpush1.msra.mxu0 %v12903_v55  ;;  %3056 = vmatpush1.msra.mxu1 %v12904_v36  ;;  %v12935_v55 = vld [vmem:[#allocation64_spill] sm:$0xff]  ;;  %v12936_v36 = vld [vmem:[#allocation65_spill] sm:$0xff] }
 0x67c   :  { %2986 = vmatprep.subr.mxu0 %v12905_v37  ;;  %3057 = vmatprep.subr.mxu1 %v12906_v38  ;;  %v12937_v37 = vld [vmem:[#allocation66_spill] sm:$0xff]  ;;  %v12938_v38 = vld [vmem:[#allocation67_spill] sm:$0xff] }
 0x67d   :  { %2987 = vmatpush1.msra.mxu0 %v12907_v2  ;;  %3058 = vmatpush1.msra.mxu1 %v12908_v0  ;;  %v12939_v2 = vld [vmem:[#allocation68_spill] sm:$0xff]  ;;  %v12940_v0 = vld [vmem:[#allocation69_spill] sm:$0xff] }
 0x67e   :  { %2988 = vmatprep.subr.mxu0 %v12909_v48  ;;  %3059 = vmatprep.subr.mxu1 %v12910_v29  ;;  %v12941_v48 = vld [vmem:[#allocation70_spill] sm:$0xff]  ;;  %v12942_v29 = vld [vmem:[#allocation71_spill] sm:$0xff] }
 0x67f   :  { %2989 = vmatpush1.msra.mxu0 %v12911_v28  ;;  %3022 = vmatprep.mubr.f32.mxu0 %v12185_v59  ;;  %v12943_v28 = vld [vmem:[#allocation72_spill] sm:$0xff] }
 0x680   :  { %3060 = vmatpush1.msra.mxu1 %v12912_v52  ;;  %3093 = vmatprep.mubr.f32.mxu1 %v12185_v59  ;;  %v12944_v52 = vld [vmem:[#allocation73_spill] sm:$0xff] }
 0x681   :  { %3023 = vmatmul.mubr.f32.vlgmr.msra.gmra.mxu0 %v9446_v53  ;;  %3094 = vmatmul.mubr.f32.vlgmr.msra.gmra.mxu1 %v9446_v53  ;;  %v12923_v53 = vld [vmem:[#allocation52_spill] sm:$0xff] }
 0x682   :  { %3146 = vmatprep.subr.mxu0 %v12913_v26  ;;  %3217 = vmatprep.subr.mxu1 %v12914_v22  ;;  %v12945_v26 = vld [vmem:[#allocation74_spill] sm:$0xff]  ;;  %v12946_v22 = vld [vmem:[#allocation75_spill] sm:$0xff] }
 0x683   :  { %3147 = vmatpush1.msra.mxu0 %v12915_v61  ;;  %3218 = vmatpush1.msra.mxu1 %v12916_v27  ;;  %v12947_v61 = vld [vmem:[#allocation76_spill] sm:$0xff]  ;;  %v12948_v27 = vld [vmem:[#allocation77_spill] sm:$0xff] }
 0x684   :  { %3148 = vmatprep.subr.mxu0 %v12917_v15  ;;  %3219 = vmatprep.subr.mxu1 %v12918_v30  ;;  %v12949_v15 = vld [vmem:[#allocation78_spill] sm:$0xff]  ;;  %v12950_v30 = vld [vmem:[#allocation79_spill] sm:$0xff] }
 0x685   :  { %3149 = vmatpush1.msra.mxu0 %v12919_v17  ;;  %3220 = vmatpush1.msra.mxu1 %v12920_v19  ;;  %v12951_v17 = vld [vmem:[#allocation80_spill] sm:$0xff]  ;;  %v12952_v19 = vld [vmem:[#allocation81_spill] sm:$0xff] }
 0x686   :  { %3150 = vmatprep.subr.mxu0 %v12921_v24  ;;  %3221 = vmatprep.subr.mxu1 %v12922_v4  ;;  %v12953_v24 = vld [vmem:[#allocation82_spill] sm:$0xff]  ;;  %v12954_v4 = vld [vmem:[#allocation83_spill] sm:$0xff] }
 0x687   :  { %3151 = vmatpush1.msra.mxu0 %v12923_v53  ;;  %3222 = vmatpush1.msra.mxu1 %v12924_v35  ;;  %v12955_v53 = vld [vmem:[#allocation84_spill] sm:$0xff]  ;;  %v12956_v35 = vld [vmem:[#allocation85_spill] sm:$0xff] }
 0x688   :  { %3152 = vmatprep.subr.mxu0 %v12925_v46  ;;  %3223 = vmatprep.subr.mxu1 %v12926_v11  ;;  %v12957_v46 = vld [vmem:[#allocation86_spill] sm:$0xff]  ;;  %v12958_v11 = vld [vmem:[#allocation87_spill] sm:$0xff] }
 0x689   :  { %3153 = vmatpush1.msra.mxu0 %v12927_v34  ;;  %3224 = vmatpush1.msra.mxu1 %v12928_v23  ;;  %v12959_v34 = vld [vmem:[#allocation88_spill] sm:$0xff]  ;;  %v12960_v23 = vld [vmem:[#allocation89_spill] sm:$0xff] }
 0x68a   :  { %3154 = vmatprep.subr.mxu0 %v12929_v1  ;;  %3225 = vmatprep.subr.mxu1 %v12930_v51  ;;  %v12961_v1 = vld [vmem:[#allocation93_spill] sm:$0xff]  ;;  %v12962_v51 = vld [vmem:[#allocation94_spill] sm:$0xff] }
 0x68b   :  { %3155 = vmatpush1.msra.mxu0 %v12931_v47  ;;  %3226 = vmatpush1.msra.mxu1 %v12932_v50  ;;  %v12963_v47 = vld [vmem:[#allocation95_spill] sm:$0xff]  ;;  %v12964_v50 = vld [vmem:[#allocation90_spill] sm:$0xff] }
 0x68c   :  { %3156 = vmatprep.subr.mxu0 %v12933_v56  ;;  %3227 = vmatprep.subr.mxu1 %v12934_v62  ;;  %v12965_v56 = vld [vmem:[#allocation96_spill] sm:$0xff]  ;;  %v12966_v62 = vld [vmem:[#allocation97_spill] sm:$0xff] }
 0x68d   :  { %3157 = vmatpush1.msra.mxu0 %v12935_v55  ;;  %3228 = vmatpush1.msra.mxu1 %v12936_v36  ;;  %v12967_v55 = vld [vmem:[#allocation98_spill] sm:$0xff]  ;;  %v12968_v36 = vld [vmem:[#allocation99_spill] sm:$0xff] }
 0x68e   :  { %3158 = vmatprep.subr.mxu0 %v12937_v37  ;;  %3229 = vmatprep.subr.mxu1 %v12938_v38  ;;  %v12969_v37 = vld [vmem:[#allocation100_spill] sm:$0xff]  ;;  %v12970_v38 = vld [vmem:[#allocation101_spill] sm:$0xff] }
 0x68f   :  { %3159 = vmatpush1.msra.mxu0 %v12939_v2  ;;  %3230 = vmatpush1.msra.mxu1 %v12940_v0  ;;  %v12971_v2 = vld [vmem:[#allocation102_spill] sm:$0xff]  ;;  %v12972_v0 = vld [vmem:[#allocation103_spill] sm:$0xff] }
 0x690   :  { %3160 = vmatprep.subr.mxu0 %v12941_v48  ;;  %3231 = vmatprep.subr.mxu1 %v12942_v29  ;;  %v12973_v48 = vld [vmem:[#allocation104_spill] sm:$0xff]  ;;  %v12974_v29 = vld [vmem:[#allocation105_spill] sm:$0xff] }
 0x691   :  { %3161 = vmatpush1.msra.mxu0 %v12943_v28  ;;  %3232 = vmatpush1.msra.mxu1 %v12944_v52  ;;  %v12975_v28 = vld [vmem:[#allocation106_spill] sm:$0xff]  ;;  %v12976_v52 = vld [vmem:[#allocation107_spill] sm:$0xff] }
 0x692   :  { %3162 = vmatprep.subr.mxu0 %v12945_v26  ;;  %3233 = vmatprep.subr.mxu1 %v12946_v22  ;;  %v12977_v26 = vld [vmem:[#allocation108_spill] sm:$0xff]  ;;  %v12978_v22 = vld [vmem:[#allocation109_spill] sm:$0xff] }
 0x693   :  { %3163 = vmatpush1.msra.mxu0 %v12947_v61  ;;  %3234 = vmatpush1.msra.mxu1 %v12948_v27 }
 0x694   :  { %3164 = vmatprep.subr.mxu0 %v12949_v15  ;;  %3235 = vmatprep.subr.mxu1 %v12950_v30 }
 0x695   :  { %3165 = vmatpush1.msra.mxu0 %v12951_v17  ;;  %3236 = vmatpush1.msra.mxu1 %v12952_v19 }
 0x696   :  { %3166 = vmatprep.subr.mxu0 %v12953_v24  ;;  %3237 = vmatprep.subr.mxu1 %v12954_v4 }
 0x697   :  { %3167 = vmatpush1.msra.mxu0 %v12955_v53  ;;  %3238 = vmatpush1.msra.mxu1 %v12956_v35 }
 0x698   :  { %3168 = vmatprep.subr.mxu0 %v12957_v46  ;;  %3239 = vmatprep.subr.mxu1 %v12958_v11 }
 0x699   :  { %3169 = vmatpush1.msra.mxu0 %v12959_v34  ;;  %3240 = vmatpush1.msra.mxu1 %v12960_v23 }
 0x69a   :  { %3170 = vmatprep.subr.mxu0 %v12961_v1  ;;  %3241 = vmatprep.subr.mxu1 %v12962_v51 }
 0x69b   :  { %3171 = vmatpush1.msra.mxu0 %v12963_v47  ;;  %3242 = vmatpush1.msra.mxu1 %v12964_v50 }
 0x69c   :  { %3172 = vmatprep.subr.mxu0 %v12965_v56  ;;  %3243 = vmatprep.subr.mxu1 %v12966_v62 }
 0x69d   :  { %3173 = vmatpush1.msra.mxu0 %v12967_v55  ;;  %3244 = vmatpush1.msra.mxu1 %v12968_v36 }
 0x69e   :  { %3174 = vmatprep.subr.mxu0 %v12969_v37  ;;  %3245 = vmatprep.subr.mxu1 %v12970_v38 }
 0x69f   :  { %3175 = vmatpush1.msra.mxu0 %v12971_v2  ;;  %3246 = vmatpush1.msra.mxu1 %v12972_v0 }
 0x6a0   :  { %3176 = vmatprep.subr.mxu0 %v12973_v48  ;;  %3247 = vmatprep.subr.mxu1 %v12974_v29 }
 0x6a1   :  { %3177 = vmatpush1.msra.mxu0 %v12975_v28  ;;  %3248 = vmatpush1.msra.mxu1 %v12976_v52 }
 0x6a2   :  { %3210 = vmatprep.mubr.f32.mxu0 %v12185_v59  ;;  %3281 = vmatprep.mubr.f32.mxu1 %v12185_v59 }
 0x6a3   :  { %3288 = vmatprep.subr.mxu0 %v12977_v26  ;;  %3359 = vmatprep.subr.mxu1 %v12978_v22 }
 0x6fe   :  { %v2712_v61 = vpop.f32.mrf.mxu0  ;;  %v2783_v30 = vpop.f32.mrf.mxu1 }
 0x6ff   :  { %v2713_v28 = vadd.f32 %v2712_v61, %v7146_v25 }
 0x700   :  { %v2714_v27 = vpop.f32.mrf.mxu0  ;;  %v2785_v19 = vpop.f32.mrf.mxu1 }
 0x701   :  { %v2715_v48 = vadd.f32 %v2714_v27, %v7143_v21 }
 0x71f   :  { %v2854_v15 = vpop.f32.mrf.mxu0  ;;  %v2925_v53 = vpop.f32.mrf.mxu1 }
 0x720   :  { %v2930_v26 = vadd.f32 %v2854_v15, %v2713_v28  ;;  %v12995_v28 = vld [vmem:[#allocation126_spill] sm:$0xff] }
 0x721   :  { %v2856_v17 = vpop.f32.mrf.mxu0  ;;  %v2927_v1 = vpop.f32.mrf.mxu1 }
 0x722   :  { %v2931_v52 = vadd.f32 %v2856_v17, %v2715_v48  ;;  %v2784_v17 = vadd.f32 %v2783_v30, %v7157_v45  ;;  %v12993_v48 = vld [vmem:[#allocation124_spill] sm:$0xff] }
 0x724   :  { %v4669_v22 = vmul.f32 -1.442695, %v2931_v52  ;;  %v12996_v52 = vld [vmem:[#allocation127_spill] sm:$0xff] }
 0x741   :  { %v3024_v24 = vpop.f32.mrf.mxu0  ;;  %v3095_v47 = vpop.f32.mrf.mxu1 }
 0x742   :  { %v3104_v4 = vrot.slane %v3024_v24, 3  ;;  %v3106_v50 = vrot.slane %v3095_v47, 3  ;;  %v4668_v24 = vmul.f32 -1.442695, %v2930_v26  ;;  %v12997_v26 = vld [vmem:[#allocation128_spill] sm:$0xff] }
 0x743   :  { %v3026_v35 = vpop.f32.mrf.mxu0  ;;  %v3097_v56 = vpop.f32.mrf.mxu1 }
 0x744   :  { %v3112_v46 = vadd.f32 %v3104_v4, %v12390_v5  ;;  %v3105_v11 = vrot.slane %v3026_v35, 3  ;;  %v3114_v62 = vadd.f32 %v3106_v50, %v12392_v16  ;;  %v3107_v55 = vrot.slane %v3097_v56, 3 }
 0x745   :  { %v2786_v56 = vadd.f32 %v2785_v19, %v7161_v8  ;;  %v12990_v19 = vld [vmem:[#allocation121_spill] sm:$0xff] }
 0x746   :  { %v4671_v34 = vmul.f32 -1.442695, %v3112_v46  ;;  %v3113_v23 = vadd.f32 %v3105_v11, %v12391_v9  ;;  %v4673_v36 = vmul.f32 -1.442695, %v3114_v62  ;;  %v3115_v38 = vadd.f32 %v3107_v55, %v6614_v57 }
 0x747   :  { %v3136_v11 = vrot.slane %v9441_v12, 7  ;;  %v2932_v55 = vadd.f32 %v2925_v53, %v2784_v17  ;;  %v2933_v12 = vadd.f32 %v2927_v1, %v2786_v56  ;;  %v12991_v53 = vld [vmem:[#allocation122_spill] sm:$0xff]  ;;  %v12992_v1 = vld [vmem:[#allocation123_spill] sm:$0xff]  ;;  %v13010_v17 = vld [vmem:[#allocation141_spill] sm:$0xff] }
 0x748   :  { %v4672_v51 = vmul.f32 -1.442695, %v3113_v23  ;;  %4835 = vpow2.f32 %v4671_v34  ;;  %v13012_v56 = vld [vmem:[#allocation143_spill] sm:$0xff] }
 0x74a   :  { %4837 = vpow2.f32 %v4672_v51 }
 0x74b   :  { %4839 = vpow2.f32 %v4673_v36  ;;  %v4670_v36 = vmul.f32 -1.442695, %v2932_v55  ;;  %v13014_v55 = vld [vmem:[#allocation145_spill] sm:$0xff] }
 0x755   :  { %v4836_v37 = vpop.eup %4835 }
 0x756   :  { %v3125_v2 = vadd.f32 1.0, %v4836_v37 }
 0x757   :  { %v4838_v0 = vpop.eup %4837 }
 0x758   :  { %4841 = vrcp.f32 %v3125_v2  ;;  %v3126_v29 = vadd.f32 1.0, %v4838_v0  ;;  %v4840_v4 = vpop.eup %4839 }
 0x759   :  { %4843 = vtanh.f32 %v3115_v38  ;;  %v3127_v27 = vadd.f32 1.0, %v4840_v4  ;;  %v13000_v4 = vld [vmem:[#allocation131_spill] sm:$0xff] }
 0x75a   :  { %4845 = vrcp.f32 %v3126_v29  ;;  %v12994_v29 = vld [vmem:[#allocation125_spill] sm:$0xff] }
 0x75b   :  { %4847 = vpow2.f32 %v4669_v22  ;;  %v12998_v22 = vld [vmem:[#allocation129_spill] sm:$0xff] }
 0x75c   :  { %4849 = vpow2.f32 %v4668_v24  ;;  %v12999_v24 = vld [vmem:[#allocation130_spill] sm:$0xff] }
 0x75d   :  { %4851 = vrcp.f32 %v3127_v27  ;;  %v13005_v27 = vld [vmem:[#allocation136_spill] sm:$0xff] }
 0x765   :  { %v4842_v35 = vpop.eup %4841 }
 0x766   :  { %v4844_v46 = vpop.eup %4843 }
 0x767   :  { %v4846_v34 = vpop.eup %4845  ;;  %v3139_v51 = vmul.f32 %v4844_v46, %v4842_v35  ;;  %v13001_v35 = vld [vmem:[#allocation132_spill] sm:$0xff]  ;;  %v13002_v46 = vld [vmem:[#allocation133_spill] sm:$0xff] }
 0x768   :  { %v3138_v23 = vmul.f32 %v4846_v34, %v3136_v11  ;;  %v4848_v61 = vpop.eup %4847  ;;  %v13003_v11 = vld [vmem:[#allocation134_spill] sm:$0xff]  ;;  %v13004_v34 = vld [vmem:[#allocation135_spill] sm:$0xff] }
 0x769   :  { %v4850_v15 = vpop.eup %4849  ;;  %v2944_v50 = vadd.f32 1.0, %v4848_v61  ;;  %v13008_v61 = vld [vmem:[#allocation139_spill] sm:$0xff] }
 0x76a   :  { %v9975_v47 = vadd.f32 %v3139_v51, %v3138_v23  ;;  %v2943_v62 = vadd.f32 1.0, %v4850_v15  ;;  %v4852_v37 = vpop.eup %4851  ;;  %v13006_v23 = vld [vmem:[#allocation137_spill] sm:$0xff]  ;;  %v13007_v51 = vld [vmem:[#allocation138_spill] sm:$0xff]  ;;  %v13009_v15 = vld [vmem:[#allocation140_spill] sm:$0xff] }
 0x76c   :  { %4853 = vtanh.f32 %v9975_v47 }
 0x76d   :  { %4855 = vrcp.f32 %v2944_v50  ;;  %v13011_v50 = vld [vmem:[#allocation142_spill] sm:$0xff] }
 0x76e   :  { %4857 = vrcp.f32 %v2943_v62  ;;  %v13013_v62 = vld [vmem:[#allocation144_spill] sm:$0xff] }
 0x76f   :  { %4859 = vtanh.f32 %v2933_v12  ;;  %v13015_v12 = vld [vmem:[#allocation146_spill] sm:$0xff] }
 0x770   :  { %4861 = vpow2.f32 %v4670_v36 }
 0x779   :  { %v4854_v38 = vpop.eup %4853 }
 0x77a   :  { %v3142_v2 = vmul.f32 %v4854_v38, %v4852_v37  ;;  %v4856_v30 = vpop.eup %4855  ;;  %v13016_v37 = vld [vmem:[#allocation147_spill] sm:$0xff]  ;;  %v13017_v38 = vld [vmem:[#allocation148_spill] sm:$0xff] }
 0x77c   :  { %v9980_v0 = vrot.slane %v3142_v2, 5  ;;  %v13018_v2 = vld [vmem:[#allocation149_spill] sm:$0xff] }
 0x77e   :  { %3211 = vmatmul.mubr.f32.vlgmr.msra.gmra.mxu0 %v9980_v0  ;;  %3282 = vmatmul.mubr.f32.vlgmr.msra.gmra.mxu1 %v9980_v0 }
 0x77f   :  { %3289 = vmatpush1.msra.mxu0 %v9453_v14  ;;  %3360 = vmatpush1.msra.mxu1 %v9459_v33  ;;  %v4858_v14 = vpop.eup %4857  ;;  %v2953_v33 = vmul.f32 %v4856_v30, %v9571_v6  ;;  %v12989_v6 = vld [vmem:[#allocation120_spill] sm:$0xff]  ;;  %v13019_v30 = vld [vmem:[#allocation150_spill] sm:$0xff] }
 0x780   :  { %3290 = vmatprep.subr.mxu0 %v9465_v58  ;;  %3361 = vmatprep.subr.mxu1 %v9471_v32  ;;  %v4860_v58 = vpop.eup %4859 }
 0x781   :  { %3291 = vmatpush1.msra.mxu0 %v9477_v41  ;;  %3362 = vmatpush1.msra.mxu1 %v9483_v63  ;;  %v2954_v32 = vmul.f32 %v4860_v58, %v4858_v14  ;;  %v12979_v41 = vld [vmem:[#allocation110_spill] sm:$0xff]  ;;  %v4862_v63 = vpop.eup %4861 }
 0x782   :  { %3292 = vmatprep.subr.mxu0 %v9489_v13  ;;  %3363 = vmatprep.subr.mxu1 %v9495_v44  ;;  %v12980_v13 = vld [vmem:[#allocation111_spill] sm:$0xff]  ;;  %v12981_v44 = vld [vmem:[#allocation112_spill] sm:$0xff] }
 0x783   :  { %3293 = vmatpush1.msra.mxu0 %v9501_v42  ;;  %3364 = vmatpush1.msra.mxu1 %v9507_v39  ;;  %v10005_v42 = vadd.f32 %v2954_v32, %v2953_v33  ;;  %v12982_v39 = vld [vmem:[#allocation113_spill] sm:$0xff]  ;;  %v13020_v33 = vld [vmem:[#allocation152_spill] sm:$0xff] }
 0x784   :  { %3294 = vmatprep.subr.mxu0 %v9513_v20  ;;  %3365 = vmatprep.subr.mxu1 %v9519_v54  ;;  %v12983_v20 = vld [vmem:[#allocation114_spill] sm:$0xff]  ;;  %v12984_v54 = vld [vmem:[#allocation115_spill] sm:$0xff]  ;;  %v10059_v32 = vld [vmem:[%s11576_s2 + $0x1e8] sm:$0xff] }
 0x785   :  { %3295 = vmatpush1.msra.mxu0 %v9526_v10  ;;  %3366 = vmatpush1.msra.mxu1 %v9532_v60  ;;  %v12985_v10 = vld [vmem:[#allocation116_spill] sm:$0xff]  ;;  %v2945_v60 = vadd.f32 1.0, %v4862_v63  ;;  %4863 = vtanh.f32 %v10005_v42  ;;  %v10089_v63 = vld [vmem:[%s11576_s2 + $0x1d8] sm:$0xff] }
 0x786   :  { %3296 = vmatprep.subr.mxu0 %v9538_v43  ;;  %3367 = vmatprep.subr.mxu1 %v9544_v18  ;;  %v12986_v43 = vld [vmem:[#allocation117_spill] sm:$0xff]  ;;  %v12987_v18 = vld [vmem:[#allocation118_spill] sm:$0xff] }
 0x787   :  { %3297 = vmatpush1.msra.mxu0 %v9550_v31  ;;  %3368 = vmatpush1.msra.mxu1 %v12979_v41  ;;  %v12988_v31 = vld [vmem:[#allocation119_spill] sm:$0xff]  ;;  %4865 = vrcp.f32 %v2945_v60  ;;  %v10083_v41 = vld [vmem:[%s11576_s2 + $0x1c8] sm:$0xff] }
 0x788   :  { %3298 = vmatprep.subr.mxu0 %v12980_v13  ;;  %3369 = vmatprep.subr.mxu1 %v12981_v44  ;;  %v10095_v13 = vld [vmem:[%s11576_s2 + $0x1c0] sm:$0xff]  ;;  %v10101_v44 = vld [vmem:[%s11576_s2 + $0x1d0] sm:$0xff]  ;;  %v10131_v60 = vld [vmem:[%s11576_s2 + $0x188] sm:$0xff] }
 0x789   :  { %3299 = vmatpush1.msra.mxu0 %v12982_v39  ;;  %3370 = vmatpush1.msra.mxu1 %v12983_v20  ;;  %v10107_v39 = vld [vmem:[%s11576_s2 + $0x1a8] sm:$0xff]  ;;  %v10113_v20 = vld [vmem:[%s11576_s2 + $0x1b8] sm:$0xff] }
 0x78a   :  { %3300 = vmatprep.subr.mxu0 %v12984_v54  ;;  %3371 = vmatprep.subr.mxu1 %v12985_v10  ;;  %v10119_v54 = vld [vmem:[%s11576_s2 + $0x1a0] sm:$0xff]  ;;  %v10125_v10 = vld [vmem:[%s11576_s2 + $0x1b0] sm:$0xff] }
 0x78b   :  { %3301 = vmatpush1.msra.mxu0 %v12986_v43  ;;  %3372 = vmatpush1.msra.mxu1 %v12987_v18  ;;  %v10137_v43 = vld [vmem:[%s11576_s2 + $0x198] sm:$0xff]  ;;  %v10143_v18 = vld [vmem:[%s11576_s2 + $0x180] sm:$0xff] }
 0x78c   :  { %3302 = vmatprep.subr.mxu0 %v12988_v31  ;;  %3373 = vmatprep.subr.mxu1 %v12989_v6  ;;  %v10149_v31 = vld [vmem:[%s11576_s2 + $0x190] sm:$0xff]  ;;  %v10155_v6 = vld [vmem:[%s11576_s2 + $0x168] sm:$0xff] }
 0x78d   :  { %3303 = vmatpush1.msra.mxu0 %v12990_v19  ;;  %3374 = vmatpush1.msra.mxu1 %v12991_v53  ;;  %v10161_v19 = vld [vmem:[%s11576_s2 + $0x178] sm:$0xff]  ;;  %v10167_v53 = vld [vmem:[%s11576_s2 + $0x160] sm:$0xff] }
 0x78e   :  { %3304 = vmatprep.subr.mxu0 %v12992_v1  ;;  %3375 = vmatprep.subr.mxu1 %v12993_v48  ;;  %v10173_v1 = vld [vmem:[%s11576_s2 + $0x170] sm:$0xff]  ;;  %v10179_v48 = vld [vmem:[%s11576_s2 + $0x148] sm:$0xff] }
 0x78f   :  { %3305 = vmatpush1.msra.mxu0 %v12994_v29  ;;  %3376 = vmatpush1.msra.mxu1 %v12995_v28  ;;  %v10185_v29 = vld [vmem:[%s11576_s2 + $0x158] sm:$0xff]  ;;  %v10191_v28 = vld [vmem:[%s11576_s2 + $0x140] sm:$0xff] }
 0x790   :  { %3306 = vmatprep.subr.mxu0 %v12996_v52  ;;  %3377 = vmatprep.subr.mxu1 %v12997_v26  ;;  %v10197_v52 = vld [vmem:[%s11576_s2 + $0x150] sm:$0xff]  ;;  %v10203_v26 = vld [vmem:[%s11576_s2 + $0x128] sm:$0xff] }
 0x791   :  { %3307 = vmatpush1.msra.mxu0 %v12998_v22  ;;  %3378 = vmatpush1.msra.mxu1 %v12999_v24  ;;  %v10209_v22 = vld [vmem:[%s11576_s2 + $0x138] sm:$0xff]  ;;  %v10215_v24 = vld [vmem:[%s11576_s2 + $0x120] sm:$0xff] }
 0x792   :  { %3308 = vmatprep.subr.mxu0 %v13000_v4  ;;  %3379 = vmatprep.subr.mxu1 %v13001_v35  ;;  %v4864_v36 = vpop.eup %4863  ;;  %v10221_v4 = vld [vmem:[%s11576_s2 + $0x130] sm:$0xff]  ;;  %v10227_v35 = vld [vmem:[%s11576_s2 + $0x108] sm:$0xff] }
 0x793   :  { %3309 = vmatpush1.msra.mxu0 %v13002_v46  ;;  %3380 = vmatpush1.msra.mxu1 %v13003_v11  ;;  %v10233_v46 = vld [vmem:[%s11576_s2 + $0x118] sm:$0xff]  ;;  %v10239_v11 = vld [vmem:[%s11576_s2 + $0x100] sm:$0xff] }
 0x794   :  { %3310 = vmatprep.subr.mxu0 %v13004_v34  ;;  %3381 = vmatprep.subr.mxu1 %v13005_v27  ;;  %v4866_v14 = vpop.eup %4865  ;;  %13022 = vst [vmem:[#allocation8_spill] sm:$0xff] %v10233_v46  ;;  %13023 = vst [vmem:[#allocation9_spill] sm:$0xff] %v10239_v11  ;;  %v10245_v34 = vld [vmem:[%s11576_s2 + $0x110] sm:$0xff]  ;;  %v10251_v27 = vld [vmem:[%s11576_s2 + $0xe8] sm:$0xff] }
 0x795   :  { %3311 = vmatpush1.msra.mxu0 %v13006_v23  ;;  %3382 = vmatpush1.msra.mxu1 %v13007_v51  ;;  %v10050_v58 = vmul.f32 %v4866_v14, %v4864_v36  ;;  %13024 = vst [vmem:[#allocation10_spill] sm:$0xff] %v10245_v34  ;;  %13025 = vst [vmem:[#allocation11_spill] sm:$0xff] %v10251_v27  ;;  %v10257_v23 = vld [vmem:[%s11576_s2 + $0xf8] sm:$0xff]  ;;  %v10263_v51 = vld [vmem:[%s11576_s2 + $0xe0] sm:$0xff] }
 0x796   :  { %3312 = vmatprep.subr.mxu0 %v13008_v61  ;;  %3383 = vmatprep.subr.mxu1 %v13009_v15  ;;  %13026 = vst [vmem:[#allocation12_spill] sm:$0xff] %v10257_v23  ;;  %13027 = vst [vmem:[#allocation13_spill] sm:$0xff] %v10263_v51  ;;  %v10269_v61 = vld [vmem:[%s11576_s2 + $0xf0] sm:$0xff]  ;;  %v10275_v15 = vld [vmem:[%s11576_s2 + $0xc8] sm:$0xff] }
 0x797   :  { %3313 = vmatpush1.msra.mxu0 %v13010_v17  ;;  %3384 = vmatpush1.msra.mxu1 %v13011_v50  ;;  %13021 = vst [vmem:[#allocation7_spill] sm:$0xff] %v10050_v58  ;;  %13028 = vst [vmem:[#allocation14_spill] sm:$0xff] %v10269_v61  ;;  %v10281_v17 = vld [vmem:[%s11576_s2 + $0xd8] sm:$0xff]  ;;  %v10287_v50 = vld [vmem:[%s11576_s2 + $0xc0] sm:$0xff] }
 0x798   :  { %3314 = vmatprep.subr.mxu0 %v13012_v56  ;;  %3385 = vmatprep.subr.mxu1 %v13013_v62  ;;  %13029 = vst [vmem:[#allocation15_spill] sm:$0xff] %v10275_v15  ;;  %13030 = vst [vmem:[#allocation16_spill] sm:$0xff] %v10281_v17  ;;  %v10293_v56 = vld [vmem:[%s11576_s2 + $0xd0] sm:$0xff]  ;;  %v10299_v62 = vld [vmem:[%s11576_s2 + $0xa8] sm:$0xff] }
 0x799   :  { %3315 = vmatpush1.msra.mxu0 %v13014_v55  ;;  %3386 = vmatpush1.msra.mxu1 %v13015_v12  ;;  %13031 = vst [vmem:[#allocation17_spill] sm:$0xff] %v10287_v50  ;;  %13032 = vst [vmem:[#allocation18_spill] sm:$0xff] %v10293_v56  ;;  %v10305_v55 = vld [vmem:[%s11576_s2 + $0xb8] sm:$0xff]  ;;  %v10311_v12 = vld [vmem:[%s11576_s2 + $0xa0] sm:$0xff] }
 0x79a   :  { %3316 = vmatprep.subr.mxu0 %v13016_v37  ;;  %3387 = vmatprep.subr.mxu1 %v13017_v38  ;;  %13033 = vst [vmem:[#allocation19_spill] sm:$0xff] %v10299_v62  ;;  %13034 = vst [vmem:[#allocation20_spill] sm:$0xff] %v10305_v55  ;;  %v10317_v36 = vld [vmem:[%s11576_s2 + $0xb0] sm:$0xff]  ;;  %v10323_v37 = vld [vmem:[%s11576_s2 + $0x88] sm:$0xff] }
 0x79b   :  { %3317 = vmatpush1.msra.mxu0 %v13018_v2  ;;  %3388 = vmatpush1.msra.mxu1 %v13019_v30  ;;  %13035 = vst [vmem:[#allocation21_spill] sm:$0xff] %v10311_v12  ;;  %13036 = vst [vmem:[#allocation22_spill] sm:$0xff] %v10317_v36  ;;  %v10329_v38 = vld [vmem:[%s11576_s2 + $0x98] sm:$0xff]  ;;  %v10335_v2 = vld [vmem:[%s11576_s2 + $0x80] sm:$0xff] }
 0x79c   :  { %3318 = vmatprep.subr.mxu0 %v13020_v33  ;;  %3389 = vmatprep.subr.mxu1 %v9811_v7  ;;  %v10077_v7 = vld [vmem:[%s11576_s2 + $0x1f0] sm:$0xff]  ;;  %13037 = vst [vmem:[#allocation23_spill] sm:$0xff] %v10323_v37  ;;  %13038 = vst [vmem:[#allocation24_spill] sm:$0xff] %v10329_v38  ;;  %v10347_v14 = vld [vmem:[%s11576_s2 + $0x68] sm:$0xff] }
 0x79d   :  { %3319 = vmatpush1.msra.mxu0 %v9817_v49  ;;  %3352 = vmatprep.mubr.f32.mxu0 %v12185_v59  ;;  %v10065_v49 = vld [vmem:[%s11576_s2 + $0x1f8] sm:$0xff]  ;;  %13039 = vst [vmem:[#allocation25_spill] sm:$0xff] %v10335_v2  ;;  %v10341_v30 = vld [vmem:[%s11576_s2 + $0x90] sm:$0xff]  ;;  %13041 = vst [vmem:[#allocation27_spill] sm:$0xff] %v10347_v14 }
 0x79e   :  { %3390 = vmatpush1.msra.mxu1 %v9826_v3  ;;  %3423 = vmatprep.mubr.f32.mxu1 %v12185_v59  ;;  %v10071_v3 = vld [vmem:[%s11576_s2 + $0x1e0] sm:$0xff]  ;;  %13040 = vst [vmem:[#allocation26_spill] sm:$0xff] %v10341_v30  ;;  %v10353_v33 = vld [vmem:[%s11576_s2 + $0x78] sm:$0xff] }
 0x79f   :  { %3353 = vmatmul.mubr.f32.vlgmr.msra.gmra.mxu0 %v10050_v58  ;;  %3424 = vmatmul.mubr.f32.vlgmr.msra.gmra.mxu1 %v10050_v58  ;;  %13042 = vst [vmem:[#allocation28_spill] sm:$0xff] %v10353_v33  ;;  %v10359_v58 = vld [vmem:[%s11576_s2 + $0x60] sm:$0xff] }
 0x7a0   :  { %3458 = vmatprep.subr.mxu0 %v10059_v32  ;;  %3529 = vmatprep.subr.mxu1 %v10065_v49  ;;  %13043 = vst [vmem:[#allocation29_spill] sm:$0xff] %v10359_v58 }
 0x7a1   :  { %3459 = vmatpush1.msra.mxu0 %v10071_v3  ;;  %3530 = vmatpush1.msra.mxu1 %v10077_v7 }
 0x7a2   :  { %3460 = vmatprep.subr.mxu0 %v10083_v41  ;;  %3531 = vmatprep.subr.mxu1 %v10089_v63 }
 0x7a3   :  { %3461 = vmatpush1.msra.mxu0 %v10095_v13  ;;  %3532 = vmatpush1.msra.mxu1 %v10101_v44 }
 0x7a4   :  { %3462 = vmatprep.subr.mxu0 %v10107_v39  ;;  %3533 = vmatprep.subr.mxu1 %v10113_v20 }
 0x7a5   :  { %3463 = vmatpush1.msra.mxu0 %v10119_v54  ;;  %3534 = vmatpush1.msra.mxu1 %v10125_v10 }
 0x7a6   :  { %3464 = vmatprep.subr.mxu0 %v10131_v60  ;;  %3535 = vmatprep.subr.mxu1 %v10137_v43 }
 0x7a7   :  { %3465 = vmatpush1.msra.mxu0 %v10143_v18  ;;  %3536 = vmatpush1.msra.mxu1 %v10149_v31 }
 0x7a8   :  { %3466 = vmatprep.subr.mxu0 %v10155_v6  ;;  %3537 = vmatprep.subr.mxu1 %v10161_v19 }
 0x7a9   :  { %3467 = vmatpush1.msra.mxu0 %v10167_v53  ;;  %3538 = vmatpush1.msra.mxu1 %v10173_v1 }
 0x7aa   :  { %3468 = vmatprep.subr.mxu0 %v10179_v48  ;;  %3539 = vmatprep.subr.mxu1 %v10185_v29 }
 0x7ab   :  { %3469 = vmatpush1.msra.mxu0 %v10191_v28  ;;  %3540 = vmatpush1.msra.mxu1 %v10197_v52 }
 0x7ac   :  { %3470 = vmatprep.subr.mxu0 %v10203_v26  ;;  %3541 = vmatprep.subr.mxu1 %v10209_v22 }
 0x7ad   :  { %3471 = vmatpush1.msra.mxu0 %v10215_v24  ;;  %3542 = vmatpush1.msra.mxu1 %v10221_v4 }
 0x7ae   :  { %3472 = vmatprep.subr.mxu0 %v10227_v35  ;;  %3543 = vmatprep.subr.mxu1 %v10233_v46 }
 0x7af   :  { %3473 = vmatpush1.msra.mxu0 %v10239_v11  ;;  %3544 = vmatpush1.msra.mxu1 %v10245_v34 }
 0x7b0   :  { %3474 = vmatprep.subr.mxu0 %v10251_v27  ;;  %3545 = vmatprep.subr.mxu1 %v10257_v23 }
 0x7b1   :  { %3475 = vmatpush1.msra.mxu0 %v10263_v51  ;;  %3546 = vmatpush1.msra.mxu1 %v10269_v61 }
 0x7b2   :  { %3476 = vmatprep.subr.mxu0 %v10275_v15  ;;  %3547 = vmatprep.subr.mxu1 %v10281_v17 }
 0x7b3   :  { %3477 = vmatpush1.msra.mxu0 %v10287_v50  ;;  %3548 = vmatpush1.msra.mxu1 %v10293_v56 }
 0x7b4   :  { %3478 = vmatprep.subr.mxu0 %v10299_v62  ;;  %3549 = vmatprep.subr.mxu1 %v10305_v55 }
 0x7b5   :  { %3479 = vmatpush1.msra.mxu0 %v10311_v12  ;;  %3550 = vmatpush1.msra.mxu1 %v10317_v36 }
 0x7b6   :  { %3480 = vmatprep.subr.mxu0 %v10323_v37  ;;  %3551 = vmatprep.subr.mxu1 %v10329_v38 }
 0x7b7   :  { %3481 = vmatpush1.msra.mxu0 %v10335_v2  ;;  %3552 = vmatpush1.msra.mxu1 %v10341_v30 }
 0x7b8   :  { %3482 = vmatprep.subr.mxu0 %v10347_v14  ;;  %3553 = vmatprep.subr.mxu1 %v10353_v33  ;;  %v10371_v14 = vld [vmem:[%s11576_s2 + $0x48] sm:$0xff]  ;;  %v10377_v33 = vld [vmem:[%s11576_s2 + $0x58] sm:$0xff] }
 0x7b9   :  { %3483 = vmatpush1.msra.mxu0 %v10359_v58  ;;  %3554 = vmatpush1.msra.mxu1 %v10365_v40  ;;  %13045 = vst [vmem:[#allocation31_spill] sm:$0xff] %v10371_v14  ;;  %13046 = vst [vmem:[#allocation32_spill] sm:$0xff] %v10377_v33  ;;  %v10383_v58 = vld [vmem:[%s11576_s2 + $0x40] sm:$0xff]  ;;  %v10389_v40 = vld [vmem:[%s11576_s2 + $0x50] sm:$0xff] }
 0x7ba   :  { %3484 = vmatprep.subr.mxu0 %v10371_v14  ;;  %3555 = vmatprep.subr.mxu1 %v10377_v33  ;;  %13047 = vst [vmem:[#allocation33_spill] sm:$0xff] %v10383_v58  ;;  %13048 = vst [vmem:[#allocation34_spill] sm:$0xff] %v10389_v40  ;;  %v10395_v14 = vld [vmem:[%s11576_s2 + $0x28] sm:$0xff]  ;;  %v10401_v33 = vld [vmem:[%s11576_s2 + $0x38] sm:$0xff] }
 0x7bb   :  { %3485 = vmatpush1.msra.mxu0 %v10383_v58  ;;  %3556 = vmatpush1.msra.mxu1 %v10389_v40  ;;  %13049 = vst [vmem:[#allocation35_spill] sm:$0xff] %v10395_v14  ;;  %13050 = vst [vmem:[#allocation36_spill] sm:$0xff] %v10401_v33  ;;  %v10407_v58 = vld [vmem:[%s11576_s2 + $0x20] sm:$0xff]  ;;  %v10413_v40 = vld [vmem:[%s11576_s2 + $0x30] sm:$0xff] }
 0x7bc   :  { %3486 = vmatprep.subr.mxu0 %v10395_v14  ;;  %3557 = vmatprep.subr.mxu1 %v10401_v33  ;;  %13051 = vst [vmem:[#allocation37_spill] sm:$0xff] %v10407_v58  ;;  %13052 = vst [vmem:[#allocation38_spill] sm:$0xff] %v10413_v40  ;;  %v10419_v14 = vld [vmem:[%s11576_s2 + $0x8] sm:$0xff]  ;;  %v10425_v33 = vld [vmem:[%s11576_s2 + $0x18] sm:$0xff] }
 0x7bd   :  { %3487 = vmatpush1.msra.mxu0 %v10407_v58  ;;  %3558 = vmatpush1.msra.mxu1 %v10413_v40  ;;  %13053 = vst [vmem:[#allocation39_spill] sm:$0xff] %v10419_v14  ;;  %13054 = vst [vmem:[#allocation40_spill] sm:$0xff] %v10425_v33  ;;  %v10431_v58 = vld [vmem:[%s11576_s2] sm:$0xff] }
 0x7be   :  { %3488 = vmatprep.subr.mxu0 %v10419_v14  ;;  %3559 = vmatprep.subr.mxu1 %v10425_v33  ;;  %13055 = vst [vmem:[#allocation41_spill] sm:$0xff] %v10431_v58  ;;  %v10438_v14 = vld [vmem:[%s11576_s2 + $0x10] sm:$0xff]  ;;  %v10447_v33 = vld [vmem:[%s11578_s4 + $0x1e8] sm:$0xff] }
 0x7bf   :  { %3489 = vmatpush1.msra.mxu0 %v10431_v58  ;;  %3522 = vmatprep.mubr.f32.mxu0 %v12185_v59  ;;  %13056 = vst [vmem:[#allocation42_spill] sm:$0xff] %v10438_v14  ;;  %13057 = vst [vmem:[#allocation43_spill] sm:$0xff] %v10447_v33  ;;  %v10453_v58 = vld [vmem:[%s11578_s4 + $0x1f8] sm:$0xff] }
 0x7c0   :  { %3560 = vmatpush1.msra.mxu1 %v10438_v14  ;;  %3593 = vmatprep.mubr.f32.mxu1 %v12185_v59  ;;  %13058 = vst [vmem:[#allocation44_spill] sm:$0xff] %v10453_v58  ;;  %v10459_v14 = vld [vmem:[%s11578_s4 + $0x1e0] sm:$0xff] }
 0x7c1   :  { %3523 = vmatmul.mubr.f32.vlgmr.msra.gmra.mxu0 %v9980_v0  ;;  %3594 = vmatmul.mubr.f32.vlgmr.msra.gmra.mxu1 %v9980_v0  ;;  %13059 = vst [vmem:[#allocation45_spill] sm:$0xff] %v10459_v14  ;;  %v10465_v0 = vld [vmem:[%s11578_s4 + $0x1f0] sm:$0xff] }
 0x7c2   :  { %3646 = vmatprep.subr.mxu0 %v10447_v33  ;;  %3717 = vmatprep.subr.mxu1 %v10453_v58  ;;  %13060 = vst [vmem:[#allocation46_spill] sm:$0xff] %v10465_v0  ;;  %v10471_v33 = vld [vmem:[%s11578_s4 + $0x1c8] sm:$0xff]  ;;  %v10477_v58 = vld [vmem:[%s11578_s4 + $0x1d8] sm:$0xff] }
 0x7c3   :  { %3647 = vmatpush1.msra.mxu0 %v10459_v14  ;;  %3718 = vmatpush1.msra.mxu1 %v10465_v0  ;;  %13061 = vst [vmem:[#allocation47_spill] sm:$0xff] %v10471_v33  ;;  %13062 = vst [vmem:[#allocation48_spill] sm:$0xff] %v10477_v58  ;;  %v10483_v14 = vld [vmem:[%s11578_s4 + $0x1c0] sm:$0xff]  ;;  %v10489_v0 = vld [vmem:[%s11578_s4 + $0x1d0] sm:$0xff] }
 0x7c4   :  { %3648 = vmatprep.subr.mxu0 %v10471_v33  ;;  %3719 = vmatprep.subr.mxu1 %v10477_v58  ;;  %13063 = vst [vmem:[#allocation49_spill] sm:$0xff] %v10483_v14  ;;  %13064 = vst [vmem:[#allocation50_spill] sm:$0xff] %v10489_v0  ;;  %v10495_v33 = vld [vmem:[%s11578_s4 + $0x1a8] sm:$0xff]  ;;  %v10501_v58 = vld [vmem:[%s11578_s4 + $0x1b8] sm:$0xff] }
 0x7c5   :  { %3649 = vmatpush1.msra.mxu0 %v10483_v14  ;;  %3720 = vmatpush1.msra.mxu1 %v10489_v0  ;;  %13065 = vst [vmem:[#allocation51_spill] sm:$0xff] %v10495_v33  ;;  %13066 = vst [vmem:[#allocation52_spill] sm:$0xff] %v10501_v58  ;;  %v10507_v14 = vld [vmem:[%s11578_s4 + $0x1a0] sm:$0xff]  ;;  %v10513_v0 = vld [vmem:[%s11578_s4 + $0x1b0] sm:$0xff] }
 0x7c6   :  { %3650 = vmatprep.subr.mxu0 %v10495_v33  ;;  %3721 = vmatprep.subr.mxu1 %v10501_v58  ;;  %13067 = vst [vmem:[#allocation53_spill] sm:$0xff] %v10507_v14  ;;  %13068 = vst [vmem:[#allocation54_spill] sm:$0xff] %v10513_v0  ;;  %v10519_v33 = vld [vmem:[%s11578_s4 + $0x188] sm:$0xff]  ;;  %v10525_v58 = vld [vmem:[%s11578_s4 + $0x198] sm:$0xff] }
 0x7c7   :  { %3651 = vmatpush1.msra.mxu0 %v10507_v14  ;;  %3722 = vmatpush1.msra.mxu1 %v10513_v0  ;;  %13069 = vst [vmem:[#allocation55_spill] sm:$0xff] %v10519_v33  ;;  %13070 = vst [vmem:[#allocation56_spill] sm:$0xff] %v10525_v58  ;;  %v10531_v14 = vld [vmem:[%s11578_s4 + $0x180] sm:$0xff]  ;;  %v10537_v0 = vld [vmem:[%s11578_s4 + $0x190] sm:$0xff] }
 0x7c8   :  { %3652 = vmatprep.subr.mxu0 %v10519_v33  ;;  %3723 = vmatprep.subr.mxu1 %v10525_v58  ;;  %13071 = vst [vmem:[#allocation57_spill] sm:$0xff] %v10531_v14  ;;  %13072 = vst [vmem:[#allocation58_spill] sm:$0xff] %v10537_v0  ;;  %v10543_v33 = vld [vmem:[%s11578_s4 + $0x168] sm:$0xff]  ;;  %v10549_v58 = vld [vmem:[%s11578_s4 + $0x178] sm:$0xff] }
 0x7c9   :  { %3653 = vmatpush1.msra.mxu0 %v10531_v14  ;;  %3724 = vmatpush1.msra.mxu1 %v10537_v0  ;;  %13073 = vst [vmem:[#allocation59_spill] sm:$0xff] %v10543_v33  ;;  %13074 = vst [vmem:[#allocation60_spill] sm:$0xff] %v10549_v58  ;;  %v10555_v14 = vld [vmem:[%s11578_s4 + $0x160] sm:$0xff]  ;;  %v10561_v0 = vld [vmem:[%s11578_s4 + $0x170] sm:$0xff] }
 0x7ca   :  { %3654 = vmatprep.subr.mxu0 %v10543_v33  ;;  %3725 = vmatprep.subr.mxu1 %v10549_v58  ;;  %13075 = vst [vmem:[#allocation61_spill] sm:$0xff] %v10555_v14  ;;  %13076 = vst [vmem:[#allocation62_spill] sm:$0xff] %v10561_v0  ;;  %v10567_v33 = vld [vmem:[%s11578_s4 + $0x148] sm:$0xff]  ;;  %v10573_v58 = vld [vmem:[%s11578_s4 + $0x158] sm:$0xff] }
 0x7cb   :  { %3655 = vmatpush1.msra.mxu0 %v10555_v14  ;;  %3726 = vmatpush1.msra.mxu1 %v10561_v0  ;;  %13077 = vst [vmem:[#allocation63_spill] sm:$0xff] %v10567_v33  ;;  %13078 = vst [vmem:[#allocation64_spill] sm:$0xff] %v10573_v58  ;;  %v10579_v14 = vld [vmem:[%s11578_s4 + $0x140] sm:$0xff]  ;;  %v10585_v0 = vld [vmem:[%s11578_s4 + $0x150] sm:$0xff] }
 0x7cc   :  { %3656 = vmatprep.subr.mxu0 %v10567_v33  ;;  %3727 = vmatprep.subr.mxu1 %v10573_v58  ;;  %13079 = vst [vmem:[#allocation65_spill] sm:$0xff] %v10579_v14  ;;  %13080 = vst [vmem:[#allocation66_spill] sm:$0xff] %v10585_v0  ;;  %v10591_v33 = vld [vmem:[%s11578_s4 + $0x128] sm:$0xff]  ;;  %v10597_v58 = vld [vmem:[%s11578_s4 + $0x138] sm:$0xff] }
 0x7cd   :  { %3657 = vmatpush1.msra.mxu0 %v10579_v14  ;;  %3728 = vmatpush1.msra.mxu1 %v10585_v0  ;;  %13081 = vst [vmem:[#allocation67_spill] sm:$0xff] %v10591_v33  ;;  %13082 = vst [vmem:[#allocation68_spill] sm:$0xff] %v10597_v58  ;;  %v10603_v14 = vld [vmem:[%s11578_s4 + $0x120] sm:$0xff]  ;;  %v10609_v0 = vld [vmem:[%s11578_s4 + $0x130] sm:$0xff] }
 0x7ce   :  { %3658 = vmatprep.subr.mxu0 %v10591_v33  ;;  %3729 = vmatprep.subr.mxu1 %v10597_v58  ;;  %13083 = vst [vmem:[#allocation69_spill] sm:$0xff] %v10603_v14  ;;  %13084 = vst [vmem:[#allocation70_spill] sm:$0xff] %v10609_v0  ;;  %v10615_v33 = vld [vmem:[%s11578_s4 + $0x108] sm:$0xff]  ;;  %v10621_v58 = vld [vmem:[%s11578_s4 + $0x118] sm:$0xff] }
 0x7cf   :  { %3659 = vmatpush1.msra.mxu0 %v10603_v14  ;;  %3730 = vmatpush1.msra.mxu1 %v10609_v0  ;;  %13085 = vst [vmem:[#allocation71_spill] sm:$0xff] %v10615_v33  ;;  %13086 = vst [vmem:[#allocation72_spill] sm:$0xff] %v10621_v58  ;;  %v10627_v14 = vld [vmem:[%s11578_s4 + $0x100] sm:$0xff]  ;;  %v10633_v0 = vld [vmem:[%s11578_s4 + $0x110] sm:$0xff] }
 0x7d0   :  { %3660 = vmatprep.subr.mxu0 %v10615_v33  ;;  %3731 = vmatprep.subr.mxu1 %v10621_v58  ;;  %13087 = vst [vmem:[#allocation73_spill] sm:$0xff] %v10627_v14  ;;  %13088 = vst [vmem:[#allocation74_spill] sm:$0xff] %v10633_v0  ;;  %v10639_v33 = vld [vmem:[%s11578_s4 + $0xe8] sm:$0xff]  ;;  %v10645_v58 = vld [vmem:[%s11578_s4 + $0xf8] sm:$0xff] }
 0x7d1   :  { %3661 = vmatpush1.msra.mxu0 %v10627_v14  ;;  %3732 = vmatpush1.msra.mxu1 %v10633_v0  ;;  %13089 = vst [vmem:[#allocation75_spill] sm:$0xff] %v10639_v33  ;;  %13090 = vst [vmem:[#allocation76_spill] sm:$0xff] %v10645_v58  ;;  %v10651_v14 = vld [vmem:[%s11578_s4 + $0xe0] sm:$0xff]  ;;  %v10657_v0 = vld [vmem:[%s11578_s4 + $0xf0] sm:$0xff] }
 0x7d2   :  { %3662 = vmatprep.subr.mxu0 %v10639_v33  ;;  %3733 = vmatprep.subr.mxu1 %v10645_v58  ;;  %13091 = vst [vmem:[#allocation77_spill] sm:$0xff] %v10651_v14  ;;  %13092 = vst [vmem:[#allocation78_spill] sm:$0xff] %v10657_v0  ;;  %v10663_v33 = vld [vmem:[%s11578_s4 + $0xc8] sm:$0xff]  ;;  %v10669_v58 = vld [vmem:[%s11578_s4 + $0xd8] sm:$0xff] }
 0x7d3   :  { %3663 = vmatpush1.msra.mxu0 %v10651_v14  ;;  %3734 = vmatpush1.msra.mxu1 %v10657_v0  ;;  %13093 = vst [vmem:[#allocation79_spill] sm:$0xff] %v10663_v33  ;;  %13094 = vst [vmem:[#allocation80_spill] sm:$0xff] %v10669_v58  ;;  %v10675_v14 = vld [vmem:[%s11578_s4 + $0xc0] sm:$0xff]  ;;  %v10681_v0 = vld [vmem:[%s11578_s4 + $0xd0] sm:$0xff] }
 0x7d4   :  { %3664 = vmatprep.subr.mxu0 %v10663_v33  ;;  %3735 = vmatprep.subr.mxu1 %v10669_v58  ;;  %13095 = vst [vmem:[#allocation81_spill] sm:$0xff] %v10675_v14  ;;  %13096 = vst [vmem:[#allocation82_spill] sm:$0xff] %v10681_v0  ;;  %v10687_v33 = vld [vmem:[%s11578_s4 + $0xa8] sm:$0xff]  ;;  %v10693_v58 = vld [vmem:[%s11578_s4 + $0xb8] sm:$0xff] }
 0x7d5   :  { %3665 = vmatpush1.msra.mxu0 %v10675_v14  ;;  %3736 = vmatpush1.msra.mxu1 %v10681_v0  ;;  %13097 = vst [vmem:[#allocation83_spill] sm:$0xff] %v10687_v33  ;;  %13098 = vst [vmem:[#allocation84_spill] sm:$0xff] %v10693_v58  ;;  %v10699_v14 = vld [vmem:[%s11578_s4 + $0xa0] sm:$0xff]  ;;  %v10705_v0 = vld [vmem:[%s11578_s4 + $0xb0] sm:$0xff] }
 0x7d6   :  { %3666 = vmatprep.subr.mxu0 %v10687_v33  ;;  %3737 = vmatprep.subr.mxu1 %v10693_v58  ;;  %13099 = vst [vmem:[#allocation85_spill] sm:$0xff] %v10699_v14  ;;  %13100 = vst [vmem:[#allocation86_spill] sm:$0xff] %v10705_v0  ;;  %v10711_v33 = vld [vmem:[%s11578_s4 + $0x88] sm:$0xff]  ;;  %v10717_v58 = vld [vmem:[%s11578_s4 + $0x98] sm:$0xff] }
 0x7d7   :  { %3667 = vmatpush1.msra.mxu0 %v10699_v14  ;;  %3738 = vmatpush1.msra.mxu1 %v10705_v0  ;;  %13101 = vst [vmem:[#allocation87_spill] sm:$0xff] %v10711_v33  ;;  %13102 = vst [vmem:[#allocation88_spill] sm:$0xff] %v10717_v58  ;;  %v10723_v14 = vld [vmem:[%s11578_s4 + $0x80] sm:$0xff]  ;;  %v10729_v0 = vld [vmem:[%s11578_s4 + $0x90] sm:$0xff] }
 0x7d8   :  { %3668 = vmatprep.subr.mxu0 %v10711_v33  ;;  %3739 = vmatprep.subr.mxu1 %v10717_v58  ;;  %13103 = vst [vmem:[#allocation89_spill] sm:$0xff] %v10723_v14  ;;  %13104 = vst [vmem:[#allocation93_spill] sm:$0xff] %v10729_v0  ;;  %v10735_v33 = vld [vmem:[%s11578_s4 + $0x68] sm:$0xff]  ;;  %v10741_v58 = vld [vmem:[%s11578_s4 + $0x78] sm:$0xff] }
 0x7d9   :  { %3669 = vmatpush1.msra.mxu0 %v10723_v14  ;;  %3740 = vmatpush1.msra.mxu1 %v10729_v0  ;;  %13105 = vst [vmem:[#allocation94_spill] sm:$0xff] %v10735_v33  ;;  %13106 = vst [vmem:[#allocation95_spill] sm:$0xff] %v10741_v58  ;;  %v10747_v14 = vld [vmem:[%s11578_s4 + $0x60] sm:$0xff]  ;;  %v10753_v0 = vld [vmem:[%s11578_s4 + $0x70] sm:$0xff] }
 0x7da   :  { %3670 = vmatprep.subr.mxu0 %v10735_v33  ;;  %3741 = vmatprep.subr.mxu1 %v10741_v58  ;;  %13107 = vst [vmem:[#allocation90_spill] sm:$0xff] %v10747_v14  ;;  %13108 = vst [vmem:[#allocation96_spill] sm:$0xff] %v10753_v0  ;;  %v10759_v33 = vld [vmem:[%s11578_s4 + $0x48] sm:$0xff]  ;;  %v10765_v58 = vld [vmem:[%s11578_s4 + $0x58] sm:$0xff] }
 0x7db   :  { %3671 = vmatpush1.msra.mxu0 %v10747_v14  ;;  %3742 = vmatpush1.msra.mxu1 %v10753_v0  ;;  %13109 = vst [vmem:[#allocation97_spill] sm:$0xff] %v10759_v33  ;;  %13110 = vst [vmem:[#allocation98_spill] sm:$0xff] %v10765_v58  ;;  %v10771_v14 = vld [vmem:[%s11578_s4 + $0x40] sm:$0xff]  ;;  %v10777_v0 = vld [vmem:[%s11578_s4 + $0x50] sm:$0xff] }
 0x7dc   :  { %3672 = vmatprep.subr.mxu0 %v10759_v33  ;;  %3743 = vmatprep.subr.mxu1 %v10765_v58  ;;  %13111 = vst [vmem:[#allocation99_spill] sm:$0xff] %v10771_v14  ;;  %13112 = vst [vmem:[#allocation100_spill] sm:$0xff] %v10777_v0  ;;  %v10783_v33 = vld [vmem:[%s11578_s4 + $0x28] sm:$0xff]  ;;  %v10789_v58 = vld [vmem:[%s11578_s4 + $0x38] sm:$0xff] }
 0x7dd   :  { %3673 = vmatpush1.msra.mxu0 %v10771_v14  ;;  %3744 = vmatpush1.msra.mxu1 %v10777_v0  ;;  %13113 = vst [vmem:[#allocation101_spill] sm:$0xff] %v10783_v33  ;;  %13114 = vst [vmem:[#allocation102_spill] sm:$0xff] %v10789_v58  ;;  %v10795_v14 = vld [vmem:[%s11578_s4 + $0x20] sm:$0xff]  ;;  %v10801_v0 = vld [vmem:[%s11578_s4 + $0x30] sm:$0xff] }
 0x7de   :  { %3674 = vmatprep.subr.mxu0 %v10783_v33  ;;  %3745 = vmatprep.subr.mxu1 %v10789_v58  ;;  %13115 = vst [vmem:[#allocation103_spill] sm:$0xff] %v10795_v14  ;;  %13116 = vst [vmem:[#allocation104_spill] sm:$0xff] %v10801_v0  ;;  %v10807_v33 = vld [vmem:[%s11578_s4 + $0x8] sm:$0xff]  ;;  %v10813_v58 = vld [vmem:[%s11578_s4 + $0x18] sm:$0xff] }
 0x7df   :  { %3675 = vmatpush1.msra.mxu0 %v10795_v14  ;;  %3746 = vmatpush1.msra.mxu1 %v10801_v0  ;;  %13117 = vst [vmem:[#allocation105_spill] sm:$0xff] %v10807_v33  ;;  %13118 = vst [vmem:[#allocation106_spill] sm:$0xff] %v10813_v58  ;;  %v10819_v14 = vld [vmem:[%s11578_s4] sm:$0xff]  ;;  %v10825_v0 = vld [vmem:[%s11578_s4 + $0x10] sm:$0xff] }
 0x7e0   :  { %3676 = vmatprep.subr.mxu0 %v10807_v33  ;;  %3747 = vmatprep.subr.mxu1 %v10813_v58  ;;  %13119 = vst [vmem:[#allocation107_spill] sm:$0xff] %v10819_v14  ;;  %13120 = vst [vmem:[#allocation108_spill] sm:$0xff] %v10825_v0  ;;  %v10833_v58 = vld [vmem:[%s11579_s5 + $0x1e8] sm:$0xff] }
 0x7e1   :  { %3677 = vmatpush1.msra.mxu0 %v10819_v14  ;;  %3748 = vmatpush1.msra.mxu1 %v10825_v0  ;;  %13121 = vst [vmem:[#allocation109_spill] sm:$0xff] %v10833_v58  ;;  %v10839_v14 = vld [vmem:[%s11579_s5 + $0x1f8] sm:$0xff] }
 0x7e2   :  { %3710 = vmatprep.mubr.f32.mxu0 %v12185_v59  ;;  %3781 = vmatprep.mubr.f32.mxu1 %v12185_v59  ;;  %13122 = vst [vmem:[#allocation110_spill] sm:$0xff] %v10839_v14 }
 0x7e3   :  { %3788 = vmatprep.subr.mxu0 %v10833_v58  ;;  %3859 = vmatprep.subr.mxu1 %v10839_v14 }
 0x83e   :  { %v3212_v33 = vpop.f32.mrf.mxu0  ;;  %v3283_v30 = vpop.f32.mrf.mxu1 }
 0x840   :  { %v3214_v0 = vpop.f32.mrf.mxu0  ;;  %v3285_v38 = vpop.f32.mrf.mxu1 }
 0x85f   :  { %v3354_v40 = vpop.f32.mrf.mxu0  ;;  %v3425_v12 = vpop.f32.mrf.mxu1 }
 0x861   :  { %v3356_v2 = vpop.f32.mrf.mxu0  ;;  %v3427_v17 = vpop.f32.mrf.mxu1 }
 0x881   :  { %v3524_v37 = vpop.f32.mrf.mxu0  ;;  %v3595_v14 = vpop.f32.mrf.mxu1 }
 0x882   :  { %v3604_v36 = vrot.slane %v3524_v37, 2  ;;  %v3606_v61 = vrot.slane %v3595_v14, 2  ;;  %v3636_v14 = vrot.slane %v9975_v47, 7 }
 0x883   :  { %v3526_v55 = vpop.f32.mrf.mxu0  ;;  %v3597_v51 = vpop.f32.mrf.mxu1 }
 0x884   :  { %v3612_v62 = vadd.f32 %v3604_v36, %v12390_v5  ;;  %v3605_v58 = vrot.slane %v3526_v55, 2  ;;  %v3614_v23 = vadd.f32 %v3606_v61, %v12392_v16  ;;  %v3607_v27 = vrot.slane %v3597_v51, 2 }
 0x886   :  { %v4677_v56 = vmul.f32 -1.442695, %v3612_v62  ;;  %v3613_v50 = vadd.f32 %v3605_v58, %v12391_v9  ;;  %v4679_v34 = vmul.f32 -1.442695, %v3614_v23  ;;  %v3615_v11 = vadd.f32 %v3607_v27, %v6614_v57 }
 0x887   :  { %v3215_v62 = vadd.f32 %v3214_v0, %v7143_v21 }
 0x888   :  { %v4678_v15 = vmul.f32 -1.442695, %v3613_v50  ;;  %4867 = vpow2.f32 %v4677_v56  ;;  %v3213_v50 = vadd.f32 %v3212_v33, %v7146_v25 }
 0x889   :  { %v3431_v56 = vadd.f32 %v3356_v2, %v3215_v62  ;;  %v3284_v2 = vadd.f32 %v3283_v30, %v7157_v45  ;;  %v3286_v62 = vadd.f32 %v3285_v38, %v7161_v8  ;;  %v10861_v38 = vld [vmem:[%s11579_s5 + $0x1e0] sm:$0xff]  ;;  %v10879_v30 = vld [vmem:[%s11579_s5 + $0x1d8] sm:$0xff] }
 0x88a   :  { %4869 = vpow2.f32 %v4678_v15  ;;  %v3430_v15 = vadd.f32 %v3354_v40, %v3213_v50 }
 0x88b   :  { %4871 = vpow2.f32 %v4679_v34  ;;  %v4675_v55 = vmul.f32 -1.442695, %v3431_v56  ;;  %v3432_v50 = vadd.f32 %v3425_v12, %v3284_v2  ;;  %v3433_v47 = vadd.f32 %v3427_v17, %v3286_v62  ;;  %v10867_v17 = vld [vmem:[%s11579_s5 + $0x1f0] sm:$0xff]  ;;  %v10873_v12 = vld [vmem:[%s11579_s5 + $0x1c8] sm:$0xff]  ;;  %v10927_v2 = vld [vmem:[%s11579_s5 + $0x198] sm:$0xff] }
 0x88c   :  { %v4674_v61 = vmul.f32 -1.442695, %v3430_v15  ;;  %v10934_v62 = vld [vmem:[%s11579_s5 + $0x180] sm:$0xff] }
 0x88d   :  { %v4676_v56 = vmul.f32 -1.442695, %v3432_v50 }
 0x895   :  { %v4868_v37 = vpop.eup %4867 }
 0x896   :  { %v3625_v46 = vadd.f32 1.0, %v4868_v37 }
 0x897   :  { %v4870_v36 = vpop.eup %4869 }
 0x898   :  { %4873 = vrcp.f32 %v3625_v46  ;;  %v3626_v58 = vadd.f32 1.0, %v4870_v36  ;;  %v4872_v23 = vpop.eup %4871 }
 0x899   :  { %4875 = vtanh.f32 %v3615_v11  ;;  %v3627_v0 = vadd.f32 1.0, %v4872_v23 }
 0x89a   :  { %4877 = vrcp.f32 %v3626_v58 }
 0x89b   :  { %4879 = vpow2.f32 %v4675_v55 }
 0x89c   :  { %4881 = vpow2.f32 %v4674_v61 }
 0x89d   :  { %4883 = vrcp.f32 %v3627_v0  ;;  %v10903_v0 = vld [vmem:[%s11579_s5 + $0x1b8] sm:$0xff] }
 0x8a5   :  { %v4874_v51 = vpop.eup %4873 }
 0x8a6   :  { %v4876_v27 = vpop.eup %4875 }
 0x8a7   :  { %v4878_v37 = vpop.eup %4877  ;;  %v3639_v46 = vmul.f32 %v4876_v27, %v4874_v51  ;;  %v10885_v51 = vld [vmem:[%s11579_s5 + $0x1c0] sm:$0xff]  ;;  %v10891_v27 = vld [vmem:[%s11579_s5 + $0x1d0] sm:$0xff] }
 0x8a8   :  { %v3638_v34 = vmul.f32 %v4878_v37, %v3636_v14  ;;  %v4880_v11 = vpop.eup %4879  ;;  %v10897_v37 = vld [vmem:[%s11579_s5 + $0x1a8] sm:$0xff] }
 0x8a9   :  { %v4882_v40 = vpop.eup %4881  ;;  %v3444_v33 = vadd.f32 1.0, %v4880_v11 }
 0x8aa   :  { %v10849_v36 = vadd.f32 %v3639_v46, %v3638_v34  ;;  %v3443_v58 = vadd.f32 1.0, %v4882_v40  ;;  %v4884_v15 = vpop.eup %4883  ;;  %v10909_v34 = vld [vmem:[%s11579_s5 + $0x1a0] sm:$0xff]  ;;  %v10915_v46 = vld [vmem:[%s11579_s5 + $0x1b0] sm:$0xff]  ;;  %v10921_v40 = vld [vmem:[%s11579_s5 + $0x188] sm:$0xff] }
 0x8ac   :  { %4885 = vtanh.f32 %v10849_v36 }
 0x8ad   :  { %4887 = vrcp.f32 %v3444_v33 }
 0x8ae   :  { %4889 = vrcp.f32 %v3443_v58  ;;  %v10940_v58 = vld [vmem:[%s11579_s5 + $0x190] sm:$0xff] }
 0x8af   :  { %4891 = vtanh.f32 %v3433_v47  ;;  %v10946_v47 = vld [vmem:[%s11579_s5 + $0x168] sm:$0xff] }
 0x8b0   :  { %4893 = vpow2.f32 %v4676_v56 }
 0x8b9   :  { %v4886_v55 = vpop.eup %4885 }
 0x8ba   :  { %v3642_v61 = vmul.f32 %v4886_v55, %v4884_v15  ;;  %v4888_v14 = vpop.eup %4887  ;;  %v10958_v15 = vld [vmem:[%s11579_s5 + $0x160] sm:$0xff]  ;;  %v10964_v55 = vld [vmem:[%s11579_s5 + $0x170] sm:$0xff] }
 0x8bb   :  { %v4890_v11 = vpop.eup %4889  ;;  %v3453_v33 = vmul.f32 %v4888_v14, %v10005_v42  ;;  %v10952_v42 = vld [vmem:[%s11579_s5 + $0x178] sm:$0xff]  ;;  %13123 = vst [vmem:[#allocation111_spill] sm:$0xff] %v10964_v55  ;;  %v10970_v14 = vld [vmem:[%s11579_s5 + $0x148] sm:$0xff] }
 0x8bc   :  { %v10854_v23 = vrot.slane %v3642_v61, 6  ;;  %v4892_v50 = vpop.eup %4891  ;;  %13124 = vst [vmem:[#allocation112_spill] sm:$0xff] %v10970_v14 }
 0x8bd   :  { %v3454_v56 = vmul.f32 %v4892_v50, %v4890_v11  ;;  %v4894_v61 = vpop.eup %4893  ;;  %v10976_v11 = vld [vmem:[%s11579_s5 + $0x158] sm:$0xff] }
 0x8be   :  { %3711 = vmatmul.mubr.f32.vlgmr.msra.gmra.mxu0 %v10854_v23  ;;  %3782 = vmatmul.mubr.f32.vlgmr.msra.gmra.mxu1 %v10854_v23  ;;  %13125 = vst [vmem:[#allocation113_spill] sm:$0xff] %v10976_v11 }
 0x8bf   :  { %3789 = vmatpush1.msra.mxu0 %v10861_v38  ;;  %3860 = vmatpush1.msra.mxu1 %v10867_v17  ;;  %v10979_v50 = vadd.f32 %v3454_v56, %v3453_v33  ;;  %v11002_v33 = vld [vmem:[%s11579_s5 + $0x138] sm:$0xff]  ;;  %v3445_v56 = vadd.f32 1.0, %v4894_v61 }
 0x8c0   :  { %3790 = vmatprep.subr.mxu0 %v10873_v12  ;;  %3861 = vmatprep.subr.mxu1 %v10879_v30  ;;  %13129 = vst [vmem:[#allocation117_spill] sm:$0xff] %v11002_v33  ;;  %v11026_v61 = vld [vmem:[%s11579_s5 + $0x118] sm:$0xff] }
 0x8c1   :  { %3791 = vmatpush1.msra.mxu0 %v10885_v51  ;;  %3862 = vmatpush1.msra.mxu1 %v10891_v27  ;;  %13133 = vst [vmem:[#allocation121_spill] sm:$0xff] %v11026_v61  ;;  %4895 = vtanh.f32 %v10979_v50 }
 0x8c2   :  { %3792 = vmatprep.subr.mxu0 %v10897_v37  ;;  %3863 = vmatprep.subr.mxu1 %v10903_v0  ;;  %4897 = vrcp.f32 %v3445_v56  ;;  %v11075_v56 = vld [vmem:[%s11579_s5 + $0xd8] sm:$0xff] }
 0x8c3   :  { %3793 = vmatpush1.msra.mxu0 %v10909_v34  ;;  %3864 = vmatpush1.msra.mxu1 %v10915_v46  ;;  %13141 = vst [vmem:[#allocation129_spill] sm:$0xff] %v11075_v56 }
 0x8c4   :  { %3794 = vmatprep.subr.mxu0 %v10921_v40  ;;  %3865 = vmatprep.subr.mxu1 %v10927_v2 }
 0x8c5   :  { %3795 = vmatpush1.msra.mxu0 %v10934_v62  ;;  %3866 = vmatpush1.msra.mxu1 %v10940_v58 }
 0x8c6   :  { %3796 = vmatprep.subr.mxu0 %v10946_v47  ;;  %3867 = vmatprep.subr.mxu1 %v10952_v42 }
 0x8c7   :  { %3797 = vmatpush1.msra.mxu0 %v10958_v15  ;;  %3868 = vmatpush1.msra.mxu1 %v10964_v55  ;;  %v10984_v55 = vld [vmem:[%s11579_s5 + $0x140] sm:$0xff] }
 0x8c8   :  { %3798 = vmatprep.subr.mxu0 %v10970_v14  ;;  %3869 = vmatprep.subr.mxu1 %v10976_v11  ;;  %13126 = vst [vmem:[#allocation114_spill] sm:$0xff] %v10984_v55  ;;  %v10990_v14 = vld [vmem:[%s11579_s5 + $0x150] sm:$0xff]  ;;  %v10996_v11 = vld [vmem:[%s11579_s5 + $0x128] sm:$0xff] }
 0x8c9   :  { %3799 = vmatpush1.msra.mxu0 %v10984_v55  ;;  %13127 = vst [vmem:[#allocation115_spill] sm:$0xff] %v10990_v14  ;;  %3870 = vmatpush1.msra.mxu1 %v10990_v14  ;;  %13128 = vst [vmem:[#allocation116_spill] sm:$0xff] %v10996_v11  ;;  %v11008_v55 = vld [vmem:[%s11579_s5 + $0x120] sm:$0xff]  ;;  %v11014_v14 = vld [vmem:[%s11579_s5 + $0x130] sm:$0xff] }
 0x8ca   :  { %3800 = vmatprep.subr.mxu0 %v10996_v11  ;;  %3871 = vmatprep.subr.mxu1 %v11002_v33  ;;  %13130 = vst [vmem:[#allocation118_spill] sm:$0xff] %v11008_v55  ;;  %13131 = vst [vmem:[#allocation119_spill] sm:$0xff] %v11014_v14  ;;  %v11020_v11 = vld [vmem:[%s11579_s5 + $0x108] sm:$0xff] }
 0x8cb   :  { %3801 = vmatpush1.msra.mxu0 %v11008_v55  ;;  %3872 = vmatpush1.msra.mxu1 %v11014_v14  ;;  %13132 = vst [vmem:[#allocation120_spill] sm:$0xff] %v11020_v11  ;;  %v11033_v14 = vld [vmem:[%s11579_s5 + $0x100] sm:$0xff]  ;;  %v11051_v55 = vld [vmem:[%s11579_s5 + $0xf8] sm:$0xff]  ;;  %v11213_v33 = vld [vmem:[%s11579_s5 + $0x8] sm:$0xff] }
 0x8cc   :  { %3802 = vmatprep.subr.mxu0 %v11020_v11  ;;  %3873 = vmatprep.subr.mxu1 %v11026_v61  ;;  %13134 = vst [vmem:[#allocation122_spill] sm:$0xff] %v11033_v14  ;;  %v11039_v11 = vld [vmem:[%s11579_s5 + $0x110] sm:$0xff]  ;;  %v11045_v61 = vld [vmem:[%s11579_s5 + $0xe8] sm:$0xff]  ;;  %13137 = vst [vmem:[#allocation125_spill] sm:$0xff] %v11051_v55 }
 0x8cd   :  { %3803 = vmatpush1.msra.mxu0 %v11033_v14  ;;  %13135 = vst [vmem:[#allocation123_spill] sm:$0xff] %v11039_v11  ;;  %3874 = vmatpush1.msra.mxu1 %v11039_v11  ;;  %13136 = vst [vmem:[#allocation124_spill] sm:$0xff] %v11045_v61  ;;  %v11057_v14 = vld [vmem:[%s11579_s5 + $0xe0] sm:$0xff]  ;;  %v11063_v11 = vld [vmem:[%s11579_s5 + $0xf0] sm:$0xff] }
 0x8ce   :  { %3804 = vmatprep.subr.mxu0 %v11045_v61  ;;  %3875 = vmatprep.subr.mxu1 %v11051_v55  ;;  %13138 = vst [vmem:[#allocation126_spill] sm:$0xff] %v11057_v14  ;;  %13139 = vst [vmem:[#allocation127_spill] sm:$0xff] %v11063_v11  ;;  %v11069_v61 = vld [vmem:[%s11579_s5 + $0xc8] sm:$0xff] }
 0x8cf   :  { %3805 = vmatpush1.msra.mxu0 %v11057_v14  ;;  %3876 = vmatpush1.msra.mxu1 %v11063_v11  ;;  %13140 = vst [vmem:[#allocation128_spill] sm:$0xff] %v11069_v61  ;;  %v11081_v14 = vld [vmem:[%s11579_s5 + $0xc0] sm:$0xff]  ;;  %v11087_v11 = vld [vmem:[%s11579_s5 + $0xd0] sm:$0xff]  ;;  %v11189_v55 = vld [vmem:[%s11579_s5 + $0x28] sm:$0xff] }
 0x8d0   :  { %3806 = vmatprep.subr.mxu0 %v11069_v61  ;;  %3877 = vmatprep.subr.mxu1 %v11075_v56  ;;  %13142 = vst [vmem:[#allocation130_spill] sm:$0xff] %v11081_v14  ;;  %13143 = vst [vmem:[#allocation131_spill] sm:$0xff] %v11087_v11  ;;  %v11093_v61 = vld [vmem:[%s11579_s5 + $0xa8] sm:$0xff]  ;;  %v11099_v56 = vld [vmem:[%s11579_s5 + $0xb8] sm:$0xff] }
 0x8d1   :  { %3807 = vmatpush1.msra.mxu0 %v11081_v14  ;;  %3878 = vmatpush1.msra.mxu1 %v11087_v11  ;;  %13144 = vst [vmem:[#allocation132_spill] sm:$0xff] %v11093_v61  ;;  %13145 = vst [vmem:[#allocation133_spill] sm:$0xff] %v11099_v56  ;;  %v11105_v14 = vld [vmem:[%s11579_s5 + $0xa0] sm:$0xff]  ;;  %v11111_v11 = vld [vmem:[%s11579_s5 + $0xb0] sm:$0xff] }
 0x8d2   :  { %3808 = vmatprep.subr.mxu0 %v11093_v61  ;;  %3879 = vmatprep.subr.mxu1 %v11099_v56  ;;  %13146 = vst [vmem:[#allocation134_spill] sm:$0xff] %v11105_v14  ;;  %13147 = vst [vmem:[#allocation135_spill] sm:$0xff] %v11111_v11  ;;  %v11117_v61 = vld [vmem:[%s11579_s5 + $0x88] sm:$0xff]  ;;  %v11123_v56 = vld [vmem:[%s11579_s5 + $0x98] sm:$0xff] }
 0x8d3   :  { %3809 = vmatpush1.msra.mxu0 %v11105_v14  ;;  %3880 = vmatpush1.msra.mxu1 %v11111_v11  ;;  %13148 = vst [vmem:[#allocation136_spill] sm:$0xff] %v11117_v61  ;;  %13149 = vst [vmem:[#allocation137_spill] sm:$0xff] %v11123_v56  ;;  %v11129_v14 = vld [vmem:[%s11579_s5 + $0x80] sm:$0xff]  ;;  %v11135_v11 = vld [vmem:[%s11579_s5 + $0x90] sm:$0xff] }
 0x8d4   :  { %3810 = vmatprep.subr.mxu0 %v11117_v61  ;;  %3881 = vmatprep.subr.mxu1 %v11123_v56  ;;  %13150 = vst [vmem:[#allocation138_spill] sm:$0xff] %v11129_v14  ;;  %13151 = vst [vmem:[#allocation139_spill] sm:$0xff] %v11135_v11  ;;  %v11141_v61 = vld [vmem:[%s11579_s5 + $0x68] sm:$0xff]  ;;  %v11147_v56 = vld [vmem:[%s11579_s5 + $0x78] sm:$0xff] }
 0x8d5   :  { %3811 = vmatpush1.msra.mxu0 %v11129_v14  ;;  %3882 = vmatpush1.msra.mxu1 %v11135_v11  ;;  %13152 = vst [vmem:[#allocation140_spill] sm:$0xff] %v11141_v61  ;;  %13153 = vst [vmem:[#allocation141_spill] sm:$0xff] %v11147_v56  ;;  %v11153_v14 = vld [vmem:[%s11579_s5 + $0x60] sm:$0xff]  ;;  %v11159_v11 = vld [vmem:[%s11579_s5 + $0x70] sm:$0xff] }
 0x8d6   :  { %3812 = vmatprep.subr.mxu0 %v11141_v61  ;;  %3883 = vmatprep.subr.mxu1 %v11147_v56  ;;  %13154 = vst [vmem:[#allocation142_spill] sm:$0xff] %v11153_v14  ;;  %13155 = vst [vmem:[#allocation143_spill] sm:$0xff] %v11159_v11  ;;  %v11165_v61 = vld [vmem:[%s11579_s5 + $0x48] sm:$0xff]  ;;  %v11171_v56 = vld [vmem:[%s11579_s5 + $0x58] sm:$0xff] }
 0x8d7   :  { %3813 = vmatpush1.msra.mxu0 %v11153_v14  ;;  %3884 = vmatpush1.msra.mxu1 %v11159_v11  ;;  %13156 = vst [vmem:[#allocation144_spill] sm:$0xff] %v11165_v61  ;;  %13157 = vst [vmem:[#allocation145_spill] sm:$0xff] %v11171_v56  ;;  %v11177_v14 = vld [vmem:[%s11579_s5 + $0x40] sm:$0xff]  ;;  %v11183_v11 = vld [vmem:[%s11579_s5 + $0x50] sm:$0xff] }
 0x8d8   :  { %3814 = vmatprep.subr.mxu0 %v11165_v61  ;;  %3885 = vmatprep.subr.mxu1 %v11171_v56  ;;  %13158 = vst [vmem:[#allocation146_spill] sm:$0xff] %v11177_v14  ;;  %13159 = vst [vmem:[#allocation147_spill] sm:$0xff] %v11183_v11  ;;  %v4896_v61 = vpop.eup %4895  ;;  %v11195_v56 = vld [vmem:[%s11579_s5 + $0x38] sm:$0xff] }
 0x8d9   :  { %3815 = vmatpush1.msra.mxu0 %v11177_v14  ;;  %3886 = vmatpush1.msra.mxu1 %v11183_v11  ;;  %13160 = vst [vmem:[#allocation148_spill] sm:$0xff] %v11189_v55  ;;  %13161 = vst [vmem:[#allocation149_spill] sm:$0xff] %v11195_v56  ;;  %v11201_v14 = vld [vmem:[%s11579_s5 + $0x20] sm:$0xff]  ;;  %v11207_v11 = vld [vmem:[%s11579_s5 + $0x30] sm:$0xff] }
 0x8da   :  { %3816 = vmatprep.subr.mxu0 %v11189_v55  ;;  %3887 = vmatprep.subr.mxu1 %v11195_v56  ;;  %13162 = vst [vmem:[#allocation150_spill] sm:$0xff] %v11201_v14  ;;  %13163 = vst [vmem:[#allocation152_spill] sm:$0xff] %v11207_v11  ;;  %v4898_v55 = vpop.eup %4897  ;;  %v11219_v56 = vld [vmem:[%s11579_s5 + $0x18] sm:$0xff] }
 0x8db   :  { %3817 = vmatpush1.msra.mxu0 %v11201_v14  ;;  %3888 = vmatpush1.msra.mxu1 %v11207_v11  ;;  %13164 = vst [vmem:[#allocation154_spill] sm:$0xff] %v11213_v33  ;;  %v11225_v14 = vld [vmem:[%s11579_s5] sm:$0xff]  ;;  %v11229_v11 = vmul.f32 %v4898_v55, %v4896_v61  ;;  %v13194_v55 = vld [vmem:[#allocation37_spill] sm:$0xff]  ;;  %v13195_v61 = vld [vmem:[#allocation38_spill] sm:$0xff] }
 0x8dc   :  { %3818 = vmatprep.subr.mxu0 %v11213_v33  ;;  %3889 = vmatprep.subr.mxu1 %v11219_v56  ;;  %v11234_v33 = vld [vmem:[%s11579_s5 + $0x10] sm:$0xff] }
 0x8dd   :  { %3819 = vmatpush1.msra.mxu0 %v11225_v14  ;;  %3852 = vmatprep.mubr.f32.mxu0 %v12185_v59 }
 0x8de   :  { %3890 = vmatpush1.msra.mxu1 %v11234_v33  ;;  %3923 = vmatprep.mubr.f32.mxu1 %v12185_v59 }
 0x8df   :  { %3853 = vmatmul.mubr.f32.vlgmr.msra.gmra.mxu0 %v11229_v11  ;;  %3924 = vmatmul.mubr.f32.vlgmr.msra.gmra.mxu1 %v11229_v11 }
 0x8e0   :  { %3958 = vmatprep.subr.mxu0 %v10059_v32  ;;  %4029 = vmatprep.subr.mxu1 %v10065_v49  ;;  %v13165_v32 = vld [vmem:[#allocation8_spill] sm:$0xff]  ;;  %v13166_v49 = vld [vmem:[#allocation9_spill] sm:$0xff] }
 0x8e1   :  { %3959 = vmatpush1.msra.mxu0 %v10071_v3  ;;  %4030 = vmatpush1.msra.mxu1 %v10077_v7  ;;  %v13167_v3 = vld [vmem:[#allocation10_spill] sm:$0xff]  ;;  %v13168_v7 = vld [vmem:[#allocation11_spill] sm:$0xff] }
 0x8e2   :  { %3960 = vmatprep.subr.mxu0 %v10083_v41  ;;  %4031 = vmatprep.subr.mxu1 %v10089_v63  ;;  %v13169_v41 = vld [vmem:[#allocation12_spill] sm:$0xff]  ;;  %v13170_v63 = vld [vmem:[#allocation13_spill] sm:$0xff] }
 0x8e3   :  { %3961 = vmatpush1.msra.mxu0 %v10095_v13  ;;  %4032 = vmatpush1.msra.mxu1 %v10101_v44  ;;  %v13171_v13 = vld [vmem:[#allocation14_spill] sm:$0xff]  ;;  %v13172_v44 = vld [vmem:[#allocation15_spill] sm:$0xff] }
 0x8e4   :  { %3962 = vmatprep.subr.mxu0 %v10107_v39  ;;  %4033 = vmatprep.subr.mxu1 %v10113_v20  ;;  %v13173_v39 = vld [vmem:[#allocation16_spill] sm:$0xff]  ;;  %v13174_v20 = vld [vmem:[#allocation17_spill] sm:$0xff] }
 0x8e5   :  { %3963 = vmatpush1.msra.mxu0 %v10119_v54  ;;  %4034 = vmatpush1.msra.mxu1 %v10125_v10  ;;  %v13175_v54 = vld [vmem:[#allocation18_spill] sm:$0xff]  ;;  %v13176_v10 = vld [vmem:[#allocation19_spill] sm:$0xff] }
 0x8e6   :  { %3964 = vmatprep.subr.mxu0 %v10131_v60  ;;  %4035 = vmatprep.subr.mxu1 %v10137_v43  ;;  %v13177_v60 = vld [vmem:[#allocation20_spill] sm:$0xff]  ;;  %v13178_v43 = vld [vmem:[#allocation21_spill] sm:$0xff] }
 0x8e7   :  { %3965 = vmatpush1.msra.mxu0 %v10143_v18  ;;  %4036 = vmatpush1.msra.mxu1 %v10149_v31  ;;  %v13179_v18 = vld [vmem:[#allocation22_spill] sm:$0xff]  ;;  %v13180_v31 = vld [vmem:[#allocation23_spill] sm:$0xff] }
 0x8e8   :  { %3966 = vmatprep.subr.mxu0 %v10155_v6  ;;  %4037 = vmatprep.subr.mxu1 %v10161_v19  ;;  %v13181_v6 = vld [vmem:[#allocation24_spill] sm:$0xff]  ;;  %v13182_v19 = vld [vmem:[#allocation25_spill] sm:$0xff] }
 0x8e9   :  { %3967 = vmatpush1.msra.mxu0 %v10167_v53  ;;  %4038 = vmatpush1.msra.mxu1 %v10173_v1  ;;  %v13183_v53 = vld [vmem:[#allocation26_spill] sm:$0xff]  ;;  %v13184_v1 = vld [vmem:[#allocation27_spill] sm:$0xff] }
 0x8ea   :  { %3968 = vmatprep.subr.mxu0 %v10179_v48  ;;  %4039 = vmatprep.subr.mxu1 %v10185_v29  ;;  %v13185_v48 = vld [vmem:[#allocation28_spill] sm:$0xff]  ;;  %v13186_v29 = vld [vmem:[#allocation29_spill] sm:$0xff] }
 0x8eb   :  { %3969 = vmatpush1.msra.mxu0 %v10191_v28  ;;  %4040 = vmatpush1.msra.mxu1 %v10197_v52  ;;  %v13187_v28 = vld [vmem:[#allocation30_spill] sm:$0xff]  ;;  %v13188_v52 = vld [vmem:[#allocation31_spill] sm:$0xff] }
 0x8ec   :  { %3970 = vmatprep.subr.mxu0 %v10203_v26  ;;  %4041 = vmatprep.subr.mxu1 %v10209_v22  ;;  %v13189_v26 = vld [vmem:[#allocation32_spill] sm:$0xff]  ;;  %v13190_v22 = vld [vmem:[#allocation33_spill] sm:$0xff] }
 0x8ed   :  { %3971 = vmatpush1.msra.mxu0 %v10215_v24  ;;  %4042 = vmatpush1.msra.mxu1 %v10221_v4  ;;  %v13191_v24 = vld [vmem:[#allocation34_spill] sm:$0xff]  ;;  %v13192_v4 = vld [vmem:[#allocation35_spill] sm:$0xff] }
 0x8ee   :  { %3972 = vmatprep.subr.mxu0 %v10227_v35  ;;  %4043 = vmatprep.subr.mxu1 %v13165_v32  ;;  %v13193_v35 = vld [vmem:[#allocation36_spill] sm:$0xff]  ;;  %v13196_v32 = vld [vmem:[#allocation39_spill] sm:$0xff] }
 0x8ef   :  { %3973 = vmatpush1.msra.mxu0 %v13166_v49  ;;  %4044 = vmatpush1.msra.mxu1 %v13167_v3  ;;  %v13197_v49 = vld [vmem:[#allocation40_spill] sm:$0xff]  ;;  %v13198_v3 = vld [vmem:[#allocation41_spill] sm:$0xff] }
 0x8f0   :  { %3974 = vmatprep.subr.mxu0 %v13168_v7  ;;  %4045 = vmatprep.subr.mxu1 %v13169_v41  ;;  %v13199_v7 = vld [vmem:[#allocation42_spill] sm:$0xff]  ;;  %v13200_v41 = vld [vmem:[#allocation43_spill] sm:$0xff] }
 0x8f1   :  { %3975 = vmatpush1.msra.mxu0 %v13170_v63  ;;  %4046 = vmatpush1.msra.mxu1 %v13171_v13  ;;  %v13201_v63 = vld [vmem:[#allocation44_spill] sm:$0xff]  ;;  %v13202_v13 = vld [vmem:[#allocation45_spill] sm:$0xff] }
 0x8f2   :  { %3976 = vmatprep.subr.mxu0 %v13172_v44  ;;  %4047 = vmatprep.subr.mxu1 %v13173_v39  ;;  %v13203_v44 = vld [vmem:[#allocation46_spill] sm:$0xff]  ;;  %v13204_v39 = vld [vmem:[#allocation47_spill] sm:$0xff] }
 0x8f3   :  { %3977 = vmatpush1.msra.mxu0 %v13174_v20  ;;  %4048 = vmatpush1.msra.mxu1 %v13175_v54  ;;  %v13205_v20 = vld [vmem:[#allocation48_spill] sm:$0xff]  ;;  %v13206_v54 = vld [vmem:[#allocation49_spill] sm:$0xff] }
 0x8f4   :  { %3978 = vmatprep.subr.mxu0 %v13176_v10  ;;  %4049 = vmatprep.subr.mxu1 %v13177_v60  ;;  %v13207_v10 = vld [vmem:[#allocation50_spill] sm:$0xff]  ;;  %v13208_v60 = vld [vmem:[#allocation51_spill] sm:$0xff] }
 0x8f5   :  { %3979 = vmatpush1.msra.mxu0 %v13178_v43  ;;  %4050 = vmatpush1.msra.mxu1 %v13179_v18  ;;  %v13209_v43 = vld [vmem:[#allocation52_spill] sm:$0xff]  ;;  %v13211_v18 = vld [vmem:[#allocation54_spill] sm:$0xff] }
 0x8f6   :  { %3980 = vmatprep.subr.mxu0 %v13180_v31  ;;  %4051 = vmatprep.subr.mxu1 %v13181_v6  ;;  %v13212_v31 = vld [vmem:[#allocation55_spill] sm:$0xff]  ;;  %v13213_v6 = vld [vmem:[#allocation56_spill] sm:$0xff] }
 0x8f7   :  { %3981 = vmatpush1.msra.mxu0 %v13182_v19  ;;  %4052 = vmatpush1.msra.mxu1 %v13183_v53  ;;  %v13214_v19 = vld [vmem:[#allocation57_spill] sm:$0xff]  ;;  %v13215_v53 = vld [vmem:[#allocation58_spill] sm:$0xff] }
 0x8f8   :  { %3982 = vmatprep.subr.mxu0 %v13184_v1  ;;  %4053 = vmatprep.subr.mxu1 %v13185_v48  ;;  %v13216_v1 = vld [vmem:[#allocation59_spill] sm:$0xff]  ;;  %v13217_v48 = vld [vmem:[#allocation60_spill] sm:$0xff] }
 0x8f9   :  { %3983 = vmatpush1.msra.mxu0 %v13186_v29  ;;  %4054 = vmatpush1.msra.mxu1 %v13187_v28  ;;  %v13218_v29 = vld [vmem:[#allocation61_spill] sm:$0xff]  ;;  %v13219_v28 = vld [vmem:[#allocation62_spill] sm:$0xff] }
 0x8fa   :  { %3984 = vmatprep.subr.mxu0 %v13188_v52  ;;  %4055 = vmatprep.subr.mxu1 %v13189_v26  ;;  %v13220_v52 = vld [vmem:[#allocation63_spill] sm:$0xff]  ;;  %v13221_v26 = vld [vmem:[#allocation64_spill] sm:$0xff] }
 0x8fb   :  { %3985 = vmatpush1.msra.mxu0 %v13190_v22  ;;  %4056 = vmatpush1.msra.mxu1 %v13191_v24  ;;  %v13222_v22 = vld [vmem:[#allocation65_spill] sm:$0xff]  ;;  %v13223_v24 = vld [vmem:[#allocation66_spill] sm:$0xff] }
 0x8fc   :  { %3986 = vmatprep.subr.mxu0 %v13192_v4  ;;  %4057 = vmatprep.subr.mxu1 %v13193_v35  ;;  %v13224_v4 = vld [vmem:[#allocation67_spill] sm:$0xff]  ;;  %v13225_v35 = vld [vmem:[#allocation68_spill] sm:$0xff] }
 0x8fd   :  { %3987 = vmatpush1.msra.mxu0 %v13194_v55  ;;  %4058 = vmatpush1.msra.mxu1 %v13195_v61  ;;  %v13226_v55 = vld [vmem:[#allocation69_spill] sm:$0xff]  ;;  %v13227_v61 = vld [vmem:[#allocation70_spill] sm:$0xff] }
 0x8fe   :  { %3988 = vmatprep.subr.mxu0 %v13196_v32  ;;  %4059 = vmatprep.subr.mxu1 %v13197_v49  ;;  %v13228_v32 = vld [vmem:[#allocation71_spill] sm:$0xff]  ;;  %v13229_v49 = vld [vmem:[#allocation72_spill] sm:$0xff] }
 0x8ff   :  { %3989 = vmatpush1.msra.mxu0 %v13198_v3  ;;  %4022 = vmatprep.mubr.f32.mxu0 %v12185_v59  ;;  %v13230_v3 = vld [vmem:[#allocation73_spill] sm:$0xff] }
 0x900   :  { %4060 = vmatpush1.msra.mxu1 %v13199_v7  ;;  %4093 = vmatprep.mubr.f32.mxu1 %v12185_v59  ;;  %v13231_v7 = vld [vmem:[#allocation74_spill] sm:$0xff] }
 0x901   :  { %4023 = vmatmul.mubr.f32.vlgmr.msra.gmra.mxu0 %v10854_v23  ;;  %4094 = vmatmul.mubr.f32.vlgmr.msra.gmra.mxu1 %v10854_v23  ;;  %v13210_v23 = vld [vmem:[#allocation53_spill] sm:$0xff] }
 0x902   :  { %4146 = vmatprep.subr.mxu0 %v13200_v41  ;;  %4217 = vmatprep.subr.mxu1 %v13201_v63  ;;  %v13232_v41 = vld [vmem:[#allocation75_spill] sm:$0xff]  ;;  %v13233_v63 = vld [vmem:[#allocation76_spill] sm:$0xff] }
 0x903   :  { %4147 = vmatpush1.msra.mxu0 %v13202_v13  ;;  %4218 = vmatpush1.msra.mxu1 %v13203_v44  ;;  %v13234_v13 = vld [vmem:[#allocation77_spill] sm:$0xff]  ;;  %v13235_v44 = vld [vmem:[#allocation78_spill] sm:$0xff] }
 0x904   :  { %4148 = vmatprep.subr.mxu0 %v13204_v39  ;;  %4219 = vmatprep.subr.mxu1 %v13205_v20  ;;  %v13236_v39 = vld [vmem:[#allocation79_spill] sm:$0xff]  ;;  %v13237_v20 = vld [vmem:[#allocation80_spill] sm:$0xff] }
 0x905   :  { %4149 = vmatpush1.msra.mxu0 %v13206_v54  ;;  %4220 = vmatpush1.msra.mxu1 %v13207_v10  ;;  %v13238_v54 = vld [vmem:[#allocation81_spill] sm:$0xff]  ;;  %v13239_v10 = vld [vmem:[#allocation82_spill] sm:$0xff] }
 0x906   :  { %4150 = vmatprep.subr.mxu0 %v13208_v60  ;;  %4221 = vmatprep.subr.mxu1 %v13209_v43  ;;  %v13240_v60 = vld [vmem:[#allocation83_spill] sm:$0xff]  ;;  %v13241_v43 = vld [vmem:[#allocation84_spill] sm:$0xff] }
 0x907   :  { %4151 = vmatpush1.msra.mxu0 %v13210_v23  ;;  %4222 = vmatpush1.msra.mxu1 %v13211_v18  ;;  %v13242_v23 = vld [vmem:[#allocation85_spill] sm:$0xff]  ;;  %v13243_v18 = vld [vmem:[#allocation86_spill] sm:$0xff] }
 0x908   :  { %4152 = vmatprep.subr.mxu0 %v13212_v31  ;;  %4223 = vmatprep.subr.mxu1 %v13213_v6  ;;  %v13244_v31 = vld [vmem:[#allocation87_spill] sm:$0xff]  ;;  %v13245_v6 = vld [vmem:[#allocation88_spill] sm:$0xff] }
 0x909   :  { %4153 = vmatpush1.msra.mxu0 %v13214_v19  ;;  %4224 = vmatpush1.msra.mxu1 %v13215_v53  ;;  %v13246_v19 = vld [vmem:[#allocation89_spill] sm:$0xff] }
 0x90a   :  { %4154 = vmatprep.subr.mxu0 %v13216_v1  ;;  %4225 = vmatprep.subr.mxu1 %v13217_v48  ;;  %v13247_v53 = vld [vmem:[#allocation93_spill] sm:$0xff]  ;;  %v13248_v1 = vld [vmem:[#allocation94_spill] sm:$0xff]  ;;  %v13249_v48 = vld [vmem:[#allocation95_spill] sm:$0xff] }
 0x90b   :  { %4155 = vmatpush1.msra.mxu0 %v13218_v29  ;;  %4226 = vmatpush1.msra.mxu1 %v13219_v28  ;;  %v13250_v29 = vld [vmem:[#allocation90_spill] sm:$0xff]  ;;  %v13251_v28 = vld [vmem:[#allocation96_spill] sm:$0xff] }
 0x90c   :  { %4156 = vmatprep.subr.mxu0 %v13220_v52  ;;  %4227 = vmatprep.subr.mxu1 %v13221_v26  ;;  %v13252_v52 = vld [vmem:[#allocation97_spill] sm:$0xff]  ;;  %v13253_v26 = vld [vmem:[#allocation98_spill] sm:$0xff] }
 0x90d   :  { %4157 = vmatpush1.msra.mxu0 %v13222_v22  ;;  %4228 = vmatpush1.msra.mxu1 %v13223_v24  ;;  %v13254_v22 = vld [vmem:[#allocation99_spill] sm:$0xff]  ;;  %v13255_v24 = vld [vmem:[#allocation100_spill] sm:$0xff] }
 0x90e   :  { %4158 = vmatprep.subr.mxu0 %v13224_v4  ;;  %4229 = vmatprep.subr.mxu1 %v13225_v35  ;;  %v13256_v4 = vld [vmem:[#allocation101_spill] sm:$0xff]  ;;  %v13257_v35 = vld [vmem:[#allocation102_spill] sm:$0xff] }
 0x90f   :  { %4159 = vmatpush1.msra.mxu0 %v13226_v55  ;;  %4230 = vmatpush1.msra.mxu1 %v13227_v61  ;;  %v13258_v55 = vld [vmem:[#allocation103_spill] sm:$0xff]  ;;  %v13259_v61 = vld [vmem:[#allocation104_spill] sm:$0xff] }
 0x910   :  { %4160 = vmatprep.subr.mxu0 %v13228_v32  ;;  %4231 = vmatprep.subr.mxu1 %v13229_v49  ;;  %v13260_v32 = vld [vmem:[#allocation105_spill] sm:$0xff]  ;;  %v13261_v49 = vld [vmem:[#allocation106_spill] sm:$0xff] }
 0x911   :  { %4161 = vmatpush1.msra.mxu0 %v13230_v3  ;;  %4232 = vmatpush1.msra.mxu1 %v13231_v7  ;;  %v13262_v3 = vld [vmem:[#allocation107_spill] sm:$0xff]  ;;  %v13263_v7 = vld [vmem:[#allocation108_spill] sm:$0xff] }
 0x912   :  { %4162 = vmatprep.subr.mxu0 %v13232_v41  ;;  %4233 = vmatprep.subr.mxu1 %v13233_v63  ;;  %v13264_v41 = vld [vmem:[#allocation109_spill] sm:$0xff]  ;;  %v13265_v63 = vld [vmem:[#allocation110_spill] sm:$0xff] }
 0x913   :  { %4163 = vmatpush1.msra.mxu0 %v13234_v13  ;;  %4234 = vmatpush1.msra.mxu1 %v13235_v44 }
 0x914   :  { %4164 = vmatprep.subr.mxu0 %v13236_v39  ;;  %4235 = vmatprep.subr.mxu1 %v13237_v20 }
 0x915   :  { %4165 = vmatpush1.msra.mxu0 %v13238_v54  ;;  %4236 = vmatpush1.msra.mxu1 %v13239_v10 }
 0x916   :  { %4166 = vmatprep.subr.mxu0 %v13240_v60  ;;  %4237 = vmatprep.subr.mxu1 %v13241_v43 }
 0x917   :  { %4167 = vmatpush1.msra.mxu0 %v13242_v23  ;;  %4238 = vmatpush1.msra.mxu1 %v13243_v18 }
 0x918   :  { %4168 = vmatprep.subr.mxu0 %v13244_v31  ;;  %4239 = vmatprep.subr.mxu1 %v13245_v6 }
 0x919   :  { %4169 = vmatpush1.msra.mxu0 %v13246_v19  ;;  %4240 = vmatpush1.msra.mxu1 %v13247_v53 }
 0x91a   :  { %4170 = vmatprep.subr.mxu0 %v13248_v1  ;;  %4241 = vmatprep.subr.mxu1 %v13249_v48 }
 0x91b   :  { %4171 = vmatpush1.msra.mxu0 %v13250_v29  ;;  %4242 = vmatpush1.msra.mxu1 %v13251_v28 }
 0x91c   :  { %4172 = vmatprep.subr.mxu0 %v13252_v52  ;;  %4243 = vmatprep.subr.mxu1 %v13253_v26 }
 0x91d   :  { %4173 = vmatpush1.msra.mxu0 %v13254_v22  ;;  %4244 = vmatpush1.msra.mxu1 %v13255_v24 }
 0x91e   :  { %4174 = vmatprep.subr.mxu0 %v13256_v4  ;;  %4245 = vmatprep.subr.mxu1 %v13257_v35 }
 0x91f   :  { %4175 = vmatpush1.msra.mxu0 %v13258_v55  ;;  %4246 = vmatpush1.msra.mxu1 %v13259_v61 }
 0x920   :  { %4176 = vmatprep.subr.mxu0 %v13260_v32  ;;  %4247 = vmatprep.subr.mxu1 %v13261_v49 }
 0x921   :  { %4177 = vmatpush1.msra.mxu0 %v13262_v3  ;;  %4248 = vmatpush1.msra.mxu1 %v13263_v7 }
 0x922   :  { %4210 = vmatprep.mubr.f32.mxu0 %v12185_v59  ;;  %4281 = vmatprep.mubr.f32.mxu1 %v12185_v59 }
 0x923   :  { %4288 = vmatprep.subr.mxu0 %v13264_v41  ;;  %4359 = vmatprep.subr.mxu1 %v13265_v63 }
 0x97e   :  { %v3712_v13 = vpop.f32.mrf.mxu0  ;;  %v3783_v20 = vpop.f32.mrf.mxu1 }
 0x97f   :  { %v3713_v32 = vadd.f32 %v3712_v13, %v7146_v25 }
 0x980   :  { %v3714_v44 = vpop.f32.mrf.mxu0  ;;  %v3785_v10 = vpop.f32.mrf.mxu1 }
 0x981   :  { %v3715_v61 = vadd.f32 %v3714_v44, %v7143_v21 }
 0x99f   :  { %v3854_v39 = vpop.f32.mrf.mxu0  ;;  %v3925_v23 = vpop.f32.mrf.mxu1 }
 0x9a0   :  { %v3930_v3 = vadd.f32 %v3854_v39, %v3713_v32  ;;  %v3784_v39 = vadd.f32 %v3783_v20, %v7157_v45  ;;  %v13286_v32 = vld [vmem:[#allocation131_spill] sm:$0xff] }
 0x9a1   :  { %v3856_v54 = vpop.f32.mrf.mxu0  ;;  %v3927_v1 = vpop.f32.mrf.mxu1 }
 0x9a2   :  { %v3931_v49 = vadd.f32 %v3856_v54, %v3715_v61  ;;  %v13284_v61 = vld [vmem:[#allocation129_spill] sm:$0xff] }
 0x9a4   :  { %v4681_v7 = vmul.f32 -1.442695, %v3931_v49  ;;  %v13287_v49 = vld [vmem:[#allocation132_spill] sm:$0xff] }
 0x9c1   :  { %v4024_v60 = vpop.f32.mrf.mxu0  ;;  %v4095_v29 = vpop.f32.mrf.mxu1 }
 0x9c2   :  { %v4104_v43 = vrot.slane %v4024_v60, 1  ;;  %v4106_v28 = vrot.slane %v4095_v29, 1  ;;  %v4136_v60 = vrot.slane %v10849_v36, 7  ;;  %v3932_v29 = vadd.f32 %v3925_v23, %v3784_v39  ;;  %v13278_v23 = vld [vmem:[#allocation123_spill] sm:$0xff] }
 0x9c3   :  { %v4026_v18 = vpop.f32.mrf.mxu0  ;;  %v4097_v52 = vpop.f32.mrf.mxu1  ;;  %v13302_v39 = vld [vmem:[#allocation147_spill] sm:$0xff] }
 0x9c4   :  { %v4112_v31 = vadd.f32 %v4104_v43, %v12390_v5  ;;  %v4105_v6 = vrot.slane %v4026_v18, 1  ;;  %v4114_v26 = vadd.f32 %v4106_v28, %v12392_v16  ;;  %v4107_v22 = vrot.slane %v4097_v52, 1 }
 0x9c5   :  { %v4680_v16 = vmul.f32 -1.442695, %v3930_v3  ;;  %v4682_v36 = vmul.f32 -1.442695, %v3932_v29  ;;  %v13288_v3 = vld [vmem:[#allocation133_spill] sm:$0xff]  ;;  %v13305_v29 = vld [vmem:[#allocation150_spill] sm:$0xff] }
 0x9c6   :  { %v4683_v19 = vmul.f32 -1.442695, %v4112_v31  ;;  %v4113_v53 = vadd.f32 %v4105_v6, %v12391_v9  ;;  %v4685_v24 = vmul.f32 -1.442695, %v4114_v26  ;;  %v4115_v35 = vadd.f32 %v4107_v22, %v6614_v57 }
 0x9c8   :  { %v4684_v48 = vmul.f32 -1.442695, %v4113_v53  ;;  %4899 = vpow2.f32 %v4683_v19  ;;  %v3786_v53 = vadd.f32 %v3785_v10, %v7161_v8  ;;  %v13277_v10 = vld [vmem:[#allocation122_spill] sm:$0xff] }
 0x9ca   :  { %4901 = vpow2.f32 %v4684_v48  ;;  %v3933_v28 = vadd.f32 %v3927_v1, %v3786_v53  ;;  %v13279_v1 = vld [vmem:[#allocation124_spill] sm:$0xff] }
 0x9cb   :  { %4903 = vpow2.f32 %v4685_v24  ;;  %v13303_v53 = vld [vmem:[#allocation148_spill] sm:$0xff] }
 0x9d5   :  { %v4900_v4 = vpop.eup %4899 }
 0x9d6   :  { %v4125_v55 = vadd.f32 1.0, %v4900_v4  ;;  %v13280_v4 = vld [vmem:[#allocation125_spill] sm:$0xff] }
 0x9d7   :  { %v4902_v5 = vpop.eup %4901 }
 0x9d8   :  { %4905 = vrcp.f32 %v4125_v55  ;;  %v4126_v9 = vadd.f32 1.0, %v4902_v5  ;;  %v4904_v41 = vpop.eup %4903  ;;  %v13282_v55 = vld [vmem:[#allocation127_spill] sm:$0xff]  ;;  %v13283_v5 = vld [vmem:[#allocation128_spill] sm:$0xff] }
 0x9d9   :  { %4907 = vtanh.f32 %v4115_v35  ;;  %v4127_v44 = vadd.f32 1.0, %v4904_v41  ;;  %v13281_v35 = vld [vmem:[#allocation126_spill] sm:$0xff]  ;;  %v13291_v41 = vld [vmem:[#allocation136_spill] sm:$0xff] }
 0x9da   :  { %4909 = vrcp.f32 %v4126_v9  ;;  %v13285_v9 = vld [vmem:[#allocation130_spill] sm:$0xff] }
 0x9db   :  { %4911 = vpow2.f32 %v4681_v7  ;;  %v13289_v7 = vld [vmem:[#allocation134_spill] sm:$0xff] }
 0x9dc   :  { %4913 = vpow2.f32 %v4680_v16  ;;  %v13290_v16 = vld [vmem:[#allocation135_spill] sm:$0xff] }
 0x9dd   :  { %4915 = vrcp.f32 %v4127_v44  ;;  %v13296_v44 = vld [vmem:[#allocation141_spill] sm:$0xff] }
 0x9e5   :  { %v4906_v63 = vpop.eup %4905 }
 0x9e6   :  { %v4908_v57 = vpop.eup %4907 }
 0x9e7   :  { %v4910_v43 = vpop.eup %4909  ;;  %v4139_v31 = vmul.f32 %v4908_v57, %v4906_v63  ;;  %v13292_v63 = vld [vmem:[#allocation137_spill] sm:$0xff]  ;;  %v13293_v57 = vld [vmem:[#allocation138_spill] sm:$0xff] }
 0x9e8   :  { %v4138_v18 = vmul.f32 %v4910_v43, %v4136_v60  ;;  %v4912_v13 = vpop.eup %4911  ;;  %v13294_v60 = vld [vmem:[#allocation139_spill] sm:$0xff]  ;;  %v13295_v43 = vld [vmem:[#allocation140_spill] sm:$0xff] }
 0x9e9   :  { %v4914_v54 = vpop.eup %4913  ;;  %v3944_v19 = vadd.f32 1.0, %v4912_v13  ;;  %v13300_v13 = vld [vmem:[#allocation145_spill] sm:$0xff] }
 0x9ea   :  { %v4140_v6 = vadd.f32 %v4139_v31, %v4138_v18  ;;  %v3943_v48 = vadd.f32 1.0, %v4914_v54  ;;  %v4916_v52 = vpop.eup %4915  ;;  %v13297_v18 = vld [vmem:[#allocation142_spill] sm:$0xff]  ;;  %v13298_v31 = vld [vmem:[#allocation143_spill] sm:$0xff] }
 0x9eb   :  { %v13301_v54 = vld [vmem:[#allocation146_spill] sm:$0xff] }
 0x9ec   :  { %4917 = vtanh.f32 %v4140_v6  ;;  %v13299_v6 = vld [vmem:[#allocation144_spill] sm:$0xff] }
 0x9ed   :  { %4919 = vrcp.f32 %v3944_v19 }
 0x9ee   :  { %4921 = vrcp.f32 %v3943_v48  ;;  %v13304_v48 = vld [vmem:[#allocation149_spill] sm:$0xff] }
 0x9ef   :  { %4923 = vtanh.f32 %v3933_v28  ;;  %v13306_v28 = vld [vmem:[#allocation152_spill] sm:$0xff] }
 0x9f0   :  { %4925 = vpow2.f32 %v4682_v36 }
 0x9f9   :  { %v4918_v26 = vpop.eup %4917 }
 0x9fa   :  { %v4142_v22 = vmul.f32 %v4918_v26, %v4916_v52  ;;  %v4920_v20 = vpop.eup %4919  ;;  %v13307_v52 = vld [vmem:[#allocation154_spill] sm:$0xff] }
 0x9fc   :  { %v4144_v24 = vrot.slane %v4142_v22, 7  ;;  %v4521_v22 = vld [vmem:[%s11581_s7 + $0xe0] sm:$0xff] }
 0x9fe   :  { %4211 = vmatmul.mubr.f32.vlgmr.msra.gmra.mxu0 %v4144_v24  ;;  %4282 = vmatmul.mubr.f32.vlgmr.msra.gmra.mxu1 %v4144_v24  ;;  %v4519_v24 = vld [vmem:[%s11581_s7 + $0xd0] sm:$0xff] }
 0x9ff   :  { %4289 = vmatpush1.msra.mxu0 %v10861_v38  ;;  %4360 = vmatpush1.msra.mxu1 %v10867_v17  ;;  %v4922_v38 = vpop.eup %4921  ;;  %v3953_v17 = vmul.f32 %v4920_v20, %v10979_v50  ;;  %v13276_v50 = vld [vmem:[#allocation121_spill] sm:$0xff]  ;;  %v4518_v20 = vld [vmem:[%s11581_s7 + $0xc8] sm:$0xff] }
 0xa00   :  { %4290 = vmatprep.subr.mxu0 %v10873_v12  ;;  %4361 = vmatprep.subr.mxu1 %v10879_v30  ;;  %v4924_v12 = vpop.eup %4923 }
 0xa01   :  { %4291 = vmatpush1.msra.mxu0 %v10885_v51  ;;  %4362 = vmatpush1.msra.mxu1 %v10891_v27  ;;  %v3954_v30 = vmul.f32 %v4924_v12, %v4922_v38  ;;  %v13266_v51 = vld [vmem:[#allocation111_spill] sm:$0xff]  ;;  %v4926_v27 = vpop.eup %4925  ;;  %v4515_v12 = vld [vmem:[%s11581_s7 + $0xb0] sm:$0xff] }
 0xa02   :  { %4292 = vmatprep.subr.mxu0 %v10897_v37  ;;  %4363 = vmatprep.subr.mxu1 %v10903_v0  ;;  %v13267_v37 = vld [vmem:[#allocation112_spill] sm:$0xff]  ;;  %v13268_v0 = vld [vmem:[#allocation113_spill] sm:$0xff]  ;;  %v4517_v38 = vld [vmem:[%s11581_s7 + $0xc0] sm:$0xff] }
 0xa03   :  { %4293 = vmatpush1.msra.mxu0 %v10909_v34  ;;  %4364 = vmatpush1.msra.mxu1 %v10915_v46  ;;  %v11406_v34 = vadd.f32 %v3954_v30, %v3953_v17  ;;  %v13269_v46 = vld [vmem:[#allocation114_spill] sm:$0xff]  ;;  %v4514_v30 = vld [vmem:[%s11581_s7 + $0xa8] sm:$0xff] }
 0xa04   :  { %4294 = vmatprep.subr.mxu0 %v10921_v40  ;;  %4365 = vmatprep.subr.mxu1 %v10927_v2  ;;  %v13270_v40 = vld [vmem:[#allocation115_spill] sm:$0xff]  ;;  %v13271_v2 = vld [vmem:[#allocation116_spill] sm:$0xff]  ;;  %v4516_v17 = vld [vmem:[%s11581_s7 + $0xb8] sm:$0xff] }
 0xa05   :  { %4295 = vmatpush1.msra.mxu0 %v10934_v62  ;;  %4366 = vmatpush1.msra.mxu1 %v10940_v58  ;;  %v13272_v62 = vld [vmem:[#allocation117_spill] sm:$0xff]  ;;  %v3945_v58 = vadd.f32 1.0, %v4926_v27  ;;  %4927 = vtanh.f32 %v11406_v34  ;;  %v4512_v27 = vld [vmem:[%s11581_s7 + $0x98] sm:$0xff] }
 0xa06   :  { %4296 = vmatprep.subr.mxu0 %v10946_v47  ;;  %4367 = vmatprep.subr.mxu1 %v10952_v42  ;;  %v13273_v47 = vld [vmem:[#allocation118_spill] sm:$0xff]  ;;  %v13274_v42 = vld [vmem:[#allocation119_spill] sm:$0xff] }
 0xa07   :  { %4297 = vmatpush1.msra.mxu0 %v10958_v15  ;;  %4368 = vmatpush1.msra.mxu1 %v13266_v51  ;;  %v13275_v15 = vld [vmem:[#allocation120_spill] sm:$0xff]  ;;  %4929 = vrcp.f32 %v3945_v58  ;;  %v4513_v51 = vld [vmem:[%s11581_s7 + $0xa0] sm:$0xff] }
 0xa08   :  { %4298 = vmatprep.subr.mxu0 %v13267_v37  ;;  %4369 = vmatprep.subr.mxu1 %v13268_v0  ;;  %v4511_v37 = vld [vmem:[%s11581_s7 + $0x90] sm:$0xff]  ;;  %v4510_v0 = vld [vmem:[%s11581_s7 + $0x88] sm:$0xff]  ;;  %v4505_v58 = vld [vmem:[%s11581_s7 + $0x60] sm:$0xff] }
 0xa09   :  { %4299 = vmatpush1.msra.mxu0 %v13269_v46  ;;  %4370 = vmatpush1.msra.mxu1 %v13270_v40  ;;  %v4509_v46 = vld [vmem:[%s11581_s7 + $0x80] sm:$0xff]  ;;  %v4508_v40 = vld [vmem:[%s11581_s7 + $0x78] sm:$0xff] }
 0xa0a   :  { %4300 = vmatprep.subr.mxu0 %v13271_v2  ;;  %4371 = vmatprep.subr.mxu1 %v13272_v62  ;;  %v4507_v2 = vld [vmem:[%s11581_s7 + $0x70] sm:$0xff]  ;;  %v4506_v62 = vld [vmem:[%s11581_s7 + $0x68] sm:$0xff] }
 0xa0b   :  { %4301 = vmatpush1.msra.mxu0 %v13273_v47  ;;  %4372 = vmatpush1.msra.mxu1 %v13274_v42  ;;  %v4504_v47 = vld [vmem:[%s11581_s7 + $0x58] sm:$0xff]  ;;  %v4503_v42 = vld [vmem:[%s11581_s7 + $0x50] sm:$0xff] }
 0xa0c   :  { %4302 = vmatprep.subr.mxu0 %v13275_v15  ;;  %4373 = vmatprep.subr.mxu1 %v13276_v50  ;;  %v4502_v15 = vld [vmem:[%s11581_s7 + $0x48] sm:$0xff]  ;;  %v4501_v50 = vld [vmem:[%s11581_s7 + $0x40] sm:$0xff] }
 0xa0d   :  { %4303 = vmatpush1.msra.mxu0 %v13277_v10  ;;  %4374 = vmatpush1.msra.mxu1 %v13278_v23  ;;  %v4500_v10 = vld [vmem:[%s11581_s7 + $0x38] sm:$0xff]  ;;  %v4499_v23 = vld [vmem:[%s11581_s7 + $0x30] sm:$0xff] }
 0xa0e   :  { %4304 = vmatprep.subr.mxu0 %v13279_v1  ;;  %4375 = vmatprep.subr.mxu1 %v13280_v4  ;;  %v4498_v1 = vld [vmem:[%s11581_s7 + $0x28] sm:$0xff]  ;;  %v4497_v4 = vld [vmem:[%s11581_s7 + $0x20] sm:$0xff] }
 0xa0f   :  { %4305 = vmatpush1.msra.mxu0 %v13281_v35  ;;  %4376 = vmatpush1.msra.mxu1 %v13282_v55  ;;  %v4496_v35 = vld [vmem:[%s11581_s7 + $0x18] sm:$0xff]  ;;  %v4495_v55 = vld [vmem:[%s11581_s7 + $0x10] sm:$0xff] }
 0xa10   :  { %4306 = vmatprep.subr.mxu0 %v13283_v5  ;;  %4377 = vmatprep.subr.mxu1 %v13284_v61  ;;  %v4494_v5 = vld [vmem:[%s11581_s7 + $0x8] sm:$0xff]  ;;  %v4493_v61 = vld [vmem:[%s11581_s7] sm:$0xff] }
 0xa11   :  { %4307 = vmatpush1.msra.mxu0 %v13285_v9  ;;  %4378 = vmatpush1.msra.mxu1 %v13286_v32 }
 0xa12   :  { %4308 = vmatprep.subr.mxu0 %v13287_v49  ;;  %4379 = vmatprep.subr.mxu1 %v13288_v3  ;;  %v4928_v19 = vpop.eup %4927 }
 0xa13   :  { %4309 = vmatpush1.msra.mxu0 %v13289_v7  ;;  %4380 = vmatpush1.msra.mxu1 %v13290_v16 }
 0xa14   :  { %4310 = vmatprep.subr.mxu0 %v13291_v41  ;;  %4381 = vmatprep.subr.mxu1 %v13292_v63  ;;  %v4930_v36 = vpop.eup %4929 }
 0xa15   :  { %4311 = vmatpush1.msra.mxu0 %v13293_v57  ;;  %4382 = vmatpush1.msra.mxu1 %v13294_v60  ;;  %v11451_v26 = vmul.f32 %v4930_v36, %v4928_v19 }
 0xa16   :  { %4312 = vmatprep.subr.mxu0 %v13295_v43  ;;  %4383 = vmatprep.subr.mxu1 %v13296_v44 }
 0xa17   :  { %4313 = vmatpush1.msra.mxu0 %v13297_v18  ;;  %4384 = vmatpush1.msra.mxu1 %v13298_v31 }
 0xa18   :  { %4314 = vmatprep.subr.mxu0 %v13299_v6  ;;  %4385 = vmatprep.subr.mxu1 %v13300_v13 }
 0xa19   :  { %4315 = vmatpush1.msra.mxu0 %v13301_v54  ;;  %4386 = vmatpush1.msra.mxu1 %v13302_v39 }
 0xa1a   :  { %4316 = vmatprep.subr.mxu0 %v13303_v53  ;;  %4387 = vmatprep.subr.mxu1 %v13304_v48 }
 0xa1b   :  { %4317 = vmatpush1.msra.mxu0 %v13305_v29  ;;  %4388 = vmatpush1.msra.mxu1 %v13306_v28 }
 0xa1c   :  { %4318 = vmatprep.subr.mxu0 %v13307_v52  ;;  %4389 = vmatprep.subr.mxu1 %v11219_v56  ;;  %v4524_v56 = vld [vmem:[%s11581_s7 + $0xf8] sm:$0xff] }
 0xa1d   :  { %4319 = vmatpush1.msra.mxu0 %v11225_v14  ;;  %4352 = vmatprep.mubr.f32.mxu0 %v12185_v59  ;;  %v4523_v14 = vld [vmem:[%s11581_s7 + $0xf0] sm:$0xff] }
 0xa1e   :  { %4390 = vmatpush1.msra.mxu1 %v11234_v33  ;;  %4423 = vmatprep.mubr.f32.mxu1 %v12185_v59  ;;  %v4522_v33 = vld [vmem:[%s11581_s7 + $0xe8] sm:$0xff] }
 0xa1f   :  { %4353 = vmatmul.mubr.f32.vlgmr.msra.gmra.mxu0 %v11451_v26  ;;  %4424 = vmatmul.mubr.f32.vlgmr.msra.gmra.mxu1 %v11451_v26 }
 0xa20   :  { %4601 = vmatprep.mubr.f32.mxu0 %v12185_v59  ;;  %4537 = vmatprep.subr.mxu0 %v4524_v56  ;;  %v4520_v59 = vld [vmem:[%s11581_s7 + $0xd8] sm:$0xff] }
 0xa21   :  { %4538 = vmatpush1.msra.mxu0 %v4523_v14 }
 0xa22   :  { %4539 = vmatprep.subr.mxu0 %v4522_v33 }
 0xa23   :  { %4540 = vmatpush1.msra.mxu0 %v4521_v22 }
 0xa24   :  { %4541 = vmatprep.subr.mxu0 %v4520_v59  ;;  %v13309_v59 = vld [vmem:[#allocation6_spill] sm:$0xff] }
 0xa25   :  { %4542 = vmatpush1.msra.mxu0 %v4519_v24  ;;  %v4462_v24 = vrot.slane %v13309_v59, 6 }
 0xa26   :  { %4543 = vmatprep.subr.mxu0 %v4518_v20  ;;  %v13310_v20 = vld [vmem:[#allocation153_spill] sm:$0xff] }
 0xa27   :  { %4544 = vmatpush1.msra.mxu0 %v4517_v38  ;;  %v4465_v38 = vrot.slane %v13310_v20, 5 }
 0xa28   :  { %4545 = vmatprep.subr.mxu0 %v4516_v17  ;;  %v13311_v17 = vld [vmem:[#allocation7_spill] sm:$0xff] }
 0xa29   :  { %4546 = vmatpush1.msra.mxu0 %v4515_v12  ;;  %v4468_v12 = vrot.slane %v13311_v17, 4 }
 0xa2a   :  { %4547 = vmatprep.subr.mxu0 %v4514_v30 }
 0xa2b   :  { %4548 = vmatpush1.msra.mxu0 %v4513_v51  ;;  %v13312_v51 = vld [vmem:[#allocation5_spill] sm:$0xff] }
 0xa2c   :  { %4549 = vmatprep.subr.mxu0 %v4512_v27 }
 0xa2d   :  { %4550 = vmatpush1.msra.mxu0 %v4511_v37 }
 0xa2e   :  { %4551 = vmatprep.subr.mxu0 %v4510_v0  ;;  %v4474_v0 = vrot.slane %v11451_v26, 2 }
 0xa2f   :  { %4552 = vmatpush1.msra.mxu0 %v4509_v46 }
 0xa30   :  { %4553 = vmatprep.subr.mxu0 %v4508_v40 }
 0xa31   :  { %4554 = vmatpush1.msra.mxu0 %v4507_v2 }
 0xa32   :  { %4555 = vmatprep.subr.mxu0 %v4506_v62 }
 0xa33   :  { %4556 = vmatpush1.msra.mxu0 %v4505_v58 }
 0xa34   :  { %4557 = vmatprep.subr.mxu0 %v4504_v47 }
 0xa35   :  { %4558 = vmatpush1.msra.mxu0 %v4503_v42 }
 0xa36   :  { %4559 = vmatprep.subr.mxu0 %v4502_v15 }
 0xa37   :  { %4560 = vmatpush1.msra.mxu0 %v4501_v50  ;;  %v13313_v50 = vld [vmem:[#allocation91_spill] sm:$0xff] }
 0xa38   :  { %4561 = vmatprep.subr.mxu0 %v4500_v10 }
 0xa39   :  { %4562 = vmatpush1.msra.mxu0 %v4499_v23  ;;  %v13314_v23 = vld [vmem:[#allocation92_spill] sm:$0xff] }
 0xa3a   :  { %4563 = vmatprep.subr.mxu0 %v4498_v1 }
 0xa3b   :  { %4564 = vmatpush1.msra.mxu0 %v4497_v4 }
 0xa3c   :  { %4565 = vmatprep.subr.mxu0 %v4496_v35 }
 0xa3d   :  { %4566 = vmatpush1.msra.mxu0 %v4495_v55 }
 0xa3e   :  { %4567 = vmatprep.subr.mxu0 %v4494_v5 }
 0xa3f   :  { %4568 = vmatpush1.msra.mxu0 %v4493_v61 }
 0xabe   :  { %v4212_v9 = vpop.f32.mrf.mxu0  ;;  %v4283_v63 = vpop.f32.mrf.mxu1 }
 0xabf   :  { %v4213_v49 = vadd.f32 %v4212_v9, %v7146_v25  ;;  %v4284_v31 = vadd.f32 %v4283_v63, %v7157_v45 }
 0xac0   :  { %v4214_v32 = vpop.f32.mrf.mxu0  ;;  %v4285_v44 = vpop.f32.mrf.mxu1 }
 0xac1   :  { %v4215_v7 = vadd.f32 %v4214_v32, %v7143_v21  ;;  %v4286_v54 = vadd.f32 %v4285_v44, %v7161_v8  ;;  %v13308_v8 = vld [vmem:[#allocation151_spill] sm:$0xff] }
 0xac2   :  { %v4459_v22 = vrot.slane %v13308_v8, 7 }
 0xac4   :  { %v4480_v27 = vsel %vm4479_vm0, %v13312_v51, %v4459_v22 }
 0xac5   :  { %v4482_v46 = vsel %vm4481_vm1, %v4480_v27, %v4462_v24 }
 0xac6   :  { %v4484_v2 = vsel %vm4483_vm2, %v4482_v46, %v4465_v38 }
 0xac7   :  { %v4486_v62 = vsel %vm4485_vm3, %v4484_v2, %v4468_v12 }
 0xadf   :  { %v4354_v3 = vpop.f32.mrf.mxu0  ;;  %v4425_v18 = vpop.f32.mrf.mxu1 }
 0xae0   :  { %v4430_v16 = vadd.f32 %v4354_v3, %v4213_v49  ;;  %v4432_v6 = vadd.f32 %v4425_v18, %v4284_v31 }
 0xae1   :  { %v4356_v41 = vpop.f32.mrf.mxu0  ;;  %v4427_v13 = vpop.f32.mrf.mxu1 }
 0xae2   :  { %v4686_v57 = vmul.f32 -1.442695, %v4430_v16  ;;  %v4431_v60 = vadd.f32 %v4356_v41, %v4215_v7  ;;  %v4688_v25 = vmul.f32 -1.442695, %v4432_v6  ;;  %v4433_v19 = vadd.f32 %v4427_v13, %v4286_v54 }
 0xae4   :  { %4931 = vpow2.f32 %v4686_v57  ;;  %v4687_v43 = vmul.f32 -1.442695, %v4431_v60 }
 0xae6   :  { %4933 = vpow2.f32 %v4687_v43 }
 0xae7   :  { %4935 = vpow2.f32 %v4688_v25 }
 0xaf1   :  { %v4932_v39 = vpop.eup %4931 }
 0xaf2   :  { %v4443_v21 = vadd.f32 1.0, %v4932_v39 }
 0xaf3   :  { %v4934_v53 = vpop.eup %4933 }
 0xaf4   :  { %4937 = vrcp.f32 %v4443_v21  ;;  %v4444_v48 = vadd.f32 1.0, %v4934_v53  ;;  %v4936_v29 = vpop.eup %4935 }
 0xaf5   :  { %4939 = vtanh.f32 %v4433_v19  ;;  %v4445_v56 = vadd.f32 1.0, %v4936_v29 }
 0xaf6   :  { %4941 = vrcp.f32 %v4444_v48 }
 0xaf7   :  { %4943 = vrcp.f32 %v4445_v56 }
 0xb01   :  { %v4938_v28 = vpop.eup %4937 }
 0xb02   :  { %v4940_v36 = vpop.eup %4939 }
 0xb03   :  { %v4942_v52 = vpop.eup %4941  ;;  %v4454_v14 = vmul.f32 %v4940_v36, %v4938_v28 }
 0xb04   :  { %v4453_v45 = vmul.f32 %v4942_v52, %v11406_v34  ;;  %v4944_v30 = vpop.eup %4943  ;;  %v4471_v34 = vrot.slane %v11229_v11, 3  ;;  %v4525_v11 = vld [vmem:[%s11582_s8] sm:$0x3]  ;;  %s5552_s8 = smov [#allocation2]  }
 0xb05   :  { %v4530_v10 = vrot.slane %v4525_v11, %v13313_v50  ;;  %v4534_v26 = vrot.slane %v4525_v11, %v13314_v23  ;;  %s4633_s20 = sshll.u32 %s5552_s8, 4  ;;  %s4634_s20 = int_to_ptr.vmem [resolvable:$true] %s4633_s20 }
 0xb06   :  { %v4455_v33 = vadd.f32 %v4454_v14, %v4453_v45  ;;  %v4488_v47 = vsel %vm4487_vm4, %v4486_v62, %v4471_v34  ;;  %s5529_s21 = scalar_lea.vmem %s4634_s20, 256  ;;  %p5534_p1 = scmp.lt.s32.totalorder %s4634_s20, %s4634_s20 }
 0xb07   :  { %v4490_v42 = vsel %vm4489_vm5, %v4488_v47, %v4474_v0  ;;  %p5530_p0 = scmp.ne.s32.totalorder %s4634_s20, %s5529_s21  ;;  %p5535_p2 = scmp.lt.s32.totalorder %s5529_s21, %s5529_s21 }
 0xb08   :  { %4945 = vtanh.f32 %v4455_v33 }
 0xb09   :  { %p5536_p3 = por %p5535_p2, %p5534_p1 }
 0xb0b   :  { %p5537_p4 = pnand %p5536_p3, %p5530_p0 }
 0xb15   :  { %v4946_v37 = vpop.eup %4945 }
 0xb16   :  { %v4457_v40 = vmul.f32 %v4946_v37, %v4944_v30 }
 0xb18   :  { %v4477_v58 = vrot.slane %v4457_v40, 1 }
 0xb1a   :  { %v4492_v15 = vsel %vm4491_vm6, %v4490_v42, %v4477_v58 }
 0xb1b   :  { %4602 = vmatmul.mubr.f32.vlgmr.msra.gmra.mxu0 %v4492_v15 }
 0xbdb   :  { %v4603_v1 = vpop.f32.mrf.mxu0 }
 0xbdc   :  { %v4604_v35 = vadd.f32 %v4603_v1, %v4530_v10 }
 0xbdd   :  { %v4605_v4 = vpop.f32.mrf.mxu0 }
 0xbde   :  { %v4606_v55 = vadd.f32 %v4605_v4, %v4534_v26 }
 0xbe0   :  { %v4608_v5 = vmax.f32 %v4604_v35, %v4606_v55 }
 0xbe2   :  { %4609 = vmax.xlane.f32.xlu0 %v4608_v5 }
 0xc6b   :  { %v4610_v61 = vpop.xlane.xlu0 %4609 }
 0xc6c   :  { %v4611_v9 = vsub.f32 %v4604_v35, %v4610_v61  ;;  %v4612_v32 = vsub.f32 %v4606_v55, %v4610_v61 }
 0xc6e   :  { %v4613_v49 = vmul.f32 1.442695, %v4611_v9  ;;  %v4615_v3 = vmul.f32 1.442695, %v4612_v32 }
 0xc70   :  { %4947 = vpow2.f32 %v4613_v49 }
 0xc71   :  { %4949 = vpow2.f32 %v4615_v3 }
 0xc7d   :  { %v4948_v7 = vpop.eup %4947 }
 0xc7e   :  { %v4950_v16 = vpop.eup %4949 }
 0xc7f   :  { %v4617_v41 = vadd.f32 %v4950_v16, %v4948_v7 }
 0xc81   :  { %4618 = vadd.xlane.f32.xlu0 %v4617_v41 }
 0xd0a   :  { %v4619_v63 = vpop.xlane.xlu0 %4618 }
 0xd0b   :  { %4951 = vlog2.f32 %v4619_v63 }
 0xd18   :  { %v4952_v57 = vpop.eup %4951 }
 0xd19   :  { %v4621_v60 = vmul.f32 0.6931472, %v4952_v57 }
 0xd1b   :  { %v4622_v43 = vadd.f32 %v4621_v60, %v4610_v61 }
 0xd1d   :  { %v4623_v44 = vsub.f32 %v4604_v35, %v4622_v43  ;;  %v4624_v18 = vsub.f32 %v4606_v55, %v4622_v43 }
 0xd1f   :  { %4625 = vst [vmem:[#allocation2] sm:$0xff] %v4623_v44  ;;  %4626 = vst [vmem:[#allocation2 + $0x8] sm:$0xff] %v4624_v18 }
 0xd20   :  { %5540 = shalt.err (!%p5537_p4)
}
 0xd21   :  { %4636 = dma.vmem_to_hbm [thread:$0]  %s4634_s20, 256, %s11583_s9, [#allocation3]  }
 0xd22   :  { %5549 = dma.done.wait [#allocation3], 256  }
 0xd23   :  { %5550 = vsyncadd [#allocation3], 4294967040 }
 0xd24   :  { %4640 = vsyncpa [#allocation3], 1 }

</bundles_post_ra>
